<compile_context>
chip_gen: v5e
topology: v5e:2x2
jax: 0.10.0
libtpu: 0.0.40
codegen_flags: <defaults>
</compile_context>

<pallas_src>
import functools
import math

import jax
import jax.numpy as jnp
from jax.experimental import pallas as pl
from jax.experimental.pallas import tpu as pltpu


# ----------------------------------------------------------------------------
# Pallas kernel: fused 3x3x3 conv (pad=1) + bias/BN-shift + ReLU for one
# output D-plane.
# ----------------------------------------------------------------------------
def _conv3x3x3_plane_kernel(x0_ref, x1_ref, x2_ref, w_ref, b_ref, o_ref, *,
                            wp, rout):
    """One output depth-plane.

    x{0,1,2}_ref : (1, 1, Rin, Cin) bf16 -- padded plane at D offsets 0/1/2
    w_ref        : (27, Cin, Cout)  bf16 -- tap-major weights (VMEM resident)
    b_ref        : (1, Cout)        f32  -- bias (+ folded BN shift)
    o_ref        : (1, 1, Rout, Cout) f32
    out[r, :] = relu(b + sum_{a,b,c} x_a[r + b*wp + c, :] @ W[a*9+b*3+c])
    """
    cout = o_ref.shape[-1]
    acc = jnp.zeros((rout, cout), jnp.float32)
    for a, x_ref in enumerate((x0_ref, x1_ref, x2_ref)):
        for kb in range(3):
            for kc in range(3):
                off = kb * wp + kc                      # static row offset
                slab = x_ref[0, 0, pl.ds(off, rout), :]  # (Rout, Cin) bf16
                acc += jnp.dot(slab, w_ref[a * 9 + kb * 3 + kc],
                               preferred_element_type=jnp.float32)
    y = jnp.maximum(acc + b_ref[...], 0.0)               # f32 epilogue (v5e ok)
    o_ref[0, 0, :, :] = y.astype(o_ref.dtype)


def _conv3x3x3_bias_relu(xflat, wk, shift, d_out, rout, wp):
    """xflat: (N, Dp, Rin, Cin) bf16 flattened padded planes."""
    n, _, rin, cin = xflat.shape
    taps, _, cout = wk.shape
    return pl.pallas_call(
        functools.partial(_conv3x3x3_plane_kernel, wp=wp, rout=rout),
        out_shape=jax.ShapeDtypeStruct((n, d_out, rout, cout), jnp.float32),
        grid=(n, d_out),
        in_specs=[
            # Same HBM array viewed at D offsets 0/1/2 (block size 1 along D
            # => block index is an element index) -- no shifted copies.
            pl.BlockSpec((1, 1, rin, cin), lambda i, d: (i, d, 0, 0)),
            pl.BlockSpec((1, 1, rin, cin), lambda i, d: (i, d + 1, 0, 0)),
            pl.BlockSpec((1, 1, rin, cin), lambda i, d: (i, d + 2, 0, 0)),
            # Whole weight panel / bias resident in VMEM (constant index map).
            pl.BlockSpec((taps, cin, cout), lambda i, d: (0, 0, 0)),
            pl.BlockSpec((1, cout), lambda i, d: (0, 0)),
        ],
        out_specs=pl.BlockSpec((1, 1, rout, cout), lambda i, d: (i, d, 0, 0)),
        compiler_params=pltpu.CompilerParams(
            dimension_semantics=("parallel", "parallel"),
            vmem_limit_bytes=32 * 1024 * 1024),
    )(xflat, xflat, xflat, wk, shift)


# ----------------------------------------------------------------------------
# Trilinear upsample glue (PyTorch nn.Upsample semantics).
# TODO(synk): the x2 trilinear resize stays as JAX gather/lerp glue; fusing its
# fixed 0.25/0.75 stencil into the conv kernel's index maps would avoid
# materializing the 8x upsampled tensor.
# ----------------------------------------------------------------------------
def _linear_resize_axis(x, axis, out_size, align_corners=False):
    in_size = x.shape[axis]
    if in_size == out_size:
        return x
    out_idx = jnp.arange(out_size, dtype=jnp.float32)
    if align_corners:
        src = (jnp.zeros_like(out_idx) if out_size == 1
               else out_idx * (in_size - 1) / (out_size - 1))
    else:
        src = (out_idx + 0.5) * (in_size / out_size) - 0.5
        src = jnp.maximum(src, 0.0)
    i0 = jnp.clip(jnp.floor(src).astype(jnp.int32), 0, in_size - 1)
    i1 = jnp.minimum(i0 + 1, in_size - 1)
    w1 = src - i0.astype(jnp.float32)
    w0 = 1.0 - w1
    x0 = jnp.take(x, i0, axis=axis)
    x1 = jnp.take(x, i1, axis=axis)
    bshape = [1] * x.ndim
    bshape[axis] = out_size
    return x0 * w0.reshape(bshape) + x1 * w1.reshape(bshape)


# ----------------------------------------------------------------------------
# UpSampleBlock forward
# ----------------------------------------------------------------------------
def upsample_block_fwd(params, x, normalization="none"):
    """x: (N, Cin, D, H, W) f32 -> (N, Cout, 2D, 2H, 2W) f32."""
    w, b = params["w"], params["b"]          # (Cout, Cin, 3, 3, 3), (Cout,)
    n, cin, d, h, wd = x.shape
    cout = w.shape[0]
    d2, h2, w2 = 2 * d, 2 * h, 2 * wd

    # 1) NCDHW -> NDHWC once, then x2 trilinear upsample (align_corners=False).
    xl = jnp.transpose(x, (0, 2, 3, 4, 1))
    for ax, s in ((1, d2), (2, h2), (3, w2)):
        xl = _linear_resize_axis(xl, ax, s, align_corners=False)

    # 2) Fold normalization into per-channel scale/shift (eval-mode affine).
    if normalization == "none":
        scale = jnp.ones((cout,), jnp.float32)
        shift = b
    elif normalization == "batchnorm":
        bn = params["bn"]
        scale = bn["gamma"] * jax.lax.rsqrt(bn["var"] + 1e-5)
        shift = bn["beta"] + (b - bn["mean"]) * scale
    else:
        # TODO(synk): groupnorm/instancenorm depend on output statistics and
        # cannot be folded into the matmul; not implemented here.
        raise NotImplementedError(normalization)

    # 3) Weights tap-major, BN scale folded into the columns, bf16 for the MXU.
    wk = (jnp.transpose(w, (2, 3, 4, 1, 0)) * scale)       # (3,3,3,Cin,Cout)
    wk = wk.reshape(27, cin, cout).astype(jnp.bfloat16)
    shift = shift.reshape(1, cout).astype(jnp.float32)

    # 4) Halo pad (D:(1,1), H:(1,2), W:(1,1)), bf16, flatten each D-plane to 2D.
    #    The extra bottom H row guarantees every tap row-offset stays in range.
    xp = jnp.pad(xl, ((0, 0), (1, 1), (1, 2), (1, 1), (0, 0)))
    xp = xp.astype(jnp.bfloat16)
    hp, wp = h2 + 3, w2 + 2
    xflat = xp.reshape(n, d2 + 2, hp * wp, cin)
    rout = h2 * wp                                          # rows per out plane

    # 5) Fused conv + bias + ReLU Pallas kernel.
    out_flat = _conv3x3x3_bias_relu(xflat, wk, shift, d2, rout, wp)

    # 6) Drop the garbage W-pad columns, back to NCDHW.
    out = out_flat.reshape(n, d2, h2, wp, cout)[:, :, :, :w2, :]
    return jnp.transpose(out, (0, 4, 1, 2, 3))


# ----------------------------------------------------------------------------
# Pure-JAX reference (for correctness check)
# ----------------------------------------------------------------------------
def upsample_block_ref(params, x):
    w, b = params["w"], params["b"]
    n, cin, d, h, wd = x.shape
    xl = jnp.transpose(x, (0, 2, 3, 4, 1))
    for ax, s in ((1, 2 * d), (2, 2 * h), (3, 2 * wd)):
        xl = _linear_resize_axis(xl, ax, s, align_corners=False)
    y = jax.lax.conv_general_dilated(
        xl, jnp.transpose(w, (2, 3, 4, 1, 0)),
        window_strides=(1, 1, 1),
        padding=((1, 1), (1, 1), (1, 1)),
        dimension_numbers=("NDHWC", "DHWIO", "NDHWC"))
    y = jnp.maximum(y + b, 0.0)
    return jnp.transpose(y, (0, 4, 1, 2, 3))


# ----------------------------------------------------------------------------
if __name__ == "__main__":
    key = jax.random.PRNGKey(0)
    kx, kw, kb = jax.random.split(key, 3)

    N, Cin, Cout = 2, 32, 16
    D = H = W = 8                                   # upsampled to 16^3

    x = jax.random.normal(kx, (N, Cin, D, H, W), jnp.float32)
    fan_in = Cin * 27
    bound = 1.0 / math.sqrt(fan_in)
    params = {
        "w": jax.random.uniform(kw, (Cout, Cin, 3, 3, 3), jnp.float32,
                                -bound, bound),
        "b": jax.random.uniform(kb, (Cout,), jnp.float32, -bound, bound),
    }

    fwd = jax.jit(lambda p, xx: upsample_block_fwd(p, xx, normalization="none"))
    out = fwd(params, x)
    jax.block_until_ready(out)

    assert out.shape == (N, Cout, 2 * D, 2 * H, 2 * W), out.shape
    assert bool(jnp.all(jnp.isfinite(out)))
    assert bool(jnp.all(out >= 0.0))                # ReLU

    ref = upsample_block_ref(params, x)
    err = float(jnp.max(jnp.abs(out - ref)))
    assert err < 5e-2, f"max abs err vs reference: {err}"

    print("KERNEL_OK")
</pallas_src>

<mosaic_0001>
module attributes {stable_mosaic.version = 11 : i64} {
  func.func @_conv3x3x3_plane_kernel(%arg0: i32, %arg1: i32, %arg2: memref<1x1x342x32xbf16, #tpu.memory_space<vmem>>, %arg3: memref<1x1x342x32xbf16, #tpu.memory_space<vmem>>, %arg4: memref<1x1x342x32xbf16, #tpu.memory_space<vmem>>, %arg5: memref<27x32x16xbf16, #tpu.memory_space<vmem>>, %arg6: memref<1x16xf32, #tpu.memory_space<vmem>>, %arg7: memref<1x1x288x16xf32, #tpu.memory_space<vmem>>) attributes {dimension_semantics = [#tpu.dimension_semantics<parallel>, #tpu.dimension_semantics<parallel>], iteration_bounds = array<i64: 2, 16>, scalar_prefetch = 0 : i64, scratch_operands = 0 : i64, tpu.core_type = #tpu.core_type<tc>, window_params = [{transform_indices = @transform_0, window_bounds = array<i64: 1, 1, 342, 32>}, {transform_indices = @transform_1, window_bounds = array<i64: 1, 1, 342, 32>}, {transform_indices = @transform_2, window_bounds = array<i64: 1, 1, 342, 32>}, {pipeline_mode = #tpu.pipeline_mode<synchronous>, transform_indices = @transform_3, window_bounds = array<i64: 27, 32, 16>}, {pipeline_mode = #tpu.pipeline_mode<synchronous>, transform_indices = @transform_4, window_bounds = array<i64: 1, 16>}, {transform_indices = @transform_5, window_bounds = array<i64: 1, 1, 288, 16>}]} {
    %cst = arith.constant 0.000000e+00 : f32
    %0 = vector.broadcast %cst : f32 to vector<288x16xf32>
    %c0 = arith.constant 0 : index
    %c0_0 = arith.constant 0 : index
    %c0_1 = arith.constant 0 : index
    %c0_2 = arith.constant 0 : index
    %1 = vector.load %arg2[%c0, %c0_0, %c0_1, %c0_2] : memref<1x1x342x32xbf16, #tpu.memory_space<vmem>>, vector<1x1x288x32xbf16>
    %2 = vector.shape_cast %1 : vector<1x1x288x32xbf16> to vector<288x32xbf16>
    %c0_3 = arith.constant 0 : index
    %c0_4 = arith.constant 0 : index
    %c0_5 = arith.constant 0 : index
    %3 = vector.load %arg5[%c0_3, %c0_4, %c0_5] : memref<27x32x16xbf16, #tpu.memory_space<vmem>>, vector<1x32x16xbf16>
    %4 = vector.shape_cast %3 : vector<1x32x16xbf16> to vector<32x16xbf16>
    %cst_6 = arith.constant dense<0.000000e+00> : vector<288x16xf32>
    %5 = tpu.matmul %2, %4, %cst_6 {dimension_numbers = #tpu.dot_dimension_numbers<[1], [0], [0], [1], [0, 0, 1, 1], [], []>} : vector<288x32xbf16>, vector<32x16xbf16>, vector<288x16xf32> -> vector<288x16xf32>
    %6 = arith.addf %0, %5 : vector<288x16xf32>
    %c0_7 = arith.constant 0 : index
    %c0_8 = arith.constant 0 : index
    %c1 = arith.constant 1 : index
    %c0_9 = arith.constant 0 : index
    %7 = vector.load %arg2[%c0_7, %c0_8, %c1, %c0_9] : memref<1x1x342x32xbf16, #tpu.memory_space<vmem>>, vector<1x1x288x32xbf16>
    %8 = vector.shape_cast %7 : vector<1x1x288x32xbf16> to vector<288x32xbf16>
    %c1_10 = arith.constant 1 : index
    %c0_11 = arith.constant 0 : index
    %c0_12 = arith.constant 0 : index
    %9 = vector.load %arg5[%c1_10, %c0_11, %c0_12] : memref<27x32x16xbf16, #tpu.memory_space<vmem>>, vector<1x32x16xbf16>
    %10 = vector.shape_cast %9 : vector<1x32x16xbf16> to vector<32x16xbf16>
    %cst_13 = arith.constant dense<0.000000e+00> : vector<288x16xf32>
    %11 = tpu.matmul %8, %10, %cst_13 {dimension_numbers = #tpu.dot_dimension_numbers<[1], [0], [0], [1], [0, 0, 1, 1], [], []>} : vector<288x32xbf16>, vector<32x16xbf16>, vector<288x16xf32> -> vector<288x16xf32>
    %12 = arith.addf %6, %11 : vector<288x16xf32>
    %c0_14 = arith.constant 0 : index
    %c0_15 = arith.constant 0 : index
    %c2 = arith.constant 2 : index
    %c0_16 = arith.constant 0 : index
    %13 = vector.load %arg2[%c0_14, %c0_15, %c2, %c0_16] : memref<1x1x342x32xbf16, #tpu.memory_space<vmem>>, vector<1x1x288x32xbf16>
    %14 = vector.shape_cast %13 : vector<1x1x288x32xbf16> to vector<288x32xbf16>
    %c2_17 = arith.constant 2 : index
    %c0_18 = arith.constant 0 : index
    %c0_19 = arith.constant 0 : index
    %15 = vector.load %arg5[%c2_17, %c0_18, %c0_19] : memref<27x32x16xbf16, #tpu.memory_space<vmem>>, vector<1x32x16xbf16>
    %16 = vector.shape_cast %15 : vector<1x32x16xbf16> to vector<32x16xbf16>
    %cst_20 = arith.constant dense<0.000000e+00> : vector<288x16xf32>
    %17 = tpu.matmul %14, %16, %cst_20 {dimension_numbers = #tpu.dot_dimension_numbers<[1], [0], [0], [1], [0, 0, 1, 1], [], []>} : vector<288x32xbf16>, vector<32x16xbf16>, vector<288x16xf32> -> vector<288x16xf32>
    %18 = arith.addf %12, %17 : vector<288x16xf32>
    %c0_21 = arith.constant 0 : index
    %c0_22 = arith.constant 0 : index
    %c18 = arith.constant 18 : index
    %c0_23 = arith.constant 0 : index
    %19 = vector.load %arg2[%c0_21, %c0_22, %c18, %c0_23] : memref<1x1x342x32xbf16, #tpu.memory_space<vmem>>, vector<1x1x288x32xbf16>
    %20 = vector.shape_cast %19 : vector<1x1x288x32xbf16> to vector<288x32xbf16>
    %c3 = arith.constant 3 : index
    %c0_24 = arith.constant 0 : index
    %c0_25 = arith.constant 0 : index
    %21 = vector.load %arg5[%c3, %c0_24, %c0_25] : memref<27x32x16xbf16, #tpu.memory_space<vmem>>, vector<1x32x16xbf16>
    %22 = vector.shape_cast %21 : vector<1x32x16xbf16> to vector<32x16xbf16>
    %cst_26 = arith.constant dense<0.000000e+00> : vector<288x16xf32>
    %23 = tpu.matmul %20, %22, %cst_26 {dimension_numbers = #tpu.dot_dimension_numbers<[1], [0], [0], [1], [0, 0, 1, 1], [], []>} : vector<288x32xbf16>, vector<32x16xbf16>, vector<288x16xf32> -> vector<288x16xf32>
    %24 = arith.addf %18, %23 : vector<288x16xf32>
    %c0_27 = arith.constant 0 : index
    %c0_28 = arith.constant 0 : index
    %c19 = arith.constant 19 : index
    %c0_29 = arith.constant 0 : index
    %25 = vector.load %arg2[%c0_27, %c0_28, %c19, %c0_29] : memref<1x1x342x32xbf16, #tpu.memory_space<vmem>>, vector<1x1x288x32xbf16>
    %26 = vector.shape_cast %25 : vector<1x1x288x32xbf16> to vector<288x32xbf16>
    %c4 = arith.constant 4 : index
    %c0_30 = arith.constant 0 : index
    %c0_31 = arith.constant 0 : index
    %27 = vector.load %arg5[%c4, %c0_30, %c0_31] : memref<27x32x16xbf16, #tpu.memory_space<vmem>>, vector<1x32x16xbf16>
    %28 = vector.shape_cast %27 : vector<1x32x16xbf16> to vector<32x16xbf16>
    %cst_32 = arith.constant dense<0.000000e+00> : vector<288x16xf32>
    %29 = tpu.matmul %26, %28, %cst_32 {dimension_numbers = #tpu.dot_dimension_numbers<[1], [0], [0], [1], [0, 0, 1, 1], [], []>} : vector<288x32xbf16>, vector<32x16xbf16>, vector<288x16xf32> -> vector<288x16xf32>
    %30 = arith.addf %24, %29 : vector<288x16xf32>
    %c0_33 = arith.constant 0 : index
    %c0_34 = arith.constant 0 : index
    %c20 = arith.constant 20 : index
    %c0_35 = arith.constant 0 : index
    %31 = vector.load %arg2[%c0_33, %c0_34, %c20, %c0_35] : memref<1x1x342x32xbf16, #tpu.memory_space<vmem>>, vector<1x1x288x32xbf16>
    %32 = vector.shape_cast %31 : vector<1x1x288x32xbf16> to vector<288x32xbf16>
    %c5 = arith.constant 5 : index
    %c0_36 = arith.constant 0 : index
    %c0_37 = arith.constant 0 : index
    %33 = vector.load %arg5[%c5, %c0_36, %c0_37] : memref<27x32x16xbf16, #tpu.memory_space<vmem>>, vector<1x32x16xbf16>
    %34 = vector.shape_cast %33 : vector<1x32x16xbf16> to vector<32x16xbf16>
    %cst_38 = arith.constant dense<0.000000e+00> : vector<288x16xf32>
    %35 = tpu.matmul %32, %34, %cst_38 {dimension_numbers = #tpu.dot_dimension_numbers<[1], [0], [0], [1], [0, 0, 1, 1], [], []>} : vector<288x32xbf16>, vector<32x16xbf16>, vector<288x16xf32> -> vector<288x16xf32>
    %36 = arith.addf %30, %35 : vector<288x16xf32>
    %c0_39 = arith.constant 0 : index
    %c0_40 = arith.constant 0 : index
    %c36 = arith.constant 36 : index
    %c0_41 = arith.constant 0 : index
    %37 = vector.load %arg2[%c0_39, %c0_40, %c36, %c0_41] : memref<1x1x342x32xbf16, #tpu.memory_space<vmem>>, vector<1x1x288x32xbf16>
    %38 = vector.shape_cast %37 : vector<1x1x288x32xbf16> to vector<288x32xbf16>
    %c6 = arith.constant 6 : index
    %c0_42 = arith.constant 0 : index
    %c0_43 = arith.constant 0 : index
    %39 = vector.load %arg5[%c6, %c0_42, %c0_43] : memref<27x32x16xbf16, #tpu.memory_space<vmem>>, vector<1x32x16xbf16>
    %40 = vector.shape_cast %39 : vector<1x32x16xbf16> to vector<32x16xbf16>
    %cst_44 = arith.constant dense<0.000000e+00> : vector<288x16xf32>
    %41 = tpu.matmul %38, %40, %cst_44 {dimension_numbers = #tpu.dot_dimension_numbers<[1], [0], [0], [1], [0, 0, 1, 1], [], []>} : vector<288x32xbf16>, vector<32x16xbf16>, vector<288x16xf32> -> vector<288x16xf32>
    %42 = arith.addf %36, %41 : vector<288x16xf32>
    %c0_45 = arith.constant 0 : index
    %c0_46 = arith.constant 0 : index
    %c37 = arith.constant 37 : index
    %c0_47 = arith.constant 0 : index
    %43 = vector.load %arg2[%c0_45, %c0_46, %c37, %c0_47] : memref<1x1x342x32xbf16, #tpu.memory_space<vmem>>, vector<1x1x288x32xbf16>
    %44 = vector.shape_cast %43 : vector<1x1x288x32xbf16> to vector<288x32xbf16>
    %c7 = arith.constant 7 : index
    %c0_48 = arith.constant 0 : index
    %c0_49 = arith.constant 0 : index
    %45 = vector.load %arg5[%c7, %c0_48, %c0_49] : memref<27x32x16xbf16, #tpu.memory_space<vmem>>, vector<1x32x16xbf16>
    %46 = vector.shape_cast %45 : vector<1x32x16xbf16> to vector<32x16xbf16>
    %cst_50 = arith.constant dense<0.000000e+00> : vector<288x16xf32>
    %47 = tpu.matmul %44, %46, %cst_50 {dimension_numbers = #tpu.dot_dimension_numbers<[1], [0], [0], [1], [0, 0, 1, 1], [], []>} : vector<288x32xbf16>, vector<32x16xbf16>, vector<288x16xf32> -> vector<288x16xf32>
    %48 = arith.addf %42, %47 : vector<288x16xf32>
    %c0_51 = arith.constant 0 : index
    %c0_52 = arith.constant 0 : index
    %c38 = arith.constant 38 : index
    %c0_53 = arith.constant 0 : index
    %49 = vector.load %arg2[%c0_51, %c0_52, %c38, %c0_53] : memref<1x1x342x32xbf16, #tpu.memory_space<vmem>>, vector<1x1x288x32xbf16>
    %50 = vector.shape_cast %49 : vector<1x1x288x32xbf16> to vector<288x32xbf16>
    %c8 = arith.constant 8 : index
    %c0_54 = arith.constant 0 : index
    %c0_55 = arith.constant 0 : index
    %51 = vector.load %arg5[%c8, %c0_54, %c0_55] : memref<27x32x16xbf16, #tpu.memory_space<vmem>>, vector<1x32x16xbf16>
    %52 = vector.shape_cast %51 : vector<1x32x16xbf16> to vector<32x16xbf16>
    %cst_56 = arith.constant dense<0.000000e+00> : vector<288x16xf32>
    %53 = tpu.matmul %50, %52, %cst_56 {dimension_numbers = #tpu.dot_dimension_numbers<[1], [0], [0], [1], [0, 0, 1, 1], [], []>} : vector<288x32xbf16>, vector<32x16xbf16>, vector<288x16xf32> -> vector<288x16xf32>
    %54 = arith.addf %48, %53 : vector<288x16xf32>
    %c0_57 = arith.constant 0 : index
    %c0_58 = arith.constant 0 : index
    %c0_59 = arith.constant 0 : index
    %c0_60 = arith.constant 0 : index
    %55 = vector.load %arg3[%c0_57, %c0_58, %c0_59, %c0_60] : memref<1x1x342x32xbf16, #tpu.memory_space<vmem>>, vector<1x1x288x32xbf16>
    %56 = vector.shape_cast %55 : vector<1x1x288x32xbf16> to vector<288x32xbf16>
    %c9 = arith.constant 9 : index
    %c0_61 = arith.constant 0 : index
    %c0_62 = arith.constant 0 : index
    %57 = vector.load %arg5[%c9, %c0_61, %c0_62] : memref<27x32x16xbf16, #tpu.memory_space<vmem>>, vector<1x32x16xbf16>
    %58 = vector.shape_cast %57 : vector<1x32x16xbf16> to vector<32x16xbf16>
    %cst_63 = arith.constant dense<0.000000e+00> : vector<288x16xf32>
    %59 = tpu.matmul %56, %58, %cst_63 {dimension_numbers = #tpu.dot_dimension_numbers<[1], [0], [0], [1], [0, 0, 1, 1], [], []>} : vector<288x32xbf16>, vector<32x16xbf16>, vector<288x16xf32> -> vector<288x16xf32>
    %60 = arith.addf %54, %59 : vector<288x16xf32>
    %c0_64 = arith.constant 0 : index
    %c0_65 = arith.constant 0 : index
    %c1_66 = arith.constant 1 : index
    %c0_67 = arith.constant 0 : index
    %61 = vector.load %arg3[%c0_64, %c0_65, %c1_66, %c0_67] : memref<1x1x342x32xbf16, #tpu.memory_space<vmem>>, vector<1x1x288x32xbf16>
    %62 = vector.shape_cast %61 : vector<1x1x288x32xbf16> to vector<288x32xbf16>
    %c10 = arith.constant 10 : index
    %c0_68 = arith.constant 0 : index
    %c0_69 = arith.constant 0 : index
    %63 = vector.load %arg5[%c10, %c0_68, %c0_69] : memref<27x32x16xbf16, #tpu.memory_space<vmem>>, vector<1x32x16xbf16>
    %64 = vector.shape_cast %63 : vector<1x32x16xbf16> to vector<32x16xbf16>
    %cst_70 = arith.constant dense<0.000000e+00> : vector<288x16xf32>
    %65 = tpu.matmul %62, %64, %cst_70 {dimension_numbers = #tpu.dot_dimension_numbers<[1], [0], [0], [1], [0, 0, 1, 1], [], []>} : vector<288x32xbf16>, vector<32x16xbf16>, vector<288x16xf32> -> vector<288x16xf32>
    %66 = arith.addf %60, %65 : vector<288x16xf32>
    %c0_71 = arith.constant 0 : index
    %c0_72 = arith.constant 0 : index
    %c2_73 = arith.constant 2 : index
    %c0_74 = arith.constant 0 : index
    %67 = vector.load %arg3[%c0_71, %c0_72, %c2_73, %c0_74] : memref<1x1x342x32xbf16, #tpu.memory_space<vmem>>, vector<1x1x288x32xbf16>
    %68 = vector.shape_cast %67 : vector<1x1x288x32xbf16> to vector<288x32xbf16>
    %c11 = arith.constant 11 : index
    %c0_75 = arith.constant 0 : index
    %c0_76 = arith.constant 0 : index
    %69 = vector.load %arg5[%c11, %c0_75, %c0_76] : memref<27x32x16xbf16, #tpu.memory_space<vmem>>, vector<1x32x16xbf16>
    %70 = vector.shape_cast %69 : vector<1x32x16xbf16> to vector<32x16xbf16>
    %cst_77 = arith.constant dense<0.000000e+00> : vector<288x16xf32>
    %71 = tpu.matmul %68, %70, %cst_77 {dimension_numbers = #tpu.dot_dimension_numbers<[1], [0], [0], [1], [0, 0, 1, 1], [], []>} : vector<288x32xbf16>, vector<32x16xbf16>, vector<288x16xf32> -> vector<288x16xf32>
    %72 = arith.addf %66, %71 : vector<288x16xf32>
    %c0_78 = arith.constant 0 : index
    %c0_79 = arith.constant 0 : index
    %c18_80 = arith.constant 18 : index
    %c0_81 = arith.constant 0 : index
    %73 = vector.load %arg3[%c0_78, %c0_79, %c18_80, %c0_81] : memref<1x1x342x32xbf16, #tpu.memory_space<vmem>>, vector<1x1x288x32xbf16>
    %74 = vector.shape_cast %73 : vector<1x1x288x32xbf16> to vector<288x32xbf16>
    %c12 = arith.constant 12 : index
    %c0_82 = arith.constant 0 : index
    %c0_83 = arith.constant 0 : index
    %75 = vector.load %arg5[%c12, %c0_82, %c0_83] : memref<27x32x16xbf16, #tpu.memory_space<vmem>>, vector<1x32x16xbf16>
    %76 = vector.shape_cast %75 : vector<1x32x16xbf16> to vector<32x16xbf16>
    %cst_84 = arith.constant dense<0.000000e+00> : vector<288x16xf32>
    %77 = tpu.matmul %74, %76, %cst_84 {dimension_numbers = #tpu.dot_dimension_numbers<[1], [0], [0], [1], [0, 0, 1, 1], [], []>} : vector<288x32xbf16>, vector<32x16xbf16>, vector<288x16xf32> -> vector<288x16xf32>
    %78 = arith.addf %72, %77 : vector<288x16xf32>
    %c0_85 = arith.constant 0 : index
    %c0_86 = arith.constant 0 : index
    %c19_87 = arith.constant 19 : index
    %c0_88 = arith.constant 0 : index
    %79 = vector.load %arg3[%c0_85, %c0_86, %c19_87, %c0_88] : memref<1x1x342x32xbf16, #tpu.memory_space<vmem>>, vector<1x1x288x32xbf16>
    %80 = vector.shape_cast %79 : vector<1x1x288x32xbf16> to vector<288x32xbf16>
    %c13 = arith.constant 13 : index
    %c0_89 = arith.constant 0 : index
    %c0_90 = arith.constant 0 : index
    %81 = vector.load %arg5[%c13, %c0_89, %c0_90] : memref<27x32x16xbf16, #tpu.memory_space<vmem>>, vector<1x32x16xbf16>
    %82 = vector.shape_cast %81 : vector<1x32x16xbf16> to vector<32x16xbf16>
    %cst_91 = arith.constant dense<0.000000e+00> : vector<288x16xf32>
    %83 = tpu.matmul %80, %82, %cst_91 {dimension_numbers = #tpu.dot_dimension_numbers<[1], [0], [0], [1], [0, 0, 1, 1], [], []>} : vector<288x32xbf16>, vector<32x16xbf16>, vector<288x16xf32> -> vector<288x16xf32>
    %84 = arith.addf %78, %83 : vector<288x16xf32>
    %c0_92 = arith.constant 0 : index
    %c0_93 = arith.constant 0 : index
    %c20_94 = arith.constant 20 : index
    %c0_95 = arith.constant 0 : index
    %85 = vector.load %arg3[%c0_92, %c0_93, %c20_94, %c0_95] : memref<1x1x342x32xbf16, #tpu.memory_space<vmem>>, vector<1x1x288x32xbf16>
    %86 = vector.shape_cast %85 : vector<1x1x288x32xbf16> to vector<288x32xbf16>
    %c14 = arith.constant 14 : index
    %c0_96 = arith.constant 0 : index
    %c0_97 = arith.constant 0 : index
    %87 = vector.load %arg5[%c14, %c0_96, %c0_97] : memref<27x32x16xbf16, #tpu.memory_space<vmem>>, vector<1x32x16xbf16>
    %88 = vector.shape_cast %87 : vector<1x32x16xbf16> to vector<32x16xbf16>
    %cst_98 = arith.constant dense<0.000000e+00> : vector<288x16xf32>
    %89 = tpu.matmul %86, %88, %cst_98 {dimension_numbers = #tpu.dot_dimension_numbers<[1], [0], [0], [1], [0, 0, 1, 1], [], []>} : vector<288x32xbf16>, vector<32x16xbf16>, vector<288x16xf32> -> vector<288x16xf32>
    %90 = arith.addf %84, %89 : vector<288x16xf32>
    %c0_99 = arith.constant 0 : index
    %c0_100 = arith.constant 0 : index
    %c36_101 = arith.constant 36 : index
    %c0_102 = arith.constant 0 : index
    %91 = vector.load %arg3[%c0_99, %c0_100, %c36_101, %c0_102] : memref<1x1x342x32xbf16, #tpu.memory_space<vmem>>, vector<1x1x288x32xbf16>
    %92 = vector.shape_cast %91 : vector<1x1x288x32xbf16> to vector<288x32xbf16>
    %c15 = arith.constant 15 : index
    %c0_103 = arith.constant 0 : index
    %c0_104 = arith.constant 0 : index
    %93 = vector.load %arg5[%c15, %c0_103, %c0_104] : memref<27x32x16xbf16, #tpu.memory_space<vmem>>, vector<1x32x16xbf16>
    %94 = vector.shape_cast %93 : vector<1x32x16xbf16> to vector<32x16xbf16>
    %cst_105 = arith.constant dense<0.000000e+00> : vector<288x16xf32>
    %95 = tpu.matmul %92, %94, %cst_105 {dimension_numbers = #tpu.dot_dimension_numbers<[1], [0], [0], [1], [0, 0, 1, 1], [], []>} : vector<288x32xbf16>, vector<32x16xbf16>, vector<288x16xf32> -> vector<288x16xf32>
    %96 = arith.addf %90, %95 : vector<288x16xf32>
    %c0_106 = arith.constant 0 : index
    %c0_107 = arith.constant 0 : index
    %c37_108 = arith.constant 37 : index
    %c0_109 = arith.constant 0 : index
    %97 = vector.load %arg3[%c0_106, %c0_107, %c37_108, %c0_109] : memref<1x1x342x32xbf16, #tpu.memory_space<vmem>>, vector<1x1x288x32xbf16>
    %98 = vector.shape_cast %97 : vector<1x1x288x32xbf16> to vector<288x32xbf16>
    %c16 = arith.constant 16 : index
    %c0_110 = arith.constant 0 : index
    %c0_111 = arith.constant 0 : index
    %99 = vector.load %arg5[%c16, %c0_110, %c0_111] : memref<27x32x16xbf16, #tpu.memory_space<vmem>>, vector<1x32x16xbf16>
    %100 = vector.shape_cast %99 : vector<1x32x16xbf16> to vector<32x16xbf16>
    %cst_112 = arith.constant dense<0.000000e+00> : vector<288x16xf32>
    %101 = tpu.matmul %98, %100, %cst_112 {dimension_numbers = #tpu.dot_dimension_numbers<[1], [0], [0], [1], [0, 0, 1, 1], [], []>} : vector<288x32xbf16>, vector<32x16xbf16>, vector<288x16xf32> -> vector<288x16xf32>
    %102 = arith.addf %96, %101 : vector<288x16xf32>
    %c0_113 = arith.constant 0 : index
    %c0_114 = arith.constant 0 : index
    %c38_115 = arith.constant 38 : index
    %c0_116 = arith.constant 0 : index
    %103 = vector.load %arg3[%c0_113, %c0_114, %c38_115, %c0_116] : memref<1x1x342x32xbf16, #tpu.memory_space<vmem>>, vector<1x1x288x32xbf16>
    %104 = vector.shape_cast %103 : vector<1x1x288x32xbf16> to vector<288x32xbf16>
    %c17 = arith.constant 17 : index
    %c0_117 = arith.constant 0 : index
    %c0_118 = arith.constant 0 : index
    %105 = vector.load %arg5[%c17, %c0_117, %c0_118] : memref<27x32x16xbf16, #tpu.memory_space<vmem>>, vector<1x32x16xbf16>
    %106 = vector.shape_cast %105 : vector<1x32x16xbf16> to vector<32x16xbf16>
    %cst_119 = arith.constant dense<0.000000e+00> : vector<288x16xf32>
    %107 = tpu.matmul %104, %106, %cst_119 {dimension_numbers = #tpu.dot_dimension_numbers<[1], [0], [0], [1], [0, 0, 1, 1], [], []>} : vector<288x32xbf16>, vector<32x16xbf16>, vector<288x16xf32> -> vector<288x16xf32>
    %108 = arith.addf %102, %107 : vector<288x16xf32>
    %c0_120 = arith.constant 0 : index
    %c0_121 = arith.constant 0 : index
    %c0_122 = arith.constant 0 : index
    %c0_123 = arith.constant 0 : index
    %109 = vector.load %arg4[%c0_120, %c0_121, %c0_122, %c0_123] : memref<1x1x342x32xbf16, #tpu.memory_space<vmem>>, vector<1x1x288x32xbf16>
    %110 = vector.shape_cast %109 : vector<1x1x288x32xbf16> to vector<288x32xbf16>
    %c18_124 = arith.constant 18 : index
    %c0_125 = arith.constant 0 : index
    %c0_126 = arith.constant 0 : index
    %111 = vector.load %arg5[%c18_124, %c0_125, %c0_126] : memref<27x32x16xbf16, #tpu.memory_space<vmem>>, vector<1x32x16xbf16>
    %112 = vector.shape_cast %111 : vector<1x32x16xbf16> to vector<32x16xbf16>
    %cst_127 = arith.constant dense<0.000000e+00> : vector<288x16xf32>
    %113 = tpu.matmul %110, %112, %cst_127 {dimension_numbers = #tpu.dot_dimension_numbers<[1], [0], [0], [1], [0, 0, 1, 1], [], []>} : vector<288x32xbf16>, vector<32x16xbf16>, vector<288x16xf32> -> vector<288x16xf32>
    %114 = arith.addf %108, %113 : vector<288x16xf32>
    %c0_128 = arith.constant 0 : index
    %c0_129 = arith.constant 0 : index
    %c1_130 = arith.constant 1 : index
    %c0_131 = arith.constant 0 : index
    %115 = vector.load %arg4[%c0_128, %c0_129, %c1_130, %c0_131] : memref<1x1x342x32xbf16, #tpu.memory_space<vmem>>, vector<1x1x288x32xbf16>
    %116 = vector.shape_cast %115 : vector<1x1x288x32xbf16> to vector<288x32xbf16>
    %c19_132 = arith.constant 19 : index
    %c0_133 = arith.constant 0 : index
    %c0_134 = arith.constant 0 : index
    %117 = vector.load %arg5[%c19_132, %c0_133, %c0_134] : memref<27x32x16xbf16, #tpu.memory_space<vmem>>, vector<1x32x16xbf16>
    %118 = vector.shape_cast %117 : vector<1x32x16xbf16> to vector<32x16xbf16>
    %cst_135 = arith.constant dense<0.000000e+00> : vector<288x16xf32>
    %119 = tpu.matmul %116, %118, %cst_135 {dimension_numbers = #tpu.dot_dimension_numbers<[1], [0], [0], [1], [0, 0, 1, 1], [], []>} : vector<288x32xbf16>, vector<32x16xbf16>, vector<288x16xf32> -> vector<288x16xf32>
    %120 = arith.addf %114, %119 : vector<288x16xf32>
    %c0_136 = arith.constant 0 : index
    %c0_137 = arith.constant 0 : index
    %c2_138 = arith.constant 2 : index
    %c0_139 = arith.constant 0 : index
    %121 = vector.load %arg4[%c0_136, %c0_137, %c2_138, %c0_139] : memref<1x1x342x32xbf16, #tpu.memory_space<vmem>>, vector<1x1x288x32xbf16>
    %122 = vector.shape_cast %121 : vector<1x1x288x32xbf16> to vector<288x32xbf16>
    %c20_140 = arith.constant 20 : index
    %c0_141 = arith.constant 0 : index
    %c0_142 = arith.constant 0 : index
    %123 = vector.load %arg5[%c20_140, %c0_141, %c0_142] : memref<27x32x16xbf16, #tpu.memory_space<vmem>>, vector<1x32x16xbf16>
    %124 = vector.shape_cast %123 : vector<1x32x16xbf16> to vector<32x16xbf16>
    %cst_143 = arith.constant dense<0.000000e+00> : vector<288x16xf32>
    %125 = tpu.matmul %122, %124, %cst_143 {dimension_numbers = #tpu.dot_dimension_numbers<[1], [0], [0], [1], [0, 0, 1, 1], [], []>} : vector<288x32xbf16>, vector<32x16xbf16>, vector<288x16xf32> -> vector<288x16xf32>
    %126 = arith.addf %120, %125 : vector<288x16xf32>
    %c0_144 = arith.constant 0 : index
    %c0_145 = arith.constant 0 : index
    %c18_146 = arith.constant 18 : index
    %c0_147 = arith.constant 0 : index
    %127 = vector.load %arg4[%c0_144, %c0_145, %c18_146, %c0_147] : memref<1x1x342x32xbf16, #tpu.memory_space<vmem>>, vector<1x1x288x32xbf16>
    %128 = vector.shape_cast %127 : vector<1x1x288x32xbf16> to vector<288x32xbf16>
    %c21 = arith.constant 21 : index
    %c0_148 = arith.constant 0 : index
    %c0_149 = arith.constant 0 : index
    %129 = vector.load %arg5[%c21, %c0_148, %c0_149] : memref<27x32x16xbf16, #tpu.memory_space<vmem>>, vector<1x32x16xbf16>
    %130 = vector.shape_cast %129 : vector<1x32x16xbf16> to vector<32x16xbf16>
    %cst_150 = arith.constant dense<0.000000e+00> : vector<288x16xf32>
    %131 = tpu.matmul %128, %130, %cst_150 {dimension_numbers = #tpu.dot_dimension_numbers<[1], [0], [0], [1], [0, 0, 1, 1], [], []>} : vector<288x32xbf16>, vector<32x16xbf16>, vector<288x16xf32> -> vector<288x16xf32>
    %132 = arith.addf %126, %131 : vector<288x16xf32>
    %c0_151 = arith.constant 0 : index
    %c0_152 = arith.constant 0 : index
    %c19_153 = arith.constant 19 : index
    %c0_154 = arith.constant 0 : index
    %133 = vector.load %arg4[%c0_151, %c0_152, %c19_153, %c0_154] : memref<1x1x342x32xbf16, #tpu.memory_space<vmem>>, vector<1x1x288x32xbf16>
    %134 = vector.shape_cast %133 : vector<1x1x288x32xbf16> to vector<288x32xbf16>
    %c22 = arith.constant 22 : index
    %c0_155 = arith.constant 0 : index
    %c0_156 = arith.constant 0 : index
    %135 = vector.load %arg5[%c22, %c0_155, %c0_156] : memref<27x32x16xbf16, #tpu.memory_space<vmem>>, vector<1x32x16xbf16>
    %136 = vector.shape_cast %135 : vector<1x32x16xbf16> to vector<32x16xbf16>
    %cst_157 = arith.constant dense<0.000000e+00> : vector<288x16xf32>
    %137 = tpu.matmul %134, %136, %cst_157 {dimension_numbers = #tpu.dot_dimension_numbers<[1], [0], [0], [1], [0, 0, 1, 1], [], []>} : vector<288x32xbf16>, vector<32x16xbf16>, vector<288x16xf32> -> vector<288x16xf32>
    %138 = arith.addf %132, %137 : vector<288x16xf32>
    %c0_158 = arith.constant 0 : index
    %c0_159 = arith.constant 0 : index
    %c20_160 = arith.constant 20 : index
    %c0_161 = arith.constant 0 : index
    %139 = vector.load %arg4[%c0_158, %c0_159, %c20_160, %c0_161] : memref<1x1x342x32xbf16, #tpu.memory_space<vmem>>, vector<1x1x288x32xbf16>
    %140 = vector.shape_cast %139 : vector<1x1x288x32xbf16> to vector<288x32xbf16>
    %c23 = arith.constant 23 : index
    %c0_162 = arith.constant 0 : index
    %c0_163 = arith.constant 0 : index
    %141 = vector.load %arg5[%c23, %c0_162, %c0_163] : memref<27x32x16xbf16, #tpu.memory_space<vmem>>, vector<1x32x16xbf16>
    %142 = vector.shape_cast %141 : vector<1x32x16xbf16> to vector<32x16xbf16>
    %cst_164 = arith.constant dense<0.000000e+00> : vector<288x16xf32>
    %143 = tpu.matmul %140, %142, %cst_164 {dimension_numbers = #tpu.dot_dimension_numbers<[1], [0], [0], [1], [0, 0, 1, 1], [], []>} : vector<288x32xbf16>, vector<32x16xbf16>, vector<288x16xf32> -> vector<288x16xf32>
    %144 = arith.addf %138, %143 : vector<288x16xf32>
    %c0_165 = arith.constant 0 : index
    %c0_166 = arith.constant 0 : index
    %c36_167 = arith.constant 36 : index
    %c0_168 = arith.constant 0 : index
    %145 = vector.load %arg4[%c0_165, %c0_166, %c36_167, %c0_168] : memref<1x1x342x32xbf16, #tpu.memory_space<vmem>>, vector<1x1x288x32xbf16>
    %146 = vector.shape_cast %145 : vector<1x1x288x32xbf16> to vector<288x32xbf16>
    %c24 = arith.constant 24 : index
    %c0_169 = arith.constant 0 : index
    %c0_170 = arith.constant 0 : index
    %147 = vector.load %arg5[%c24, %c0_169, %c0_170] : memref<27x32x16xbf16, #tpu.memory_space<vmem>>, vector<1x32x16xbf16>
    %148 = vector.shape_cast %147 : vector<1x32x16xbf16> to vector<32x16xbf16>
    %cst_171 = arith.constant dense<0.000000e+00> : vector<288x16xf32>
    %149 = tpu.matmul %146, %148, %cst_171 {dimension_numbers = #tpu.dot_dimension_numbers<[1], [0], [0], [1], [0, 0, 1, 1], [], []>} : vector<288x32xbf16>, vector<32x16xbf16>, vector<288x16xf32> -> vector<288x16xf32>
    %150 = arith.addf %144, %149 : vector<288x16xf32>
    %c0_172 = arith.constant 0 : index
    %c0_173 = arith.constant 0 : index
    %c37_174 = arith.constant 37 : index
    %c0_175 = arith.constant 0 : index
    %151 = vector.load %arg4[%c0_172, %c0_173, %c37_174, %c0_175] : memref<1x1x342x32xbf16, #tpu.memory_space<vmem>>, vector<1x1x288x32xbf16>
    %152 = vector.shape_cast %151 : vector<1x1x288x32xbf16> to vector<288x32xbf16>
    %c25 = arith.constant 25 : index
    %c0_176 = arith.constant 0 : index
    %c0_177 = arith.constant 0 : index
    %153 = vector.load %arg5[%c25, %c0_176, %c0_177] : memref<27x32x16xbf16, #tpu.memory_space<vmem>>, vector<1x32x16xbf16>
    %154 = vector.shape_cast %153 : vector<1x32x16xbf16> to vector<32x16xbf16>
    %cst_178 = arith.constant dense<0.000000e+00> : vector<288x16xf32>
    %155 = tpu.matmul %152, %154, %cst_178 {dimension_numbers = #tpu.dot_dimension_numbers<[1], [0], [0], [1], [0, 0, 1, 1], [], []>} : vector<288x32xbf16>, vector<32x16xbf16>, vector<288x16xf32> -> vector<288x16xf32>
    %156 = arith.addf %150, %155 : vector<288x16xf32>
    %c0_179 = arith.constant 0 : index
    %c0_180 = arith.constant 0 : index
    %c38_181 = arith.constant 38 : index
    %c0_182 = arith.constant 0 : index
    %157 = vector.load %arg4[%c0_179, %c0_180, %c38_181, %c0_182] : memref<1x1x342x32xbf16, #tpu.memory_space<vmem>>, vector<1x1x288x32xbf16>
    %158 = vector.shape_cast %157 : vector<1x1x288x32xbf16> to vector<288x32xbf16>
    %c26 = arith.constant 26 : index
    %c0_183 = arith.constant 0 : index
    %c0_184 = arith.constant 0 : index
    %159 = vector.load %arg5[%c26, %c0_183, %c0_184] : memref<27x32x16xbf16, #tpu.memory_space<vmem>>, vector<1x32x16xbf16>
    %160 = vector.shape_cast %159 : vector<1x32x16xbf16> to vector<32x16xbf16>
    %cst_185 = arith.constant dense<0.000000e+00> : vector<288x16xf32>
    %161 = tpu.matmul %158, %160, %cst_185 {dimension_numbers = #tpu.dot_dimension_numbers<[1], [0], [0], [1], [0, 0, 1, 1], [], []>} : vector<288x32xbf16>, vector<32x16xbf16>, vector<288x16xf32> -> vector<288x16xf32>
    %162 = arith.addf %156, %161 : vector<288x16xf32>
    %c0_186 = arith.constant 0 : index
    %c0_187 = arith.constant 0 : index
    %163 = vector.load %arg6[%c0_186, %c0_187] : memref<1x16xf32, #tpu.memory_space<vmem>>, vector<1x16xf32>
    %164 = vector.broadcast %163 : vector<1x16xf32> to vector<288x16xf32>
    %165 = arith.addf %162, %164 : vector<288x16xf32>
    %cst_188 = arith.constant 0.000000e+00 : f32
    %166 = vector.broadcast %cst_188 : f32 to vector<288x16xf32>
    %167 = arith.maximumf %165, %166 : vector<288x16xf32>
    %c0_189 = arith.constant 0 : index
    %c0_190 = arith.constant 0 : index
    %c0_191 = arith.constant 0 : index
    %c0_192 = arith.constant 0 : index
    %168 = vector.load %arg7[%c0_189, %c0_190, %c0_191, %c0_192] : memref<1x1x288x16xf32, #tpu.memory_space<vmem>>, vector<1x1x288x16xf32>
    %169 = vector.shape_cast %168 : vector<1x1x288x16xf32> to vector<288x16xf32>
    %170 = vector.shape_cast %167 : vector<288x16xf32> to vector<1x1x288x16xf32>
    tpu.vector_store %arg7[%c0_189, %c0_190, %c0_191, %c0_192], %170 {strides = array<i32>} : memref<1x1x288x16xf32, #tpu.memory_space<vmem>>, vector<1x1x288x16xf32>,
    return
  }
  func.func @transform_0(%arg0: i32, %arg1: i32) -> (i32, i32, i32, i32) {
    %c0_i32 = arith.constant 0 : i32
    %c0_i32_0 = arith.constant 0 : i32
    %c0_i32_1 = arith.constant 0 : i32
    return %arg0, %arg1, %c0_i32, %c0_i32_0 : i32, i32, i32, i32
  }
  func.func @transform_1(%arg0: i32, %arg1: i32) -> (i32, i32, i32, i32) {
    %c1_i32 = arith.constant 1 : i32
    %0 = arith.addi %arg1, %c1_i32 : i32
    %c0_i32 = arith.constant 0 : i32
    %c0_i32_0 = arith.constant 0 : i32
    %c0_i32_1 = arith.constant 0 : i32
    return %arg0, %0, %c0_i32, %c0_i32_0 : i32, i32, i32, i32
  }
  func.func @transform_2(%arg0: i32, %arg1: i32) -> (i32, i32, i32, i32) {
    %c2_i32 = arith.constant 2 : i32
    %0 = arith.addi %arg1, %c2_i32 : i32
    %c0_i32 = arith.constant 0 : i32
    %c0_i32_0 = arith.constant 0 : i32
    %c0_i32_1 = arith.constant 0 : i32
    return %arg0, %0, %c0_i32, %c0_i32_0 : i32, i32, i32, i32
  }
  func.func @transform_3(%arg0: i32, %arg1: i32) -> (i32, i32, i32) {
    %c0_i32 = arith.constant 0 : i32
    %c0_i32_0 = arith.constant 0 : i32
    %c0_i32_1 = arith.constant 0 : i32
    %c0_i32_2 = arith.constant 0 : i32
    return %c0_i32, %c0_i32_0, %c0_i32_1 : i32, i32, i32
  }
  func.func @transform_4(%arg0: i32, %arg1: i32) -> (i32, i32) {
    %c0_i32 = arith.constant 0 : i32
    %c0_i32_0 = arith.constant 0 : i32
    %c0_i32_1 = arith.constant 0 : i32
    return %c0_i32, %c0_i32_0 : i32, i32
  }
  func.func @transform_5(%arg0: i32, %arg1: i32) -> (i32, i32, i32, i32) {
    %c0_i32 = arith.constant 0 : i32
    %c0_i32_0 = arith.constant 0 : i32
    %c0_i32_1 = arith.constant 0 : i32
    return %arg0, %arg1, %c0_i32, %c0_i32_0 : i32, i32, i32, i32
  }
}

</mosaic_0001>

<bundles_post_ra>
// kernel: _lambda_.1
= control target key start
LH: loop header
LB: loop body
LE: loop exit
PB: predicated region body
PF: predicated region fallthrough
CT: control target
= control target key end

     0   :  { %s11585_s18 = smov 0   ;;  %s11587_s19 = smov 0   ;;  %s14728_s0 = inlined_call_operand.vmem [shape: bf16[2,18,342,32], index: 0, kind: input, shape index: {}, may-alias: {0,1,2}]   ;;  %s14729_s1 = inlined_call_operand.vmem [shape: bf16[2,18,342,32], index: 1, kind: input, shape index: {}, may-alias: {0,1,2}]   ;;  %s14730_s2 = inlined_call_operand.vmem [shape: bf16[2,18,342,32], index: 2, kind: input, shape index: {}, may-alias: {0,1,2}]   ;;  %s14731_s3 = inlined_call_operand.vmem [shape: bf16[27,32,16], index: 3, kind: input, shape index: {}]   ;;  %s14732_s4 = inlined_call_operand.vmem [shape: f32[1,16], index: 4, kind: input, shape index: {}]   ;;  %s14733_s5 = inlined_call_operand.vmem [shape: f32[2,16,288,16], index: 5, kind: output, shape index: {}]  }
   0x1   :  { %s11589_s20 = smov 0   ;;  %s11591_s21 = smov 0  }
   0x2   :  { %s11593_s22 = smov 0  }
   0x3 LB: > { %s24_s23 = sadd.s32 1, %s11545_s20  ;;  %s27_s24 = sadd.s32 1, %s11549_s21  ;;  %s11553_s22 = sphi %s11593_s22, %s15_s22   ;;  %s11549_s21 = sphi %s11591_s21, %s14757_s21   ;;  %s11545_s20 = sphi %s11589_s20, %s14756_s20   ;;  %s11541_s19 = sphi %s11587_s19, %s14755_s19   ;;  %s11537_s18 = sphi %s11585_s18, %s14754_s18  }
   0x4   : > { %p25_p0 = scmp.ge.s32.totalorder %s24_s23, 16  ;;  %p9577_p1 = scmp.ge.s32.totalorder %s11553_s22, 1 }
   0x5   : > { %p247_p2 = scmp.lt.s32.totalorder %s11553_s22, 33 }
   0x6   : > { %s14759_s23 = smov (%p25_p0, %s24_s23), 0  ;;  %s14761_s24 = smov (!%p25_p0, %s27_s24), %s11549_s21 }
   0x7   : > { %p248_p3 = pnand %p9577_p1, %p247_p2  ;;  %p29_p4 = scmp.ge.s32.totalorder %s14761_s24, 2 }
   0x9   : > { %s14763_s24 = smov (%p29_p4, %s14761_s24), 0  ;;  %251 = sbr.rel (%p248_p3) target bundleno = 2114 (0x842), region = 40 }
   0xe   : > { %v11164_v0 = vld [vmem:[%s14731_s3 + $0x8] sm:$0xff]  ;;  %p303_p5 = scmp.lt.s32.totalorder %s11541_s19, 1  ;;  %p305_p6 = scmp.lt.s32.totalorder %s11537_s18, 17  ;;  %v11166_v2 = vld [vmem:[%s14731_s3 + $0x18] sm:$0xff]  ;;  %v11163_v3 = vld [vmem:[%s14731_s3] sm:$0xff]  ;;  %vm644_vm0 = vcmask 261120  }
   0xf   : > { %v11168_v1 = vld [vmem:[%s14731_s3 + $0x28] sm:$0xff]  ;;  %852 = vmatpush.bf16.msra.mxu1 %v11164_v0  ;;  %v11167_v4 = vld [vmem:[%s14731_s3 + $0x20] sm:$0xff]  ;;  %705 = vmatpush.bf16.msra.mxu0 %v11166_v2  ;;  %v11165_v5 = vld [vmem:[%s14731_s3 + $0x10] sm:$0xff]  ;;  %vm954_vm1 = vcmask 1046528   ;;  %vm483_vm2 = vsmask.f32 7424 }
  0x10   : > { %1064 = vmatpush.bf16.msra.mxu2 %v11168_v1  ;;  %s14765_s19 = smov (!%p303_p5, %s11541_s19), 1  ;;  %11410 = vmatpush.bf16.msra.mxu3 %v11166_v2  ;;  %v11210_v6 = vld [vmem:[%s14731_s3 + $0x68] sm:$0xff]  ;;  %v11191_v8 = vld [vmem:[%s14731_s3 + $0x58] sm:$0xff]  ;;  %vm1956_vm3 = vcmask 1045504   ;;  %vm1575_vm4 = vsmask.f32 6400 }
  0x11   : > { %s306_s10 = scalar_select %p305_p6, %s11537_s18, 17  ;;  %v11189_v7 = vld [vmem:[%s14731_s3 + $0x48] sm:$0xff]  ;;  %vm2577_vm5 = vsmask.f32 5376  ;;  %vm2958_vm6 = vcmask 1044480   ;;  %vm9399_vm7 = vcmask 130048  }
  0x12   : > { %s11643_s15 = smul.u32 774, %s14765_s19  ;;  %s312_s26 = sadd.s32 1, %s11537_s18 }
  0x13   : > { %s11416_s25 = smul.u32 43, %s306_s10  ;;  %853 = vmatpush.bf16.msra.mxu1 %v11163_v3  ;;  %706 = vmatpush.bf16.msra.mxu0 %v11165_v5  ;;  %p315_p7 = scmp.lt.s32.totalorder %s312_s26, 17 }
  0x14   : > { %1065 = vmatpush.bf16.msra.mxu2 %v11167_v4  ;;  %11411 = vmatpush.bf16.msra.mxu3 %v11165_v5  ;;  %s323_s14 = sadd.s32 2, %s11537_s18  ;;  %p336_p9 = scmp.lt.s32.totalorder %s11537_s18, 15 }
  0x15   : > { %s309_s28 = sadd.s32 %s11643_s15, %s11416_s25  ;;  %s14767_s26 = smov (!%p315_p7, %s312_s26), 17 }
  0x16   : > { %s9578_s29 = sshll.u32 %s309_s28, 2  ;;  %s11418_s6 = smul.u32 43, %s14767_s26 }
  0x17   : > { %1818 = vmatpush.bf16.msrb.mxu0 %v11189_v7  ;;  %s11655_s7 = scalar_lea.vmem %s14728_s0, %s9578_s29  ;;  %2066 = vmatpush.bf16.msrb.mxu1 %v11191_v8  ;;  %p326_p8 = scmp.lt.s32.totalorder %s323_s14, 17 }
  0x18   : > { %2439 = vmatpush.bf16.msrb.mxu2 %v11210_v6  ;;  %11412 = vmatpush.bf16.msrb.mxu3 %v11164_v0  ;;  %v11390_v9 = vld [vmem:[%s11655_s7] sm:$0xff]   ;;  %v11146_v11 = vld [vmem:[%s11655_s7 + $0x8] sm:$0xff]  ;;  %v11663_v15 = vld [vmem:[%s11655_s7 + $0x70] sm:$0xff]  ;;  %s319_s12 = sadd.s32 %s11418_s6, %s11643_s15  ;;  %s14771_s18 = smov (!%p336_p9, %s11537_s18), 15 }
  0x19   : > { %v11401_v10 = vld [vmem:[%s11655_s7] sm:$0xf0]  ;;  %v485_v12 = vshrl.u32 %v11390_v9, 16  ;;  %v487_v13 = vshll.u32 %v11390_v9, 16  ;;  %9688 = vmatmul.msk.bf16.vlgmr.msra.gmra.mxu1 %vm644_vm0, %v11390_v9  ;;  %v11402_v14 = vld [vmem:[%s11655_s7] sm:$0xe] }
  0x1a   : > { %v11403_v16 = vor.u32 %v11402_v14, %v11401_v10  ;;  %v956_v17 = vrot.slane %v11146_v11, 1  ;;  %v492_v18 = vshll.u32 %v11146_v11, 16  ;;  %v11666_v19 = vld [vmem:[%s11655_s7 + $0x78] sm:$0xff]  ;;  %v596_v21 = vshll.u32 %v11663_v15, 16  ;;  %v11147_v33 = vld [vmem:[%s11655_s7 + $0x10] sm:$0xff]  ;;  %v11682_v34 = vld [vmem:[%s11655_s7 + $0x80] sm:$0xff] }
  0x1b   : > { %v489_v20 = vrot.slane %v487_v13, 1  ;;  %v600_v22 = vshrl.u32 %v11663_v15, 16  ;;  %v604_v25 = vshll.u32 %v11666_v19, 16  ;;  %v496_v35 = vshrl.u32 %v11146_v11, 16  ;;  %v11148_v47 = vld [vmem:[%s11655_s7 + $0x18] sm:$0xff]  ;;  %v11695_v48 = vld [vmem:[%s11655_s7 + $0x88] sm:$0xff] }
  0x1c   : > { %11413 = vmatpush.bf16.msrb.mxu3 %v11163_v3  ;;  %v955_v23 = vrot.slane %v11403_v16, 1  ;;  %v494_v24 = vrot.slane %v492_v18, 1  ;;  %v11671_v27 = vrot.slane %v596_v21, 1  ;;  %v500_v36 = vshll.u32 %v11147_v33, 16  ;;  %v384_v59 = vld [vmem:[%s11655_s7 + $0x90] sm:$0x1] }
  0x1d   : > { %v490_v26 = vor.u32 %v489_v20, %v485_v12  ;;  %v606_v29 = vrot.slane %v604_v25, 1  ;;  %v608_v37 = vshrl.u32 %v11666_v19, 16  ;;  %v612_v38 = vshll.u32 %v11682_v34, 16  ;;  %v11149_v63 = vld [vmem:[%s11655_s7 + $0x20] sm:$0xff]  ;;  %v11150_v13 = vld [vmem:[%s11655_s7 + $0x28] sm:$0xff]  ;;  %s9579_s13 = sshll.u32 %s319_s12, 2 }
  0x1e   : > { %v957_v28 = vsel %vm954_vm1, %v955_v23, %v956_v17  ;;  %v602_v31 = vor.u32 %v600_v22, %v11671_v27  ;;  %v958_v39 = vrot.slane %v11147_v33, 1  ;;  %v498_v40 = vor.u32 %v496_v35, %v494_v24  ;;  %v11151_v23 = vld [vmem:[%s11655_s7 + $0x30] sm:$0xff]  ;;  %v11152_v35 = vld [vmem:[%s11655_s7 + $0x38] sm:$0xff]  ;;  %s12382_s17 = scalar_lea.vmem %s14729_s1, %s9579_s13  ;;  %s14769_s14 = smov (!%p326_p8, %s323_s14), 17 }
  0x1f   : > { %9718 = vmatmul.msk.bf16.vlgmr.msra.gmra.mxu2 %vm644_vm0, %v957_v28  ;;  %v495_v30 = vsel %vm483_vm2, %v490_v26, %v494_v24  ;;  %v502_v41 = vrot.slane %v500_v36, 1  ;;  %v610_v42 = vor.u32 %v608_v37, %v606_v29  ;;  %v614_v43 = vrot.slane %v612_v38, 1  ;;  %v11190_v36 = vld [vmem:[%s14731_s3 + $0x50] sm:$0xff]  ;;  %s11419_s26 = smul.u32 43, %s14769_s14 }
  0x20   : > { %9662 = vmatmul.msk.bf16.vlgmr.msra.gmra.mxu0 %vm644_vm0, %v495_v30  ;;  %v607_v32 = vsel %vm483_vm2, %v602_v31, %v606_v29  ;;  %v959_v44 = vsel %vm954_vm1, %v956_v17, %v958_v39  ;;  %v504_v49 = vshrl.u32 %v11147_v33, 16  ;;  %v508_v50 = vshll.u32 %v11148_v47, 16  ;;  %2067 = vmatpush.bf16.msrb.mxu1 %v11190_v36  ;;  %s11421_s13 = smul.u32 576, %s14765_s19 }
  0x21   : > { %9676 = vmatmul.msk.bf16.vlgmr.msra.gmra.mxu3 %vm644_vm0, %v607_v32  ;;  %v503_v45 = vsel %vm483_vm2, %v498_v40, %v502_v41  ;;  %v615_v46 = vsel %vm483_vm2, %v610_v42, %v614_v43  ;;  %v616_v51 = vshrl.u32 %v11682_v34, 16  ;;  %v620_v52 = vshll.u32 %v11695_v48, 16  ;;  %v11209_v32 = vld [vmem:[%s14731_s3 + $0x60] sm:$0xff]  ;;  %s330_s27 = sadd.s32 %s11419_s26, %s11643_s15  ;;  %s11420_s14 = smul.u32 36, %s14771_s18 }
  0x22   : > { %11414 = vmatpush.bf16.msra.mxu3 %v11168_v1  ;;  %v960_v53 = vrot.slane %v11148_v47, 1  ;;  %v506_v54 = vor.u32 %v504_v49, %v502_v41  ;;  %v510_v55 = vrot.slane %v508_v50, 1  ;;  %v463_v62 = vunpack.c.l.b16 %v384_v59  ;;  %2440 = vmatpush.bf16.msrb.mxu2 %v11209_v32  ;;  %s9580_s28 = sshll.u32 %s330_s27, 2 }
  0x23   : > { %v618_v56 = vor.u32 %v616_v51, %v614_v43  ;;  %v622_v57 = vrot.slane %v620_v52, 1  ;;  %v512_v1 = vshrl.u32 %v11148_v47, 16  ;;  %v516_v2 = vshll.u32 %v11149_v63, 16  ;;  %s13312_s30 = scalar_lea.vmem %s14730_s2, %s9580_s28  ;;  %s340_s19 = sadd.s32 %s11421_s13, %s11420_s14 }
  0x24   : > { %v961_v58 = vsel %vm954_vm1, %v958_v39, %v960_v53  ;;  %v511_v60 = vsel %vm483_vm2, %v506_v54, %v510_v55  ;;  %v11708_v0 = vpack.c.b16 %v463_v62, %v463_v62  ;;  %v624_v3 = vshrl.u32 %v11695_v48, 16  ;;  %s9581_s18 = sshll.u32 %s340_s19, 3 }
  0x25   : > { %v623_v61 = vsel %vm483_vm2, %v618_v56, %v622_v57  ;;  %v962_v5 = vrot.slane %v11149_v63, 1  ;;  %v514_v6 = vor.u32 %v512_v1, %v510_v55  ;;  %v518_v7 = vrot.slane %v516_v2, 1  ;;  %s14442_s27 = scalar_lea.vmem %s14733_s5, %s9581_s18 }
  0x26   : > { %11415 = vmatpush.bf16.msra.mxu3 %v11167_v4  ;;  %v628_v4 = vshll.u32 %v11708_v0, 16  ;;  %v626_v8 = vor.u32 %v624_v3, %v622_v57  ;;  %v520_v14 = vshrl.u32 %v11149_v63, 16  ;;  %v524_v16 = vshll.u32 %v11150_v13, 16  ;;  %v11187_v57 = vld [vmem:[%s14731_s3 + $0x38] sm:$0xff] }
  0x27   : > { %v963_v10 = vsel %vm954_vm1, %v960_v53, %v962_v5  ;;  %v964_v17 = vrot.slane %v11150_v13, 1  ;;  %v528_v24 = vshrl.u32 %v11150_v13, 16  ;;  %v532_v25 = vshll.u32 %v11151_v23, 16  ;;  %v11154_v53 = vld [vmem:[%s11655_s7 + $0x48] sm:$0xff] }
  0x28   : > { %v630_v9 = vrot.slane %v628_v4, 1  ;;  %v522_v18 = vor.u32 %v520_v14, %v518_v7  ;;  %v526_v20 = vrot.slane %v524_v16, 1  ;;  %v966_v26 = vrot.slane %v11151_v23, 1 }
  0x29   : > { %9689 = vmatmul.msk.bf16.gmra.mxu1 %vm644_vm0, %v11146_v11  ;;  %v519_v11 = vsel %vm483_vm2, %v514_v6, %v518_v7  ;;  %v965_v21 = vsel %vm954_vm1, %v962_v5, %v964_v17  ;;  %v534_v29 = vrot.slane %v532_v25, 1  ;;  %v536_v37 = vshrl.u32 %v11151_v23, 16  ;;  %v11155_v6 = vld [vmem:[%s11655_s7 + $0x50] sm:$0xff] }
  0x2a   : > { %v631_v12 = vsel %vm483_vm2, %v626_v8, %v630_v9  ;;  %v527_v22 = vsel %vm483_vm2, %v522_v18, %v526_v20  ;;  %v530_v28 = vor.u32 %v528_v24, %v526_v20  ;;  %v967_v30 = vsel %vm954_vm1, %v964_v17, %v966_v26 }
  0x2b   : > { %v540_v38 = vshll.u32 %v11152_v35, 16  ;;  %v968_v39 = vrot.slane %v11152_v35, 1  ;;  %v538_v40 = vor.u32 %v536_v37, %v534_v29  ;;  %v556_v55 = vshll.u32 %v11154_v53, 16 }
  0x2c   : > { %v535_v31 = vsel %vm483_vm2, %v530_v28, %v534_v29  ;;  %v984_v62 = vrot.slane %v11666_v19, 1  ;;  %v974_v14 = vrot.slane %v11155_v6, 1 }
  0x2d   : > { %v542_v41 = vrot.slane %v540_v38, 1  ;;  %v969_v42 = vsel %vm954_vm1, %v966_v26, %v968_v39 }
  0x2f   : > { %9719 = vmatmul.msk.bf16.gmra.mxu2 %vm644_vm0, %v959_v44  ;;  %v543_v43 = vsel %vm483_vm2, %v538_v40, %v542_v41  ;;  %v11153_v44 = vld [vmem:[%s11655_s7 + $0x40] sm:$0xff] }
  0x30   : > { %9663 = vmatmul.msk.bf16.gmra.mxu0 %vm644_vm0, %v503_v45  ;;  %v544_v45 = vshrl.u32 %v11152_v35, 16  ;;  %v552_v54 = vshrl.u32 %v11153_v44, 16 }
  0x31   : > { %9677 = vmatmul.msk.bf16.gmra.mxu3 %vm644_vm0, %v615_v46  ;;  %v548_v46 = vshll.u32 %v11153_v44, 16 }
  0x32   : > { %v546_v49 = vor.u32 %v544_v45, %v542_v41  ;;  %v988_v45 = vrot.slane %v11695_v48, 1 }
  0x33   : > { %v550_v50 = vrot.slane %v548_v46, 1 }
  0x35   : > { %v551_v52 = vsel %vm483_vm2, %v546_v49, %v550_v50  ;;  %v554_v59 = vor.u32 %v552_v54, %v550_v50  ;;  %v11157_v54 = vld [vmem:[%s11655_s7 + $0x60] sm:$0xff] }
  0x39   : > { %9690 = vmatmul.msk.bf16.gmra.mxu1 %vm644_vm0, %v11147_v33  ;;  %v11188_v33 = vld [vmem:[%s14731_s3 + $0x40] sm:$0xff] }
  0x3a   : > { %1819 = vmatpush.bf16.msrb.mxu0 %v11188_v33 }
  0x3f   : > { %9720 = vmatmul.msk.bf16.gmra.mxu2 %vm644_vm0, %v961_v58  ;;  %v972_v58 = vrot.slane %v11154_v53, 1 }
  0x40   : > { %9664 = vmatmul.msk.bf16.gmra.mxu0 %vm644_vm0, %v511_v60  ;;  %v558_v60 = vrot.slane %v556_v55, 1 }
  0x41   : > { %9678 = vmatmul.msk.bf16.gmra.mxu3 %vm644_vm0, %v623_v61  ;;  %v982_v61 = vrot.slane %v11663_v15, 1 }
  0x42   : > { %v559_v2 = vsel %vm483_vm2, %v554_v59, %v558_v60  ;;  %v580_v59 = vshll.u32 %v11157_v54, 16 }
  0x43   : > { %v985_v5 = vsel %vm954_vm1, %v982_v61, %v984_v62 }
  0x49   : > { %9691 = vmatmul.msk.bf16.gmra.mxu1 %vm644_vm0, %v11148_v47  ;;  %v970_v47 = vrot.slane %v11153_v44, 1 }
  0x4b   : > { %v971_v51 = vsel %vm954_vm1, %v968_v39, %v970_v47  ;;  %v11186_v39 = vld [vmem:[%s14731_s3 + $0x30] sm:$0xff] }
  0x4f   : > { %9721 = vmatmul.msk.bf16.gmra.mxu2 %vm644_vm0, %v963_v10  ;;  %v560_v10 = vshrl.u32 %v11154_v53, 16 }
  0x50   : > { %9665 = vmatmul.msk.bf16.gmra.mxu0 %vm644_vm0, %v519_v11  ;;  %v564_v11 = vshll.u32 %v11155_v6, 16 }
  0x51   : > { %9679 = vmatmul.msk.bf16.gmra.mxu3 %vm644_vm0, %v631_v12  ;;  %v562_v16 = vor.u32 %v560_v10, %v558_v60 }
  0x52   : > { %v566_v17 = vrot.slane %v564_v11, 1 }
  0x54   : > { %v567_v25 = vsel %vm483_vm2, %v562_v16, %v566_v17  ;;  %v11830_v16 = vld [vmem:[%s11655_s7 + $0xc] sm:$0xf] }
  0x59   : > { %9692 = vmatmul.msk.bf16.gmra.mxu1 %vm644_vm0, %v11149_v63  ;;  %v973_v63 = vsel %vm954_vm1, %v970_v47, %v972_v58 }
  0x5f   : > { %9722 = vmatmul.msk.bf16.gmra.mxu2 %vm644_vm0, %v965_v21  ;;  %v986_v21 = vrot.slane %v11682_v34, 1 }
  0x60   : > { %9666 = vmatmul.msk.bf16.gmra.mxu0 %vm644_vm0, %v527_v22  ;;  %v975_v22 = vsel %vm954_vm1, %v972_v58, %v974_v14 }
  0x61   : > { %9702 = vmatmul.msk.bf16.vlgmr.msrb.gmra.mxu3 %vm644_vm0, %v11663_v15  ;;  %v987_v29 = vsel %vm954_vm1, %v984_v62, %v986_v21 }
  0x62   : > { %1437 = vmatpush.bf16.msrb.mxu3 %v11187_v57 }
  0x66   : > { %1438 = vmatpush.bf16.msrb.mxu3 %v11186_v39 }
  0x69   : > { %9693 = vmatmul.msk.bf16.gmra.mxu1 %vm644_vm0, %v11150_v13 }
  0x6f   : > { %9723 = vmatmul.msk.bf16.gmra.mxu2 %vm644_vm0, %v967_v30  ;;  %v11156_v30 = vld [vmem:[%s11655_s7 + $0x58] sm:$0xff] }
  0x70   : > { %9667 = vmatmul.msk.bf16.gmra.mxu0 %vm644_vm0, %v535_v31  ;;  %v572_v36 = vshll.u32 %v11156_v30, 16  ;;  %v976_v40 = vrot.slane %v11156_v30, 1  ;;  %v576_v58 = vshrl.u32 %v11156_v30, 16 }
  0x71   : > { %9703 = vmatmul.msk.bf16.gmra.mxu3 %vm644_vm0, %v11666_v19 }
  0x72   : > { %v977_v46 = vsel %vm954_vm1, %v974_v14, %v976_v40  ;;  %v1193_v14 = vld [vmem:[%s11655_s7 + $0x8] sm:$0xe] }
  0x79   : > { %9694 = vmatmul.msk.bf16.gmra.mxu1 %vm644_vm0, %v11151_v23 }
  0x7f   : > { %9724 = vmatmul.msk.bf16.gmra.mxu2 %vm644_vm0, %v969_v42  ;;  %v574_v42 = vrot.slane %v572_v36, 1 }
  0x80   : > { %9668 = vmatmul.msk.bf16.gmra.mxu0 %vm644_vm0, %v543_v43 }
  0x81   : > { %9704 = vmatmul.msk.bf16.gmra.mxu3 %vm644_vm0, %v11682_v34 }
  0x89   : > { %9695 = vmatmul.msk.bf16.gmra.mxu1 %vm644_vm0, %v11152_v35  ;;  %v568_v35 = vshrl.u32 %v11155_v6, 16 }
  0x8b   : > { %v570_v41 = vor.u32 %v568_v35, %v566_v17 }
  0x8d   : > { %v575_v50 = vsel %vm483_vm2, %v570_v41, %v574_v42 }
  0x8f   : > { %9725 = vmatmul.msk.bf16.gmra.mxu2 %vm644_vm0, %v971_v51 }
  0x90   : > { %9669 = vmatmul.msk.bf16.gmra.mxu0 %vm644_vm0, %v551_v52 }
  0x91   : > { %9705 = vmatmul.msk.bf16.gmra.mxu3 %vm644_vm0, %v11695_v48 }
  0x96   : > { %v855_v56 = vpop.f32.mrf.mxu1 }
  0x99   : > { %9696 = vmatmul.msk.bf16.gmra.mxu1 %vm644_vm0, %v11153_v44 }
  0x9d   : > { %v708_v1 = vpop.f32.mrf.mxu0 }
  0x9e   : > { %v856_v3 = vadd.f32 %v855_v56, %v708_v1  ;;  %v857_v4 = vpop.f32.mrf.mxu1  ;;  %v578_v1 = vor.u32 %v576_v58, %v574_v42  ;;  %v11234_v58 = vld [vmem:[%s14731_s3 + $0x98] sm:$0xff] }
  0x9f   : > { %9726 = vmatmul.msk.bf16.gmra.mxu2 %vm644_vm0, %v973_v63  ;;  %v978_v63 = vrot.slane %v11157_v54, 1  ;;  %3400 = vmatpush.bf16.msra.mxu1 %v11234_v58 }
  0xa0   : > { %9670 = vmatmul.msk.bf16.gmra.mxu0 %vm644_vm0, %v559_v2  ;;  %v582_v2 = vrot.slane %v580_v59, 1 }
  0xa1   : > { %9732 = vmatmul.msk.bf16.vlgmr.msra.gmra.mxu3 %vm644_vm0, %v985_v5  ;;  %v990_v5 = vrot.slane %v11708_v0, 1  ;;  %v11158_v0 = vld [vmem:[%s11655_s7 + $0x68] sm:$0xff] }
  0xa2   : > { %v1067_v7 = vpop.f32.mrf.mxu2  ;;  %v583_v10 = vsel %vm483_vm2, %v578_v1, %v582_v2  ;;  %v980_v36 = vrot.slane %v11158_v0, 1 }
  0xa3   : > { %v11776_v19 = vadd.f32 %v1067_v7, %v856_v3 }
  0xa4   : > { %v11778_v9 = vpop.f32.mrf.mxu3 }
  0xa5   : > { %v710_v8 = vpop.f32.mrf.mxu0 }
  0xa6   : > { %v858_v12 = vadd.f32 %v857_v4, %v710_v8  ;;  %v860_v13 = vpop.f32.mrf.mxu1 }
  0xa9   : > { %9697 = vmatmul.msk.bf16.gmra.mxu1 %vm644_vm0, %v11154_v53  ;;  %v989_v53 = vsel %vm954_vm1, %v986_v21, %v988_v45  ;;  %v1272_v21 = vunpack.c.l.b16 %v1193_v14 }
  0xaa   : > { %v1069_v18 = vpop.f32.mrf.mxu2 }
  0xab   : > { %v11781_v20 = vadd.f32 %v1069_v18, %v858_v12 }
  0xac   : > { %v11785_v24 = vpop.f32.mrf.mxu3 }
  0xad   : > { %v713_v23 = vpop.f32.mrf.mxu0 }
  0xae   : > { %v861_v26 = vadd.f32 %v860_v13, %v713_v23  ;;  %v862_v28 = vpop.f32.mrf.mxu1  ;;  %v991_v13 = vsel %vm954_vm1, %v988_v45, %v990_v5  ;;  %v1947_v5 = vld [vmem:[%s11655_s7 + $0x8] sm:$0xc] }
  0xaf   : > { %9727 = vmatmul.msk.bf16.gmra.mxu2 %vm644_vm0, %v975_v22  ;;  %v1273_v22 = vunpack.c.l.b16 %v11830_v16 }
  0xb0   : > { %9671 = vmatmul.msk.bf16.gmra.mxu0 %vm644_vm0, %v567_v25 }
  0xb1   : > { %9733 = vmatmul.msk.bf16.gmra.mxu3 %vm644_vm0, %v987_v29  ;;  %v11845_v35 = vpack.c.b16 %v1273_v22, %v1272_v21  ;;  %v11889_v21 = vld [vmem:[%s11655_s7 + $0x14] sm:$0xf] }
  0xb2   : > { %v1072_v31 = vpop.f32.mrf.mxu2 }
  0xb3   : > { %v11793_v34 = vadd.f32 %v1072_v31, %v861_v26  ;;  %v584_v26 = vshrl.u32 %v11157_v54, 16  ;;  %v11212_v31 = vld [vmem:[%s14731_s3 + $0x78] sm:$0xff]  ;;  %v1328_v41 = vrot.slane %v11845_v35, 1 }
  0xb4   : > { %v11795_v33 = vpop.f32.mrf.mxu3  ;;  %2820 = vmatpush.bf16.msra.mxu3 %v11212_v31 }
  0xb5   : > { %v715_v32 = vpop.f32.mrf.mxu0 }
  0xb6   : > { %v863_v37 = vadd.f32 %v862_v28, %v715_v32  ;;  %v865_v38 = vpop.f32.mrf.mxu1  ;;  %v588_v28 = vshll.u32 %v11158_v0, 16  ;;  %v11843_v32 = vld [vmem:[%s11655_s7 + $0x10] sm:$0xff] }
  0xb7   : > { %v1329_v42 = vrot.slane %v11843_v32, 1  ;;  %v1585_v31 = vshrl.u32 %v11843_v32, 16 }
  0xb9   : > { %9698 = vmatmul.msk.bf16.gmra.mxu1 %vm644_vm0, %v11155_v6  ;;  %v979_v6 = vsel %vm954_vm1, %v976_v40, %v978_v63 }
  0xba   : > { %v1074_v43 = vpop.f32.mrf.mxu2 }
  0xbb   : > { %v11801_v44 = vadd.f32 %v1074_v43, %v863_v37  ;;  %v586_v37 = vor.u32 %v584_v26, %v582_v2  ;;  %v981_v43 = vsel %vm954_vm1, %v978_v63, %v980_v36 }
  0xbc   : > { %v11805_v49 = vpop.f32.mrf.mxu3 }
  0xbd   : > { %v718_v47 = vpop.f32.mrf.mxu0 }
  0xbe   : > { %v866_v51 = vadd.f32 %v865_v38, %v718_v47  ;;  %v867_v52 = vpop.f32.mrf.mxu1  ;;  %v590_v38 = vrot.slane %v588_v28, 1 }
  0xbf   : > { %9728 = vmatmul.msk.bf16.gmra.mxu2 %vm644_vm0, %v977_v46 }
  0xc0   : > { %9672 = vmatmul.msk.bf16.gmra.mxu0 %vm644_vm0, %v575_v50  ;;  %v591_v47 = vsel %vm483_vm2, %v586_v37, %v590_v38  ;;  %v1958_v37 = vrot.slane %v11843_v32, 2 }
  0xc1   : > { %9734 = vmatmul.msk.bf16.gmra.mxu3 %vm644_vm0, %v989_v53  ;;  %v11253_v53 = vld [vmem:[%s14731_s3 + $0xa8] sm:$0xff] }
  0xc2   : > { %v1077_v55 = vpop.f32.mrf.mxu2  ;;  %3884 = vmatpush.bf16.msra.mxu2 %v11253_v53 }
  0xc3   : > { %v11813_v48 = vadd.f32 %v1077_v55, %v866_v51 }
  0xc4   : > { %v11815_v57 = vpop.f32.mrf.mxu3 }
  0xc5   : > { %v720_v56 = vpop.f32.mrf.mxu0 }
  0xc6   : > { %v868_v60 = vadd.f32 %v867_v52, %v720_v56  ;;  %v870_v62 = vpop.f32.mrf.mxu1  ;;  %v1330_v52 = vsel %vm954_vm1, %v1328_v41, %v1329_v42 }
  0xc9   : > { %9699 = vmatmul.msk.bf16.gmra.mxu1 %vm644_vm0, %v11156_v30 }
  0xca   : > { %v1079_v3 = vpop.f32.mrf.mxu2 }
  0xcb   : > { %v11818_v4 = vadd.f32 %v1079_v3, %v868_v60  ;;  %v11875_v3 = vld [vmem:[%s11655_s7 + $0x18] sm:$0xff] }
  0xcc   : > { %v11822_v8 = vpop.f32.mrf.mxu3 }
  0xcd   : > { %v723_v7 = vpop.f32.mrf.mxu0 }
  0xce   : > { %v871_v11 = vadd.f32 %v870_v62, %v723_v7  ;;  %v872_v12 = vpop.f32.mrf.mxu1  ;;  %v592_v62 = vshrl.u32 %v11158_v0, 16 }
  0xcf   : > { %9729 = vmatmul.msk.bf16.gmra.mxu2 %vm644_vm0, %v979_v6 }
  0xd0   : > { %9673 = vmatmul.msk.bf16.gmra.mxu0 %vm644_vm0, %v583_v10  ;;  %v594_v6 = vor.u32 %v592_v62, %v590_v38  ;;  %v1954_v10 = vunpack.c.l.b16 %v1947_v5 }
  0xd1   : > { %9735 = vmatmul.msk.bf16.gmra.mxu3 %vm644_vm0, %v991_v13  ;;  %v983_v13 = vsel %vm954_vm1, %v980_v36, %v982_v61 }
  0xd2   : > { %v1082_v17 = vpop.f32.mrf.mxu2  ;;  %v599_v16 = vsel %vm483_vm2, %v594_v6, %v11671_v27  ;;  %v1955_v28 = vpack.c.b16 %v1273_v22, %v1954_v10  ;;  %v1577_v27 = vshrl.u32 %v11845_v35, 16 }
  0xd3   : > { %v11834_v18 = vadd.f32 %v1082_v17, %v871_v11  ;;  %v2195_v17 = vld [vmem:[%s11655_s7 + $0x10] sm:$0xc] }
  0xd4   : > { %v11837_v25 = vpop.f32.mrf.mxu3  ;;  %v2274_v61 = vunpack.c.l.b16 %v2195_v17  ;;  %v1957_v22 = vrot.slane %v1955_v28, 2  ;;  %v1597_v17 = vshll.u32 %v11875_v3, 16 }
  0xd5   : > { %v725_v23 = vpop.f32.mrf.mxu0 }
  0xd6   : > { %v873_v29 = vadd.f32 %v872_v12, %v725_v23  ;;  %v875_v30 = vpop.f32.mrf.mxu1  ;;  %v1331_v12 = vrot.slane %v11875_v3, 1 }
  0xd8   : > { %v1332_v15 = vsel %vm954_vm1, %v1329_v42, %v1331_v12 }
  0xd9   : > { %9700 = vmatmul.msk.bf16.gmra.mxu1 %vm644_vm0, %v11157_v54  ;;  %v11214_v54 = vld [vmem:[%s14731_s3 + $0x88] sm:$0xff] }
  0xda   : > { %v1084_v39 = vpop.f32.mrf.mxu2  ;;  %3068 = vmatpush.bf16.msra.mxu0 %v11214_v54  ;;  %v11916_v54 = vld [vmem:[%s11655_s7 + $0x20] sm:$0xff] }
  0xdb   : > { %v11848_v40 = vadd.f32 %v1084_v39, %v873_v29  ;;  %v14734_v29 = vunpack.c.l.b16 %v11889_v21  ;;  %v11192_v39 = vld [vmem:[%s11655_s7 + $0x18] sm:$0xff] }
  0xdc   : > { %v11853_v46 = vpop.f32.mrf.mxu3  ;;  %v2331_v58 = vrot.slane %v11192_v39, 2 }
  0xdd   : > { %v728_v45 = vpop.f32.mrf.mxu0  ;;  %v11909_v41 = vpack.c.b16 %v14734_v29, %v2274_v61 }
  0xde   : > { %v876_v50 = vadd.f32 %v875_v30, %v728_v45  ;;  %v877_v51 = vpop.f32.mrf.mxu1  ;;  %v1580_v30 = vshll.u32 %v11845_v35, 16 }
  0xdf   : > { %9730 = vmatmul.msk.bf16.gmra.mxu2 %vm644_vm0, %v981_v43  ;;  %v1579_v43 = vrot.slane %v1577_v27, 1 }
  0xe0   : > { %9674 = vmatmul.msk.bf16.gmra.mxu0 %vm644_vm0, %v591_v47  ;;  %v1582_v45 = vrot.slane %v1580_v30, 2  ;;  %v1587_v47 = vrot.slane %v1585_v31, 1  ;;  %v1599_v30 = vrot.slane %v1597_v17, 2 }
  0xe1   : > { %9816 = vmatmul.msk.bf16.vlgmr.msrb.gmra.mxu3 %vm644_vm0, %v1330_v52 }
  0xe2   : > { %v1087_v55 = vpop.f32.mrf.mxu2 }
  0xe3   : > { %v11866_v56 = vadd.f32 %v1087_v55, %v876_v50  ;;  %v2330_v55 = vrot.slane %v11909_v41, 2 }
  0xe4   : > { %v925_v60 = vpop.f32.mrf.mxu3 }
  0xe5   : > { %v730_v59 = vpop.f32.mrf.mxu0  ;;  %v11872_v1 = vadd.f32 %v925_v60, %v11778_v9 }
  0xe6   : > { %v878_v63 = vadd.f32 %v877_v51, %v730_v59  ;;  %v880_v2 = vpop.f32.mrf.mxu1  ;;  %v1583_v59 = vor.u32 %v1582_v45, %v1579_v43 }
  0xe9   : > { %9701 = vmatmul.msk.bf16.gmra.mxu1 %vm644_vm0, %v11158_v0 }
  0xea   : > { %v1089_v7 = vpop.f32.mrf.mxu2 }
  0xeb   : > { %v11879_v11 = vadd.f32 %v1089_v7, %v878_v63 }
  0xec   : > { %v927_v9 = vpop.f32.mrf.mxu3 }
  0xed   : > { %v733_v14 = vpop.f32.mrf.mxu0  ;;  %v11892_v23 = vadd.f32 %v927_v9, %v11785_v24  ;;  %v1588_v24 = vshll.u32 %v11843_v32, 16  ;;  %v1959_v32 = vsel %vm1956_vm3, %v1957_v22, %v1958_v37  ;;  %v11943_v22 = vld [vmem:[%s11655_s7 + $0x28] sm:$0xff] }
  0xee   : > { %v881_v0 = vadd.f32 %v880_v2, %v733_v14  ;;  %v882_v26 = vpop.f32.mrf.mxu1  ;;  %v1333_v2 = vrot.slane %v11916_v54, 1  ;;  %v1335_v43 = vrot.slane %v11943_v22, 1 }
  0xef   : > { %9731 = vmatmul.msk.bf16.gmra.mxu2 %vm644_vm0, %v983_v13  ;;  %v1590_v50 = vrot.slane %v1588_v24, 2 }
  0xf0   : > { %9675 = vmatmul.msk.bf16.gmra.mxu0 %vm644_vm0, %v599_v16  ;;  %v1334_v9 = vsel %vm954_vm1, %v1331_v12, %v1333_v2  ;;  %v1594_v16 = vshrl.u32 %v11875_v3, 16 }
  0xf1   : > { %9817 = vmatmul.msk.bf16.gmra.mxu3 %vm644_vm0, %v1332_v15  ;;  %v1591_v60 = vor.u32 %v1590_v50, %v1587_v47 }
  0xf2   : > { %v1092_v36 = vpop.f32.mrf.mxu2  ;;  %v1596_v27 = vrot.slane %v1594_v16, 1  ;;  %v11969_v16 = vld [vmem:[%s11655_s7 + $0x30] sm:$0xff] }
  0xf3   : > { %v11904_v38 = vadd.f32 %v1092_v36, %v881_v0  ;;  %v1592_v7 = vsel %vm1575_vm4, %v1583_v59, %v1591_v60 }
  0xf4   : > { %v930_v42 = vpop.f32.mrf.mxu3 }
  0xf5   : > { %v735_v35 = vpop.f32.mrf.mxu0  ;;  %v11912_v52 = vadd.f32 %v930_v42, %v11795_v33  ;;  %v2332_v33 = vsel %vm1956_vm3, %v2330_v55, %v2331_v58  ;;  %v1603_v55 = vshrl.u32 %v11916_v54, 16 }
  0xf6   : > { %v883_v51 = vadd.f32 %v882_v26, %v735_v35  ;;  %v885_v53 = vpop.f32.mrf.mxu1  ;;  %v1960_v26 = vrot.slane %v11875_v3, 2  ;;  %v1600_v3 = vor.u32 %v1599_v30, %v1596_v27 }
  0xf8   : > { %v1961_v36 = vsel %vm1956_vm3, %v1958_v37, %v1960_v26  ;;  %v1601_v50 = vsel %vm1575_vm4, %v1591_v60, %v1600_v3  ;;  %v1962_v60 = vrot.slane %v11916_v54, 2 }
  0xf9   : > { %9876 = vmatmul.msk.bf16.vlgmr.msrb.gmra.mxu1 %vm644_vm0, %v1959_v32  ;;  %v1336_v32 = vsel %vm954_vm1, %v1333_v2, %v1335_v43 }
  0xfa   : > { %v1094_v62 = vpop.f32.mrf.mxu2 }
  0xfb   : > { %v11920_v63 = vadd.f32 %v1094_v62, %v883_v51 }
  0xfc   : > { %v932_v6 = vpop.f32.mrf.mxu3 }
  0xfd   : > { %v738_v5 = vpop.f32.mrf.mxu0  ;;  %v11926_v13 = vadd.f32 %v932_v6, %v11805_v49  ;;  %v11193_v49 = vld [vmem:[%s11655_s7 + $0x20] sm:$0xff]  ;;  %v1605_v6 = vrot.slane %v1603_v55, 1 }
  0xfe   : > { %v886_v10 = vadd.f32 %v885_v53, %v738_v5  ;;  %v887_v14 = vpop.f32.mrf.mxu1  ;;  %v2333_v39 = vrot.slane %v11193_v49, 2 }
  0xff   : > { %9974 = vmatmul.msk.bf16.vlgmr.msrb.gmra.mxu2 %vm644_vm0, %v2332_v33 }
 0x100   : > { %9846 = vmatmul.msk.bf16.vlgmr.msrb.gmra.mxu0 %vm644_vm0, %v1592_v7  ;;  %v2334_v45 = vsel %vm1956_vm3, %v2331_v58, %v2333_v39  ;;  %v1606_v58 = vshll.u32 %v11916_v54, 16 }
 0x101   : > { %9818 = vmatmul.msk.bf16.gmra.mxu3 %vm644_vm0, %v1334_v9  ;;  %v1963_v9 = vsel %vm1956_vm3, %v1960_v26, %v1962_v60 }
 0x102   : > { %v1097_v0 = vpop.f32.mrf.mxu2  ;;  %v1608_v7 = vrot.slane %v1606_v58, 2 }
 0x103   : > { %v11935_v28 = vadd.f32 %v1097_v0, %v886_v10 }
 0x104   : > { %v935_v61 = vpop.f32.mrf.mxu3  ;;  %v1609_v54 = vor.u32 %v1608_v7, %v1605_v6 }
 0x105   : > { %v740_v15 = vpop.f32.mrf.mxu0  ;;  %v11939_v31 = vadd.f32 %v935_v61, %v11815_v57 }
 0x106   : > { %v888_v12 = vadd.f32 %v887_v14, %v740_v15  ;;  %v890_v24 = vpop.f32.mrf.mxu1  ;;  %v1337_v15 = vrot.slane %v11969_v16, 1  ;;  %v1610_v30 = vsel %vm1575_vm4, %v1600_v3, %v1609_v54  ;;  %v1964_v3 = vrot.slane %v11943_v22, 2 }
 0x108   : > { %v1965_v58 = vsel %vm1956_vm3, %v1962_v60, %v1964_v3 }
 0x109   : > { %9877 = vmatmul.msk.bf16.gmra.mxu1 %vm644_vm0, %v1961_v36  ;;  %v1338_v36 = vsel %vm954_vm1, %v1335_v43, %v1337_v15 }
 0x10a   : > { %v1099_v35 = vpop.f32.mrf.mxu2 }
 0x10b   : > { %v11946_v42 = vadd.f32 %v1099_v35, %v888_v12  ;;  %v1612_v35 = vshrl.u32 %v11943_v22, 16 }
 0x10c   : > { %v937_v57 = vpop.f32.mrf.mxu3 }
 0x10d   : > { %v743_v47 = vpop.f32.mrf.mxu0  ;;  %v11952_v37 = vadd.f32 %v937_v57, %v11822_v8  ;;  %v11194_v8 = vld [vmem:[%s11655_s7 + $0x28] sm:$0xff] }
 0x10e   : > { %v891_v51 = vadd.f32 %v890_v24, %v743_v47  ;;  %v892_v53 = vpop.f32.mrf.mxu1  ;;  %v2335_v17 = vrot.slane %v11194_v8, 2 }
 0x10f   : > { %9975 = vmatmul.msk.bf16.gmra.mxu2 %vm644_vm0, %v2334_v45 }
 0x110   : > { %9847 = vmatmul.msk.bf16.gmra.mxu0 %vm644_vm0, %v1601_v50  ;;  %v2336_v61 = vsel %vm1956_vm3, %v2333_v39, %v2335_v17  ;;  %v1615_v39 = vshll.u32 %v11943_v22, 16 }
 0x111   : > { %9819 = vmatmul.msk.bf16.gmra.mxu3 %vm644_vm0, %v1336_v32 }
 0x112   : > { %v1102_v59 = vpop.f32.mrf.mxu2 }
 0x113   : > { %v11961_v62 = vadd.f32 %v1102_v59, %v891_v51  ;;  %v1614_v51 = vrot.slane %v1612_v35, 1  ;;  %v11995_v59 = vld [vmem:[%s11655_s7 + $0x38] sm:$0xff] }
 0x114   : > { %v940_v5 = vpop.f32.mrf.mxu3  ;;  %v1339_v6 = vrot.slane %v11995_v59, 1 }
 0x115   : > { %v745_v33 = vpop.f32.mrf.mxu0  ;;  %v11965_v10 = vadd.f32 %v940_v5, %v11837_v25 }
 0x116   : > { %v893_v2 = vadd.f32 %v892_v53, %v745_v33  ;;  %v895_v14 = vpop.f32.mrf.mxu1  ;;  %v1617_v53 = vrot.slane %v1615_v39, 2 }
 0x118   : > { %v1618_v22 = vor.u32 %v1617_v53, %v1614_v51 }
 0x119   : > { %9878 = vmatmul.msk.bf16.gmra.mxu1 %vm644_vm0, %v1963_v9 }
 0x11a   : > { %v1104_v0 = vpop.f32.mrf.mxu2 }
 0x11b   : > { %v11972_v49 = vadd.f32 %v1104_v0, %v893_v2 }
 0x11c   : > { %v942_v25 = vpop.f32.mrf.mxu3 }
 0x11d   : > { %v748_v27 = vpop.f32.mrf.mxu0  ;;  %v11978_v26 = vadd.f32 %v942_v25, %v11853_v46  ;;  %v11195_v46 = vld [vmem:[%s11655_s7 + $0x30] sm:$0xff] }
 0x11e   : > { %v896_v12 = vadd.f32 %v895_v14, %v748_v27  ;;  %v897_v24 = vpop.f32.mrf.mxu1  ;;  %v2337_v8 = vrot.slane %v11195_v46, 2  ;;  %v1619_v14 = vsel %vm1575_vm4, %v1609_v54, %v1618_v22  ;;  %v1621_v27 = vshrl.u32 %v11969_v16, 16 }
 0x11f   : > { %9976 = vmatmul.msk.bf16.gmra.mxu2 %vm644_vm0, %v2336_v61  ;;  %v1340_v61 = vsel %vm954_vm1, %v1337_v15, %v1339_v6  ;;  %v1966_v54 = vrot.slane %v11969_v16, 2 }
 0x120   : > { %9848 = vmatmul.msk.bf16.gmra.mxu0 %vm644_vm0, %v1610_v30  ;;  %v2338_v7 = vsel %vm1956_vm3, %v2335_v17, %v2337_v8  ;;  %v1624_v17 = vshll.u32 %v11969_v16, 16 }
 0x121   : > { %9820 = vmatmul.msk.bf16.gmra.mxu3 %vm644_vm0, %v1338_v36  ;;  %v1623_v36 = vrot.slane %v1621_v27, 1  ;;  %v1967_v46 = vsel %vm1956_vm3, %v1964_v3, %v1966_v54 }
 0x122   : > { %v1107_v45 = vpop.f32.mrf.mxu2  ;;  %v1626_v35 = vrot.slane %v1624_v17, 2 }
 0x123   : > { %v11987_v47 = vadd.f32 %v1107_v45, %v896_v12 }
 0x124   : > { %v1137_v50 = vpop.f32.mrf.mxu3  ;;  %v1627_v16 = vor.u32 %v1626_v35, %v1623_v36  ;;  %v12047_v36 = vld [vmem:[%s11655_s7 + $0x48] sm:$0xff] }
 0x125   : > { %v750_v57 = vpop.f32.mrf.mxu0  ;;  %v11991_v32 = vadd.f32 %v1137_v50, %v11872_v1 }
 0x126   : > { %v898_v43 = vadd.f32 %v897_v24, %v750_v57  ;;  %v900_v55 = vpop.f32.mrf.mxu1  ;;  %v12021_v57 = vld [vmem:[%s11655_s7 + $0x40] sm:$0xff] }
 0x129   : > { %9879 = vmatmul.msk.bf16.gmra.mxu1 %vm644_vm0, %v1965_v58 }
 0x12a   : > { %v1109_v33 = vpop.f32.mrf.mxu2 }
 0x12b   : > { %v11998_v5 = vadd.f32 %v1109_v33, %v898_v43  ;;  %v1341_v43 = vrot.slane %v12021_v57, 1  ;;  %v1628_v33 = vsel %vm1575_vm4, %v1618_v22, %v1627_v16  ;;  %v1968_v22 = vrot.slane %v11995_v59, 2 }
 0x12c   : > { %v1139_v1 = vpop.f32.mrf.mxu3 }
 0x12d   : > { %v753_v2 = vpop.f32.mrf.mxu0  ;;  %v12004_v60 = vadd.f32 %v1139_v1, %v11892_v23  ;;  %v11196_v23 = vld [vmem:[%s11655_s7 + $0x38] sm:$0xff]  ;;  %v1342_v1 = vsel %vm954_vm1, %v1339_v6, %v1341_v43 }
 0x12e   : > { %v901_v9 = vadd.f32 %v900_v55, %v753_v2  ;;  %v902_v0 = vpop.f32.mrf.mxu1  ;;  %v2339_v50 = vrot.slane %v11196_v23, 2 }
 0x12f   : > { %9977 = vmatmul.msk.bf16.gmra.mxu2 %vm644_vm0, %v2338_v7 }
 0x130   : > { %9849 = vmatmul.msk.bf16.gmra.mxu0 %vm644_vm0, %v1619_v14  ;;  %v2340_v55 = vsel %vm1956_vm3, %v2337_v8, %v2339_v50  ;;  %v1630_v14 = vshrl.u32 %v11995_v59, 16  ;;  %v1633_v8 = vshll.u32 %v11995_v59, 16 }
 0x131   : > { %9821 = vmatmul.msk.bf16.gmra.mxu3 %vm644_vm0, %v1340_v61 }
 0x132   : > { %v1112_v25 = vpop.f32.mrf.mxu2  ;;  %v1632_v17 = vrot.slane %v1630_v14, 1 }
 0x133   : > { %v12013_v30 = vadd.f32 %v1112_v25, %v901_v9  ;;  %v1635_v25 = vrot.slane %v1633_v8, 2 }
 0x134   : > { %v1142_v24 = vpop.f32.mrf.mxu3 }
 0x135   : > { %v755_v12 = vpop.f32.mrf.mxu0  ;;  %v12017_v39 = vadd.f32 %v1142_v24, %v11912_v52  ;;  %v1969_v24 = vsel %vm1956_vm3, %v1966_v54, %v1968_v22  ;;  %v1636_v59 = vor.u32 %v1635_v25, %v1632_v17 }
 0x136   : > { %v903_v15 = vadd.f32 %v902_v0, %v755_v12  ;;  %v905_v45 = vpop.f32.mrf.mxu1 }
 0x139   : > { %9880 = vmatmul.msk.bf16.gmra.mxu1 %vm644_vm0, %v1967_v46  ;;  %v1343_v46 = vrot.slane %v12047_v36, 1 }
 0x13a   : > { %v1114_v51 = vpop.f32.mrf.mxu2 }
 0x13b   : > { %v12024_v53 = vadd.f32 %v1114_v51, %v903_v15 }
 0x13c   : > { %v1144_v52 = vpop.f32.mrf.mxu3 }
 0x13d   : > { %v758_v58 = vpop.f32.mrf.mxu0  ;;  %v12030_v3 = vadd.f32 %v1144_v52, %v11926_v13  ;;  %v11197_v13 = vld [vmem:[%s11655_s7 + $0x40] sm:$0xff] }
 0x13e   : > { %v906_v7 = vadd.f32 %v905_v45, %v758_v58  ;;  %v907_v2 = vpop.f32.mrf.mxu1  ;;  %v2341_v35 = vrot.slane %v11197_v13, 2  ;;  %v1637_v58 = vsel %vm1575_vm4, %v1627_v16, %v1636_v59  ;;  %v1970_v16 = vrot.slane %v12021_v57, 2 }
 0x13f   : > { %9978 = vmatmul.msk.bf16.gmra.mxu2 %vm644_vm0, %v2340_v55 }
 0x140   : > { %9850 = vmatmul.msk.bf16.gmra.mxu0 %vm644_vm0, %v1628_v33  ;;  %v2342_v51 = vsel %vm1956_vm3, %v2339_v50, %v2341_v35  ;;  %v1642_v50 = vshll.u32 %v12021_v57, 16  ;;  %v1971_v25 = vsel %vm1956_vm3, %v1968_v22, %v1970_v16 }
 0x141   : > { %9822 = vmatmul.msk.bf16.gmra.mxu3 %vm644_vm0, %v1342_v1 }
 0x142   : > { %v1117_v9 = vpop.f32.mrf.mxu2 }
 0x143   : > { %v12039_v0 = vadd.f32 %v1117_v9, %v906_v7  ;;  %v1344_v7 = vsel %vm954_vm1, %v1341_v43, %v1343_v46 }
 0x144   : > { %v1147_v27 = vpop.f32.mrf.mxu3 }
 0x145   : > { %v760_v61 = vpop.f32.mrf.mxu0  ;;  %v12043_v23 = vadd.f32 %v1147_v27, %v11939_v31 }
 0x146   : > { %v908_v6 = vadd.f32 %v907_v2, %v760_v61  ;;  %v910_v12 = vpop.f32.mrf.mxu1  ;;  %v1639_v2 = vshrl.u32 %v12021_v57, 16  ;;  %v1644_v61 = vrot.slane %v1642_v50, 2 }
 0x148   : > { %v1641_v13 = vrot.slane %v1639_v2, 1  ;;  %v1648_v2 = vshrl.u32 %v12047_v36, 16 }
 0x149   : > { %9881 = vmatmul.msk.bf16.gmra.mxu1 %vm644_vm0, %v1969_v24 }
 0x14a   : > { %v1119_v15 = vpop.f32.mrf.mxu2  ;;  %v1645_v57 = vor.u32 %v1644_v61, %v1641_v13 }
 0x14b   : > { %v12050_v45 = vadd.f32 %v1119_v15, %v908_v6  ;;  %v12073_v6 = vld [vmem:[%s11655_s7 + $0x50] sm:$0xff] }
 0x14c   : > { %v1149_v31 = vpop.f32.mrf.mxu3 }
 0x14d   : > { %v763_v55 = vpop.f32.mrf.mxu0  ;;  %v12056_v54 = vadd.f32 %v1149_v31, %v11952_v37  ;;  %v11198_v37 = vld [vmem:[%s11655_s7 + $0x48] sm:$0xff] }
 0x14e   : > { %v911_v52 = vadd.f32 %v910_v12, %v763_v55  ;;  %v912_v33 = vpop.f32.mrf.mxu1  ;;  %v2343_v12 = vrot.slane %v11198_v37, 2 }
 0x14f   : > { %9979 = vmatmul.msk.bf16.gmra.mxu2 %vm644_vm0, %v2342_v51  ;;  %v1345_v51 = vrot.slane %v12073_v6, 1 }
 0x150   : > { %9851 = vmatmul.msk.bf16.gmra.mxu0 %vm644_vm0, %v1637_v58  ;;  %v2344_v55 = vsel %vm1956_vm3, %v2341_v35, %v2343_v12  ;;  %v1646_v58 = vsel %vm1575_vm4, %v1636_v59, %v1645_v57  ;;  %v1651_v35 = vshll.u32 %v12047_v36, 16  ;;  %v1972_v59 = vrot.slane %v12047_v36, 2 }
 0x151   : > { %9823 = vmatmul.msk.bf16.gmra.mxu3 %vm644_vm0, %v1344_v7  ;;  %v1346_v7 = vsel %vm954_vm1, %v1343_v46, %v1345_v51 }
 0x152   : > { %v1122_v1 = vpop.f32.mrf.mxu2  ;;  %v1653_v13 = vrot.slane %v1651_v35, 2 }
 0x153   : > { %v12065_v14 = vadd.f32 %v1122_v1, %v911_v52 }
 0x154   : > { %v1152_v9 = vpop.f32.mrf.mxu3 }
 0x155   : > { %v765_v8 = vpop.f32.mrf.mxu0  ;;  %v12069_v27 = vadd.f32 %v1152_v9, %v11965_v10  ;;  %v1650_v9 = vrot.slane %v1648_v2, 1 }
 0x156   : > { %v913_v43 = vadd.f32 %v912_v33, %v765_v8  ;;  %v915_v17 = vpop.f32.mrf.mxu1 }
 0x159   : > { %9882 = vmatmul.msk.bf16.gmra.mxu1 %vm644_vm0, %v1971_v25  ;;  %v11211_v25 = vld [vmem:[%s14731_s3 + $0x70] sm:$0xff] }
 0x15a   : > { %v1124_v24 = vpop.f32.mrf.mxu2  ;;  %2821 = vmatpush.bf16.msra.mxu3 %v11211_v25 }
 0x15b   : > { %v12076_v15 = vadd.f32 %v1124_v24, %v913_v43  ;;  %v12100_v24 = vld [vmem:[%s11655_s7 + $0x58] sm:$0xff] }
 0x15c   : > { %v1154_v10 = vpop.f32.mrf.mxu3 }
 0x15d   : > { %v768_v31 = vpop.f32.mrf.mxu0  ;;  %v12082_v22 = vadd.f32 %v1154_v10, %v11978_v26  ;;  %v11199_v26 = vld [vmem:[%s11655_s7 + $0x50] sm:$0xff] }
 0x15e   : > { %v916_v52 = vadd.f32 %v915_v17, %v768_v31  ;;  %v917_v33 = vpop.f32.mrf.mxu1  ;;  %v1973_v17 = vsel %vm1956_vm3, %v1970_v16, %v1972_v59  ;;  %v2345_v36 = vrot.slane %v11199_v26, 2  ;;  %v11252_v26 = vld [vmem:[%s14731_s3 + $0xa0] sm:$0xff] }
 0x15f   : > { %9980 = vmatmul.msk.bf16.gmra.mxu2 %vm644_vm0, %v2344_v55  ;;  %v1654_v55 = vor.u32 %v1653_v13, %v1650_v9  ;;  %v11233_v9 = vld [vmem:[%s14731_s3 + $0x90] sm:$0xff]  ;;  %v11200_v13 = vld [vmem:[%s11655_s7 + $0x58] sm:$0xff] }
 0x160   : > { %9852 = vmatmul.msk.bf16.gmra.mxu0 %vm644_vm0, %v1646_v58  ;;  %v1347_v58 = vrot.slane %v12100_v24, 1  ;;  %3885 = vmatpush.bf16.msra.mxu2 %v11252_v26 }
 0x161   : > { %9824 = vmatmul.msk.bf16.gmra.mxu3 %vm644_vm0, %v1346_v7  ;;  %3401 = vmatpush.bf16.msra.mxu1 %v11233_v9 }
 0x162   : > { %v1127_v50 = vpop.f32.mrf.mxu2 }
 0x163   : > { %v12091_v1 = vadd.f32 %v1127_v50, %v916_v52  ;;  %v1348_v50 = vsel %vm954_vm1, %v1345_v51, %v1347_v58  ;;  %v1974_v51 = vrot.slane %v12073_v6, 2 }
 0x164   : > { %v1440_v8 = vpop.f32.mrf.mxu3 }
 0x165   : > { %v770_v37 = vpop.f32.mrf.mxu0  ;;  %v1530_v61 = vadd.f32 %v1440_v8, %v11776_v19  ;;  %v2346_v19 = vsel %vm1956_vm3, %v2343_v12, %v2345_v36  ;;  %v11213_v12 = vld [vmem:[%s14731_s3 + $0x80] sm:$0xff] }
 0x166   : > { %v918_v46 = vadd.f32 %v917_v33, %v770_v37  ;;  %v920_v43 = vpop.f32.mrf.mxu1  ;;  %v1655_v33 = vsel %vm1575_vm4, %v1645_v57, %v1654_v55  ;;  %v1657_v57 = vshrl.u32 %v12073_v6, 16  ;;  %3069 = vmatpush.bf16.msra.mxu0 %v11213_v12 }
 0x169   : > { %9883 = vmatmul.msk.bf16.gmra.mxu1 %vm644_vm0, %v1973_v17  ;;  %v1659_v17 = vrot.slane %v1657_v57, 1 }
 0x16a   : > { %v1129_v31 = vpop.f32.mrf.mxu2 }
 0x16b   : > { %v12103_v10 = vadd.f32 %v1129_v31, %v918_v46 }
 0x16c   : > { %v1442_v16 = vpop.f32.mrf.mxu3 }
 0x16d   : > { %v773_v52 = vpop.f32.mrf.mxu0  ;;  %v1531_v2 = vadd.f32 %v1442_v16, %v11781_v20  ;;  %v1660_v20 = vshll.u32 %v12073_v6, 16  ;;  %v1975_v16 = vsel %vm1956_vm3, %v1972_v59, %v1974_v51  ;;  %v12131_v6 = vld [vmem:[%s11655_s7 + $0x60] sm:$0xff] }
 0x16e   : > { %v921_v7 = vadd.f32 %v920_v43, %v773_v52  ;;  %v922_v35 = vpop.f32.mrf.mxu1  ;;  %v1349_v12 = vrot.slane %v12131_v6, 1 }
 0x16f   : > { %9981 = vmatmul.msk.bf16.gmra.mxu2 %vm644_vm0, %v2346_v19  ;;  %v1662_v25 = vrot.slane %v1660_v20, 2 }
 0x170   : > { %9853 = vmatmul.msk.bf16.gmra.mxu0 %vm644_vm0, %v1655_v33  ;;  %v2347_v33 = vrot.slane %v11200_v13, 2  ;;  %v1350_v13 = vsel %vm954_vm1, %v1347_v58, %v1349_v12 }
 0x171   : > { %9825 = vmatmul.msk.bf16.gmra.mxu3 %vm644_vm0, %v1348_v50 }
 0x172   : > { %v1132_v37 = vpop.f32.mrf.mxu2  ;;  %v2348_v57 = vsel %vm1956_vm3, %v2345_v36, %v2347_v33  ;;  %v1669_v36 = vshll.u32 %v12100_v24, 16 }
 0x173   : > { %v12122_v8 = vadd.f32 %v1132_v37, %v921_v7  ;;  %v1663_v7 = vor.u32 %v1662_v25, %v1659_v17 }
 0x174   : > { %v1445_v43 = vpop.f32.mrf.mxu3  ;;  %v1671_v58 = vrot.slane %v1669_v36, 2 }
 0x175   : > { %v775_v46 = vpop.f32.mrf.mxu0  ;;  %v1532_v19 = vadd.f32 %v1445_v43, %v11793_v34  ;;  %v1664_v34 = vsel %vm1575_vm4, %v1654_v55, %v1663_v7  ;;  %v1666_v43 = vshrl.u32 %v12100_v24, 16  ;;  %v1976_v55 = vrot.slane %v12100_v24, 2 }
 0x176   : > { %v923_v31 = vadd.f32 %v922_v35, %v775_v46  ;;  %v2069_v52 = vpop.f32.mrf.mxu1 }
 0x179   : > { %9884 = vmatmul.msk.bf16.gmra.mxu1 %vm644_vm0, %v1975_v16  ;;  %v1668_v16 = vrot.slane %v1666_v43, 1 }
 0x17a   : > { %v1134_v50 = vpop.f32.mrf.mxu2 }
 0x17b   : > { %v12134_v26 = vadd.f32 %v1134_v50, %v923_v31  ;;  %v1672_v24 = vor.u32 %v1671_v58, %v1668_v16  ;;  %v1675_v16 = vshrl.u32 %v12131_v6, 16 }
 0x17c   : > { %v1447_v20 = vpop.f32.mrf.mxu3 }
 0x17d   : > { %v1821_v35 = vpop.f32.mrf.mxu0  ;;  %v1533_v59 = vadd.f32 %v1447_v20, %v11801_v44  ;;  %v1977_v20 = vsel %vm1956_vm3, %v1974_v51, %v1976_v55 }
 0x17e   : > { %v1911_v37 = vadd.f32 %v1821_v35, %v1530_v61  ;;  %v2071_v9 = vpop.f32.mrf.mxu1  ;;  %v11201_v61 = vld [vmem:[%s11655_s7 + $0x60] sm:$0xff]  ;;  %v12153_v35 = vld [vmem:[%s11655_s7 + $0x68] sm:$0xff] }
 0x17f   : > { %9982 = vmatmul.msk.bf16.gmra.mxu2 %vm644_vm0, %v2348_v57 }
 0x180   : > { %9854 = vmatmul.msk.bf16.gmra.mxu0 %vm644_vm0, %v1664_v34  ;;  %v2159_v46 = vadd.f32 %v2069_v52, %v1911_v37  ;;  %v2349_v37 = vrot.slane %v11201_v61, 2 }
 0x181   : > { %9826 = vmatmul.msk.bf16.gmra.mxu3 %vm644_vm0, %v1350_v13 }
 0x182   : > { %v2442_v17 = vpop.f32.mrf.mxu2  ;;  %v2350_v43 = vsel %vm1956_vm3, %v2347_v33, %v2349_v37  ;;  %v1678_v33 = vshll.u32 %v12131_v6, 16 }
 0x183   : > { %v12147_v44 = vadd.f32 %v2442_v17, %v2159_v46  ;;  %v1351_v17 = vrot.slane %v12153_v35, 1 }
 0x184   : > { %v1450_v25 = vpop.f32.mrf.mxu3 }
 0x185   : > { %v1823_v31 = vpop.f32.mrf.mxu0  ;;  %v1534_v50 = vadd.f32 %v1450_v25, %v11813_v48  ;;  %v1352_v61 = vsel %vm954_vm1, %v1349_v12, %v1351_v17  ;;  %v1680_v12 = vrot.slane %v1678_v33, 2 }
 0x186   : > { %v1912_v52 = vadd.f32 %v1823_v31, %v1531_v2  ;;  %v2074_v57 = vpop.f32.mrf.mxu1  ;;  %v1673_v2 = vsel %vm1575_vm4, %v1663_v7, %v1672_v24  ;;  %v1978_v7 = vrot.slane %v12131_v6, 2 }
 0x188   : > { %v2160_v34 = vadd.f32 %v2071_v9, %v1912_v52 }
 0x189   : > { %9885 = vmatmul.msk.bf16.gmra.mxu1 %vm644_vm0, %v1977_v20 }
 0x18a   : > { %v2444_v13 = vpop.f32.mrf.mxu2 }
 0x18b   : > { %v12156_v46 = vadd.f32 %v2444_v13, %v2160_v34  ;;  %v1677_v34 = vrot.slane %v1675_v16, 1 }
 0x18c   : > { %v1452_v36 = vpop.f32.mrf.mxu3 }
 0x18d   : > { %v1826_v48 = vpop.f32.mrf.mxu0  ;;  %v1535_v51 = vadd.f32 %v1452_v36, %v11818_v4  ;;  %v1979_v36 = vsel %vm1956_vm3, %v1976_v55, %v1978_v7  ;;  %v1681_v6 = vor.u32 %v1680_v12, %v1677_v34  ;;  %v1684_v34 = vshrl.u32 %v12153_v35, 16 }
 0x18e   : > { %v1913_v25 = vadd.f32 %v1826_v48, %v1532_v19  ;;  %v2076_v9 = vpop.f32.mrf.mxu1  ;;  %v11202_v19 = vld [vmem:[%s11655_s7 + $0x68] sm:$0xff]  ;;  %v12175_v48 = vld [vmem:[%s11655_s7 + $0x70] sm:$0xff] }
 0x18f   : > { %9983 = vmatmul.msk.bf16.gmra.mxu2 %vm644_vm0, %v2350_v43 }
 0x190   : > { %9855 = vmatmul.msk.bf16.gmra.mxu0 %vm644_vm0, %v1673_v2  ;;  %v2161_v31 = vadd.f32 %v2074_v57, %v1913_v25  ;;  %v2351_v25 = vrot.slane %v11202_v19, 2 }
 0x191   : > { %9827 = vmatmul.msk.bf16.gmra.mxu3 %vm644_vm0, %v1352_v61 }
 0x192   : > { %v2447_v58 = vpop.f32.mrf.mxu2  ;;  %v2352_v16 = vsel %vm1956_vm3, %v2349_v37, %v2351_v25  ;;  %v1687_v37 = vshll.u32 %v12153_v35, 16 }
 0x193   : > { %v12169_v4 = vadd.f32 %v2447_v58, %v2161_v31  ;;  %v1353_v58 = vrot.slane %v12175_v48, 1 }
 0x194   : > { %v1455_v52 = vpop.f32.mrf.mxu3 }
 0x195   : > { %v1828_v20 = vpop.f32.mrf.mxu0  ;;  %v1536_v13 = vadd.f32 %v1455_v52, %v11834_v18  ;;  %v1354_v19 = vsel %vm954_vm1, %v1351_v17, %v1353_v58  ;;  %v1689_v17 = vrot.slane %v1687_v37, 2 }
 0x196   : > { %v1914_v57 = vadd.f32 %v1828_v20, %v1533_v59  ;;  %v2079_v43 = vpop.f32.mrf.mxu1  ;;  %v1682_v59 = vsel %vm1575_vm4, %v1672_v24, %v1681_v6  ;;  %v1980_v24 = vrot.slane %v12153_v35, 2 }
 0x198   : > { %v2162_v2 = vadd.f32 %v2076_v9, %v1914_v57 }
 0x199   : > { %9886 = vmatmul.msk.bf16.gmra.mxu1 %vm644_vm0, %v1979_v36 }
 0x19a   : > { %v2449_v61 = vpop.f32.mrf.mxu2 }
 0x19b   : > { %v12178_v31 = vadd.f32 %v2449_v61, %v2162_v2  ;;  %v1686_v2 = vrot.slane %v1684_v34, 1 }
 0x19c   : > { %v1457_v33 = vpop.f32.mrf.mxu3 }
 0x19d   : > { %v1831_v18 = vpop.f32.mrf.mxu0  ;;  %v1537_v55 = vadd.f32 %v1457_v33, %v11848_v40  ;;  %v1981_v33 = vsel %vm1956_vm3, %v1978_v7, %v1980_v24  ;;  %v1690_v35 = vor.u32 %v1689_v17, %v1686_v2  ;;  %v1693_v2 = vshrl.u32 %v12175_v48, 16 }
 0x19e   : > { %v1915_v52 = vadd.f32 %v1831_v18, %v1534_v50  ;;  %v2081_v9 = vpop.f32.mrf.mxu1  ;;  %v11203_v50 = vld [vmem:[%s11655_s7 + $0x70] sm:$0xff]  ;;  %v12197_v18 = vld [vmem:[%s11655_s7 + $0x78] sm:$0xff] }
 0x19f   : > { %9984 = vmatmul.msk.bf16.gmra.mxu2 %vm644_vm0, %v2352_v16 }
 0x1a0   : > { %9856 = vmatmul.msk.bf16.gmra.mxu0 %vm644_vm0, %v1682_v59  ;;  %v2163_v20 = vadd.f32 %v2079_v43, %v1915_v52  ;;  %v2353_v52 = vrot.slane %v11203_v50, 2 }
 0x1a1   : > { %9828 = vmatmul.msk.bf16.gmra.mxu3 %vm644_vm0, %v1354_v19 }
 0x1a2   : > { %v2452_v12 = vpop.f32.mrf.mxu2  ;;  %v2354_v34 = vsel %vm1956_vm3, %v2351_v25, %v2353_v52  ;;  %v1696_v25 = vshll.u32 %v12175_v48, 16 }
 0x1a3   : > { %v12191_v40 = vadd.f32 %v2452_v12, %v2163_v20  ;;  %v1355_v12 = vrot.slane %v12197_v18, 1 }
 0x1a4   : > { %v1460_v57 = vpop.f32.mrf.mxu3 }
 0x1a5   : > { %v1833_v36 = vpop.f32.mrf.mxu0  ;;  %v1538_v61 = vadd.f32 %v1460_v57, %v11866_v56  ;;  %v1356_v50 = vsel %vm954_vm1, %v1353_v58, %v1355_v12  ;;  %v1698_v58 = vrot.slane %v1696_v25, 2 }
 0x1a6   : > { %v1916_v43 = vadd.f32 %v1833_v36, %v1535_v51  ;;  %v2084_v16 = vpop.f32.mrf.mxu1  ;;  %v1691_v51 = vsel %vm1575_vm4, %v1681_v6, %v1690_v35  ;;  %v1982_v6 = vrot.slane %v12175_v48, 2 }
 0x1a8   : > { %v2164_v59 = vadd.f32 %v2081_v9, %v1916_v43 }
 0x1a9   : > { %9887 = vmatmul.msk.bf16.gmra.mxu1 %vm644_vm0, %v1981_v33 }
 0x1aa   : > { %v2454_v19 = vpop.f32.mrf.mxu2 }
 0x1ab   : > { %v12200_v20 = vadd.f32 %v2454_v19, %v2164_v59  ;;  %v1695_v59 = vrot.slane %v1693_v2, 1 }
 0x1ac   : > { %v1462_v37 = vpop.f32.mrf.mxu3 }
 0x1ad   : > { %v1836_v56 = vpop.f32.mrf.mxu0  ;;  %v1539_v7 = vadd.f32 %v1462_v37, %v11879_v11  ;;  %v1983_v37 = vsel %vm1956_vm3, %v1980_v24, %v1982_v6  ;;  %v1699_v48 = vor.u32 %v1698_v58, %v1695_v59  ;;  %v1702_v59 = vshrl.u32 %v12197_v18, 16 }
 0x1ae   : > { %v1917_v57 = vadd.f32 %v1836_v56, %v1536_v13  ;;  %v2086_v9 = vpop.f32.mrf.mxu1  ;;  %v11204_v13 = vld [vmem:[%s11655_s7 + $0x78] sm:$0xff]  ;;  %v12219_v56 = vld [vmem:[%s11655_s7 + $0x80] sm:$0xff] }
 0x1af   : > { %9985 = vmatmul.msk.bf16.gmra.mxu2 %vm644_vm0, %v2354_v34 }
 0x1b0   : > { %9857 = vmatmul.msk.bf16.gmra.mxu0 %vm644_vm0, %v1691_v51  ;;  %v2165_v36 = vadd.f32 %v2084_v16, %v1917_v57  ;;  %v2355_v57 = vrot.slane %v11204_v13, 2 }
 0x1b1   : > { %9829 = vmatmul.msk.bf16.gmra.mxu3 %vm644_vm0, %v1356_v50 }
 0x1b2   : > { %v2457_v17 = vpop.f32.mrf.mxu2  ;;  %v2356_v2 = vsel %vm1956_vm3, %v2353_v52, %v2355_v57  ;;  %v1705_v52 = vshll.u32 %v12197_v18, 16 }
 0x1b3   : > { %v12213_v11 = vadd.f32 %v2457_v17, %v2165_v36  ;;  %v1357_v17 = vrot.slane %v12219_v56, 1 }
 0x1b4   : > { %v1465_v43 = vpop.f32.mrf.mxu3 }
 0x1b5   : > { %v1838_v33 = vpop.f32.mrf.mxu0  ;;  %v1540_v19 = vadd.f32 %v1465_v43, %v11904_v38  ;;  %v1358_v13 = vsel %vm954_vm1, %v1355_v12, %v1357_v17  ;;  %v1707_v12 = vrot.slane %v1705_v52, 2 }
 0x1b6   : > { %v1918_v16 = vadd.f32 %v1838_v33, %v1537_v55  ;;  %v2089_v34 = vpop.f32.mrf.mxu1  ;;  %v1700_v55 = vsel %vm1575_vm4, %v1690_v35, %v1699_v48  ;;  %v1984_v35 = vrot.slane %v12197_v18, 2 }
 0x1b8   : > { %v2166_v51 = vadd.f32 %v2086_v9, %v1918_v16 }
 0x1b9   : > { %9888 = vmatmul.msk.bf16.gmra.mxu1 %vm644_vm0, %v1983_v37 }
 0x1ba   : > { %v2459_v50 = vpop.f32.mrf.mxu2 }
 0x1bb   : > { %v12222_v36 = vadd.f32 %v2459_v50, %v2166_v51  ;;  %v1704_v51 = vrot.slane %v1702_v59, 1 }
 0x1bc   : > { %v1467_v25 = vpop.f32.mrf.mxu3 }
 0x1bd   : > { %v1841_v38 = vpop.f32.mrf.mxu0  ;;  %v1541_v24 = vadd.f32 %v1467_v25, %v11920_v63  ;;  %v1985_v25 = vsel %vm1956_vm3, %v1982_v6, %v1984_v35  ;;  %v1708_v18 = vor.u32 %v1707_v12, %v1704_v51  ;;  %v1711_v51 = vshrl.u32 %v12219_v56, 16 }
 0x1be   : > { %v1919_v43 = vadd.f32 %v1841_v38, %v1538_v61  ;;  %v2091_v9 = vpop.f32.mrf.mxu1  ;;  %v11205_v61 = vld [vmem:[%s11655_s7 + $0x80] sm:$0xff]  ;;  %v12241_v38 = vld [vmem:[%s11655_s7 + $0x88] sm:$0xff] }
 0x1bf   : > { %9986 = vmatmul.msk.bf16.gmra.mxu2 %vm644_vm0, %v2356_v2 }
 0x1c0   : > { %9858 = vmatmul.msk.bf16.gmra.mxu0 %vm644_vm0, %v1700_v55  ;;  %v2167_v33 = vadd.f32 %v2089_v34, %v1919_v43  ;;  %v2357_v43 = vrot.slane %v11205_v61, 2 }
 0x1c1   : > { %9830 = vmatmul.msk.bf16.gmra.mxu3 %vm644_vm0, %v1358_v13 }
 0x1c2   : > { %v2462_v58 = vpop.f32.mrf.mxu2  ;;  %v2358_v59 = vsel %vm1956_vm3, %v2355_v57, %v2357_v43  ;;  %v1714_v57 = vshll.u32 %v12219_v56, 16 }
 0x1c3   : > { %v12235_v63 = vadd.f32 %v2462_v58, %v2167_v33  ;;  %v1359_v58 = vrot.slane %v12241_v38, 1 }
 0x1c4   : > { %v1470_v16 = vpop.f32.mrf.mxu3 }
 0x1c5   : > { %v1843_v37 = vpop.f32.mrf.mxu0  ;;  %v1542_v50 = vadd.f32 %v1470_v16, %v11935_v28  ;;  %v1360_v61 = vsel %vm954_vm1, %v1357_v17, %v1359_v58  ;;  %v1716_v17 = vrot.slane %v1714_v57, 2 }
 0x1c6   : > { %v1920_v34 = vadd.f32 %v1843_v37, %v1539_v7  ;;  %v2094_v2 = vpop.f32.mrf.mxu1  ;;  %v1709_v7 = vsel %vm1575_vm4, %v1699_v48, %v1708_v18  ;;  %v1986_v48 = vrot.slane %v12219_v56, 2 }
 0x1c8   : > { %v2168_v55 = vadd.f32 %v2091_v9, %v1920_v34 }
 0x1c9   : > { %9889 = vmatmul.msk.bf16.gmra.mxu1 %vm644_vm0, %v1985_v25 }
 0x1ca   : > { %v2464_v13 = vpop.f32.mrf.mxu2 }
 0x1cb   : > { %v12244_v33 = vadd.f32 %v2464_v13, %v2168_v55  ;;  %v1713_v55 = vrot.slane %v1711_v51, 1 }
 0x1cc   : > { %v1472_v52 = vpop.f32.mrf.mxu3 }
 0x1cd   : > { %v1846_v28 = vpop.f32.mrf.mxu0  ;;  %v1543_v6 = vadd.f32 %v1472_v52, %v11946_v42  ;;  %v1987_v52 = vsel %vm1956_vm3, %v1984_v35, %v1986_v48  ;;  %v1717_v56 = vor.u32 %v1716_v17, %v1713_v55  ;;  %v1229_v55 = vld [vmem:[%s11655_s7 + $0x98] sm:$0x1]  ;;  %v1720_v17 = vshrl.u32 %v12241_v38, 16 }
 0x1ce   : > { %v1921_v16 = vadd.f32 %v1846_v28, %v1540_v19  ;;  %v2096_v9 = vpop.f32.mrf.mxu1  ;;  %v11206_v19 = vld [vmem:[%s11655_s7 + $0x88] sm:$0xff]  ;;  %v12263_v28 = vld [vmem:[%s11655_s7 + $0x90] sm:$0xff] }
 0x1cf   : > { %9987 = vmatmul.msk.bf16.gmra.mxu2 %vm644_vm0, %v2358_v59  ;;  %v1361_v51 = vrot.slane %v12263_v28, 1 }
 0x1d0   : > { %9859 = vmatmul.msk.bf16.gmra.mxu0 %vm644_vm0, %v1709_v7  ;;  %v2169_v37 = vadd.f32 %v2094_v2, %v1921_v16  ;;  %v2359_v16 = vrot.slane %v11206_v19, 2 }
 0x1d1   : > { %9831 = vmatmul.msk.bf16.gmra.mxu3 %vm644_vm0, %v1360_v61 }
 0x1d2   : > { %v2467_v12 = vpop.f32.mrf.mxu2  ;;  %v2360_v57 = vsel %vm1956_vm3, %v2357_v43, %v2359_v16  ;;  %v1723_v43 = vshll.u32 %v12241_v38, 16 }
 0x1d3   : > { %v12257_v42 = vadd.f32 %v2467_v12, %v2169_v37  ;;  %v1718_v12 = vsel %vm1575_vm4, %v1708_v18, %v1717_v56  ;;  %v1988_v18 = vrot.slane %v12241_v38, 2 }
 0x1d4   : > { %v1475_v34 = vpop.f32.mrf.mxu3 }
 0x1d5   : > { %v1848_v25 = vpop.f32.mrf.mxu0  ;;  %v1544_v13 = vadd.f32 %v1475_v34, %v11961_v62  ;;  %v1362_v34 = vsel %vm954_vm1, %v1359_v58, %v1361_v51 }
 0x1d6   : > { %v1922_v2 = vadd.f32 %v1848_v25, %v1541_v24  ;;  %v2099_v59 = vpop.f32.mrf.mxu1 }
 0x1d8   : > { %v2170_v7 = vadd.f32 %v2096_v9, %v1922_v2 }
 0x1d9   : > { %9890 = vmatmul.msk.bf16.gmra.mxu1 %vm644_vm0, %v1987_v52  ;;  %v12283_v52 = vld [vmem:[%s11655_s7 + $0x90] sm:$0xff] }
 0x1da   : > { %v2469_v61 = vpop.f32.mrf.mxu2  ;;  %v2361_v38 = vrot.slane %v12283_v52, 2 }
 0x1db   : > { %v12266_v37 = vadd.f32 %v2469_v61, %v2170_v7  ;;  %v1722_v61 = vrot.slane %v1720_v17, 1 }
 0x1dc   : > { %v1477_v62 = vpop.f32.mrf.mxu3  ;;  %v2362_v17 = vsel %vm1956_vm3, %v2359_v16, %v2361_v38  ;;  %v1729_v16 = vshrl.u32 %v12263_v28, 16 }
 0x1dd   : > { %v1851_v24 = vpop.f32.mrf.mxu0  ;;  %v1545_v35 = vadd.f32 %v1477_v62, %v11972_v49 }
 0x1de   : > { %v1923_v9 = vadd.f32 %v1851_v24, %v1542_v50  ;;  %v2101_v19 = vpop.f32.mrf.mxu1  ;;  %v1308_v50 = vunpack.c.l.b16 %v1229_v55 }
 0x1df   : > { %9988 = vmatmul.msk.bf16.gmra.mxu2 %vm644_vm0, %v2360_v57  ;;  %v1725_v57 = vrot.slane %v1723_v43, 2 }
 0x1e0   : > { %9860 = vmatmul.msk.bf16.gmra.mxu0 %vm644_vm0, %v1718_v12  ;;  %v2171_v25 = vadd.f32 %v2099_v59, %v1923_v9  ;;  %v1989_v12 = vsel %vm1956_vm3, %v1986_v48, %v1988_v18  ;;  %v1327_v9 = vpack.c.b16 %v1308_v50, %v1308_v50 }
 0x1e1   : > { %9832 = vmatmul.msk.bf16.gmra.mxu3 %vm644_vm0, %v1362_v34 }
 0x1e2   : > { %v2472_v2 = vpop.f32.mrf.mxu2  ;;  %v1363_v29 = vrot.slane %v1327_v9, 1 }
 0x1e3   : > { %v12280_v49 = vadd.f32 %v2472_v2, %v2171_v25  ;;  %v1726_v25 = vor.u32 %v1725_v57, %v1722_v61  ;;  %v2582_v57 = vshll.u32 %v11909_v41, 16 }
 0x1e4   : > { %v1480_v7 = vpop.f32.mrf.mxu3  ;;  %v1364_v52 = vsel %vm954_vm1, %v1361_v51, %v1363_v29 }
 0x1e5   : > { %v1853_v58 = vpop.f32.mrf.mxu0  ;;  %v12286_v59 = vadd.f32 %v1480_v7, %v11987_v47 }
 0x1e6   : > { %v1924_v62 = vadd.f32 %v1853_v58, %v1543_v6  ;;  %v2104_v24 = vpop.f32.mrf.mxu1  ;;  %v1727_v6 = vsel %vm1575_vm4, %v1717_v56, %v1726_v25  ;;  %v1732_v58 = vshll.u32 %v12263_v28, 16 }
 0x1e8   : > { %v2172_v34 = vadd.f32 %v2101_v19, %v1924_v62  ;;  %v12310_v62 = vld [vmem:[%s11655_s7 + $0x18] sm:$0xff] }
 0x1e9   : > { %9891 = vmatmul.msk.bf16.gmra.mxu1 %vm644_vm0, %v1989_v12  ;;  %v2587_v29 = vshrl.u32 %v12310_v62, 16  ;;  %v2590_v51 = vshll.u32 %v12310_v62, 16 }
 0x1ea   : > { %v2474_v55 = vpop.f32.mrf.mxu2 }
 0x1eb   : > { %v12291_v2 = vadd.f32 %v2474_v55, %v2172_v34  ;;  %v1731_v34 = vrot.slane %v1729_v16, 1  ;;  %v1734_v55 = vrot.slane %v1732_v58, 2 }
 0x1ec   : > { %v1482_v43 = vpop.f32.mrf.mxu3 }
 0x1ed   : > { %v1856_v47 = vpop.f32.mrf.mxu0  ;;  %v12296_v48 = vadd.f32 %v1482_v43, %v11998_v5  ;;  %v1990_v5 = vrot.slane %v12263_v28, 2 }
 0x1ee   : > { %v1925_v19 = vadd.f32 %v1856_v47, %v1544_v13  ;;  %v2106_v50 = vpop.f32.mrf.mxu1  ;;  %v2579_v13 = vshrl.u32 %v11909_v41, 16 }
 0x1ef   : > { %9989 = vmatmul.msk.bf16.gmra.mxu2 %vm644_vm0, %v2362_v17  ;;  %v1991_v41 = vsel %vm1956_vm3, %v1988_v18, %v1990_v5 }
 0x1f0   : > { %9861 = vmatmul.msk.bf16.gmra.mxu0 %vm644_vm0, %v1727_v6  ;;  %v2173_v7 = vadd.f32 %v2104_v24, %v1925_v19  ;;  %v12315_v24 = vld [vmem:[%s11655_s7 + $0x98] sm:$0xff]  ;;  %v2581_v19 = vrot.slane %v2579_v13, 2 }
 0x1f1   : > { %9833 = vmatmul.msk.bf16.gmra.mxu3 %vm644_vm0, %v1364_v52  ;;  %v11255_v6 = vld [vmem:[%s14731_s3 + $0xb8] sm:$0xff]  ;;  %v2584_v52 = vrot.slane %v2582_v57, 3 }
 0x1f2   : > { %v2477_v56 = vpop.f32.mrf.mxu2  ;;  %4131 = vmatpush.bf16.msrb.mxu3 %v11255_v6  ;;  %v11278_v6 = vld [vmem:[%s14731_s3 + $0xe8] sm:$0xff] }
 0x1f3   : > { %v12306_v61 = vadd.f32 %v2477_v56, %v2173_v7  ;;  %v2589_v7 = vrot.slane %v2587_v29, 2  ;;  %v2592_v56 = vrot.slane %v2590_v51, 3  ;;  %5131 = vmatpush.bf16.msrb.mxu2 %v11278_v6 }
 0x1f4   : > { %v1485_v12 = vpop.f32.mrf.mxu3 }
 0x1f5   : > { %14739 = vst [vmem:[#allocation2_spill] sm:$0xff] %v12306_v61  ;;  %v1858_v9 = vpop.f32.mrf.mxu0  ;;  %v12319_v17 = vadd.f32 %v1485_v12, %v12013_v30  ;;  %v1566_v61 = vld [vmem:[%s11655_s7 + $0x98] sm:$0x3]  ;;  %v2363_v30 = vrot.slane %v12315_v24, 2  ;;  %v12334_v13 = vor.u32 %v2592_v56, %v2589_v7 }
 0x1f6   : > { %v1926_v43 = vadd.f32 %v1858_v9, %v1545_v35  ;;  %v2109_v47 = vpop.f32.mrf.mxu1  ;;  %v12330_v35 = vor.u32 %v1734_v55, %v1731_v34  ;;  %v1573_v58 = vunpack.c.l.b16 %v1566_v61  ;;  %v2585_v9 = vor.u32 %v2584_v52, %v2581_v19  ;;  %v2231_v34 = vld [vmem:[%s11655_s7 + $0xa0] sm:$0x3] }
 0x1f8   : > { %v2174_v16 = vadd.f32 %v2106_v50, %v1926_v43  ;;  %v2364_v50 = vsel %vm1956_vm3, %v2361_v38, %v2363_v30  ;;  %v1736_v51 = vsel %vm1575_vm4, %v1726_v25, %v12330_v35  ;;  %v2594_v38 = vsel %vm2577_vm5, %v2585_v9, %v12334_v13  ;;  %v11276_v9 = vld [vmem:[%s14731_s3 + $0xd8] sm:$0xff] }
 0x1f9   : > { %9892 = vmatmul.msk.bf16.gmra.mxu1 %vm644_vm0, %v1991_v41  ;;  %v1574_v41 = vpack.c.b16 %v1573_v58, %v1573_v58  ;;  %v2310_v25 = vunpack.c.l.b16 %v2231_v34 }
 0x1fa   : > { %v2479_v18 = vpop.f32.mrf.mxu2  ;;  %4884 = vmatpush.bf16.msrb.mxu1 %v11276_v9 }
 0x1fb   : > { %v12332_v12 = vadd.f32 %v2479_v18, %v2174_v16  ;;  %v1738_v19 = vshrl.u32 %v1574_v41, 16  ;;  %v1741_v52 = vshll.u32 %v1574_v41, 16  ;;  %v1992_v56 = vrot.slane %v1574_v41, 2  ;;  %v12363_v18 = vld [vmem:[%s11655_s7 + $0x20] sm:$0xff] }
 0x1fc   : > { %v1487_v57 = vpop.f32.mrf.mxu3  ;;  %v2596_v58 = vshrl.u32 %v12363_v18, 16 }
 0x1fd   : > { %v1861_v29 = vpop.f32.mrf.mxu0  ;;  %v12345_v61 = vadd.f32 %v1487_v57, %v12024_v53  ;;  %v1743_v34 = vrot.slane %v1741_v52, 2  ;;  %v1993_v6 = vsel %vm1956_vm3, %v1990_v5, %v1992_v56 }
 0x1fe   : > { %v1927_v55 = vadd.f32 %v1861_v29, %v12286_v59  ;;  %v2111_v43 = vpop.f32.mrf.mxu1  ;;  %v11274_v59 = vld [vmem:[%s14731_s3 + $0xc8] sm:$0xff] }
 0x1ff   : > { %9990 = vmatmul.msk.bf16.gmra.mxu2 %vm644_vm0, %v2364_v50  ;;  %4504 = vmatpush.bf16.msrb.mxu0 %v11274_v59  ;;  %v2329_v50 = vpack.c.b16 %v2310_v25, %v2310_v25 }
 0x200   : > { %9862 = vmatmul.msk.bf16.gmra.mxu0 %vm644_vm0, %v1736_v51  ;;  %v2175_v53 = vadd.f32 %v2109_v47, %v1927_v55  ;;  %v2599_v47 = vshll.u32 %v12363_v18, 16  ;;  %v1740_v51 = vrot.slane %v1738_v19, 1 }
 0x201   : > { %10004 = vmatmul.msk.bf16.vlgmr.msra.gmra.mxu3 %vm644_vm0, %v2594_v38  ;;  %v2365_v25 = vrot.slane %v2329_v50, 2 }
 0x202   : > { %v2482_v7 = vpop.f32.mrf.mxu2  ;;  %v2601_v59 = vrot.slane %v2599_v47, 3  ;;  %v1744_v19 = vor.u32 %v1743_v34, %v1740_v51 }
 0x203   : > { %v12360_v16 = vadd.f32 %v2482_v7, %v2175_v53  ;;  %v2598_v53 = vrot.slane %v2596_v58, 2  ;;  %v2366_v5 = vsel %vm1956_vm3, %v2363_v30, %v2365_v25  ;;  %v11394_v58 = vld [vmem:[%s12382_s17] sm:$0xff]  }
 0x204   : > { %v1490_v57 = vpop.f32.mrf.mxu3  ;;  %v1745_v56 = vsel %vm1575_vm4, %v12330_v35, %v1744_v19  ;;  %v3667_v35 = vshll.u32 %v11394_v58, 16  ;;  %v14740_v19 = vunpack.c.l.b16 %v11889_v21 }
 0x205   : > { %v1863_v29 = vpop.f32.mrf.mxu0  ;;  %v12372_v55 = vadd.f32 %v1490_v57, %v12039_v0  ;;  %v2949_v57 = vld [vmem:[%s11655_s7 + $0x10] sm:$0x8] }
 0x206   : > { %v1928_v41 = vadd.f32 %v1863_v29, %v12296_v48  ;;  %v2114_v38 = vpop.f32.mrf.mxu1  ;;  %v2602_v48 = vor.u32 %v2601_v59, %v2598_v53  ;;  %v11235_v29 = vld [vmem:[%s12382_s17 + $0x8] sm:$0xff]  ;;  %v2956_v51 = vunpack.c.l.b16 %v2949_v57  ;;  %v3665_v53 = vshrl.u32 %v11394_v58, 16 }
 0x207   : > { %v3672_v59 = vshll.u32 %v11235_v29, 16 }
 0x208   : > { %v2176_v7 = vadd.f32 %v2111_v43, %v1928_v41  ;;  %v2603_v24 = vsel %vm2577_vm5, %v12334_v13, %v2602_v48  ;;  %v3669_v13 = vrot.slane %v3667_v35, 1  ;;  %v2960_v35 = vrot.slane %v12310_v62, 3 }
 0x209   : > { %9893 = vmatmul.msk.bf16.gmra.mxu1 %vm644_vm0, %v1993_v6 }
 0x20a   : > { %v2484_v0 = vpop.f32.mrf.mxu2 }
 0x20b   : > { %v12384_v28 = vadd.f32 %v2484_v0, %v2176_v7  ;;  %v2957_v0 = vpack.c.b16 %v14740_v19, %v2956_v51  ;;  %v12431_v19 = vld [vmem:[%s11655_s7 + $0x30] sm:$0xff] }
 0x20c   : > { %v1492_v43 = vpop.f32.mrf.mxu3 }
 0x20d   : > { %v1866_v52 = vpop.f32.mrf.mxu0  ;;  %v12393_v47 = vadd.f32 %v1492_v43, %v12050_v45  ;;  %v2959_v58 = vrot.slane %v2957_v0, 3  ;;  %v3676_v0 = vshrl.u32 %v11235_v29, 16 }
 0x20e   : > { %v1929_v9 = vadd.f32 %v1866_v52, %v12319_v17  ;;  %v2116_v50 = vpop.f32.mrf.mxu1  ;;  %v12406_v17 = vld [vmem:[%s11655_s7 + $0x28] sm:$0xff] }
 0x20f   : > { %9991 = vmatmul.msk.bf16.gmra.mxu2 %vm644_vm0, %v2366_v5  ;;  %v2605_v41 = vshrl.u32 %v12406_v17, 16  ;;  %v2608_v6 = vshll.u32 %v12406_v17, 16 }
 0x210   : > { %9863 = vmatmul.msk.bf16.gmra.mxu0 %vm644_vm0, %v1745_v56  ;;  %v2177_v30 = vadd.f32 %v2114_v38, %v1929_v9  ;;  %v11215_v38 = vld [vmem:[%s12382_s17] sm:$0xff] }
 0x211   : > { %10005 = vmatmul.msk.bf16.gmra.mxu3 %vm644_vm0, %v2603_v24  ;;  %v2607_v56 = vrot.slane %v2605_v41, 2  ;;  %v2610_v9 = vrot.slane %v2608_v6, 3  ;;  %v3670_v24 = vor.u32 %v3669_v13, %v3665_v53 }
 0x212   : > { %v2487_v34 = vpop.f32.mrf.mxu2 }
 0x213   : > { %v12403_v45 = vadd.f32 %v2487_v34, %v2177_v30  ;;  %v3674_v30 = vrot.slane %v3672_v59, 1  ;;  %v2611_v51 = vor.u32 %v2610_v9, %v2607_v56 }
 0x214   : > { %v1495_v7 = vpop.f32.mrf.mxu3 }
 0x215   : > { %v1868_v25 = vpop.f32.mrf.mxu0  ;;  %v1552_v5 = vadd.f32 %v1495_v7, %v12065_v14  ;;  %v3675_v14 = vsel %vm483_vm2, %v3670_v24, %v3674_v30  ;;  %v2612_v62 = vsel %vm2577_vm5, %v2602_v48, %v2611_v51  ;;  %v11236_v7 = vld [vmem:[%s12382_s17 + $0x10] sm:$0xff]  ;;  %v11216_v48 = vld [vmem:[%s12382_s17 + $0x8] sm:$0xff] }
 0x216   : > { %v1930_v43 = vadd.f32 %v1868_v25, %v12345_v61  ;;  %v2119_v52 = vpop.f32.mrf.mxu1 }
 0x218   : > { %v2178_v57 = vadd.f32 %v2116_v50, %v1930_v43  ;;  %v2961_v50 = vsel %vm2958_vm6, %v2959_v58, %v2960_v35  ;;  %v3680_v43 = vshll.u32 %v11236_v7, 16 }
 0x219   : > { %10136 = vmatmul.msk.bf16.vlgmr.msra.gmra.mxu1 %vm644_vm0, %v11215_v38 }
 0x21a   : > { %v2489_v34 = vpop.f32.mrf.mxu2 }
 0x21b   : > { %v12417_v21 = vadd.f32 %v2489_v34, %v2178_v57 }
 0x21c   : > { %v1497_v61 = vpop.f32.mrf.mxu3 }
 0x21d   : > { %v1871_v41 = vpop.f32.mrf.mxu0  ;;  %v1553_v6 = vadd.f32 %v1497_v61, %v12076_v15  ;;  %v2614_v15 = vshrl.u32 %v12431_v19, 16  ;;  %v3678_v61 = vor.u32 %v3676_v0, %v3674_v30  ;;  %v11237_v0 = vld [vmem:[%s12382_s17 + $0x18] sm:$0xff] }
 0x21e   : > { %v1931_v53 = vadd.f32 %v1871_v41, %v12372_v55  ;;  %v2121_v13 = vpop.f32.mrf.mxu1  ;;  %v2617_v55 = vshll.u32 %v12431_v19, 16  ;;  %v3682_v41 = vrot.slane %v3680_v43, 1 }
 0x21f   : > { %10234 = vmatmul.msk.bf16.vlgmr.msra.gmra.mxu2 %vm644_vm0, %v3675_v14  ;;  %v2616_v58 = vrot.slane %v2614_v15, 2 }
 0x220   : > { %10034 = vmatmul.msk.bf16.vlgmr.msra.gmra.mxu0 %vm644_vm0, %v2961_v50  ;;  %v2179_v59 = vadd.f32 %v2119_v52, %v1931_v53  ;;  %v2619_v34 = vrot.slane %v2617_v55, 3  ;;  %v2962_v50 = vrot.slane %v12363_v18, 3 }
 0x221   : > { %10006 = vmatmul.msk.bf16.gmra.mxu3 %vm644_vm0, %v2612_v62 }
 0x222   : > { %v2492_v25 = vpop.f32.mrf.mxu2  ;;  %v2620_v62 = vor.u32 %v2619_v34, %v2616_v58 }
 0x223   : > { %v12428_v38 = vadd.f32 %v2492_v25, %v2179_v59  ;;  %v2963_v25 = vsel %vm2958_vm6, %v2960_v35, %v2962_v50  ;;  %v3684_v35 = vshrl.u32 %v11236_v7, 16 }
 0x224   : > { %v1500_v56 = vpop.f32.mrf.mxu3  ;;  %v2621_v18 = vsel %vm2577_vm5, %v2611_v51, %v2620_v62  ;;  %v11217_v51 = vld [vmem:[%s12382_s17 + $0x10] sm:$0xff] }
 0x225   : > { %v1873_v9 = vpop.f32.mrf.mxu0  ;;  %v1554_v57 = vadd.f32 %v1500_v56, %v12091_v1  ;;  %v3683_v1 = vsel %vm483_vm2, %v3678_v61, %v3682_v41 }
 0x226   : > { %v1932_v52 = vadd.f32 %v1873_v9, %v12393_v47  ;;  %v2124_v24 = vpop.f32.mrf.mxu1  ;;  %v12453_v9 = vld [vmem:[%s11655_s7 + $0x38] sm:$0xff] }
 0x228   : > { %v2180_v14 = vadd.f32 %v2121_v13, %v1932_v52 }
 0x229   : > { %10137 = vmatmul.msk.bf16.gmra.mxu1 %vm644_vm0, %v11216_v48  ;;  %v3688_v48 = vshll.u32 %v11237_v0, 16 }
 0x22a   : > { %v2494_v29 = vpop.f32.mrf.mxu2 }
 0x22b   : > { %v12440_v53 = vadd.f32 %v2494_v29, %v2180_v14 }
 0x22c   : > { %v1502_v59 = vpop.f32.mrf.mxu3 }
 0x22d   : > { %v1876_v47 = vpop.f32.mrf.mxu0  ;;  %v1555_v13 = vadd.f32 %v1502_v59, %v12103_v10  ;;  %v2623_v10 = vshrl.u32 %v12453_v9, 16  ;;  %v3686_v59 = vor.u32 %v3684_v35, %v3682_v41  ;;  %v11238_v35 = vld [vmem:[%s12382_s17 + $0x20] sm:$0xff] }
 0x22e   : > { %v1933_v30 = vadd.f32 %v1876_v47, %v1552_v5  ;;  %v2126_v15 = vpop.f32.mrf.mxu1  ;;  %v2626_v5 = vshll.u32 %v12453_v9, 16  ;;  %v3690_v47 = vrot.slane %v3688_v48, 1 }
 0x22f   : > { %10235 = vmatmul.msk.bf16.gmra.mxu2 %vm644_vm0, %v3683_v1  ;;  %v2625_v61 = vrot.slane %v2623_v10, 2 }
 0x230   : > { %10035 = vmatmul.msk.bf16.gmra.mxu0 %vm644_vm0, %v2963_v25  ;;  %v2181_v55 = vadd.f32 %v2124_v24, %v1933_v30  ;;  %v2628_v29 = vrot.slane %v2626_v5, 3  ;;  %v2964_v25 = vrot.slane %v12406_v17, 3 }
 0x231   : > { %10007 = vmatmul.msk.bf16.gmra.mxu3 %vm644_vm0, %v2621_v18 }
 0x232   : > { %v2497_v43 = vpop.f32.mrf.mxu2  ;;  %v2629_v18 = vor.u32 %v2628_v29, %v2625_v61 }
 0x233   : > { %v12450_v56 = vadd.f32 %v2497_v43, %v2181_v55  ;;  %v3691_v55 = vsel %vm483_vm2, %v3686_v59, %v3690_v47  ;;  %v2965_v43 = vsel %vm2958_vm6, %v2962_v50, %v2964_v25  ;;  %v3692_v50 = vshrl.u32 %v11237_v0, 16 }
 0x234   : > { %v1505_v52 = vpop.f32.mrf.mxu3  ;;  %v2630_v17 = vsel %vm2577_vm5, %v2620_v62, %v2629_v18  ;;  %v11218_v62 = vld [vmem:[%s12382_s17 + $0x18] sm:$0xff] }
 0x235   : > { %v1878_v58 = vpop.f32.mrf.mxu0  ;;  %v1556_v34 = vadd.f32 %v1505_v52, %v12122_v8 }
 0x236   : > { %v1934_v24 = vadd.f32 %v1878_v58, %v1553_v6  ;;  %v2129_v14 = vpop.f32.mrf.mxu1  ;;  %v12474_v58 = vld [vmem:[%s11655_s7 + $0x40] sm:$0xff] }
 0x238   : > { %v2182_v1 = vadd.f32 %v2126_v15, %v1934_v24 }
 0x239   : > { %10138 = vmatmul.msk.bf16.gmra.mxu1 %vm644_vm0, %v11217_v51  ;;  %v3696_v51 = vshll.u32 %v11238_v35, 16 }
 0x23a   : > { %v2499_v30 = vpop.f32.mrf.mxu2 }
 0x23b   : > { %v12461_v7 = vadd.f32 %v2499_v30, %v2182_v1 }
 0x23c   : > { %v1507_v8 = vpop.f32.mrf.mxu3 }
 0x23d   : > { %v1881_v6 = vpop.f32.mrf.mxu0  ;;  %v1557_v15 = vadd.f32 %v1507_v8, %v12134_v26  ;;  %v2632_v26 = vshrl.u32 %v12474_v58, 16  ;;  %v3694_v8 = vor.u32 %v3692_v50, %v3690_v47  ;;  %v11239_v50 = vld [vmem:[%s12382_s17 + $0x28] sm:$0xff] }
 0x23e   : > { %v1935_v41 = vadd.f32 %v1881_v6, %v1554_v57  ;;  %v2131_v10 = vpop.f32.mrf.mxu1  ;;  %v2635_v57 = vshll.u32 %v12474_v58, 16  ;;  %v3698_v6 = vrot.slane %v3696_v51, 1 }
 0x23f   : > { %10236 = vmatmul.msk.bf16.gmra.mxu2 %vm644_vm0, %v3691_v55  ;;  %v2634_v59 = vrot.slane %v2632_v26, 2 }
 0x240   : > { %10036 = vmatmul.msk.bf16.gmra.mxu0 %vm644_vm0, %v2965_v43  ;;  %v2183_v5 = vadd.f32 %v2129_v14, %v1935_v41  ;;  %v2637_v30 = vrot.slane %v2635_v57, 3  ;;  %v2966_v43 = vrot.slane %v12431_v19, 3 }
 0x241   : > { %10008 = vmatmul.msk.bf16.gmra.mxu3 %vm644_vm0, %v2630_v17 }
 0x242   : > { %v2502_v48 = vpop.f32.mrf.mxu2  ;;  %v2638_v17 = vor.u32 %v2637_v30, %v2634_v59 }
 0x243   : > { %v12471_v52 = vadd.f32 %v2502_v48, %v2183_v5  ;;  %v3699_v5 = vsel %vm483_vm2, %v3694_v8, %v3698_v6  ;;  %v2967_v48 = vsel %vm2958_vm6, %v2964_v25, %v2966_v43  ;;  %v3700_v25 = vshrl.u32 %v11238_v35, 16 }
 0x244   : > { %v1510_v24 = vpop.f32.mrf.mxu3  ;;  %v2639_v19 = vsel %vm2577_vm5, %v2629_v18, %v2638_v17  ;;  %v11219_v18 = vld [vmem:[%s12382_s17 + $0x20] sm:$0xff] }
 0x245   : > { %v1883_v61 = vpop.f32.mrf.mxu0  ;;  %v1558_v29 = vadd.f32 %v1510_v24, %v11991_v32 }
 0x246   : > { %v1936_v14 = vadd.f32 %v1883_v61, %v1555_v13  ;;  %v2134_v1 = vpop.f32.mrf.mxu1  ;;  %v12495_v61 = vld [vmem:[%s11655_s7 + $0x48] sm:$0xff] }
 0x248   : > { %v2184_v55 = vadd.f32 %v2131_v10, %v1936_v14 }
 0x249   : > { %10139 = vmatmul.msk.bf16.gmra.mxu1 %vm644_vm0, %v11218_v62  ;;  %v3704_v62 = vshll.u32 %v11239_v50, 16 }
 0x24a   : > { %v2504_v41 = vpop.f32.mrf.mxu2 }
 0x24b   : > { %v12482_v0 = vadd.f32 %v2504_v41, %v2184_v55 }
 0x24c   : > { %v1512_v32 = vpop.f32.mrf.mxu3 }
 0x24d   : > { %v1886_v13 = vpop.f32.mrf.mxu0  ;;  %v1559_v10 = vadd.f32 %v1512_v32, %v12004_v60  ;;  %v2641_v60 = vshrl.u32 %v12495_v61, 16  ;;  %v3702_v32 = vor.u32 %v3700_v25, %v3698_v6  ;;  %v11240_v25 = vld [vmem:[%s12382_s17 + $0x30] sm:$0xff] }
 0x24e   : > { %v1937_v47 = vadd.f32 %v1886_v13, %v1556_v34  ;;  %v2136_v26 = vpop.f32.mrf.mxu1  ;;  %v2644_v34 = vshll.u32 %v12495_v61, 16  ;;  %v3706_v13 = vrot.slane %v3704_v62, 1 }
 0x24f   : > { %10237 = vmatmul.msk.bf16.gmra.mxu2 %vm644_vm0, %v3699_v5  ;;  %v2643_v8 = vrot.slane %v2641_v60, 2 }
 0x250   : > { %10037 = vmatmul.msk.bf16.gmra.mxu0 %vm644_vm0, %v2967_v48  ;;  %v2185_v57 = vadd.f32 %v2134_v1, %v1937_v47  ;;  %v2646_v41 = vrot.slane %v2644_v34, 3  ;;  %v2968_v48 = vrot.slane %v12453_v9, 3 }
 0x251   : > { %10009 = vmatmul.msk.bf16.gmra.mxu3 %vm644_vm0, %v2639_v19 }
 0x252   : > { %v2507_v51 = vpop.f32.mrf.mxu2  ;;  %v2647_v19 = vor.u32 %v2646_v41, %v2643_v8 }
 0x253   : > { %v12492_v24 = vadd.f32 %v2507_v51, %v2185_v57  ;;  %v3707_v57 = vsel %vm483_vm2, %v3702_v32, %v3706_v13  ;;  %v2969_v51 = vsel %vm2958_vm6, %v2966_v43, %v2968_v48  ;;  %v3708_v43 = vshrl.u32 %v11239_v50, 16 }
 0x254   : > { %v1515_v14 = vpop.f32.mrf.mxu3  ;;  %v2648_v9 = vsel %vm2577_vm5, %v2638_v17, %v2647_v19  ;;  %v11220_v17 = vld [vmem:[%s12382_s17 + $0x28] sm:$0xff] }
 0x255   : > { %v1888_v59 = vpop.f32.mrf.mxu0  ;;  %v1560_v30 = vadd.f32 %v1515_v14, %v12017_v39 }
 0x256   : > { %v1938_v1 = vadd.f32 %v1888_v59, %v1557_v15  ;;  %v2139_v55 = vpop.f32.mrf.mxu1  ;;  %v12516_v59 = vld [vmem:[%s11655_s7 + $0x50] sm:$0xff] }
 0x258   : > { %v2186_v5 = vadd.f32 %v2136_v26, %v1938_v1 }
 0x259   : > { %10140 = vmatmul.msk.bf16.gmra.mxu1 %vm644_vm0, %v11219_v18  ;;  %v3712_v18 = vshll.u32 %v11240_v25, 16 }
 0x25a   : > { %v2509_v47 = vpop.f32.mrf.mxu2 }
 0x25b   : > { %v12503_v35 = vadd.f32 %v2509_v47, %v2186_v5 }
 0x25c   : > { %v1517_v39 = vpop.f32.mrf.mxu3 }
 0x25d   : > { %v1891_v15 = vpop.f32.mrf.mxu0  ;;  %v1561_v26 = vadd.f32 %v1517_v39, %v12030_v3  ;;  %v2650_v3 = vshrl.u32 %v12516_v59, 16  ;;  %v3710_v39 = vor.u32 %v3708_v43, %v3706_v13  ;;  %v11241_v43 = vld [vmem:[%s12382_s17 + $0x38] sm:$0xff] }
 0x25e   : > { %v1939_v6 = vadd.f32 %v1891_v15, %v1558_v29  ;;  %v2141_v60 = vpop.f32.mrf.mxu1  ;;  %v2653_v29 = vshll.u32 %v12516_v59, 16  ;;  %v3714_v15 = vrot.slane %v3712_v18, 1 }
 0x25f   : > { %10238 = vmatmul.msk.bf16.gmra.mxu2 %vm644_vm0, %v3707_v57  ;;  %v2652_v32 = vrot.slane %v2650_v3, 2 }
 0x260   : > { %10038 = vmatmul.msk.bf16.gmra.mxu0 %vm644_vm0, %v2969_v51  ;;  %v2187_v34 = vadd.f32 %v2139_v55, %v1939_v6  ;;  %v2655_v47 = vrot.slane %v2653_v29, 3  ;;  %v2970_v51 = vrot.slane %v12474_v58, 3 }
 0x261   : > { %10010 = vmatmul.msk.bf16.gmra.mxu3 %vm644_vm0, %v2648_v9 }
 0x262   : > { %v2512_v62 = vpop.f32.mrf.mxu2  ;;  %v2656_v9 = vor.u32 %v2655_v47, %v2652_v32 }
 0x263   : > { %v12513_v14 = vadd.f32 %v2512_v62, %v2187_v34  ;;  %v3715_v34 = vsel %vm483_vm2, %v3710_v39, %v3714_v15  ;;  %v2971_v62 = vsel %vm2958_vm6, %v2968_v48, %v2970_v51  ;;  %v3716_v48 = vshrl.u32 %v11240_v25, 16 }
 0x264   : > { %v1520_v1 = vpop.f32.mrf.mxu3  ;;  %v2657_v58 = vsel %vm2577_vm5, %v2647_v19, %v2656_v9  ;;  %v11221_v19 = vld [vmem:[%s12382_s17 + $0x30] sm:$0xff] }
 0x265   : > { %v1893_v8 = vpop.f32.mrf.mxu0  ;;  %v1562_v41 = vadd.f32 %v1520_v1, %v12043_v23 }
 0x266   : > { %v1940_v55 = vadd.f32 %v1893_v8, %v1559_v10  ;;  %v2144_v5 = vpop.f32.mrf.mxu1  ;;  %v12537_v8 = vld [vmem:[%s11655_s7 + $0x58] sm:$0xff] }
 0x268   : > { %v2188_v57 = vadd.f32 %v2141_v60, %v1940_v55 }
 0x269   : > { %10141 = vmatmul.msk.bf16.gmra.mxu1 %vm644_vm0, %v11220_v17  ;;  %v3720_v17 = vshll.u32 %v11241_v43, 16 }
 0x26a   : > { %v2514_v6 = vpop.f32.mrf.mxu2 }
 0x26b   : > { %v12524_v50 = vadd.f32 %v2514_v6, %v2188_v57 }
 0x26c   : > { %v1522_v23 = vpop.f32.mrf.mxu3 }
 0x26d   : > { %v1896_v10 = vpop.f32.mrf.mxu0  ;;  %v1563_v60 = vadd.f32 %v1522_v23, %v12056_v54  ;;  %v2659_v54 = vshrl.u32 %v12537_v8, 16  ;;  %v3718_v23 = vor.u32 %v3716_v48, %v3714_v15  ;;  %v12556_v48 = vld [vmem:[%s12382_s17 + $0x40] sm:$0xff] }
 0x26e   : > { %v1941_v13 = vadd.f32 %v1896_v10, %v1560_v30  ;;  %v2146_v3 = vpop.f32.mrf.mxu1  ;;  %v2662_v30 = vshll.u32 %v12537_v8, 16  ;;  %v3722_v10 = vrot.slane %v3720_v17, 1 }
 0x26f   : > { %10239 = vmatmul.msk.bf16.gmra.mxu2 %vm644_vm0, %v3715_v34  ;;  %v2661_v39 = vrot.slane %v2659_v54, 2 }
 0x270   : > { %10039 = vmatmul.msk.bf16.gmra.mxu0 %vm644_vm0, %v2971_v62  ;;  %v2189_v29 = vadd.f32 %v2144_v5, %v1941_v13  ;;  %v2664_v6 = vrot.slane %v2662_v30, 3  ;;  %v2972_v62 = vrot.slane %v12495_v61, 3 }
 0x271   : > { %10011 = vmatmul.msk.bf16.gmra.mxu3 %vm644_vm0, %v2657_v58 }
 0x272   : > { %v2517_v18 = vpop.f32.mrf.mxu2  ;;  %v2665_v58 = vor.u32 %v2664_v6, %v2661_v39  ;;  %v11222_v39 = vld [vmem:[%s12382_s17 + $0x38] sm:$0xff] }
 0x273   : > { %v12534_v1 = vadd.f32 %v2517_v18, %v2189_v29  ;;  %v3723_v29 = vsel %vm483_vm2, %v3718_v23, %v3722_v10  ;;  %v2973_v18 = vsel %vm2958_vm6, %v2970_v51, %v2972_v62  ;;  %v12562_v51 = vld [vmem:[%s11655_s7 + $0x60] sm:$0xff]  ;;  %v11254_v23 = vld [vmem:[%s14731_s3 + $0xb0] sm:$0xff] }
 0x274   : > { %v1525_v55 = vpop.f32.mrf.mxu3  ;;  %v2666_v61 = vsel %vm2577_vm5, %v2656_v9, %v2665_v58  ;;  %4132 = vmatpush.bf16.msrb.mxu3 %v11254_v23 }
 0x275   : > { %v1898_v32 = vpop.f32.mrf.mxu0  ;;  %v1564_v47 = vadd.f32 %v1525_v55, %v12069_v27 }
 0x276   : > { %v1942_v5 = vadd.f32 %v1898_v32, %v1561_v26  ;;  %v2149_v57 = vpop.f32.mrf.mxu1  ;;  %v3724_v32 = vshrl.u32 %v11241_v43, 16  ;;  %v2974_v43 = vrot.slane %v12516_v59, 3 }
 0x278   : > { %v2190_v34 = vadd.f32 %v2146_v3, %v1942_v5 }
 0x279   : > { %10142 = vmatmul.msk.bf16.gmra.mxu1 %vm644_vm0, %v11221_v19  ;;  %v3728_v19 = vshll.u32 %v12556_v48, 16 }
 0x27a   : > { %v2519_v13 = vpop.f32.mrf.mxu2 }
 0x27b   : > { %v12545_v25 = vadd.f32 %v2519_v13, %v2190_v34 }
 0x27c   : > { %v1527_v27 = vpop.f32.mrf.mxu3 }
 0x27d   : > { %v1901_v26 = vpop.f32.mrf.mxu0  ;;  %v12550_v3 = vadd.f32 %v1527_v27, %v12082_v22  ;;  %v2668_v22 = vshrl.u32 %v12562_v51, 16 }
 0x27e   : > { %v1943_v15 = vadd.f32 %v1901_v26, %v1562_v41  ;;  %v2151_v54 = vpop.f32.mrf.mxu1  ;;  %v2671_v41 = vshll.u32 %v12562_v51, 16  ;;  %v3726_v26 = vor.u32 %v3724_v32, %v3722_v10  ;;  %v11277_v32 = vld [vmem:[%s14731_s3 + $0xe0] sm:$0xff] }
 0x27f   : > { %10240 = vmatmul.msk.bf16.gmra.mxu2 %vm644_vm0, %v3723_v29  ;;  %v2670_v13 = vrot.slane %v2668_v22, 2  ;;  %v2975_v22 = vsel %vm2958_vm6, %v2972_v62, %v2974_v43 }
 0x280   : > { %10040 = vmatmul.msk.bf16.gmra.mxu0 %vm644_vm0, %v2973_v18  ;;  %v2191_v30 = vadd.f32 %v2149_v57, %v1943_v15  ;;  %v2673_v29 = vrot.slane %v2671_v41, 3  ;;  %v3730_v18 = vrot.slane %v3728_v19, 1  ;;  %5132 = vmatpush.bf16.msrb.mxu2 %v11277_v32 }
 0x281   : > { %10012 = vmatmul.msk.bf16.gmra.mxu3 %vm644_vm0, %v2666_v61 }
 0x282   : > { %v2522_v17 = vpop.f32.mrf.mxu2  ;;  %v3731_v61 = vsel %vm483_vm2, %v3726_v26, %v3730_v18 }
 0x283   : > { %v12559_v55 = vadd.f32 %v2522_v17, %v2191_v30 }
 0x284   : > { %v2823_v5 = vpop.f32.mrf.mxu3 }
 0x285   : > { %v1903_v9 = vpop.f32.mrf.mxu0  ;;  %v2913_v6 = vadd.f32 %v2823_v5, %v12147_v44  ;;  %v2674_v44 = vor.u32 %v2673_v29, %v2670_v13 }
 0x286   : > { %v1944_v57 = vadd.f32 %v1903_v9, %v1563_v60  ;;  %v2154_v34 = vpop.f32.mrf.mxu1  ;;  %v11243_v9 = vld [vmem:[%s12382_s17 + $0x48] sm:$0xff] }
 0x287   : > { %v2675_v59 = vsel %vm2577_vm5, %v2665_v58, %v2674_v44  ;;  %v12593_v58 = vld [vmem:[%s11655_s7 + $0x68] sm:$0xff]  ;;  %v3736_v23 = vshll.u32 %v11243_v9, 16 }
 0x288   : > { %v2192_v27 = vadd.f32 %v2151_v54, %v1944_v57  ;;  %v2677_v5 = vshrl.u32 %v12593_v58, 16  ;;  %v11275_v57 = vld [vmem:[%s14731_s3 + $0xd0] sm:$0xff] }
 0x289   : > { %10143 = vmatmul.msk.bf16.gmra.mxu1 %vm644_vm0, %v11222_v39  ;;  %v2680_v39 = vshll.u32 %v12593_v58, 16 }
 0x28a   : > { %v2524_v15 = vpop.f32.mrf.mxu2  ;;  %4885 = vmatpush.bf16.msrb.mxu1 %v11275_v57 }
 0x28b   : > { %v12574_v60 = vadd.f32 %v2524_v15, %v2192_v27  ;;  %v11223_v27 = vld [vmem:[%s12382_s17 + $0x40] sm:$0xff] }
 0x28c   : > { %v2825_v17 = vpop.f32.mrf.mxu3 }
 0x28d   : > { %v1906_v30 = vpop.f32.mrf.mxu0  ;;  %v2914_v10 = vadd.f32 %v2825_v17, %v12156_v46  ;;  %v2682_v17 = vrot.slane %v2680_v39, 3 }
 0x28e   : > { %v1945_v54 = vadd.f32 %v1906_v30, %v1564_v47  ;;  %v2156_v41 = vpop.f32.mrf.mxu1  ;;  %v11273_v47 = vld [vmem:[%s14731_s3 + $0xc0] sm:$0xff]  ;;  %v2679_v30 = vrot.slane %v2677_v5, 2 }
 0x28f   : > { %10241 = vmatmul.msk.bf16.gmra.mxu2 %vm644_vm0, %v3731_v61  ;;  %4505 = vmatpush.bf16.msrb.mxu0 %v11273_v47 }
 0x290   : > { %10041 = vmatmul.msk.bf16.gmra.mxu0 %vm644_vm0, %v2975_v22  ;;  %v2193_v19 = vadd.f32 %v2154_v34, %v1945_v54  ;;  %v3732_v34 = vshrl.u32 %v12556_v48, 16  ;;  %v2976_v48 = vrot.slane %v12537_v8, 3  ;;  %v2683_v47 = vor.u32 %v2682_v17, %v2679_v30 }
 0x291   : > { %10013 = vmatmul.msk.bf16.gmra.mxu3 %vm644_vm0, %v2675_v59  ;;  %v3738_v59 = vrot.slane %v3736_v23, 1 }
 0x292   : > { %v2527_v46 = vpop.f32.mrf.mxu2  ;;  %v3734_v54 = vor.u32 %v3732_v34, %v3730_v18  ;;  %v2977_v5 = vsel %vm2958_vm6, %v2974_v43, %v2976_v48  ;;  %v2684_v8 = vsel %vm2577_vm5, %v2674_v44, %v2683_v47  ;;  %v11244_v34 = vld [vmem:[%s12382_s17 + $0x50] sm:$0xff]  ;;  %v3740_v43 = vshrl.u32 %v11243_v9, 16  ;;  %v11224_v44 = vld [vmem:[%s12382_s17 + $0x48] sm:$0xff] }
 0x293   : > { %v12590_v62 = vadd.f32 %v2527_v46, %v2193_v19 }
 0x294   : > { %v2828_v29 = vpop.f32.mrf.mxu3 }
 0x295   : > { %v1908_v13 = vpop.f32.mrf.mxu0  ;;  %v2915_v15 = vadd.f32 %v2828_v29, %v12169_v4  ;;  %v12619_v29 = vld [vmem:[%s11655_s7 + $0x70] sm:$0xff] }
 0x296   : > { %v1946_v26 = vadd.f32 %v1908_v13, %v12550_v3  ;;  %v3403_v61 = vpop.f32.mrf.mxu1  ;;  %v3739_v3 = vsel %vm483_vm2, %v3734_v54, %v3738_v59 }
 0x298   : > { %v2194_v22 = vadd.f32 %v2156_v41, %v1946_v26 }
 0x299   : > { %10144 = vmatmul.msk.bf16.gmra.mxu1 %vm644_vm0, %v11223_v27  ;;  %v3744_v27 = vshll.u32 %v11244_v34, 16 }
 0x29a   : > { %v2529_v32 = vpop.f32.mrf.mxu2 }
 0x29b   : > { %v12606_v19 = vadd.f32 %v2529_v32, %v2194_v22 }
 0x29c   : > { %v2830_v46 = vpop.f32.mrf.mxu3 }
 0x29d   : > { %v3071_v4 = vpop.f32.mrf.mxu0  ;;  %v2916_v41 = vadd.f32 %v2830_v46, %v12178_v31  ;;  %v2686_v31 = vshrl.u32 %v12619_v29, 16  ;;  %v3742_v46 = vor.u32 %v3740_v43, %v3738_v59  ;;  %v11245_v43 = vld [vmem:[%s12382_s17 + $0x58] sm:$0xff] }
 0x29e   : > { %v3161_v18 = vadd.f32 %v3071_v4, %v2913_v6  ;;  %v3405_v39 = vpop.f32.mrf.mxu1  ;;  %v2689_v6 = vshll.u32 %v12619_v29, 16  ;;  %v3746_v4 = vrot.slane %v3744_v27, 1 }
 0x29f   : > { %10242 = vmatmul.msk.bf16.gmra.mxu2 %vm644_vm0, %v3739_v3  ;;  %v2688_v54 = vrot.slane %v2686_v31, 2 }
 0x2a0   : > { %10042 = vmatmul.msk.bf16.gmra.mxu0 %vm644_vm0, %v2977_v5  ;;  %v3493_v57 = vadd.f32 %v3403_v61, %v3161_v18  ;;  %v2691_v32 = vrot.slane %v2689_v6, 3  ;;  %v2978_v5 = vrot.slane %v12562_v51, 3 }
 0x2a1   : > { %10014 = vmatmul.msk.bf16.gmra.mxu3 %vm644_vm0, %v2684_v8 }
 0x2a2   : > { %v3887_v23 = vpop.f32.mrf.mxu2  ;;  %v2692_v8 = vor.u32 %v2691_v32, %v2688_v54 }
 0x2a3   : > { %v12616_v13 = vadd.f32 %v3887_v23, %v3493_v57  ;;  %v3747_v57 = vsel %vm483_vm2, %v3742_v46, %v3746_v4  ;;  %v2979_v23 = vsel %vm2958_vm6, %v2976_v48, %v2978_v5  ;;  %v3748_v48 = vshrl.u32 %v11244_v34, 16 }
 0x2a4   : > { %v2833_v26 = vpop.f32.mrf.mxu3  ;;  %v2693_v51 = vsel %vm2577_vm5, %v2683_v47, %v2692_v8  ;;  %v11225_v47 = vld [vmem:[%s12382_s17 + $0x50] sm:$0xff] }
 0x2a5   : > { %v3073_v30 = vpop.f32.mrf.mxu0  ;;  %v2917_v17 = vadd.f32 %v2833_v26, %v12191_v40 }
 0x2a6   : > { %v3162_v61 = vadd.f32 %v3073_v30, %v2914_v10  ;;  %v3408_v22 = vpop.f32.mrf.mxu1  ;;  %v12640_v30 = vld [vmem:[%s11655_s7 + $0x78] sm:$0xff] }
 0x2a8   : > { %v3494_v3 = vadd.f32 %v3405_v39, %v3162_v61 }
 0x2a9   : > { %10145 = vmatmul.msk.bf16.gmra.mxu1 %vm644_vm0, %v11224_v44  ;;  %v3752_v44 = vshll.u32 %v11245_v43, 16 }
 0x2aa   : > { %v3889_v18 = vpop.f32.mrf.mxu2 }
 0x2ab   : > { %v12627_v9 = vadd.f32 %v3889_v18, %v3494_v3 }
 0x2ac   : > { %v2835_v40 = vpop.f32.mrf.mxu3 }
 0x2ad   : > { %v3076_v10 = vpop.f32.mrf.mxu0  ;;  %v2918_v39 = vadd.f32 %v2835_v40, %v12200_v20  ;;  %v2695_v20 = vshrl.u32 %v12640_v30, 16  ;;  %v3750_v40 = vor.u32 %v3748_v48, %v3746_v4  ;;  %v11246_v48 = vld [vmem:[%s12382_s17 + $0x60] sm:$0xff] }
 0x2ae   : > { %v3163_v59 = vadd.f32 %v3076_v10, %v2915_v15  ;;  %v3410_v31 = vpop.f32.mrf.mxu1  ;;  %v2698_v15 = vshll.u32 %v12640_v30, 16  ;;  %v3754_v10 = vrot.slane %v3752_v44, 1 }
 0x2af   : > { %10243 = vmatmul.msk.bf16.gmra.mxu2 %vm644_vm0, %v3747_v57  ;;  %v2697_v46 = vrot.slane %v2695_v20, 2 }
 0x2b0   : > { %10043 = vmatmul.msk.bf16.gmra.mxu0 %vm644_vm0, %v2979_v23  ;;  %v3495_v6 = vadd.f32 %v3408_v22, %v3163_v59  ;;  %v2700_v18 = vrot.slane %v2698_v15, 3  ;;  %v2980_v23 = vrot.slane %v12593_v58, 3 }
 0x2b1   : > { %10015 = vmatmul.msk.bf16.gmra.mxu3 %vm644_vm0, %v2693_v51 }
 0x2b2   : > { %v3892_v27 = vpop.f32.mrf.mxu2  ;;  %v2701_v51 = vor.u32 %v2700_v18, %v2697_v46 }
 0x2b3   : > { %v12637_v26 = vadd.f32 %v3892_v27, %v3495_v6  ;;  %v3755_v6 = vsel %vm483_vm2, %v3750_v40, %v3754_v10  ;;  %v2981_v27 = vsel %vm2958_vm6, %v2978_v5, %v2980_v23  ;;  %v3756_v5 = vshrl.u32 %v11245_v43, 16 }
 0x2b4   : > { %v2838_v61 = vpop.f32.mrf.mxu3  ;;  %v2702_v58 = vsel %vm2577_vm5, %v2692_v8, %v2701_v51  ;;  %v11226_v8 = vld [vmem:[%s12382_s17 + $0x58] sm:$0xff] }
 0x2b5   : > { %v3078_v54 = vpop.f32.mrf.mxu0  ;;  %v2919_v32 = vadd.f32 %v2838_v61, %v12213_v11 }
 0x2b6   : > { %v3164_v22 = vadd.f32 %v3078_v54, %v2916_v41  ;;  %v3413_v3 = vpop.f32.mrf.mxu1  ;;  %v12661_v54 = vld [vmem:[%s11655_s7 + $0x80] sm:$0xff] }
 0x2b8   : > { %v3496_v57 = vadd.f32 %v3410_v31, %v3164_v22 }
 0x2b9   : > { %10146 = vmatmul.msk.bf16.gmra.mxu1 %vm644_vm0, %v11225_v47  ;;  %v3760_v47 = vshll.u32 %v11246_v48, 16 }
 0x2ba   : > { %v3894_v59 = vpop.f32.mrf.mxu2 }
 0x2bb   : > { %v12648_v34 = vadd.f32 %v3894_v59, %v3496_v57 }
 0x2bc   : > { %v2840_v11 = vpop.f32.mrf.mxu3 }
 0x2bd   : > { %v3081_v41 = vpop.f32.mrf.mxu0  ;;  %v2920_v31 = vadd.f32 %v2840_v11, %v12222_v36  ;;  %v2704_v36 = vshrl.u32 %v12661_v54, 16  ;;  %v3758_v11 = vor.u32 %v3756_v5, %v3754_v10  ;;  %v11247_v5 = vld [vmem:[%s12382_s17 + $0x68] sm:$0xff] }
 0x2be   : > { %v3165_v4 = vadd.f32 %v3081_v41, %v2917_v17  ;;  %v3415_v20 = vpop.f32.mrf.mxu1  ;;  %v2707_v17 = vshll.u32 %v12661_v54, 16  ;;  %v3762_v41 = vrot.slane %v3760_v47, 1 }
 0x2bf   : > { %10244 = vmatmul.msk.bf16.gmra.mxu2 %vm644_vm0, %v3755_v6  ;;  %v2706_v40 = vrot.slane %v2704_v36, 2 }
 0x2c0   : > { %10044 = vmatmul.msk.bf16.gmra.mxu0 %vm644_vm0, %v2981_v27  ;;  %v3497_v15 = vadd.f32 %v3413_v3, %v3165_v4  ;;  %v2709_v59 = vrot.slane %v2707_v17, 3  ;;  %v2982_v27 = vrot.slane %v12619_v29, 3 }
 0x2c1   : > { %10016 = vmatmul.msk.bf16.gmra.mxu3 %vm644_vm0, %v2702_v58 }
 0x2c2   : > { %v3897_v44 = vpop.f32.mrf.mxu2  ;;  %v2710_v58 = vor.u32 %v2709_v59, %v2706_v40 }
 0x2c3   : > { %v12658_v61 = vadd.f32 %v3897_v44, %v3497_v15  ;;  %v3763_v15 = vsel %vm483_vm2, %v3758_v11, %v3762_v41  ;;  %v2983_v44 = vsel %vm2958_vm6, %v2980_v23, %v2982_v27  ;;  %v3764_v23 = vshrl.u32 %v11246_v48, 16 }
 0x2c4   : > { %v2843_v22 = vpop.f32.mrf.mxu3  ;;  %v2711_v29 = vsel %vm2577_vm5, %v2701_v51, %v2710_v58  ;;  %v11227_v51 = vld [vmem:[%s12382_s17 + $0x60] sm:$0xff] }
 0x2c5   : > { %v3083_v46 = vpop.f32.mrf.mxu0  ;;  %v2921_v18 = vadd.f32 %v2843_v22, %v12235_v63 }
 0x2c6   : > { %v3166_v3 = vadd.f32 %v3083_v46, %v2918_v39  ;;  %v3418_v57 = vpop.f32.mrf.mxu1  ;;  %v12682_v46 = vld [vmem:[%s11655_s7 + $0x88] sm:$0xff] }
 0x2c8   : > { %v3498_v6 = vadd.f32 %v3415_v20, %v3166_v3 }
 0x2c9   : > { %10147 = vmatmul.msk.bf16.gmra.mxu1 %vm644_vm0, %v11226_v8  ;;  %v3768_v8 = vshll.u32 %v11247_v5, 16 }
 0x2ca   : > { %v3899_v4 = vpop.f32.mrf.mxu2 }
 0x2cb   : > { %v12669_v43 = vadd.f32 %v3899_v4, %v3498_v6 }
 0x2cc   : > { %v2845_v63 = vpop.f32.mrf.mxu3 }
 0x2cd   : > { %v3086_v39 = vpop.f32.mrf.mxu0  ;;  %v2922_v20 = vadd.f32 %v2845_v63, %v12244_v33  ;;  %v2713_v33 = vshrl.u32 %v12682_v46, 16  ;;  %v3766_v63 = vor.u32 %v3764_v23, %v3762_v41  ;;  %v11248_v23 = vld [vmem:[%s12382_s17 + $0x70] sm:$0xff] }
 0x2ce   : > { %v3167_v10 = vadd.f32 %v3086_v39, %v2919_v32  ;;  %v3420_v36 = vpop.f32.mrf.mxu1  ;;  %v2716_v32 = vshll.u32 %v12682_v46, 16  ;;  %v3770_v39 = vrot.slane %v3768_v8, 1 }
 0x2cf   : > { %10245 = vmatmul.msk.bf16.gmra.mxu2 %vm644_vm0, %v3763_v15  ;;  %v2715_v11 = vrot.slane %v2713_v33, 2 }
 0x2d0   : > { %10045 = vmatmul.msk.bf16.gmra.mxu0 %vm644_vm0, %v2983_v44  ;;  %v3499_v17 = vadd.f32 %v3418_v57, %v3167_v10  ;;  %v2718_v4 = vrot.slane %v2716_v32, 3  ;;  %v2984_v44 = vrot.slane %v12640_v30, 3 }
 0x2d1   : > { %10017 = vmatmul.msk.bf16.gmra.mxu3 %vm644_vm0, %v2711_v29 }
 0x2d2   : > { %v3902_v47 = vpop.f32.mrf.mxu2  ;;  %v2719_v29 = vor.u32 %v2718_v4, %v2715_v11 }
 0x2d3   : > { %v12679_v22 = vadd.f32 %v3902_v47, %v3499_v17  ;;  %v3771_v17 = vsel %vm483_vm2, %v3766_v63, %v3770_v39  ;;  %v2985_v47 = vsel %vm2958_vm6, %v2982_v27, %v2984_v44  ;;  %v3772_v27 = vshrl.u32 %v11247_v5, 16 }
 0x2d4   : > { %v2848_v3 = vpop.f32.mrf.mxu3  ;;  %v2720_v30 = vsel %vm2577_vm5, %v2710_v58, %v2719_v29  ;;  %v11228_v58 = vld [vmem:[%s12382_s17 + $0x68] sm:$0xff] }
 0x2d5   : > { %v3088_v40 = vpop.f32.mrf.mxu0  ;;  %v2923_v59 = vadd.f32 %v2848_v3, %v12257_v42 }
 0x2d6   : > { %v3168_v57 = vadd.f32 %v3088_v40, %v2920_v31  ;;  %v3423_v6 = vpop.f32.mrf.mxu1  ;;  %v12703_v40 = vld [vmem:[%s11655_s7 + $0x90] sm:$0xff] }
 0x2d8   : > { %v3500_v15 = vadd.f32 %v3420_v36, %v3168_v57 }
 0x2d9   : > { %10148 = vmatmul.msk.bf16.gmra.mxu1 %vm644_vm0, %v11227_v51  ;;  %v3776_v51 = vshll.u32 %v11248_v23, 16 }
 0x2da   : > { %v3904_v10 = vpop.f32.mrf.mxu2 }
 0x2db   : > { %v12690_v48 = vadd.f32 %v3904_v10, %v3500_v15 }
 0x2dc   : > { %v2850_v42 = vpop.f32.mrf.mxu3 }
 0x2dd   : > { %v3091_v31 = vpop.f32.mrf.mxu0  ;;  %v2924_v36 = vadd.f32 %v2850_v42, %v12266_v37  ;;  %v2722_v37 = vshrl.u32 %v12703_v40, 16  ;;  %v3774_v42 = vor.u32 %v3772_v27, %v3770_v39  ;;  %v11249_v27 = vld [vmem:[%s12382_s17 + $0x78] sm:$0xff] }
 0x2de   : > { %v3169_v41 = vadd.f32 %v3091_v31, %v2921_v18  ;;  %v3425_v33 = vpop.f32.mrf.mxu1  ;;  %v2725_v18 = vshll.u32 %v12703_v40, 16  ;;  %v3778_v31 = vrot.slane %v3776_v51, 1 }
 0x2df   : > { %10246 = vmatmul.msk.bf16.gmra.mxu2 %vm644_vm0, %v3771_v17  ;;  %v2724_v63 = vrot.slane %v2722_v37, 2 }
 0x2e0   : > { %10046 = vmatmul.msk.bf16.gmra.mxu0 %vm644_vm0, %v2985_v47  ;;  %v3501_v32 = vadd.f32 %v3423_v6, %v3169_v41  ;;  %v2727_v10 = vrot.slane %v2725_v18, 3  ;;  %v2986_v47 = vrot.slane %v12661_v54, 3 }
 0x2e1   : > { %10018 = vmatmul.msk.bf16.gmra.mxu3 %vm644_vm0, %v2720_v30 }
 0x2e2   : > { %v3907_v8 = vpop.f32.mrf.mxu2  ;;  %v2728_v30 = vor.u32 %v2727_v10, %v2724_v63  ;;  %v11229_v63 = vld [vmem:[%s12382_s17 + $0x70] sm:$0xff]  ;;  %v14742_v10 = vld [vmem:[#allocation2_spill] sm:$0xff] }
 0x2e3   : > { %v12700_v3 = vadd.f32 %v3907_v8, %v3501_v32  ;;  %v3779_v32 = vsel %vm483_vm2, %v3774_v42, %v3778_v31  ;;  %v2987_v8 = vsel %vm2958_vm6, %v2984_v44, %v2986_v47  ;;  %v3780_v44 = vshrl.u32 %v11248_v23, 16 }
 0x2e4   : > { %v2853_v57 = vpop.f32.mrf.mxu3  ;;  %v2729_v54 = vsel %vm2577_vm5, %v2719_v29, %v2728_v30 }
 0x2e5   : > { %v3093_v11 = vpop.f32.mrf.mxu0  ;;  %v2925_v4 = vadd.f32 %v2853_v57, %v12280_v49 }
 0x2e6   : > { %v3170_v6 = vadd.f32 %v3093_v11, %v2922_v20  ;;  %v3428_v15 = vpop.f32.mrf.mxu1  ;;  %v12724_v11 = vld [vmem:[%s11655_s7 + $0x98] sm:$0xff] }
 0x2e8   : > { %v3502_v17 = vadd.f32 %v3425_v33, %v3170_v6 }
 0x2e9   : > { %10149 = vmatmul.msk.bf16.gmra.mxu1 %vm644_vm0, %v11228_v58  ;;  %v3784_v58 = vshll.u32 %v11249_v27, 16 }
 0x2ea   : > { %v3909_v41 = vpop.f32.mrf.mxu2 }
 0x2eb   : > { %v12711_v5 = vadd.f32 %v3909_v41, %v3502_v17 }
 0x2ec   : > { %v2855_v49 = vpop.f32.mrf.mxu3 }
 0x2ed   : > { %v3096_v20 = vpop.f32.mrf.mxu0  ;;  %v2926_v33 = vadd.f32 %v2855_v49, %v12291_v2  ;;  %v2731_v2 = vshrl.u32 %v12724_v11, 16 }
 0x2ee   : > { %v3171_v39 = vadd.f32 %v3096_v20, %v2923_v59  ;;  %v3430_v37 = vpop.f32.mrf.mxu1  ;;  %v2734_v59 = vshll.u32 %v12724_v11, 16  ;;  %v3782_v20 = vor.u32 %v3780_v44, %v3778_v31 }
 0x2ef   : > { %10247 = vmatmul.msk.bf16.gmra.mxu2 %vm644_vm0, %v3779_v32  ;;  %v2733_v41 = vrot.slane %v2731_v2, 2 }
 0x2f0   : > { %10047 = vmatmul.msk.bf16.gmra.mxu0 %vm644_vm0, %v2987_v8  ;;  %v3503_v18 = vadd.f32 %v3428_v15, %v3171_v39  ;;  %v2736_v32 = vrot.slane %v2734_v59, 3  ;;  %v3786_v8 = vrot.slane %v3784_v58, 1  ;;  %v2568_v39 = vld [vmem:[%s11655_s7 + $0xa0] sm:$0x7] }
 0x2f1   : > { %10019 = vmatmul.msk.bf16.gmra.mxu3 %vm644_vm0, %v2729_v54  ;;  %v2988_v54 = vrot.slane %v12682_v46, 3 }
 0x2f2   : > { %v3912_v51 = vpop.f32.mrf.mxu2 }
 0x2f3   : > { %v12721_v57 = vadd.f32 %v3912_v51, %v3503_v18  ;;  %v2737_v51 = vor.u32 %v2736_v32, %v2733_v41  ;;  %v2989_v2 = vsel %vm2958_vm6, %v2986_v47, %v2988_v54  ;;  %v3788_v47 = vshrl.u32 %v11249_v27, 16 }
 0x2f4   : > { %v2858_v6 = vpop.f32.mrf.mxu3 }
 0x2f5   : > { %14741 = vst [vmem:[#allocation3_spill] sm:$0xff] %v12721_v57  ;;  %v3098_v29 = vpop.f32.mrf.mxu0  ;;  %v2927_v15 = vadd.f32 %v2858_v6, %v14742_v10  ;;  %v2575_v57 = vunpack.c.l.b16 %v2568_v39  ;;  %v3787_v6 = vsel %vm483_vm2, %v3782_v20, %v3786_v8  ;;  %v2738_v46 = vsel %vm2577_vm5, %v2728_v30, %v2737_v51  ;;  %v11230_v30 = vld [vmem:[%s12382_s17 + $0x78] sm:$0xff] }
 0x2f6   : > { %v3172_v17 = vadd.f32 %v3098_v29, %v2924_v36  ;;  %v3433_v42 = vpop.f32.mrf.mxu1 }
 0x2f7   : > { %v12740_v44 = vpack.c.b16 %v2575_v57, %v2575_v57 }
 0x2f8   : > { %v3504_v49 = vadd.f32 %v3430_v37, %v3172_v17 }
 0x2f9   : > { %10150 = vmatmul.msk.bf16.gmra.mxu1 %vm644_vm0, %v11229_v63  ;;  %v11250_v63 = vld [vmem:[%s12382_s17 + $0x80] sm:$0xff] }
 0x2fa   : > { %v3914_v18 = vpop.f32.mrf.mxu2  ;;  %v3792_v41 = vshll.u32 %v11250_v63, 16 }
 0x2fb   : > { %v12733_v23 = vadd.f32 %v3914_v18, %v3504_v49 }
 0x2fc   : > { %v2860_v36 = vpop.f32.mrf.mxu3 }
 0x2fd   : > { %v3101_v29 = vpop.f32.mrf.mxu0  ;;  %v2928_v31 = vadd.f32 %v2860_v36, %v12332_v12  ;;  %v2740_v12 = vshrl.u32 %v12740_v44, 16  ;;  %v3790_v36 = vor.u32 %v3788_v47, %v3786_v8  ;;  %v12764_v47 = vld [vmem:[%s12382_s17 + $0x88] sm:$0xff] }
 0x2fe   : > { %v3173_v37 = vadd.f32 %v3101_v29, %v2925_v4  ;;  %v3435_v59 = vpop.f32.mrf.mxu1  ;;  %v2743_v4 = vshll.u32 %v12740_v44, 16  ;;  %v3794_v29 = vrot.slane %v3792_v41, 1 }
 0x2ff   : > { %10248 = vmatmul.msk.bf16.gmra.mxu2 %vm644_vm0, %v3787_v6 }
 0x300   : > { %10048 = vmatmul.msk.bf16.gmra.mxu0 %vm644_vm0, %v2989_v2  ;;  %v3505_v58 = vadd.f32 %v3433_v42, %v3173_v37  ;;  %v2742_v42 = vrot.slane %v2740_v12, 2  ;;  %v2745_v18 = vrot.slane %v2743_v4, 3  ;;  %v2990_v2 = vrot.slane %v12703_v40, 3 }
 0x301   : > { %10020 = vmatmul.msk.bf16.gmra.mxu3 %vm644_vm0, %v2738_v46 }
 0x302   : > { %v3917_v10 = vpop.f32.mrf.mxu2  ;;  %v2746_v46 = vor.u32 %v2745_v18, %v2742_v42  ;;  %v11231_v42 = vld [vmem:[%s12382_s17 + $0x80] sm:$0xff] }
 0x303   : > { %v12745_v17 = vadd.f32 %v3917_v10, %v3505_v58  ;;  %v3795_v58 = vsel %vm483_vm2, %v3790_v36, %v3794_v29 }
 0x304   : > { %v2863_v32 = vpop.f32.mrf.mxu3  ;;  %v2747_v40 = vsel %vm2577_vm5, %v2737_v51, %v2746_v46 }
 0x305   : > { %v3103_v49 = vpop.f32.mrf.mxu0  ;;  %v2929_v57 = vadd.f32 %v2863_v32, %v12360_v16 }
 0x306   : > { %v3174_v20 = vadd.f32 %v3103_v49, %v2926_v33  ;;  %v3438_v39 = vpop.f32.mrf.mxu1  ;;  %v2991_v33 = vsel %vm2958_vm6, %v2988_v54, %v2990_v2  ;;  %v3796_v54 = vshrl.u32 %v11250_v63, 16  ;;  %v11405_v49 = vld [vmem:[%s12382_s17] sm:$0xe] }
 0x308   : > { %v3506_v6 = vadd.f32 %v3435_v59, %v3174_v20 }
 0x309   : > { %10151 = vmatmul.msk.bf16.gmra.mxu1 %vm644_vm0, %v11230_v30 }
 0x30a   : > { %v3919_v37 = vpop.f32.mrf.mxu2 }
 0x30b   : > { %v12753_v27 = vadd.f32 %v3919_v37, %v3506_v6  ;;  %v11297_v6 = vld [vmem:[%s14731_s3 + $0xf8] sm:$0xff]  ;;  %v3798_v37 = vor.u32 %v3796_v54, %v3794_v29 }
 0x30c   : > { %v2865_v10 = vpop.f32.mrf.mxu3  ;;  %5504 = vmatpush.bf16.msra.mxu3 %v11297_v6 }
 0x30d   : > { %v3106_v16 = vpop.f32.mrf.mxu0  ;;  %v12758_v8 = vadd.f32 %v2865_v10, %v12384_v28  ;;  %v3800_v28 = vshll.u32 %v12764_v47, 16  ;;  %v3565_v10 = vld [vmem:[%s12382_s17 + $0x90] sm:$0x1] }
 0x30e   : > { %v3175_v59 = vadd.f32 %v3106_v16, %v2927_v15  ;;  %v3440_v12 = vpop.f32.mrf.mxu1  ;;  %v11404_v15 = vld [vmem:[%s12382_s17] sm:$0xf0]  ;;  %v3644_v29 = vunpack.c.l.b16 %v3565_v10 }
 0x30f   : > { %10249 = vmatmul.msk.bf16.gmra.mxu2 %vm644_vm0, %v3795_v58  ;;  %v11406_v36 = vor.u32 %v11405_v49, %v11404_v15  ;;  %v3802_v46 = vrot.slane %v3800_v28, 1  ;;  %v2992_v58 = vrot.slane %v12724_v11, 3  ;;  %v4260_v15 = vld [vmem:[%s12382_s17 + $0x8] sm:$0xe]  ;;  %v12795_v49 = vld [vmem:[%s12382_s17 + $0xc] sm:$0xf] }
 0x310   : > { %10049 = vmatmul.msk.bf16.gmra.mxu0 %vm644_vm0, %v2991_v33  ;;  %v3507_v4 = vadd.f32 %v3438_v39, %v3175_v59  ;;  %v12785_v33 = vld [vmem:[%s12382_s17 + $0x8] sm:$0xff] }
 0x311   : > { %10021 = vmatmul.msk.bf16.gmra.mxu3 %vm644_vm0, %v2747_v40  ;;  %v14735_v59 = vrot.slane %v12785_v33, 1 }
 0x312   : > { %v3922_v41 = vpop.f32.mrf.mxu2 }
 0x313   : > { %v12767_v32 = vadd.f32 %v3922_v41, %v3507_v4  ;;  %v2993_v41 = vsel %vm2958_vm6, %v2990_v2, %v2992_v58  ;;  %v12805_v2 = vpack.c.b16 %v3644_v29, %v3644_v29 }
 0x314   : > { %v2868_v30 = vpop.f32.mrf.mxu3 }
 0x315   : > { %v3108_v20 = vpop.f32.mrf.mxu0  ;;  %v12774_v51 = vadd.f32 %v2868_v30, %v12403_v45  ;;  %14743 = vst [vmem:[#allocation2_spill] sm:$0xff] %v12805_v2 }
 0x316   : > { %v3176_v39 = vadd.f32 %v3108_v20, %v2928_v31  ;;  %v3443_v18 = vpop.f32.mrf.mxu1  ;;  %v4022_v31 = vrot.slane %v11406_v36, 1  ;;  %v11321_v20 = vld [vmem:[%s14731_s3 + $0x128] sm:$0xff] }
 0x317   : > { %6463 = vmatpush.bf16.msra.mxu2 %v11321_v20 }
 0x318   : > { %v3508_v63 = vadd.f32 %v3440_v12, %v3176_v39  ;;  %v3803_v12 = vsel %vm483_vm2, %v3798_v37, %v3802_v46  ;;  %v4024_v30 = vsel %vm954_vm1, %v4022_v31, %v14735_v59  ;;  %v4340_v39 = vunpack.c.l.b16 %v12795_v49  ;;  %v11232_v31 = vld [vmem:[%s12382_s17 + $0x88] sm:$0xff] }
 0x319   : > { %10152 = vmatmul.msk.bf16.gmra.mxu1 %vm644_vm0, %v11231_v42  ;;  %v4339_v42 = vunpack.c.l.b16 %v4260_v15  ;;  %v3808_v37 = vshll.u32 %v12805_v2, 16  ;;  %v2994_v49 = vrot.slane %v12740_v44, 3 }
 0x31a   : > { %v3924_v45 = vpop.f32.mrf.mxu2 }
 0x31b   : > { %v12782_v16 = vadd.f32 %v3924_v45, %v3508_v63  ;;  %v3804_v63 = vshrl.u32 %v12764_v47, 16  ;;  %v3810_v47 = vrot.slane %v3808_v37, 1 }
 0x31c   : > { %v2870_v40 = vpop.f32.mrf.mxu3 }
 0x31d   : > { %v3111_v4 = vpop.f32.mrf.mxu0  ;;  %v12791_v54 = vadd.f32 %v2870_v40, %v12417_v21  ;;  %v3806_v15 = vor.u32 %v3804_v63, %v3802_v46  ;;  %v2995_v63 = vsel %vm2958_vm6, %v2992_v58, %v2994_v49 }
 0x31e   : > { %v3177_v11 = vadd.f32 %v3111_v4, %v2929_v57  ;;  %v3445_v28 = vpop.f32.mrf.mxu1  ;;  %v11299_v57 = vld [vmem:[%s14731_s3 + $0x108] sm:$0xff] }
 0x31f   : > { %10250 = vmatmul.msk.bf16.gmra.mxu2 %vm644_vm0, %v3803_v12  ;;  %5884 = vmatpush.bf16.msra.mxu0 %v11299_v57  ;;  %v12820_v12 = vpack.c.b16 %v4340_v39, %v4339_v42  ;;  %v11481_v42 = vld [vmem:[%s12382_s17 + $0x10] sm:$0xff]  ;;  %v3811_v46 = vsel %vm483_vm2, %v3806_v15, %v3810_v47 }
 0x320   : > { %10050 = vmatmul.msk.bf16.gmra.mxu0 %vm644_vm0, %v2993_v41  ;;  %v3509_v21 = vadd.f32 %v3443_v18, %v3177_v11  ;;  %v11301_v18 = vld [vmem:[%s14731_s3 + $0x118] sm:$0xff]  ;;  %v12827_v41 = vld [vmem:[%s12382_s17 + $0x10] sm:$0xff] }
 0x321   : > { %10264 = vmatmul.msk.bf16.vlgmr.msrb.gmra.mxu3 %vm644_vm0, %v4024_v30  ;;  %6131 = vmatpush.bf16.msra.mxu1 %v11301_v18  ;;  %v4643_v30 = vshrl.u32 %v12820_v12, 16  ;;  %v4646_v20 = vshll.u32 %v12820_v12, 16 }
 0x322   : > { %v3927_v6 = vpop.f32.mrf.mxu2 }
 0x323   : > { %v12812_v36 = vadd.f32 %v3927_v6, %v3509_v21  ;;  %v4645_v44 = vrot.slane %v4643_v30, 1  ;;  %v4648_v37 = vrot.slane %v4646_v20, 2 }
 0x324   : > { %v2873_v10 = vpop.f32.mrf.mxu3 }
 0x325   : > { %v3113_v45 = vpop.f32.mrf.mxu0  ;;  %v12823_v29 = vadd.f32 %v2873_v10, %v12428_v38  ;;  %v4651_v38 = vshrl.u32 %v12827_v41, 16  ;;  %v5013_v10 = vld [vmem:[%s12382_s17 + $0x8] sm:$0xc] }
 0x326   : > { %v3178_v40 = vadd.f32 %v3113_v45, %v12758_v8  ;;  %v3448_v4 = vpop.f32.mrf.mxu1  ;;  %v4654_v8 = vshll.u32 %v12827_v41, 16  ;;  %v5020_v47 = vunpack.c.l.b16 %v5013_v10 }
 0x327   : > { %v4653_v59 = vrot.slane %v4651_v38, 1 }
 0x328   : > { %v3510_v11 = vadd.f32 %v3445_v28, %v3178_v40  ;;  %v4025_v28 = vrot.slane %v11481_v42, 1  ;;  %v4656_v2 = vrot.slane %v4654_v8, 2  ;;  %v5021_v20 = vpack.c.b16 %v4340_v39, %v5020_v47 }
 0x329   : > { %10153 = vmatmul.msk.bf16.gmra.mxu1 %vm644_vm0, %v11232_v31 }
 0x32a   : > { %v3929_v21 = vpop.f32.mrf.mxu2  ;;  %v4657_v30 = vor.u32 %v4656_v2, %v4653_v59  ;;  %v4395_v59 = vrot.slane %v12820_v12, 1  ;;  %v4396_v2 = vrot.slane %v12827_v41, 1 }
 0x32b   : > { %v12835_v57 = vadd.f32 %v3929_v21, %v3510_v11  ;;  %v14744_v11 = vrot.slane %v12785_v33, 1 }
 0x32c   : > { %v2875_v6 = vpop.f32.mrf.mxu3 }
 0x32d   : > { %v3116_v18 = vpop.f32.mrf.mxu0  ;;  %v2934_v45 = vadd.f32 %v2875_v6, %v12440_v53  ;;  %v4026_v15 = vsel %vm954_vm1, %v14744_v11, %v4025_v28  ;;  %v4649_v53 = vor.u32 %v4648_v37, %v4645_v44  ;;  %v11482_v37 = vld [vmem:[%s12382_s17 + $0x18] sm:$0xff] }
 0x32e   : > { %v3179_v31 = vadd.f32 %v3116_v18, %v12774_v51  ;;  %v3450_v40 = vpop.f32.mrf.mxu1  ;;  %v5022_v18 = vrot.slane %v5021_v20, 2  ;;  %v4027_v10 = vrot.slane %v11482_v37, 1 }
 0x32f   : > { %10251 = vmatmul.msk.bf16.gmra.mxu2 %vm644_vm0, %v3811_v46  ;;  %v4658_v46 = vsel %vm1575_vm4, %v4649_v53, %v4657_v30 }
 0x330   : > { %10051 = vmatmul.msk.bf16.gmra.mxu0 %vm644_vm0, %v2995_v63  ;;  %v3511_v58 = vadd.f32 %v3448_v4, %v3179_v31  ;;  %v12855_v4 = vld [vmem:[%s12382_s17 + $0x18] sm:$0xff]  ;;  %v5023_v63 = vrot.slane %v12827_v41, 2  ;;  %v4028_v53 = vsel %vm954_vm1, %v4025_v28, %v4027_v10 }
 0x331   : > { %10265 = vmatmul.msk.bf16.gmra.mxu3 %vm644_vm0, %v4026_v15  ;;  %v4397_v15 = vsel %vm954_vm1, %v4395_v59, %v4396_v2 }
 0x332   : > { %v3932_v49 = vpop.f32.mrf.mxu2  ;;  %v5024_v31 = vsel %vm1956_vm3, %v5022_v18, %v5023_v63 }
 0x333   : > { %v12849_v51 = vadd.f32 %v3932_v49, %v3511_v58 }
 0x334   : > { %v2878_v21 = vpop.f32.mrf.mxu3 }
 0x335   : > { %v3118_v38 = vpop.f32.mrf.mxu0  ;;  %v2935_v33 = vadd.f32 %v2878_v21, %v12450_v56  ;;  %v4660_v56 = vshrl.u32 %v12855_v4, 16 }
 0x336   : > { %v3180_v8 = vadd.f32 %v3118_v38, %v12791_v54  ;;  %v3453_v42 = vpop.f32.mrf.mxu1  ;;  %v4663_v54 = vshll.u32 %v12855_v4, 16 }
 0x337   : > { %v4662_v47 = vrot.slane %v4660_v56, 1  ;;  %v4398_v56 = vrot.slane %v12855_v4, 1 }
 0x338   : > { %v3512_v6 = vadd.f32 %v3450_v40, %v3180_v8  ;;  %v4665_v49 = vrot.slane %v4663_v54, 2 }
 0x339   : > { %10392 = vmatmul.msk.bf16.vlgmr.msrb.gmra.mxu1 %vm644_vm0, %v4658_v46 }
 0x33a   : > { %v3934_v39 = vpop.f32.mrf.mxu2  ;;  %v4666_v38 = vor.u32 %v4665_v49, %v4662_v47 }
 0x33b   : > { %v12863_v44 = vadd.f32 %v3934_v39, %v3512_v6  ;;  %v12879_v39 = vld [vmem:[%s12382_s17 + $0x20] sm:$0xff] }
 0x33c   : > { %v2880_v40 = vpop.f32.mrf.mxu3  ;;  %v4667_v59 = vsel %vm1575_vm4, %v4657_v30, %v4666_v38  ;;  %v4669_v37 = vshrl.u32 %v12879_v39, 16 }
 0x33d   : > { %v3121_v11 = vpop.f32.mrf.mxu0  ;;  %v2936_v58 = vadd.f32 %v2880_v40, %v12461_v7 }
 0x33e   : > { %v3181_v12 = vadd.f32 %v3121_v11, %v12823_v29  ;;  %v3455_v41 = vpop.f32.mrf.mxu1 }
 0x33f   : > { %10422 = vmatmul.msk.bf16.vlgmr.msrb.gmra.mxu2 %vm644_vm0, %v5024_v31  ;;  %v4672_v31 = vshll.u32 %v12879_v39, 16 }
 0x340   : > { %10362 = vmatmul.msk.bf16.vlgmr.msrb.gmra.mxu0 %vm644_vm0, %v4397_v15  ;;  %v3513_v20 = vadd.f32 %v3453_v42, %v3181_v12  ;;  %v5025_v42 = vrot.slane %v12855_v4, 2  ;;  %v4399_v12 = vsel %vm954_vm1, %v4396_v2, %v4398_v56  ;;  %v4671_v4 = vrot.slane %v4669_v37, 1 }
 0x341   : > { %10266 = vmatmul.msk.bf16.gmra.mxu3 %vm644_vm0, %v4028_v53  ;;  %v4674_v53 = vrot.slane %v4672_v31, 2  ;;  %v4400_v37 = vrot.slane %v12879_v39, 1 }
 0x342   : > { %v3937_v21 = vpop.f32.mrf.mxu2  ;;  %v5026_v30 = vsel %vm1956_vm3, %v5023_v63, %v5025_v42 }
 0x343   : > { %v12874_v8 = vadd.f32 %v3937_v21, %v3513_v20  ;;  %v4675_v63 = vor.u32 %v4674_v53, %v4671_v4 }
 0x344   : > { %v2883_v7 = vpop.f32.mrf.mxu3 }
 0x345   : > { %v3123_v29 = vpop.f32.mrf.mxu0  ;;  %v2937_v46 = vadd.f32 %v2883_v7, %v12471_v52  ;;  %v11483_v52 = vld [vmem:[%s12382_s17 + $0x20] sm:$0xff] }
 0x346   : > { %v3182_v6 = vadd.f32 %v3123_v29, %v2934_v45  ;;  %v3458_v18 = vpop.f32.mrf.mxu1  ;;  %v4029_v45 = vrot.slane %v11483_v52, 1 }
 0x348   : > { %v3514_v28 = vadd.f32 %v3455_v41, %v3182_v6  ;;  %v4030_v20 = vsel %vm954_vm1, %v4027_v10, %v4029_v45 }
 0x349   : > { %10393 = vmatmul.msk.bf16.gmra.mxu1 %vm644_vm0, %v4667_v59 }
 0x34a   : > { %v3939_v54 = vpop.f32.mrf.mxu2 }
 0x34b   : > { %v12886_v40 = vadd.f32 %v3939_v54, %v3514_v28  ;;  %v4676_v28 = vsel %vm1575_vm4, %v4666_v38, %v4675_v63  ;;  %v12901_v54 = vld [vmem:[%s12382_s17 + $0x28] sm:$0xff] }
 0x34c   : > { %v2885_v11 = vpop.f32.mrf.mxu3  ;;  %v4678_v52 = vshrl.u32 %v12901_v54, 16 }
 0x34d   : > { %v3126_v15 = vpop.f32.mrf.mxu0  ;;  %v2938_v41 = vadd.f32 %v2885_v11, %v12482_v0 }
 0x34e   : > { %v3183_v47 = vadd.f32 %v3126_v15, %v2935_v33  ;;  %v3460_v49 = vpop.f32.mrf.mxu1 }
 0x34f   : > { %10423 = vmatmul.msk.bf16.gmra.mxu2 %vm644_vm0, %v5026_v30  ;;  %v4681_v30 = vshll.u32 %v12901_v54, 16 }
 0x350   : > { %10363 = vmatmul.msk.bf16.gmra.mxu0 %vm644_vm0, %v4399_v12  ;;  %v3515_v21 = vadd.f32 %v3458_v18, %v3183_v47  ;;  %v5027_v18 = vrot.slane %v12879_v39, 2  ;;  %v4401_v47 = vsel %vm954_vm1, %v4398_v56, %v4400_v37  ;;  %v4680_v39 = vrot.slane %v4678_v52, 1 }
 0x351   : > { %10267 = vmatmul.msk.bf16.gmra.mxu3 %vm644_vm0, %v4030_v20  ;;  %v4683_v20 = vrot.slane %v4681_v30, 2  ;;  %v4402_v52 = vrot.slane %v12901_v54, 1 }
 0x352   : > { %v3942_v7 = vpop.f32.mrf.mxu2  ;;  %v5028_v38 = vsel %vm1956_vm3, %v5025_v42, %v5027_v18 }
 0x353   : > { %v12896_v29 = vadd.f32 %v3942_v7, %v3515_v21  ;;  %v4684_v42 = vor.u32 %v4683_v20, %v4680_v39 }
 0x354   : > { %v2888_v0 = vpop.f32.mrf.mxu3 }
 0x355   : > { %v3128_v33 = vpop.f32.mrf.mxu0  ;;  %v2939_v2 = vadd.f32 %v2888_v0, %v12492_v24  ;;  %v11484_v24 = vld [vmem:[%s12382_s17 + $0x28] sm:$0xff] }
 0x356   : > { %v3184_v6 = vadd.f32 %v3128_v33, %v2936_v58  ;;  %v3463_v59 = vpop.f32.mrf.mxu1  ;;  %v4031_v58 = vrot.slane %v11484_v24, 1 }
 0x358   : > { %v3516_v10 = vadd.f32 %v3460_v49, %v3184_v6  ;;  %v4032_v21 = vsel %vm954_vm1, %v4029_v45, %v4031_v58 }
 0x359   : > { %10394 = vmatmul.msk.bf16.gmra.mxu1 %vm644_vm0, %v4676_v28 }
 0x35a   : > { %v3944_v31 = vpop.f32.mrf.mxu2 }
 0x35b   : > { %v12908_v11 = vadd.f32 %v3944_v31, %v3516_v10  ;;  %v4685_v10 = vsel %vm1575_vm4, %v4675_v63, %v4684_v42  ;;  %v12923_v31 = vld [vmem:[%s12382_s17 + $0x30] sm:$0xff] }
 0x35c   : > { %v2890_v15 = vpop.f32.mrf.mxu3  ;;  %v4687_v24 = vshrl.u32 %v12923_v31, 16 }
 0x35d   : > { %v3131_v12 = vpop.f32.mrf.mxu0  ;;  %v2940_v49 = vadd.f32 %v2890_v15, %v12503_v35 }
 0x35e   : > { %v3185_v4 = vadd.f32 %v3131_v12, %v2937_v46  ;;  %v3465_v53 = vpop.f32.mrf.mxu1 }
 0x35f   : > { %10424 = vmatmul.msk.bf16.gmra.mxu2 %vm644_vm0, %v5028_v38  ;;  %v4690_v38 = vshll.u32 %v12923_v31, 16 }
 0x360   : > { %10364 = vmatmul.msk.bf16.gmra.mxu0 %vm644_vm0, %v4401_v47  ;;  %v3517_v7 = vadd.f32 %v3463_v59, %v3185_v4  ;;  %v5029_v59 = vrot.slane %v12901_v54, 2  ;;  %v4403_v4 = vsel %vm954_vm1, %v4400_v37, %v4402_v52  ;;  %v4689_v54 = vrot.slane %v4687_v24, 1 }
 0x361   : > { %10268 = vmatmul.msk.bf16.gmra.mxu3 %vm644_vm0, %v4032_v21  ;;  %v4692_v21 = vrot.slane %v4690_v38, 2  ;;  %v4404_v24 = vrot.slane %v12923_v31, 1 }
 0x362   : > { %v3947_v0 = vpop.f32.mrf.mxu2  ;;  %v5030_v63 = vsel %vm1956_vm3, %v5027_v18, %v5029_v59 }
 0x363   : > { %v12918_v33 = vadd.f32 %v3947_v0, %v3517_v7  ;;  %v4693_v18 = vor.u32 %v4692_v21, %v4689_v54 }
 0x364   : > { %v2893_v35 = vpop.f32.mrf.mxu3 }
 0x365   : > { %v3133_v46 = vpop.f32.mrf.mxu0  ;;  %v2941_v56 = vadd.f32 %v2893_v35, %v12513_v14  ;;  %v11485_v14 = vld [vmem:[%s12382_s17 + $0x30] sm:$0xff] }
 0x366   : > { %v3186_v6 = vadd.f32 %v3133_v46, %v2938_v41  ;;  %v3468_v28 = vpop.f32.mrf.mxu1  ;;  %v4033_v41 = vrot.slane %v11485_v14, 1 }
 0x368   : > { %v3518_v45 = vadd.f32 %v3465_v53, %v3186_v6  ;;  %v4034_v7 = vsel %vm954_vm1, %v4031_v58, %v4033_v41 }
 0x369   : > { %10395 = vmatmul.msk.bf16.gmra.mxu1 %vm644_vm0, %v4685_v10 }
 0x36a   : > { %v3949_v30 = vpop.f32.mrf.mxu2 }
 0x36b   : > { %v12930_v15 = vadd.f32 %v3949_v30, %v3518_v45  ;;  %v4694_v45 = vsel %vm1575_vm4, %v4684_v42, %v4693_v18  ;;  %v12945_v30 = vld [vmem:[%s12382_s17 + $0x38] sm:$0xff] }
 0x36c   : > { %v2895_v12 = vpop.f32.mrf.mxu3  ;;  %v4696_v14 = vshrl.u32 %v12945_v30, 16 }
 0x36d   : > { %v3136_v47 = vpop.f32.mrf.mxu0  ;;  %v2942_v53 = vadd.f32 %v2895_v12, %v12524_v50 }
 0x36e   : > { %v3187_v39 = vadd.f32 %v3136_v47, %v2939_v2  ;;  %v3470_v20 = vpop.f32.mrf.mxu1 }
 0x36f   : > { %10425 = vmatmul.msk.bf16.gmra.mxu2 %vm644_vm0, %v5030_v63  ;;  %v4699_v63 = vshll.u32 %v12945_v30, 16 }
 0x370   : > { %10365 = vmatmul.msk.bf16.gmra.mxu0 %vm644_vm0, %v4403_v4  ;;  %v3519_v0 = vadd.f32 %v3468_v28, %v3187_v39  ;;  %v5031_v28 = vrot.slane %v12923_v31, 2  ;;  %v4405_v39 = vsel %vm954_vm1, %v4402_v52, %v4404_v24  ;;  %v4698_v31 = vrot.slane %v4696_v14, 1 }
 0x371   : > { %10269 = vmatmul.msk.bf16.gmra.mxu3 %vm644_vm0, %v4034_v7  ;;  %v4701_v7 = vrot.slane %v4699_v63, 2  ;;  %v4406_v14 = vrot.slane %v12945_v30, 1 }
 0x372   : > { %v3952_v35 = vpop.f32.mrf.mxu2  ;;  %v5032_v42 = vsel %vm1956_vm3, %v5029_v59, %v5031_v28 }
 0x373   : > { %v12940_v46 = vadd.f32 %v3952_v35, %v3519_v0  ;;  %v4702_v59 = vor.u32 %v4701_v7, %v4698_v31 }
 0x374   : > { %v2898_v50 = vpop.f32.mrf.mxu3 }
 0x375   : > { %v3138_v2 = vpop.f32.mrf.mxu0  ;;  %v2943_v37 = vadd.f32 %v2898_v50, %v12534_v1  ;;  %v11486_v1 = vld [vmem:[%s12382_s17 + $0x38] sm:$0xff] }
 0x376   : > { %v3188_v6 = vadd.f32 %v3138_v2, %v2940_v49  ;;  %v3473_v10 = vpop.f32.mrf.mxu1  ;;  %v4035_v49 = vrot.slane %v11486_v1, 1 }
 0x378   : > { %v3520_v58 = vadd.f32 %v3470_v20, %v3188_v6  ;;  %v4036_v0 = vsel %vm954_vm1, %v4033_v41, %v4035_v49 }
 0x379   : > { %10396 = vmatmul.msk.bf16.gmra.mxu1 %vm644_vm0, %v4694_v45 }
 0x37a   : > { %v3954_v38 = vpop.f32.mrf.mxu2 }
 0x37b   : > { %v12952_v12 = vadd.f32 %v3954_v38, %v3520_v58  ;;  %v4703_v58 = vsel %vm1575_vm4, %v4693_v18, %v4702_v59  ;;  %v12967_v38 = vld [vmem:[%s12382_s17 + $0x40] sm:$0xff] }
 0x37c   : > { %v2900_v47 = vpop.f32.mrf.mxu3  ;;  %v4705_v1 = vshrl.u32 %v12967_v38, 16 }
 0x37d   : > { %v3141_v4 = vpop.f32.mrf.mxu0  ;;  %v2944_v20 = vadd.f32 %v2900_v47, %v12545_v25 }
 0x37e   : > { %v3189_v54 = vadd.f32 %v3141_v4, %v2941_v56  ;;  %v3475_v21 = vpop.f32.mrf.mxu1 }
 0x37f   : > { %10426 = vmatmul.msk.bf16.gmra.mxu2 %vm644_vm0, %v5032_v42  ;;  %v4708_v42 = vshll.u32 %v12967_v38, 16 }
 0x380   : > { %10366 = vmatmul.msk.bf16.gmra.mxu0 %vm644_vm0, %v4405_v39  ;;  %v3521_v35 = vadd.f32 %v3473_v10, %v3189_v54  ;;  %v5033_v10 = vrot.slane %v12945_v30, 2  ;;  %v4407_v54 = vsel %vm954_vm1, %v4404_v24, %v4406_v14  ;;  %v4707_v30 = vrot.slane %v4705_v1, 1 }
 0x381   : > { %10270 = vmatmul.msk.bf16.gmra.mxu3 %vm644_vm0, %v4036_v0  ;;  %v4710_v0 = vrot.slane %v4708_v42, 2  ;;  %v4408_v1 = vrot.slane %v12967_v38, 1 }
 0x382   : > { %v3957_v50 = vpop.f32.mrf.mxu2  ;;  %v5034_v18 = vsel %vm1956_vm3, %v5031_v28, %v5033_v10 }
 0x383   : > { %v12962_v2 = vadd.f32 %v3957_v50, %v3521_v35  ;;  %v4711_v28 = vor.u32 %v4710_v0, %v4707_v30 }
 0x384   : > { %v2903_v25 = vpop.f32.mrf.mxu3 }
 0x385   : > { %v3143_v56 = vpop.f32.mrf.mxu0  ;;  %v2945_v52 = vadd.f32 %v2903_v25, %v12559_v55  ;;  %v11487_v55 = vld [vmem:[%s12382_s17 + $0x40] sm:$0xff] }
 0x386   : > { %v3190_v6 = vadd.f32 %v3143_v56, %v2942_v53  ;;  %v3478_v45 = vpop.f32.mrf.mxu1  ;;  %v4037_v53 = vrot.slane %v11487_v55, 1 }
 0x388   : > { %v3522_v41 = vadd.f32 %v3475_v21, %v3190_v6  ;;  %v4038_v35 = vsel %vm954_vm1, %v4035_v49, %v4037_v53 }
 0x389   : > { %10397 = vmatmul.msk.bf16.gmra.mxu1 %vm644_vm0, %v4703_v58 }
 0x38a   : > { %v3959_v63 = vpop.f32.mrf.mxu2 }
 0x38b   : > { %v12974_v47 = vadd.f32 %v3959_v63, %v3522_v41  ;;  %v4712_v41 = vsel %vm1575_vm4, %v4702_v59, %v4711_v28  ;;  %v12989_v63 = vld [vmem:[%s12382_s17 + $0x48] sm:$0xff] }
 0x38c   : > { %v2905_v4 = vpop.f32.mrf.mxu3  ;;  %v4714_v55 = vshrl.u32 %v12989_v63, 16 }
 0x38d   : > { %v3146_v39 = vpop.f32.mrf.mxu0  ;;  %v2946_v21 = vadd.f32 %v2905_v4, %v12574_v60 }
 0x38e   : > { %v3191_v31 = vadd.f32 %v3146_v39, %v2943_v37  ;;  %v3480_v7 = vpop.f32.mrf.mxu1 }
 0x38f   : > { %10427 = vmatmul.msk.bf16.gmra.mxu2 %vm644_vm0, %v5034_v18  ;;  %v4717_v18 = vshll.u32 %v12989_v63, 16 }
 0x390   : > { %10367 = vmatmul.msk.bf16.gmra.mxu0 %vm644_vm0, %v4407_v54  ;;  %v3523_v50 = vadd.f32 %v3478_v45, %v3191_v31  ;;  %v5035_v45 = vrot.slane %v12967_v38, 2  ;;  %v4409_v31 = vsel %vm954_vm1, %v4406_v14, %v4408_v1  ;;  %v4716_v38 = vrot.slane %v4714_v55, 1 }
 0x391   : > { %10271 = vmatmul.msk.bf16.gmra.mxu3 %vm644_vm0, %v4038_v35  ;;  %v4719_v35 = vrot.slane %v4717_v18, 2  ;;  %v5037_v55 = vrot.slane %v12989_v63, 2  ;;  %v4410_v18 = vrot.slane %v12989_v63, 1 }
 0x392   : > { %v3962_v25 = vpop.f32.mrf.mxu2  ;;  %v5036_v59 = vsel %vm1956_vm3, %v5033_v10, %v5035_v45 }
 0x393   : > { %v12984_v56 = vadd.f32 %v3962_v25, %v3523_v50  ;;  %v4720_v10 = vor.u32 %v4719_v35, %v4716_v38 }
 0x394   : > { %v2908_v60 = vpop.f32.mrf.mxu3 }
 0x395   : > { %v3148_v37 = vpop.f32.mrf.mxu0  ;;  %v2947_v24 = vadd.f32 %v2908_v60, %v12590_v62  ;;  %v11488_v62 = vld [vmem:[%s12382_s17 + $0x48] sm:$0xff] }
 0x396   : > { %v3192_v6 = vadd.f32 %v3148_v37, %v2944_v20  ;;  %v3483_v58 = vpop.f32.mrf.mxu1  ;;  %v4039_v20 = vrot.slane %v11488_v62, 1 }
 0x398   : > { %v3524_v49 = vadd.f32 %v3480_v7, %v3192_v6  ;;  %v4040_v50 = vsel %vm954_vm1, %v4037_v53, %v4039_v20  ;;  %v11296_v53 = vld [vmem:[%s14731_s3 + $0xf0] sm:$0xff] }
 0x399   : > { %10398 = vmatmul.msk.bf16.gmra.mxu1 %vm644_vm0, %v4712_v41  ;;  %5505 = vmatpush.bf16.msra.mxu3 %v11296_v53 }
 0x39a   : > { %v3964_v42 = vpop.f32.mrf.mxu2 }
 0x39b   : > { %v12996_v4 = vadd.f32 %v3964_v42, %v3524_v49  ;;  %v4721_v49 = vsel %vm1575_vm4, %v4711_v28, %v4720_v10  ;;  %v13011_v42 = vld [vmem:[%s12382_s17 + $0x50] sm:$0xff] }
 0x39c   : > { %v2910_v39 = vpop.f32.mrf.mxu3  ;;  %v4726_v62 = vshll.u32 %v13011_v42, 16 }
 0x39d   : > { %v3151_v54 = vpop.f32.mrf.mxu0  ;;  %v2948_v7 = vadd.f32 %v2910_v39, %v12606_v19 }
 0x39e   : > { %v3193_v30 = vadd.f32 %v3151_v54, %v2945_v52  ;;  %v3485_v0 = vpop.f32.mrf.mxu1  ;;  %v5038_v54 = vsel %vm1956_vm3, %v5035_v45, %v5037_v55 }
 0x39f   : > { %10428 = vmatmul.msk.bf16.gmra.mxu2 %vm644_vm0, %v5036_v59  ;;  %v11489_v59 = vld [vmem:[%s12382_s17 + $0x50] sm:$0xff] }
 0x3a0   : > { %10368 = vmatmul.msk.bf16.gmra.mxu0 %vm644_vm0, %v4409_v31  ;;  %v3525_v25 = vadd.f32 %v3483_v58, %v3193_v30  ;;  %v4041_v39 = vrot.slane %v11489_v59, 1  ;;  %v5039_v59 = vrot.slane %v13011_v42, 2 }
 0x3a1   : > { %10272 = vmatmul.msk.bf16.gmra.mxu3 %vm644_vm0, %v4040_v50 }
 0x3a2   : > { %v3967_v60 = vpop.f32.mrf.mxu2 }
 0x3a3   : > { %v13006_v37 = vadd.f32 %v3967_v60, %v3525_v25  ;;  %v4728_v25 = vrot.slane %v4726_v62, 2  ;;  %v4042_v60 = vsel %vm954_vm1, %v4039_v20, %v4041_v39  ;;  %v11300_v20 = vld [vmem:[%s14731_s3 + $0x110] sm:$0xff] }
 0x3a4   : > { %v4134_v19 = vpop.f32.mrf.mxu3  ;;  %6132 = vmatpush.bf16.msra.mxu1 %v11300_v20 }
 0x3a5   : > { %v3153_v14 = vpop.f32.mrf.mxu0  ;;  %v4224_v6 = vadd.f32 %v4134_v19, %v12616_v13  ;;  %v4723_v13 = vshrl.u32 %v13011_v42, 16 }
 0x3a6   : > { %v3194_v52 = vadd.f32 %v3153_v14, %v2946_v21  ;;  %v3488_v41 = vpop.f32.mrf.mxu1  ;;  %v11320_v14 = vld [vmem:[%s14731_s3 + $0x120] sm:$0xff] }
 0x3a7   : > { %v4725_v63 = vrot.slane %v4723_v13, 1  ;;  %6464 = vmatpush.bf16.msra.mxu2 %v11320_v14  ;;  %v13045_v13 = vld [vmem:[%s12382_s17 + $0x58] sm:$0xff] }
 0x3a8   : > { %v3526_v58 = vadd.f32 %v3485_v0, %v3194_v52  ;;  %v4411_v0 = vsel %vm954_vm1, %v4408_v1, %v4410_v18 }
 0x3a9   : > { %10399 = vmatmul.msk.bf16.gmra.mxu1 %vm644_vm0, %v4721_v49  ;;  %v4729_v1 = vor.u32 %v4728_v25, %v4725_v63 }
 0x3aa   : > { %v3969_v21 = vpop.f32.mrf.mxu2 }
 0x3ab   : > { %v13021_v28 = vadd.f32 %v3969_v21, %v3526_v58  ;;  %v4730_v21 = vsel %vm1575_vm4, %v4720_v10, %v4729_v1  ;;  %v5040_v10 = vsel %vm1956_vm3, %v5037_v55, %v5039_v59 }
 0x3ac   : > { %v4136_v30 = vpop.f32.mrf.mxu3 }
 0x3ad   : > { %v3156_v31 = vpop.f32.mrf.mxu0  ;;  %v4225_v35 = vadd.f32 %v4136_v30, %v12627_v9  ;;  %v4732_v30 = vshrl.u32 %v13045_v13, 16 }
 0x3ae   : > { %v3195_v38 = vadd.f32 %v3156_v31, %v2947_v24  ;;  %v3490_v50 = vpop.f32.mrf.mxu1  ;;  %v11298_v24 = vld [vmem:[%s14731_s3 + $0x100] sm:$0xff] }
 0x3af   : > { %10429 = vmatmul.msk.bf16.gmra.mxu2 %vm644_vm0, %v5038_v54  ;;  %5885 = vmatpush.bf16.msra.mxu0 %v11298_v24  ;;  %v4412_v54 = vrot.slane %v13011_v42, 1  ;;  %v4734_v42 = vrot.slane %v4732_v30, 1  ;;  %v4414_v30 = vrot.slane %v13045_v13, 1 }
 0x3b0   : > { %10369 = vmatmul.msk.bf16.gmra.mxu0 %vm644_vm0, %v4411_v0  ;;  %v3527_v45 = vadd.f32 %v3488_v41, %v3195_v38  ;;  %v4735_v0 = vshll.u32 %v13045_v13, 16 }
 0x3b1   : > { %10273 = vmatmul.msk.bf16.gmra.mxu3 %vm644_vm0, %v4042_v60 }
 0x3b2   : > { %v3972_v9 = vpop.f32.mrf.mxu2  ;;  %v4737_v24 = vrot.slane %v4735_v0, 2 }
 0x3b3   : > { %v13037_v19 = vadd.f32 %v3972_v9, %v3527_v45 }
 0x3b4   : > { %v4139_v41 = vpop.f32.mrf.mxu3  ;;  %v4738_v55 = vor.u32 %v4737_v24, %v4734_v42 }
 0x3b5   : > { %v3158_v52 = vpop.f32.mrf.mxu0  ;;  %v4226_v53 = vadd.f32 %v4139_v41, %v12637_v26  ;;  %v11490_v26 = vld [vmem:[%s12382_s17 + $0x58] sm:$0xff] }
 0x3b6   : > { %v3196_v49 = vadd.f32 %v3158_v52, %v2948_v7  ;;  %v4887_v58 = vpop.f32.mrf.mxu1  ;;  %v4043_v38 = vrot.slane %v11490_v26, 1 }
 0x3b8   : > { %v3528_v62 = vadd.f32 %v3490_v50, %v3196_v49  ;;  %v4413_v50 = vsel %vm954_vm1, %v4410_v18, %v4412_v54  ;;  %v4044_v9 = vsel %vm954_vm1, %v4041_v39, %v4043_v38 }
 0x3b9   : > { %10400 = vmatmul.msk.bf16.gmra.mxu1 %vm644_vm0, %v4730_v21 }
 0x3ba   : > { %v3974_v31 = vpop.f32.mrf.mxu2 }
 0x3bb   : > { %v13052_v7 = vadd.f32 %v3974_v31, %v3528_v62  ;;  %v4739_v62 = vsel %vm1575_vm4, %v4729_v1, %v4738_v55  ;;  %v13067_v31 = vld [vmem:[%s12382_s17 + $0x60] sm:$0xff] }
 0x3bc   : > { %v4141_v63 = vpop.f32.mrf.mxu3  ;;  %v4741_v26 = vshrl.u32 %v13067_v31, 16 }
 0x3bd   : > { %v4507_v25 = vpop.f32.mrf.mxu0  ;;  %v4227_v60 = vadd.f32 %v4141_v63, %v12648_v34 }
 0x3be   : > { %v4597_v14 = vadd.f32 %v4507_v25, %v4224_v6  ;;  %v4889_v45 = vpop.f32.mrf.mxu1 }
 0x3bf   : > { %10430 = vmatmul.msk.bf16.gmra.mxu2 %vm644_vm0, %v5040_v10  ;;  %v4744_v10 = vshll.u32 %v13067_v31, 16 }
 0x3c0   : > { %10370 = vmatmul.msk.bf16.gmra.mxu0 %vm644_vm0, %v4413_v50  ;;  %v4977_v20 = vadd.f32 %v4887_v58, %v4597_v14  ;;  %v5041_v58 = vrot.slane %v13045_v13, 2  ;;  %v4415_v14 = vsel %vm954_vm1, %v4412_v54, %v4414_v30  ;;  %v4743_v13 = vrot.slane %v4741_v26, 1 }
 0x3c1   : > { %10274 = vmatmul.msk.bf16.gmra.mxu3 %vm644_vm0, %v4044_v9  ;;  %v4746_v9 = vrot.slane %v4744_v10, 2  ;;  %v4416_v26 = vrot.slane %v13067_v31, 1 }
 0x3c2   : > { %v5134_v52 = vpop.f32.mrf.mxu2  ;;  %v5042_v1 = vsel %vm1956_vm3, %v5039_v59, %v5041_v58 }
 0x3c3   : > { %v13062_v41 = vadd.f32 %v5134_v52, %v4977_v20  ;;  %v4747_v59 = vor.u32 %v4746_v9, %v4743_v13 }
 0x3c4   : > { %v4144_v34 = vpop.f32.mrf.mxu3 }
 0x3c5   : > { %v4509_v6 = vpop.f32.mrf.mxu0  ;;  %v4228_v18 = vadd.f32 %v4144_v34, %v12658_v61  ;;  %v11491_v61 = vld [vmem:[%s12382_s17 + $0x60] sm:$0xff] }
 0x3c6   : > { %v4598_v49 = vadd.f32 %v4509_v6, %v4225_v35  ;;  %v4892_v21 = vpop.f32.mrf.mxu1  ;;  %v4045_v35 = vrot.slane %v11491_v61, 1 }
 0x3c8   : > { %v4978_v39 = vadd.f32 %v4889_v45, %v4598_v49  ;;  %v4046_v20 = vsel %vm954_vm1, %v4043_v38, %v4045_v35 }
 0x3c9   : > { %10401 = vmatmul.msk.bf16.gmra.mxu1 %vm644_vm0, %v4739_v62 }
 0x3ca   : > { %v5136_v0 = vpop.f32.mrf.mxu2 }
 0x3cb   : > { %v13074_v63 = vadd.f32 %v5136_v0, %v4978_v39  ;;  %v4748_v39 = vsel %vm1575_vm4, %v4738_v55, %v4747_v59  ;;  %v13089_v0 = vld [vmem:[%s12382_s17 + $0x68] sm:$0xff] }
 0x3cc   : > { %v4146_v25 = vpop.f32.mrf.mxu3  ;;  %v4750_v61 = vshrl.u32 %v13089_v0, 16 }
 0x3cd   : > { %v4512_v50 = vpop.f32.mrf.mxu0  ;;  %v4229_v45 = vadd.f32 %v4146_v25, %v12669_v43 }
 0x3ce   : > { %v4599_v42 = vadd.f32 %v4512_v50, %v4226_v53  ;;  %v4894_v24 = vpop.f32.mrf.mxu1 }
 0x3cf   : > { %10431 = vmatmul.msk.bf16.gmra.mxu2 %vm644_vm0, %v5042_v1  ;;  %v4753_v1 = vshll.u32 %v13089_v0, 16 }
 0x3d0   : > { %10371 = vmatmul.msk.bf16.gmra.mxu0 %vm644_vm0, %v4415_v14  ;;  %v4979_v52 = vadd.f32 %v4892_v21, %v4599_v42  ;;  %v5043_v21 = vrot.slane %v13067_v31, 2  ;;  %v4417_v42 = vsel %vm954_vm1, %v4414_v30, %v4416_v26  ;;  %v4752_v31 = vrot.slane %v4750_v61, 1 }
 0x3d1   : > { %10275 = vmatmul.msk.bf16.gmra.mxu3 %vm644_vm0, %v4046_v20  ;;  %v4755_v20 = vrot.slane %v4753_v1, 2  ;;  %v4418_v61 = vrot.slane %v13089_v0, 1 }
 0x3d2   : > { %v5139_v34 = vpop.f32.mrf.mxu2  ;;  %v5044_v55 = vsel %vm1956_vm3, %v5041_v58, %v5043_v21 }
 0x3d3   : > { %v13084_v6 = vadd.f32 %v5139_v34, %v4979_v52  ;;  %v4756_v58 = vor.u32 %v4755_v20, %v4752_v31 }
 0x3d4   : > { %v4149_v43 = vpop.f32.mrf.mxu3 }
 0x3d5   : > { %v4514_v53 = vpop.f32.mrf.mxu0  ;;  %v4230_v54 = vadd.f32 %v4149_v43, %v12679_v22  ;;  %v11492_v22 = vld [vmem:[%s12382_s17 + $0x68] sm:$0xff] }
 0x3d6   : > { %v4600_v49 = vadd.f32 %v4514_v53, %v4227_v60  ;;  %v4897_v62 = vpop.f32.mrf.mxu1  ;;  %v4047_v60 = vrot.slane %v11492_v22, 1 }
 0x3d8   : > { %v4980_v38 = vadd.f32 %v4894_v24, %v4600_v49  ;;  %v4048_v52 = vsel %vm954_vm1, %v4045_v35, %v4047_v60 }
 0x3d9   : > { %10402 = vmatmul.msk.bf16.gmra.mxu1 %vm644_vm0, %v4748_v39 }
 0x3da   : > { %v5141_v10 = vpop.f32.mrf.mxu2 }
 0x3db   : > { %v13096_v25 = vadd.f32 %v5141_v10, %v4980_v38  ;;  %v4757_v38 = vsel %vm1575_vm4, %v4747_v59, %v4756_v58  ;;  %v13111_v10 = vld [vmem:[%s12382_s17 + $0x70] sm:$0xff] }
 0x3dc   : > { %v4151_v50 = vpop.f32.mrf.mxu3  ;;  %v4759_v22 = vshrl.u32 %v13111_v10, 16 }
 0x3dd   : > { %v4517_v14 = vpop.f32.mrf.mxu0  ;;  %v4231_v24 = vadd.f32 %v4151_v50, %v12690_v48 }
 0x3de   : > { %v4601_v13 = vadd.f32 %v4517_v14, %v4228_v18  ;;  %v4899_v9 = vpop.f32.mrf.mxu1 }
 0x3df   : > { %10432 = vmatmul.msk.bf16.gmra.mxu2 %vm644_vm0, %v5044_v55  ;;  %v4762_v55 = vshll.u32 %v13111_v10, 16 }
 0x3e0   : > { %10372 = vmatmul.msk.bf16.gmra.mxu0 %vm644_vm0, %v4417_v42  ;;  %v4981_v34 = vadd.f32 %v4897_v62, %v4601_v13  ;;  %v5045_v62 = vrot.slane %v13089_v0, 2  ;;  %v4419_v13 = vsel %vm954_vm1, %v4416_v26, %v4418_v61  ;;  %v4761_v0 = vrot.slane %v4759_v22, 1  ;;  %v14745_v26 = vld [vmem:[#allocation3_spill] sm:$0xff]  ;;  %v13133_v22 = vld [vmem:[%s12382_s17 + $0x78] sm:$0xff] }
 0x3e1   : > { %10276 = vmatmul.msk.bf16.gmra.mxu3 %vm644_vm0, %v4048_v52  ;;  %v4764_v52 = vrot.slane %v4762_v55, 2  ;;  %v4420_v55 = vrot.slane %v13111_v10, 1 }
 0x3e2   : > { %v5144_v43 = vpop.f32.mrf.mxu2  ;;  %v5046_v59 = vsel %vm1956_vm3, %v5043_v21, %v5045_v62 }
 0x3e3   : > { %v13106_v53 = vadd.f32 %v5144_v43, %v4981_v34  ;;  %v4765_v21 = vor.u32 %v4764_v52, %v4761_v0 }
 0x3e4   : > { %v4154_v48 = vpop.f32.mrf.mxu3 }
 0x3e5   : > { %v4519_v18 = vpop.f32.mrf.mxu0  ;;  %v4232_v30 = vadd.f32 %v4154_v48, %v12700_v3  ;;  %v11493_v3 = vld [vmem:[%s12382_s17 + $0x70] sm:$0xff] }
 0x3e6   : > { %v4602_v49 = vadd.f32 %v4519_v18, %v4229_v45  ;;  %v4902_v39 = vpop.f32.mrf.mxu1  ;;  %v4049_v45 = vrot.slane %v11493_v3, 1 }
 0x3e8   : > { %v4982_v35 = vadd.f32 %v4899_v9, %v4602_v49  ;;  %v4050_v34 = vsel %vm954_vm1, %v4047_v60, %v4049_v45 }
 0x3e9   : > { %10403 = vmatmul.msk.bf16.gmra.mxu1 %vm644_vm0, %v4757_v38 }
 0x3ea   : > { %v5146_v1 = vpop.f32.mrf.mxu2 }
 0x3eb   : > { %v13118_v50 = vadd.f32 %v5146_v1, %v4982_v35  ;;  %v4766_v1 = vsel %vm1575_vm4, %v4756_v58, %v4765_v21 }
 0x3ec   : > { %v4156_v14 = vpop.f32.mrf.mxu3 }
 0x3ed   : > { %v4522_v42 = vpop.f32.mrf.mxu0  ;;  %v4233_v9 = vadd.f32 %v4156_v14, %v12711_v5  ;;  %v4771_v14 = vshll.u32 %v13133_v22, 16 }
 0x3ee   : > { %v4603_v31 = vadd.f32 %v4522_v42, %v4230_v54  ;;  %v4904_v20 = vpop.f32.mrf.mxu1 }
 0x3ef   : > { %10433 = vmatmul.msk.bf16.gmra.mxu2 %vm644_vm0, %v5046_v59  ;;  %v4768_v59 = vshrl.u32 %v13133_v22, 16 }
 0x3f0   : > { %10373 = vmatmul.msk.bf16.gmra.mxu0 %vm644_vm0, %v4419_v13  ;;  %v4983_v43 = vadd.f32 %v4902_v39, %v4603_v31  ;;  %v5047_v39 = vrot.slane %v13111_v10, 2 }
 0x3f1   : > { %10277 = vmatmul.msk.bf16.gmra.mxu3 %vm644_vm0, %v4050_v34  ;;  %v4770_v10 = vrot.slane %v4768_v59, 1  ;;  %v13155_v59 = vld [vmem:[%s12382_s17 + $0x80] sm:$0xff] }
 0x3f2   : > { %v5149_v48 = vpop.f32.mrf.mxu2  ;;  %v5048_v58 = vsel %vm1956_vm3, %v5045_v62, %v5047_v39 }
 0x3f3   : > { %v13128_v18 = vadd.f32 %v5149_v48, %v4983_v43  ;;  %v4773_v48 = vrot.slane %v4771_v14, 2  ;;  %v4422_v14 = vrot.slane %v13133_v22, 1 }
 0x3f4   : > { %v4159_v5 = vpop.f32.mrf.mxu3 }
 0x3f5   : > { %v4524_v54 = vpop.f32.mrf.mxu0  ;;  %v4234_v49 = vadd.f32 %v4159_v5, %v14745_v26  ;;  %v4774_v62 = vor.u32 %v4773_v48, %v4770_v10 }
 0x3f6   : > { %v4604_v38 = vadd.f32 %v4524_v54, %v4231_v24  ;;  %v4907_v35 = vpop.f32.mrf.mxu1  ;;  %v11494_v24 = vld [vmem:[%s12382_s17 + $0x78] sm:$0xff] }
 0x3f7   : > { %v4051_v13 = vrot.slane %v11494_v24, 1 }
 0x3f8   : > { %v4984_v60 = vadd.f32 %v4904_v20, %v4604_v38  ;;  %v4421_v20 = vsel %vm954_vm1, %v4418_v61, %v4420_v55 }
 0x3f9   : > { %10404 = vmatmul.msk.bf16.gmra.mxu1 %vm644_vm0, %v4766_v1  ;;  %v4052_v5 = vsel %vm954_vm1, %v4049_v45, %v4051_v13 }
 0x3fa   : > { %v5151_v3 = vpop.f32.mrf.mxu2 }
 0x3fb   : > { %v13140_v42 = vadd.f32 %v5151_v3, %v4984_v60  ;;  %v4775_v3 = vsel %vm1575_vm4, %v4765_v21, %v4774_v62 }
 0x3fc   : > { %v4161_v31 = vpop.f32.mrf.mxu3 }
 0x3fd   : > { %v4527_v0 = vpop.f32.mrf.mxu0  ;;  %v4235_v52 = vadd.f32 %v4161_v31, %v12733_v23  ;;  %v4780_v31 = vshll.u32 %v13155_v59, 16 }
 0x3fe   : > { %v4605_v34 = vadd.f32 %v4527_v0, %v4232_v30  ;;  %v4909_v43 = vpop.f32.mrf.mxu1 }
 0x3ff   : > { %10434 = vmatmul.msk.bf16.gmra.mxu2 %vm644_vm0, %v5048_v58  ;;  %v4777_v58 = vshrl.u32 %v13155_v59, 16 }
 0x400   : > { %10374 = vmatmul.msk.bf16.gmra.mxu0 %vm644_vm0, %v4421_v20  ;;  %v4985_v54 = vadd.f32 %v4907_v35, %v4605_v34  ;;  %v5049_v35 = vrot.slane %v13133_v22, 2 }
 0x401   : > { %10278 = vmatmul.msk.bf16.gmra.mxu3 %vm644_vm0, %v4052_v5  ;;  %v4779_v22 = vrot.slane %v4777_v58, 1  ;;  %v13177_v58 = vld [vmem:[%s12382_s17 + $0x88] sm:$0xff] }
 0x402   : > { %v5154_v26 = vpop.f32.mrf.mxu2  ;;  %v5050_v21 = vsel %vm1956_vm3, %v5047_v39, %v5049_v35 }
 0x403   : > { %v13150_v38 = vadd.f32 %v5154_v26, %v4985_v54  ;;  %v4782_v54 = vrot.slane %v4780_v31, 2  ;;  %v4424_v31 = vrot.slane %v13155_v59, 1 }
 0x404   : > { %v4164_v23 = vpop.f32.mrf.mxu3 }
 0x405   : > { %v4529_v30 = vpop.f32.mrf.mxu0  ;;  %v4236_v61 = vadd.f32 %v4164_v23, %v12745_v17  ;;  %v11495_v17 = vld [vmem:[%s12382_s17 + $0x80] sm:$0xff]  ;;  %v4783_v39 = vor.u32 %v4782_v54, %v4779_v22 }
 0x406   : > { %v4606_v1 = vadd.f32 %v4529_v30, %v4233_v9  ;;  %v4912_v60 = vpop.f32.mrf.mxu1  ;;  %v4053_v9 = vrot.slane %v11495_v17, 1 }
 0x408   : > { %v4986_v45 = vadd.f32 %v4909_v43, %v4606_v1  ;;  %v4423_v43 = vsel %vm954_vm1, %v4420_v55, %v4422_v14  ;;  %v4054_v26 = vsel %vm954_vm1, %v4051_v13, %v4053_v9 }
 0x409   : > { %10405 = vmatmul.msk.bf16.gmra.mxu1 %vm644_vm0, %v4775_v3 }
 0x40a   : > { %v5156_v24 = vpop.f32.mrf.mxu2 }
 0x40b   : > { %v13162_v0 = vadd.f32 %v5156_v24, %v4986_v45  ;;  %v4784_v24 = vsel %vm1575_vm4, %v4774_v62, %v4783_v39 }
 0x40c   : > { %v4166_v20 = vpop.f32.mrf.mxu3 }
 0x40d   : > { %v4532_v34 = vpop.f32.mrf.mxu0  ;;  %v4237_v10 = vadd.f32 %v4166_v20, %v12753_v27  ;;  %v4789_v20 = vshll.u32 %v13177_v58, 16 }
 0x40e   : > { %v4607_v48 = vadd.f32 %v4532_v34, %v4234_v49  ;;  %v4914_v5 = vpop.f32.mrf.mxu1 }
 0x40f   : > { %10435 = vmatmul.msk.bf16.gmra.mxu2 %vm644_vm0, %v5050_v21  ;;  %v4786_v21 = vshrl.u32 %v13177_v58, 16 }
 0x410   : > { %10375 = vmatmul.msk.bf16.gmra.mxu0 %vm644_vm0, %v4423_v43  ;;  %v4987_v23 = vadd.f32 %v4912_v60, %v4607_v48  ;;  %v5051_v60 = vrot.slane %v13155_v59, 2 }
 0x411   : > { %10279 = vmatmul.msk.bf16.gmra.mxu3 %vm644_vm0, %v4054_v26  ;;  %v4788_v59 = vrot.slane %v4786_v21, 1  ;;  %v13201_v21 = vld [vmem:[%s12382_s17 + $0x90] sm:$0xff] }
 0x412   : > { %v5159_v30 = vpop.f32.mrf.mxu2  ;;  %v5052_v62 = vsel %vm1956_vm3, %v5049_v35, %v5051_v60 }
 0x413   : > { %v13172_v1 = vadd.f32 %v5159_v30, %v4987_v23  ;;  %v4791_v23 = vrot.slane %v4789_v20, 2  ;;  %v4426_v20 = vrot.slane %v13177_v58, 1 }
 0x414   : > { %v4169_v27 = vpop.f32.mrf.mxu3 }
 0x415   : > { %v4534_v49 = vpop.f32.mrf.mxu0  ;;  %v4238_v55 = vadd.f32 %v4169_v27, %v12767_v32  ;;  %v11496_v32 = vld [vmem:[%s12382_s17 + $0x88] sm:$0xff]  ;;  %v4792_v35 = vor.u32 %v4791_v23, %v4788_v59 }
 0x416   : > { %v4608_v3 = vadd.f32 %v4534_v49, %v4235_v52  ;;  %v4917_v45 = vpop.f32.mrf.mxu1  ;;  %v4055_v52 = vrot.slane %v11496_v32, 1 }
 0x418   : > { %v4988_v13 = vadd.f32 %v4914_v5, %v4608_v3  ;;  %v4425_v5 = vsel %vm954_vm1, %v4422_v14, %v4424_v31  ;;  %v4056_v30 = vsel %vm954_vm1, %v4053_v9, %v4055_v52 }
 0x419   : > { %10406 = vmatmul.msk.bf16.gmra.mxu1 %vm644_vm0, %v4784_v24 }
 0x41a   : > { %v5161_v17 = vpop.f32.mrf.mxu2 }
 0x41b   : > { %v13184_v34 = vadd.f32 %v5161_v17, %v4988_v13  ;;  %v4793_v17 = vsel %vm1575_vm4, %v4783_v39, %v4792_v35 }
 0x41c   : > { %v4171_v43 = vpop.f32.mrf.mxu3 }
 0x41d   : > { %v4537_v48 = vpop.f32.mrf.mxu0  ;;  %v4239_v22 = vadd.f32 %v4171_v43, %v12782_v16 }
 0x41e   : > { %v4609_v54 = vadd.f32 %v4537_v48, %v4236_v61  ;;  %v4919_v26 = vpop.f32.mrf.mxu1 }
 0x41f   : > { %10436 = vmatmul.msk.bf16.gmra.mxu2 %vm644_vm0, %v5052_v62  ;;  %v4795_v62 = vshrl.u32 %v13201_v21, 16 }
 0x420   : > { %10376 = vmatmul.msk.bf16.gmra.mxu0 %vm644_vm0, %v4425_v5  ;;  %v4989_v27 = vadd.f32 %v4917_v45, %v4609_v54  ;;  %v5053_v45 = vrot.slane %v13177_v58, 2 }
 0x421   : > { %10280 = vmatmul.msk.bf16.gmra.mxu3 %vm644_vm0, %v4056_v30  ;;  %v4797_v30 = vrot.slane %v4795_v62, 1 }
 0x422   : > { %v5164_v49 = vpop.f32.mrf.mxu2  ;;  %v5054_v48 = vsel %vm1956_vm3, %v5051_v60, %v5053_v45  ;;  %v5260_v60 = vld [vmem:[%s12382_s17 + $0x10] sm:$0xc] }
 0x423   : > { %v13194_v3 = vadd.f32 %v5164_v49, %v4989_v27 }
 0x424   : > { %v4174_v14 = vpop.f32.mrf.mxu3 }
 0x425   : > { %v4539_v16 = vpop.f32.mrf.mxu0  ;;  %v13197_v61 = vadd.f32 %v4174_v14, %v12812_v36  ;;  %v4798_v36 = vshll.u32 %v13201_v21, 16  ;;  %v4633_v14 = vld [vmem:[%s12382_s17 + $0x98] sm:$0x3] }
 0x426   : > { %v4610_v24 = vadd.f32 %v4539_v16, %v4237_v10  ;;  %v4922_v13 = vpop.f32.mrf.mxu1  ;;  %v14746_v10 = vld [vmem:[#allocation2_spill] sm:$0xff] }
 0x427   : > { %v4057_v39 = vrot.slane %v14746_v10, 1  ;;  %v4800_v27 = vrot.slane %v4798_v36, 2 }
 0x428   : > { %v4990_v9 = vadd.f32 %v4919_v26, %v4610_v24  ;;  %v4427_v26 = vsel %vm954_vm1, %v4424_v31, %v4426_v20  ;;  %v13222_v24 = vld [vmem:[%s12382_s17 + $0x14] sm:$0xf] }
 0x429   : > { %10407 = vmatmul.msk.bf16.gmra.mxu1 %vm644_vm0, %v4793_v17  ;;  %v4058_v49 = vsel %vm954_vm1, %v4055_v52, %v4057_v39 }
 0x42a   : > { %v5166_v32 = vpop.f32.mrf.mxu2 }
 0x42b   : > { %v13208_v43 = vadd.f32 %v5166_v32, %v4990_v9  ;;  %v5339_v9 = vunpack.c.l.b16 %v5260_v60  ;;  %v5340_v32 = vunpack.c.l.b16 %v13222_v24 }
 0x42c   : > { %v4176_v5 = vpop.f32.mrf.mxu3 }
 0x42d   : > { %v4542_v54 = vpop.f32.mrf.mxu0  ;;  %v13214_v58 = vadd.f32 %v4176_v5, %v12835_v57  ;;  %v4801_v57 = vor.u32 %v4800_v27, %v4797_v30  ;;  %v11340_v5 = vld [vmem:[%s14731_s3 + $0x138] sm:$0xff]  ;;  %v5055_v30 = vrot.slane %v13201_v21, 2 }
 0x42e   : > { %v4611_v59 = vadd.f32 %v4542_v54, %v4238_v55  ;;  %v4924_v23 = vpop.f32.mrf.mxu1  ;;  %v4640_v55 = vunpack.c.l.b16 %v4633_v14  ;;  %v13236_v54 = vld [vmem:[%s12382_s17 + $0x18] sm:$0xff]  ;;  %6947 = vmatpush.bf16.msrb.mxu3 %v11340_v5 }
 0x42f   : > { %10437 = vmatmul.msk.bf16.gmra.mxu2 %vm644_vm0, %v5054_v48  ;;  %v4802_v39 = vsel %vm1575_vm4, %v4792_v35, %v4801_v57  ;;  %v5056_v60 = vsel %vm1956_vm3, %v5053_v45, %v5055_v30  ;;  %v11363_v45 = vld [vmem:[%s14731_s3 + $0x168] sm:$0xff] }
 0x430   : > { %10377 = vmatmul.msk.bf16.gmra.mxu0 %vm644_vm0, %v4427_v26  ;;  %v4991_v16 = vadd.f32 %v4922_v13, %v4611_v59  ;;  %v4641_v48 = vpack.c.b16 %v4640_v55, %v4640_v55  ;;  %v13240_v26 = vpack.c.b16 %v5340_v32, %v5339_v9  ;;  %7947 = vmatpush.bf16.msrb.mxu2 %v11363_v45 }
 0x431   : > { %10281 = vmatmul.msk.bf16.gmra.mxu3 %vm644_vm0, %v4058_v49 }
 0x432   : > { %v5169_v31 = vpop.f32.mrf.mxu2  ;;  %v4804_v35 = vshrl.u32 %v4641_v48, 16  ;;  %v4807_v27 = vshll.u32 %v4641_v48, 16  ;;  %v5395_v14 = vrot.slane %v13240_v26, 2 }
 0x433   : > { %v13225_v17 = vadd.f32 %v5169_v31, %v4991_v16  ;;  %v5396_v16 = vrot.slane %v13236_v54, 2 }
 0x434   : > { %v4179_v62 = vpop.f32.mrf.mxu3 }
 0x435   : > { %v4544_v52 = vpop.f32.mrf.mxu0  ;;  %v13229_v36 = vadd.f32 %v4179_v62, %v12849_v51  ;;  %v4428_v51 = vrot.slane %v13201_v21, 1  ;;  %v5397_v5 = vsel %vm1956_vm3, %v5395_v14, %v5396_v16 }
 0x436   : > { %v4612_v13 = vadd.f32 %v4544_v52, %v4239_v22  ;;  %v4927_v10 = vpop.f32.mrf.mxu1  ;;  %v4806_v52 = vrot.slane %v4804_v35, 1 }
 0x437   : > { %v4429_v55 = vsel %vm954_vm1, %v4426_v20, %v4428_v51 }
 0x438   : > { %v4992_v59 = vadd.f32 %v4924_v23, %v4612_v13  ;;  %v4809_v13 = vrot.slane %v4807_v27, 2 }
 0x439   : > { %10408 = vmatmul.msk.bf16.gmra.mxu1 %vm644_vm0, %v4802_v39  ;;  %v4296_v39 = vld [vmem:[%s12382_s17 + $0x98] sm:$0x1] }
 0x43a   : > { %v5171_v22 = vpop.f32.mrf.mxu2 }
 0x43b   : > { %v13245_v49 = vadd.f32 %v5171_v22, %v4992_v59  ;;  %v4810_v22 = vor.u32 %v4809_v13, %v4806_v52  ;;  %v13278_v52 = vld [vmem:[%s12382_s17 + $0x20] sm:$0xff]  ;;  %v6013_v13 = vld [vmem:[%s12382_s17 + $0x10] sm:$0x8] }
 0x43c   : > { %v4181_v23 = vpop.f32.mrf.mxu3 }
 0x43d   : > { %v4547_v31 = vpop.f32.mrf.mxu0  ;;  %v13252_v9 = vadd.f32 %v4181_v23, %v12863_v44  ;;  %v11342_v44 = vld [vmem:[%s14731_s3 + $0x148] sm:$0xff] }
 0x43e   : > { %v4613_v21 = vadd.f32 %v4547_v31, %v13197_v61  ;;  %v4929_v62 = vpop.f32.mrf.mxu1  ;;  %v4375_v61 = vunpack.c.l.b16 %v4296_v39  ;;  %7194 = vmatpush.bf16.msrb.mxu0 %v11342_v44  ;;  %v6020_v44 = vunpack.c.l.b16 %v6013_v13 }
 0x43f   : > { %10438 = vmatmul.msk.bf16.gmra.mxu2 %vm644_vm0, %v5056_v60 }
 0x440   : > { %10378 = vmatmul.msk.bf16.gmra.mxu0 %vm644_vm0, %v4429_v55  ;;  %v4993_v20 = vadd.f32 %v4927_v10, %v4613_v21  ;;  %v11361_v10 = vld [vmem:[%s14731_s3 + $0x158] sm:$0xff]  ;;  %v4394_v60 = vpack.c.b16 %v4375_v61, %v4375_v61  ;;  %v4811_v21 = vsel %vm1575_vm4, %v4801_v57, %v4810_v22 }
 0x441   : > { %10520 = vmatmul.msk.bf16.vlgmr.msra.gmra.mxu3 %vm644_vm0, %v5397_v5  ;;  %7567 = vmatpush.bf16.msrb.mxu1 %v11361_v10  ;;  %v5057_v5 = vrot.slane %v4641_v48, 2 }
 0x442   : > { %v5174_v59 = vpop.f32.mrf.mxu2  ;;  %v4430_v45 = vrot.slane %v4394_v60, 1  ;;  %v5643_v60 = vshrl.u32 %v13240_v26, 16 }
 0x443   : > { %v13267_v35 = vadd.f32 %v5174_v59, %v4993_v20 }
 0x444   : > { %v4184_v27 = vpop.f32.mrf.mxu3  ;;  %v4431_v22 = vsel %vm954_vm1, %v4428_v51, %v4430_v45  ;;  %v5646_v51 = vshll.u32 %v13240_v26, 16  ;;  %v5645_v13 = vrot.slane %v5643_v60, 2 }
 0x445   : > { %v4549_v14 = vpop.f32.mrf.mxu0  ;;  %v13273_v23 = vadd.f32 %v4184_v27, %v12874_v8  ;;  %v5398_v8 = vrot.slane %v13278_v52, 2  ;;  %v6021_v27 = vpack.c.b16 %v5340_v32, %v6020_v44  ;;  %v6023_v32 = vrot.slane %v13236_v54, 3 }
 0x446   : > { %v4614_v31 = vadd.f32 %v4549_v14, %v13214_v58  ;;  %v4932_v55 = vpop.f32.mrf.mxu1  ;;  %v5058_v58 = vsel %vm1956_vm3, %v5055_v30, %v5057_v5 }
 0x447   : > { %v5399_v14 = vsel %vm1956_vm3, %v5396_v16, %v5398_v8  ;;  %v6022_v24 = vrot.slane %v6021_v27, 3 }
 0x448   : > { %v4994_v39 = vadd.f32 %v4929_v62, %v4614_v31  ;;  %v5651_v31 = vshrl.u32 %v13236_v54, 16 }
 0x449   : > { %10409 = vmatmul.msk.bf16.gmra.mxu1 %vm644_vm0, %v4811_v21 }
 0x44a   : > { %v5176_v20 = vpop.f32.mrf.mxu2  ;;  %v5653_v26 = vrot.slane %v5651_v31, 2 }
 0x44b   : > { %v13282_v61 = vadd.f32 %v5176_v20, %v4994_v39  ;;  %v5648_v39 = vrot.slane %v5646_v51, 3 }
 0x44c   : > { %v4186_v59 = vpop.f32.mrf.mxu3 }
 0x44d   : > { %v4552_v57 = vpop.f32.mrf.mxu0  ;;  %v4245_v48 = vadd.f32 %v4186_v59, %v12886_v40  ;;  %v5654_v40 = vshll.u32 %v13236_v54, 16  ;;  %v13307_v59 = vld [vmem:[%s12382_s17 + $0x28] sm:$0xff] }
 0x44e   : > { %v4615_v62 = vadd.f32 %v4552_v57, %v13229_v36  ;;  %v4934_v10 = vpop.f32.mrf.mxu1  ;;  %v5649_v57 = vor.u32 %v5648_v39, %v5645_v13  ;;  %v5400_v27 = vrot.slane %v13307_v59, 2 }
 0x44f   : > { %10439 = vmatmul.msk.bf16.gmra.mxu2 %vm644_vm0, %v5058_v58  ;;  %v5656_v5 = vrot.slane %v5654_v40, 3  ;;  %v6024_v58 = vsel %vm2958_vm6, %v6022_v24, %v6023_v32  ;;  %v5660_v24 = vshrl.u32 %v13278_v52, 16 }
 0x450   : > { %10379 = vmatmul.msk.bf16.gmra.mxu0 %vm644_vm0, %v4431_v22  ;;  %v4995_v30 = vadd.f32 %v4932_v55, %v4615_v62 }
 0x451   : > { %10521 = vmatmul.msk.bf16.gmra.mxu3 %vm644_vm0, %v5399_v14  ;;  %v5657_v22 = vor.u32 %v5656_v5, %v5653_v26  ;;  %v5662_v26 = vrot.slane %v5660_v24, 2  ;;  %v5669_v24 = vshrl.u32 %v13307_v59, 16 }
 0x452   : > { %v5179_v36 = vpop.f32.mrf.mxu2 }
 0x453   : > { %v13301_v16 = vadd.f32 %v5179_v36, %v4995_v30  ;;  %v5658_v60 = vsel %vm2577_vm5, %v5649_v57, %v5657_v22 }
 0x454   : > { %v4189_v55 = vpop.f32.mrf.mxu3 }
 0x455   : > { %v4554_v21 = vpop.f32.mrf.mxu0  ;;  %v4246_v45 = vadd.f32 %v4189_v55, %v12896_v29  ;;  %v5663_v55 = vshll.u32 %v13278_v52, 16 }
 0x456   : > { %v4616_v20 = vadd.f32 %v4554_v21, %v13252_v9  ;;  %v4937_v44 = vpop.f32.mrf.mxu1  ;;  %v11302_v9 = vld [vmem:[%s13312_s30] sm:$0xff] }
 0x458   : > { %v4996_v54 = vadd.f32 %v4934_v10, %v4616_v20  ;;  %v5401_v10 = vsel %vm1956_vm3, %v5398_v8, %v5400_v27  ;;  %v5665_v8 = vrot.slane %v5663_v55, 3  ;;  %v5672_v55 = vshll.u32 %v13307_v59, 16 }
 0x459   : > { %10580 = vmatmul.msk.bf16.vlgmr.msra.gmra.mxu1 %vm644_vm0, %v6024_v58 }
 0x45a   : > { %v5181_v62 = vpop.f32.mrf.mxu2 }
 0x45b   : > { %v13315_v29 = vadd.f32 %v5181_v62, %v4996_v54  ;;  %v13334_v54 = vld [vmem:[%s12382_s17 + $0x30] sm:$0xff]  ;;  %v5666_v62 = vor.u32 %v5665_v8, %v5662_v26 }
 0x45c   : > { %v4191_v14 = vpop.f32.mrf.mxu3 }
 0x45d   : > { %v4557_v30 = vpop.f32.mrf.mxu0  ;;  %v4247_v51 = vadd.f32 %v4191_v14, %v12908_v11  ;;  %v6025_v11 = vrot.slane %v13278_v52, 3  ;;  %v11303_v14 = vld [vmem:[%s13312_s30 + $0x8] sm:$0xff] }
 0x45e   : > { %v4617_v31 = vadd.f32 %v4557_v30, %v13273_v23  ;;  %v4939_v40 = vpop.f32.mrf.mxu1  ;;  %v5402_v30 = vrot.slane %v13334_v54, 2 }
 0x45f   : > { %10682 = vmatmul.msk.bf16.vlgmr.msra.gmra.mxu2 %vm644_vm0, %v11302_v9  ;;  %v6026_v58 = vsel %vm2958_vm6, %v6023_v32, %v6025_v11 }
 0x460   : > { %10550 = vmatmul.msk.bf16.vlgmr.msra.gmra.mxu0 %vm644_vm0, %v5658_v60  ;;  %v4997_v36 = vadd.f32 %v4937_v44, %v4617_v31 }
 0x461   : > { %10522 = vmatmul.msk.bf16.gmra.mxu3 %vm644_vm0, %v5401_v10 }
 0x462   : > { %v5184_v21 = vpop.f32.mrf.mxu2 }
 0x463   : > { %v13329_v23 = vadd.f32 %v5184_v21, %v4997_v36 }
 0x464   : > { %v4194_v13 = vpop.f32.mrf.mxu3 }
 0x465   : > { %v4559_v39 = vpop.f32.mrf.mxu0  ;;  %v4248_v5 = vadd.f32 %v4194_v13, %v12918_v33  ;;  %v5667_v33 = vsel %vm2577_vm5, %v5657_v22, %v5666_v62  ;;  %v6027_v22 = vrot.slane %v13307_v59, 3 }
 0x466   : > { %v4618_v20 = vadd.f32 %v4559_v39, %v4245_v48  ;;  %v4942_v44 = vpop.f32.mrf.mxu1  ;;  %v5671_v39 = vrot.slane %v5669_v24, 2  ;;  %v5678_v24 = vshrl.u32 %v13334_v54, 16 }
 0x468   : > { %v4998_v57 = vadd.f32 %v4939_v40, %v4618_v20  ;;  %v5403_v40 = vsel %vm1956_vm3, %v5400_v27, %v5402_v30  ;;  %v5674_v27 = vrot.slane %v5672_v55, 3  ;;  %v5681_v55 = vshll.u32 %v13334_v54, 16 }
 0x469   : > { %10581 = vmatmul.msk.bf16.gmra.mxu1 %vm644_vm0, %v6026_v58  ;;  %v13355_v58 = vld [vmem:[%s12382_s17 + $0x38] sm:$0xff] }
 0x46a   : > { %v5186_v52 = vpop.f32.mrf.mxu2 }
 0x46b   : > { %v13337_v9 = vadd.f32 %v5186_v52, %v4998_v57  ;;  %v5675_v52 = vor.u32 %v5674_v27, %v5671_v39 }
 0x46c   : > { %v4196_v60 = vpop.f32.mrf.mxu3 }
 0x46d   : > { %v4562_v31 = vpop.f32.mrf.mxu0  ;;  %v4249_v48 = vadd.f32 %v4196_v60, %v12930_v15  ;;  %v11304_v60 = vld [vmem:[%s13312_s30 + $0x10] sm:$0xff] }
 0x46e   : > { %v4619_v10 = vadd.f32 %v4562_v31, %v4246_v45  ;;  %v4944_v32 = vpop.f32.mrf.mxu1  ;;  %v5404_v31 = vrot.slane %v13355_v58, 2 }
 0x46f   : > { %10683 = vmatmul.msk.bf16.gmra.mxu2 %vm644_vm0, %v11303_v14 }
 0x470   : > { %10551 = vmatmul.msk.bf16.gmra.mxu0 %vm644_vm0, %v5667_v33  ;;  %v4999_v36 = vadd.f32 %v4942_v44, %v4619_v10  ;;  %v6028_v44 = vsel %vm2958_vm6, %v6025_v11, %v6027_v22 }
 0x471   : > { %10523 = vmatmul.msk.bf16.gmra.mxu3 %vm644_vm0, %v5403_v40 }
 0x472   : > { %v5189_v21 = vpop.f32.mrf.mxu2 }
 0x473   : > { %v13350_v15 = vadd.f32 %v5189_v21, %v4999_v36 }
 0x474   : > { %v4199_v45 = vpop.f32.mrf.mxu3 }
 0x475   : > { %v4564_v13 = vpop.f32.mrf.mxu0  ;;  %v4250_v26 = vadd.f32 %v4199_v45, %v12940_v46  ;;  %v5676_v46 = vsel %vm2577_vm5, %v5666_v62, %v5675_v52  ;;  %v6029_v62 = vrot.slane %v13334_v54, 3 }
 0x476   : > { %v4620_v8 = vadd.f32 %v4564_v13, %v4247_v51  ;;  %v4947_v20 = vpop.f32.mrf.mxu1  ;;  %v5680_v13 = vrot.slane %v5678_v24, 2  ;;  %v5687_v24 = vshrl.u32 %v13355_v58, 16 }
 0x478   : > { %v5000_v57 = vadd.f32 %v4944_v32, %v4620_v8  ;;  %v5405_v32 = vsel %vm1956_vm3, %v5402_v30, %v5404_v31  ;;  %v5683_v30 = vrot.slane %v5681_v55, 3  ;;  %v5690_v55 = vshll.u32 %v13355_v58, 16 }
 0x479   : > { %10582 = vmatmul.msk.bf16.gmra.mxu1 %vm644_vm0, %v6028_v44  ;;  %v13376_v44 = vld [vmem:[%s12382_s17 + $0x40] sm:$0xff] }
 0x47a   : > { %v5191_v59 = vpop.f32.mrf.mxu2 }
 0x47b   : > { %v13358_v14 = vadd.f32 %v5191_v59, %v5000_v57  ;;  %v5684_v59 = vor.u32 %v5683_v30, %v5680_v13 }
 0x47c   : > { %v4201_v33 = vpop.f32.mrf.mxu3 }
 0x47d   : > { %v4567_v10 = vpop.f32.mrf.mxu0  ;;  %v4251_v51 = vadd.f32 %v4201_v33, %v12952_v12  ;;  %v11305_v33 = vld [vmem:[%s13312_s30 + $0x18] sm:$0xff] }
 0x47e   : > { %v4621_v40 = vadd.f32 %v4567_v10, %v4248_v5  ;;  %v4949_v11 = vpop.f32.mrf.mxu1  ;;  %v5406_v10 = vrot.slane %v13376_v44, 2 }
 0x47f   : > { %10684 = vmatmul.msk.bf16.gmra.mxu2 %vm644_vm0, %v11304_v60 }
 0x480   : > { %10552 = vmatmul.msk.bf16.gmra.mxu0 %vm644_vm0, %v5676_v46  ;;  %v5001_v36 = vadd.f32 %v4947_v20, %v4621_v40  ;;  %v6030_v20 = vsel %vm2958_vm6, %v6027_v22, %v6029_v62 }
 0x481   : > { %10524 = vmatmul.msk.bf16.gmra.mxu3 %vm644_vm0, %v5405_v32 }
 0x482   : > { %v5194_v21 = vpop.f32.mrf.mxu2 }
 0x483   : > { %v13371_v12 = vadd.f32 %v5194_v21, %v5001_v36 }
 0x484   : > { %v4204_v5 = vpop.f32.mrf.mxu3 }
 0x485   : > { %v4569_v45 = vpop.f32.mrf.mxu0  ;;  %v4252_v39 = vadd.f32 %v4204_v5, %v12962_v2  ;;  %v5685_v2 = vsel %vm2577_vm5, %v5675_v52, %v5684_v59  ;;  %v6031_v52 = vrot.slane %v13355_v58, 3 }
 0x486   : > { %v4622_v27 = vadd.f32 %v4569_v45, %v4249_v48  ;;  %v4952_v8 = vpop.f32.mrf.mxu1  ;;  %v5689_v45 = vrot.slane %v5687_v24, 2  ;;  %v5696_v24 = vshrl.u32 %v13376_v44, 16 }
 0x488   : > { %v5002_v57 = vadd.f32 %v4949_v11, %v4622_v27  ;;  %v5407_v11 = vsel %vm1956_vm3, %v5404_v31, %v5406_v10  ;;  %v5692_v31 = vrot.slane %v5690_v55, 3  ;;  %v5699_v55 = vshll.u32 %v13376_v44, 16 }
 0x489   : > { %10583 = vmatmul.msk.bf16.gmra.mxu1 %vm644_vm0, %v6030_v20  ;;  %v13397_v20 = vld [vmem:[%s12382_s17 + $0x48] sm:$0xff] }
 0x48a   : > { %v5196_v54 = vpop.f32.mrf.mxu2 }
 0x48b   : > { %v13379_v60 = vadd.f32 %v5196_v54, %v5002_v57  ;;  %v5693_v54 = vor.u32 %v5692_v31, %v5689_v45 }
 0x48c   : > { %v4206_v46 = vpop.f32.mrf.mxu3 }
 0x48d   : > { %v4572_v40 = vpop.f32.mrf.mxu0  ;;  %v4253_v48 = vadd.f32 %v4206_v46, %v12974_v47  ;;  %v11306_v46 = vld [vmem:[%s13312_s30 + $0x20] sm:$0xff] }
 0x48e   : > { %v4623_v32 = vadd.f32 %v4572_v40, %v4250_v26  ;;  %v4954_v22 = vpop.f32.mrf.mxu1  ;;  %v5408_v40 = vrot.slane %v13397_v20, 2 }
 0x48f   : > { %10685 = vmatmul.msk.bf16.gmra.mxu2 %vm644_vm0, %v11305_v33 }
 0x490   : > { %10553 = vmatmul.msk.bf16.gmra.mxu0 %vm644_vm0, %v5685_v2  ;;  %v5003_v36 = vadd.f32 %v4952_v8, %v4623_v32  ;;  %v6032_v8 = vsel %vm2958_vm6, %v6029_v62, %v6031_v52 }
 0x491   : > { %10525 = vmatmul.msk.bf16.gmra.mxu3 %vm644_vm0, %v5407_v11 }
 0x492   : > { %v5199_v21 = vpop.f32.mrf.mxu2 }
 0x493   : > { %v13392_v47 = vadd.f32 %v5199_v21, %v5003_v36 }
 0x494   : > { %v4209_v26 = vpop.f32.mrf.mxu3 }
 0x495   : > { %v4574_v5 = vpop.f32.mrf.mxu0  ;;  %v4254_v13 = vadd.f32 %v4209_v26, %v12984_v56  ;;  %v5694_v56 = vsel %vm2577_vm5, %v5684_v59, %v5693_v54  ;;  %v6033_v59 = vrot.slane %v13376_v44, 3 }
 0x496   : > { %v4624_v30 = vadd.f32 %v4574_v5, %v4251_v51  ;;  %v4957_v27 = vpop.f32.mrf.mxu1  ;;  %v5698_v5 = vrot.slane %v5696_v24, 2  ;;  %v5705_v24 = vshrl.u32 %v13397_v20, 16 }
 0x498   : > { %v5004_v57 = vadd.f32 %v4954_v22, %v4624_v30  ;;  %v5409_v22 = vsel %vm1956_vm3, %v5406_v10, %v5408_v40  ;;  %v5701_v10 = vrot.slane %v5699_v55, 3  ;;  %v5708_v55 = vshll.u32 %v13397_v20, 16 }
 0x499   : > { %10584 = vmatmul.msk.bf16.gmra.mxu1 %vm644_vm0, %v6032_v8  ;;  %v13418_v8 = vld [vmem:[%s12382_s17 + $0x50] sm:$0xff] }
 0x49a   : > { %v5201_v58 = vpop.f32.mrf.mxu2 }
 0x49b   : > { %v13400_v33 = vadd.f32 %v5201_v58, %v5004_v57  ;;  %v5702_v58 = vor.u32 %v5701_v10, %v5698_v5 }
 0x49c   : > { %v4211_v2 = vpop.f32.mrf.mxu3 }
 0x49d   : > { %v4577_v32 = vpop.f32.mrf.mxu0  ;;  %v4255_v51 = vadd.f32 %v4211_v2, %v12996_v4  ;;  %v11307_v2 = vld [vmem:[%s13312_s30 + $0x28] sm:$0xff] }
 0x49e   : > { %v4625_v11 = vadd.f32 %v4577_v32, %v4252_v39  ;;  %v4959_v62 = vpop.f32.mrf.mxu1  ;;  %v5410_v32 = vrot.slane %v13418_v8, 2 }
 0x49f   : > { %10686 = vmatmul.msk.bf16.gmra.mxu2 %vm644_vm0, %v11306_v46 }
 0x4a0   : > { %10554 = vmatmul.msk.bf16.gmra.mxu0 %vm644_vm0, %v5694_v56  ;;  %v5005_v36 = vadd.f32 %v4957_v27, %v4625_v11  ;;  %v6034_v27 = vsel %vm2958_vm6, %v6031_v52, %v6033_v59 }
 0x4a1   : > { %10526 = vmatmul.msk.bf16.gmra.mxu3 %vm644_vm0, %v5409_v22 }
 0x4a2   : > { %v5204_v21 = vpop.f32.mrf.mxu2 }
 0x4a3   : > { %v13413_v4 = vadd.f32 %v5204_v21, %v5005_v36 }
 0x4a4   : > { %v4214_v39 = vpop.f32.mrf.mxu3 }
 0x4a5   : > { %v4579_v26 = vpop.f32.mrf.mxu0  ;;  %v4256_v45 = vadd.f32 %v4214_v39, %v13006_v37  ;;  %v5703_v37 = vsel %vm2577_vm5, %v5693_v54, %v5702_v58  ;;  %v6035_v54 = vrot.slane %v13397_v20, 3 }
 0x4a6   : > { %v4626_v31 = vadd.f32 %v4579_v26, %v4253_v48  ;;  %v4962_v30 = vpop.f32.mrf.mxu1  ;;  %v5707_v26 = vrot.slane %v5705_v24, 2  ;;  %v5714_v24 = vshrl.u32 %v13418_v8, 16 }
 0x4a8   : > { %v5006_v57 = vadd.f32 %v4959_v62, %v4626_v31  ;;  %v5411_v62 = vsel %vm1956_vm3, %v5408_v40, %v5410_v32  ;;  %v5710_v40 = vrot.slane %v5708_v55, 3  ;;  %v5717_v55 = vshll.u32 %v13418_v8, 16 }
 0x4a9   : > { %10585 = vmatmul.msk.bf16.gmra.mxu1 %vm644_vm0, %v6034_v27  ;;  %v13439_v27 = vld [vmem:[%s12382_s17 + $0x58] sm:$0xff] }
 0x4aa   : > { %v5206_v44 = vpop.f32.mrf.mxu2 }
 0x4ab   : > { %v13421_v46 = vadd.f32 %v5206_v44, %v5006_v57  ;;  %v5711_v44 = vor.u32 %v5710_v40, %v5707_v26 }
 0x4ac   : > { %v4216_v56 = vpop.f32.mrf.mxu3 }
 0x4ad   : > { %v4582_v11 = vpop.f32.mrf.mxu0  ;;  %v4257_v48 = vadd.f32 %v4216_v56, %v13021_v28  ;;  %v11308_v56 = vld [vmem:[%s13312_s30 + $0x30] sm:$0xff] }
 0x4ae   : > { %v4627_v22 = vadd.f32 %v4582_v11, %v4254_v13  ;;  %v4964_v52 = vpop.f32.mrf.mxu1  ;;  %v5412_v11 = vrot.slane %v13439_v27, 2 }
 0x4af   : > { %10687 = vmatmul.msk.bf16.gmra.mxu2 %vm644_vm0, %v11307_v2 }
 0x4b0   : > { %10555 = vmatmul.msk.bf16.gmra.mxu0 %vm644_vm0, %v5703_v37  ;;  %v5007_v36 = vadd.f32 %v4962_v30, %v4627_v22  ;;  %v6036_v30 = vsel %vm2958_vm6, %v6033_v59, %v6035_v54 }
 0x4b1   : > { %10527 = vmatmul.msk.bf16.gmra.mxu3 %vm644_vm0, %v5411_v62 }
 0x4b2   : > { %v5209_v21 = vpop.f32.mrf.mxu2 }
 0x4b3   : > { %v13434_v28 = vadd.f32 %v5209_v21, %v5007_v36 }
 0x4b4   : > { %v4219_v13 = vpop.f32.mrf.mxu3 }
 0x4b5   : > { %v4584_v39 = vpop.f32.mrf.mxu0  ;;  %v4258_v5 = vadd.f32 %v4219_v13, %v13037_v19  ;;  %v5712_v19 = vsel %vm2577_vm5, %v5702_v58, %v5711_v44  ;;  %v6037_v58 = vrot.slane %v13418_v8, 3 }
 0x4b6   : > { %v4628_v10 = vadd.f32 %v4584_v39, %v4255_v51  ;;  %v4967_v31 = vpop.f32.mrf.mxu1  ;;  %v5716_v39 = vrot.slane %v5714_v24, 2  ;;  %v11362_v24 = vld [vmem:[%s14731_s3 + $0x160] sm:$0xff] }
 0x4b7   : > { %7948 = vmatpush.bf16.msrb.mxu2 %v11362_v24 }
 0x4b8   : > { %v5008_v57 = vadd.f32 %v4964_v52, %v4628_v10  ;;  %v5413_v52 = vsel %vm1956_vm3, %v5410_v32, %v5412_v11  ;;  %v5719_v32 = vrot.slane %v5717_v55, 3 }
 0x4b9   : > { %10586 = vmatmul.msk.bf16.gmra.mxu1 %vm644_vm0, %v6036_v30  ;;  %v11339_v30 = vld [vmem:[%s14731_s3 + $0x130] sm:$0xff] }
 0x4ba   : > { %v5211_v20 = vpop.f32.mrf.mxu2  ;;  %6948 = vmatpush.bf16.msrb.mxu3 %v11339_v30 }
 0x4bb   : > { %v13442_v2 = vadd.f32 %v5211_v20, %v5008_v57  ;;  %v13463_v57 = vld [vmem:[%s12382_s17 + $0x60] sm:$0xff]  ;;  %v5720_v20 = vor.u32 %v5719_v32, %v5716_v39 }
 0x4bc   : > { %v4221_v37 = vpop.f32.mrf.mxu3 }
 0x4bd   : > { %v4587_v22 = vpop.f32.mrf.mxu0  ;;  %v4259_v51 = vadd.f32 %v4221_v37, %v13052_v7 }
 0x4be   : > { %v4629_v62 = vadd.f32 %v4587_v22, %v4256_v45  ;;  %v4969_v59 = vpop.f32.mrf.mxu1 }
 0x4bf   : > { %10688 = vmatmul.msk.bf16.gmra.mxu2 %vm644_vm0, %v11308_v56 }
 0x4c0   : > { %10556 = vmatmul.msk.bf16.gmra.mxu0 %vm644_vm0, %v5712_v19  ;;  %v5009_v36 = vadd.f32 %v4967_v31, %v4629_v62  ;;  %v6038_v31 = vsel %vm2958_vm6, %v6035_v54, %v6037_v58  ;;  %v5721_v54 = vsel %vm2577_vm5, %v5711_v44, %v5720_v20 }
 0x4c1   : > { %10528 = vmatmul.msk.bf16.gmra.mxu3 %vm644_vm0, %v5413_v52 }
 0x4c2   : > { %v5214_v21 = vpop.f32.mrf.mxu2 }
 0x4c3   : > { %v13455_v7 = vadd.f32 %v5214_v21, %v5009_v36  ;;  %v11341_v21 = vld [vmem:[%s14731_s3 + $0x140] sm:$0xff] }
 0x4c4   : > { %v5507_v13 = vpop.f32.mrf.mxu3  ;;  %7195 = vmatpush.bf16.msrb.mxu0 %v11341_v21 }
 0x4c5   : > { %v4589_v45 = vpop.f32.mrf.mxu0  ;;  %v5597_v40 = vadd.f32 %v5507_v13, %v13062_v41  ;;  %v5414_v41 = vrot.slane %v13463_v57, 2  ;;  %v11360_v13 = vld [vmem:[%s14731_s3 + $0x150] sm:$0xff] }
 0x4c6   : > { %v4630_v26 = vadd.f32 %v4589_v45, %v4257_v48  ;;  %v4972_v10 = vpop.f32.mrf.mxu1  ;;  %v11309_v48 = vld [vmem:[%s13312_s30 + $0x38] sm:$0xff]  ;;  %7568 = vmatpush.bf16.msrb.mxu1 %v11360_v13 }
 0x4c8   : > { %v5010_v8 = vadd.f32 %v4969_v59, %v4630_v26  ;;  %v5415_v59 = vsel %vm1956_vm3, %v5412_v11, %v5414_v41  ;;  %v6039_v11 = vrot.slane %v13439_v27, 3 }
 0x4c9   : > { %10587 = vmatmul.msk.bf16.gmra.mxu1 %vm644_vm0, %v6038_v31 }
 0x4ca   : > { %v5216_v56 = vpop.f32.mrf.mxu2 }
 0x4cb   : > { %v13466_v37 = vadd.f32 %v5216_v56, %v5010_v8  ;;  %v6040_v56 = vsel %vm2958_vm6, %v6037_v58, %v6039_v11 }
 0x4cc   : > { %v5509_v19 = vpop.f32.mrf.mxu3 }
 0x4cd   : > { %v4592_v22 = vpop.f32.mrf.mxu0  ;;  %v5598_v52 = vadd.f32 %v5509_v19, %v13074_v63  ;;  %v5726_v63 = vshll.u32 %v13439_v27, 16 }
 0x4ce   : > { %v4631_v62 = vadd.f32 %v4592_v22, %v4258_v5  ;;  %v4974_v36 = vpop.f32.mrf.mxu1  ;;  %v5723_v5 = vshrl.u32 %v13439_v27, 16  ;;  %v13493_v27 = vld [vmem:[%s12382_s17 + $0x68] sm:$0xff] }
 0x4cf   : > { %10689 = vmatmul.msk.bf16.gmra.mxu2 %vm644_vm0, %v11309_v48 }
 0x4d0   : > { %10557 = vmatmul.msk.bf16.gmra.mxu0 %vm644_vm0, %v5721_v54  ;;  %v5011_v55 = vadd.f32 %v4972_v10, %v4631_v62  ;;  %v5725_v26 = vrot.slane %v5723_v5, 2  ;;  %v5728_v10 = vrot.slane %v5726_v63, 3  ;;  %v11310_v62 = vld [vmem:[%s13312_s30 + $0x40] sm:$0xff]  ;;  %v5732_v63 = vshrl.u32 %v13463_v57, 16 }
 0x4d1   : > { %10529 = vmatmul.msk.bf16.gmra.mxu3 %vm644_vm0, %v5415_v59  ;;  %v5416_v59 = vrot.slane %v13493_v27, 2 }
 0x4d2   : > { %v5219_v44 = vpop.f32.mrf.mxu2  ;;  %v5729_v22 = vor.u32 %v5728_v10, %v5725_v26 }
 0x4d3   : > { %v13485_v45 = vadd.f32 %v5219_v44, %v5011_v55  ;;  %v5735_v44 = vshll.u32 %v13463_v57, 16 }
 0x4d4   : > { %v5512_v32 = vpop.f32.mrf.mxu3 }
 0x4d5   : > { %v4594_v39 = vpop.f32.mrf.mxu0  ;;  %v5599_v30 = vadd.f32 %v5512_v32, %v13084_v6  ;;  %v5734_v32 = vrot.slane %v5732_v63, 2  ;;  %v5741_v63 = vshrl.u32 %v13493_v27, 16 }
 0x4d6   : > { %v4632_v31 = vadd.f32 %v4594_v39, %v4259_v51  ;;  %v6134_v8 = vpop.f32.mrf.mxu1  ;;  %v5730_v51 = vsel %vm2577_vm5, %v5720_v20, %v5729_v22  ;;  %v6041_v20 = vrot.slane %v13463_v57, 3 }
 0x4d8   : > { %v5012_v48 = vadd.f32 %v4974_v36, %v4632_v31  ;;  %v5417_v36 = vsel %vm1956_vm3, %v5414_v41, %v5416_v59  ;;  %v5737_v41 = vrot.slane %v5735_v44, 3  ;;  %v5744_v44 = vshll.u32 %v13493_v27, 16 }
 0x4d9   : > { %10588 = vmatmul.msk.bf16.gmra.mxu1 %vm644_vm0, %v6040_v56  ;;  %v13514_v56 = vld [vmem:[%s12382_s17 + $0x70] sm:$0xff] }
 0x4da   : > { %v5221_v19 = vpop.f32.mrf.mxu2 }
 0x4db   : > { %v13496_v54 = vadd.f32 %v5221_v19, %v5012_v48  ;;  %v5738_v19 = vor.u32 %v5737_v41, %v5734_v32 }
 0x4dc   : > { %v5514_v24 = vpop.f32.mrf.mxu3 }
 0x4dd   : > { %v5887_v55 = vpop.f32.mrf.mxu0  ;;  %v5600_v6 = vadd.f32 %v5514_v24, %v13096_v25  ;;  %v11311_v24 = vld [vmem:[%s13312_s30 + $0x48] sm:$0xff] }
 0x4de   : > { %v5977_v21 = vadd.f32 %v5887_v55, %v5597_v40  ;;  %v6136_v58 = vpop.f32.mrf.mxu1  ;;  %v5418_v55 = vrot.slane %v13514_v56, 2 }
 0x4df   : > { %10690 = vmatmul.msk.bf16.gmra.mxu2 %vm644_vm0, %v11310_v62 }
 0x4e0   : > { %10558 = vmatmul.msk.bf16.gmra.mxu0 %vm644_vm0, %v5730_v51  ;;  %v6224_v5 = vadd.f32 %v6134_v8, %v5977_v21  ;;  %v6042_v8 = vsel %vm2958_vm6, %v6039_v11, %v6041_v20 }
 0x4e1   : > { %10530 = vmatmul.msk.bf16.gmra.mxu3 %vm644_vm0, %v5417_v36 }
 0x4e2   : > { %v6466_v13 = vpop.f32.mrf.mxu2 }
 0x4e3   : > { %v13509_v25 = vadd.f32 %v6466_v13, %v6224_v5 }
 0x4e4   : > { %v5517_v40 = vpop.f32.mrf.mxu3 }
 0x4e5   : > { %v5889_v39 = vpop.f32.mrf.mxu0  ;;  %v5601_v26 = vadd.f32 %v5517_v40, %v13106_v53  ;;  %v5739_v53 = vsel %vm2577_vm5, %v5729_v22, %v5738_v19  ;;  %v6043_v22 = vrot.slane %v13493_v27, 3 }
 0x4e6   : > { %v5978_v10 = vadd.f32 %v5889_v39, %v5598_v52  ;;  %v6139_v31 = vpop.f32.mrf.mxu1  ;;  %v5743_v39 = vrot.slane %v5741_v63, 2  ;;  %v5750_v63 = vshrl.u32 %v13514_v56, 16 }
 0x4e8   : > { %v6225_v48 = vadd.f32 %v6136_v58, %v5978_v10  ;;  %v5419_v58 = vsel %vm1956_vm3, %v5416_v59, %v5418_v55  ;;  %v5746_v59 = vrot.slane %v5744_v44, 3  ;;  %v5753_v44 = vshll.u32 %v13514_v56, 16 }
 0x4e9   : > { %10589 = vmatmul.msk.bf16.gmra.mxu1 %vm644_vm0, %v6042_v8  ;;  %v13535_v8 = vld [vmem:[%s12382_s17 + $0x78] sm:$0xff] }
 0x4ea   : > { %v6468_v57 = vpop.f32.mrf.mxu2 }
 0x4eb   : > { %v13517_v62 = vadd.f32 %v6468_v57, %v6225_v48  ;;  %v5747_v57 = vor.u32 %v5746_v59, %v5743_v39 }
 0x4ec   : > { %v5519_v51 = vpop.f32.mrf.mxu3 }
 0x4ed   : > { %v5892_v21 = vpop.f32.mrf.mxu0  ;;  %v5602_v52 = vadd.f32 %v5519_v51, %v13118_v50  ;;  %v11312_v51 = vld [vmem:[%s13312_s30 + $0x50] sm:$0xff] }
 0x4ee   : > { %v5979_v36 = vadd.f32 %v5892_v21, %v5599_v30  ;;  %v6141_v11 = vpop.f32.mrf.mxu1  ;;  %v5420_v21 = vrot.slane %v13535_v8, 2 }
 0x4ef   : > { %10691 = vmatmul.msk.bf16.gmra.mxu2 %vm644_vm0, %v11311_v24 }
 0x4f0   : > { %10559 = vmatmul.msk.bf16.gmra.mxu0 %vm644_vm0, %v5739_v53  ;;  %v6226_v5 = vadd.f32 %v6139_v31, %v5979_v36  ;;  %v6044_v31 = vsel %vm2958_vm6, %v6041_v20, %v6043_v22 }
 0x4f1   : > { %10531 = vmatmul.msk.bf16.gmra.mxu3 %vm644_vm0, %v5419_v58 }
 0x4f2   : > { %v6471_v13 = vpop.f32.mrf.mxu2 }
 0x4f3   : > { %v13530_v50 = vadd.f32 %v6471_v13, %v6226_v5 }
 0x4f4   : > { %v5522_v30 = vpop.f32.mrf.mxu3 }
 0x4f5   : > { %v5894_v40 = vpop.f32.mrf.mxu0  ;;  %v5603_v32 = vadd.f32 %v5522_v30, %v13128_v18  ;;  %v5748_v18 = vsel %vm2577_vm5, %v5738_v19, %v5747_v57  ;;  %v6045_v19 = vrot.slane %v13514_v56, 3 }
 0x4f6   : > { %v5980_v41 = vadd.f32 %v5894_v40, %v5600_v6  ;;  %v6144_v10 = vpop.f32.mrf.mxu1  ;;  %v5752_v40 = vrot.slane %v5750_v63, 2  ;;  %v5759_v63 = vshrl.u32 %v13535_v8, 16 }
 0x4f8   : > { %v6227_v48 = vadd.f32 %v6141_v11, %v5980_v41  ;;  %v5421_v11 = vsel %vm1956_vm3, %v5418_v55, %v5420_v21  ;;  %v5755_v55 = vrot.slane %v5753_v44, 3  ;;  %v5762_v44 = vshll.u32 %v13535_v8, 16 }
 0x4f9   : > { %10590 = vmatmul.msk.bf16.gmra.mxu1 %vm644_vm0, %v6044_v31  ;;  %v13556_v31 = vld [vmem:[%s12382_s17 + $0x80] sm:$0xff] }
 0x4fa   : > { %v6473_v27 = vpop.f32.mrf.mxu2 }
 0x4fb   : > { %v13538_v24 = vadd.f32 %v6473_v27, %v6227_v48  ;;  %v5756_v27 = vor.u32 %v5755_v55, %v5752_v40 }
 0x4fc   : > { %v5524_v53 = vpop.f32.mrf.mxu3 }
 0x4fd   : > { %v5897_v36 = vpop.f32.mrf.mxu0  ;;  %v5604_v6 = vadd.f32 %v5524_v53, %v13140_v42  ;;  %v11313_v53 = vld [vmem:[%s13312_s30 + $0x58] sm:$0xff] }
 0x4fe   : > { %v5981_v58 = vadd.f32 %v5897_v36, %v5601_v26  ;;  %v6146_v20 = vpop.f32.mrf.mxu1  ;;  %v5422_v36 = vrot.slane %v13556_v31, 2 }
 0x4ff   : > { %10692 = vmatmul.msk.bf16.gmra.mxu2 %vm644_vm0, %v11312_v51 }
 0x500   : > { %10560 = vmatmul.msk.bf16.gmra.mxu0 %vm644_vm0, %v5748_v18  ;;  %v6228_v5 = vadd.f32 %v6144_v10, %v5981_v58  ;;  %v6046_v10 = vsel %vm2958_vm6, %v6043_v22, %v6045_v19 }
 0x501   : > { %10532 = vmatmul.msk.bf16.gmra.mxu3 %vm644_vm0, %v5421_v11 }
 0x502   : > { %v6476_v13 = vpop.f32.mrf.mxu2 }
 0x503   : > { %v13551_v42 = vadd.f32 %v6476_v13, %v6228_v5 }
 0x504   : > { %v5527_v26 = vpop.f32.mrf.mxu3 }
 0x505   : > { %v5899_v30 = vpop.f32.mrf.mxu0  ;;  %v5605_v39 = vadd.f32 %v5527_v26, %v13150_v38  ;;  %v5757_v38 = vsel %vm2577_vm5, %v5747_v57, %v5756_v27  ;;  %v6047_v57 = vrot.slane %v13535_v8, 3 }
 0x506   : > { %v5982_v59 = vadd.f32 %v5899_v30, %v5602_v52  ;;  %v6149_v41 = vpop.f32.mrf.mxu1  ;;  %v5761_v30 = vrot.slane %v5759_v63, 2  ;;  %v5768_v63 = vshrl.u32 %v13556_v31, 16 }
 0x508   : > { %v6229_v48 = vadd.f32 %v6146_v20, %v5982_v59  ;;  %v5423_v20 = vsel %vm1956_vm3, %v5420_v21, %v5422_v36  ;;  %v5764_v21 = vrot.slane %v5762_v44, 3  ;;  %v5771_v44 = vshll.u32 %v13556_v31, 16 }
 0x509   : > { %10591 = vmatmul.msk.bf16.gmra.mxu1 %vm644_vm0, %v6046_v10  ;;  %v13577_v10 = vld [vmem:[%s12382_s17 + $0x88] sm:$0xff] }
 0x50a   : > { %v6478_v56 = vpop.f32.mrf.mxu2 }
 0x50b   : > { %v13559_v51 = vadd.f32 %v6478_v56, %v6229_v48  ;;  %v5765_v56 = vor.u32 %v5764_v21, %v5761_v30 }
 0x50c   : > { %v5529_v18 = vpop.f32.mrf.mxu3 }
 0x50d   : > { %v5902_v58 = vpop.f32.mrf.mxu0  ;;  %v5606_v52 = vadd.f32 %v5529_v18, %v13162_v0  ;;  %v11314_v18 = vld [vmem:[%s13312_s30 + $0x60] sm:$0xff] }
 0x50e   : > { %v5983_v11 = vadd.f32 %v5902_v58, %v5603_v32  ;;  %v6151_v22 = vpop.f32.mrf.mxu1  ;;  %v5424_v58 = vrot.slane %v13577_v10, 2 }
 0x50f   : > { %10693 = vmatmul.msk.bf16.gmra.mxu2 %vm644_vm0, %v11313_v53 }
 0x510   : > { %10561 = vmatmul.msk.bf16.gmra.mxu0 %vm644_vm0, %v5757_v38  ;;  %v6230_v5 = vadd.f32 %v6149_v41, %v5983_v11  ;;  %v6048_v41 = vsel %vm2958_vm6, %v6045_v19, %v6047_v57 }
 0x511   : > { %10533 = vmatmul.msk.bf16.gmra.mxu3 %vm644_vm0, %v5423_v20 }
 0x512   : > { %v6481_v13 = vpop.f32.mrf.mxu2 }
 0x513   : > { %v13572_v0 = vadd.f32 %v6481_v13, %v6230_v5 }
 0x514   : > { %v5532_v32 = vpop.f32.mrf.mxu3 }
 0x515   : > { %v5904_v26 = vpop.f32.mrf.mxu0  ;;  %v5607_v40 = vadd.f32 %v5532_v32, %v13172_v1  ;;  %v5766_v1 = vsel %vm2577_vm5, %v5756_v27, %v5765_v56  ;;  %v6049_v27 = vrot.slane %v13556_v31, 3 }
 0x516   : > { %v5984_v55 = vadd.f32 %v5904_v26, %v5604_v6  ;;  %v6154_v59 = vpop.f32.mrf.mxu1  ;;  %v5770_v26 = vrot.slane %v5768_v63, 2  ;;  %v5777_v63 = vshrl.u32 %v13577_v10, 16 }
 0x518   : > { %v6231_v48 = vadd.f32 %v6151_v22, %v5984_v55  ;;  %v5425_v22 = vsel %vm1956_vm3, %v5422_v36, %v5424_v58  ;;  %v5773_v36 = vrot.slane %v5771_v44, 3  ;;  %v5780_v44 = vshll.u32 %v13577_v10, 16 }
 0x519   : > { %10592 = vmatmul.msk.bf16.gmra.mxu1 %vm644_vm0, %v6048_v41  ;;  %v13598_v41 = vld [vmem:[%s12382_s17 + $0x90] sm:$0xff] }
 0x51a   : > { %v6483_v8 = vpop.f32.mrf.mxu2 }
 0x51b   : > { %v13580_v53 = vadd.f32 %v6483_v8, %v6231_v48  ;;  %v5774_v8 = vor.u32 %v5773_v36, %v5770_v26 }
 0x51c   : > { %v5534_v38 = vpop.f32.mrf.mxu3 }
 0x51d   : > { %v5907_v11 = vpop.f32.mrf.mxu0  ;;  %v5608_v6 = vadd.f32 %v5534_v38, %v13184_v34  ;;  %v11315_v38 = vld [vmem:[%s13312_s30 + $0x68] sm:$0xff] }
 0x51e   : > { %v5985_v20 = vadd.f32 %v5907_v11, %v5605_v39  ;;  %v6156_v19 = vpop.f32.mrf.mxu1  ;;  %v5426_v11 = vrot.slane %v13598_v41, 2 }
 0x51f   : > { %10694 = vmatmul.msk.bf16.gmra.mxu2 %vm644_vm0, %v11314_v18 }
 0x520   : > { %10562 = vmatmul.msk.bf16.gmra.mxu0 %vm644_vm0, %v5766_v1  ;;  %v6232_v5 = vadd.f32 %v6154_v59, %v5985_v20  ;;  %v6050_v59 = vsel %vm2958_vm6, %v6047_v57, %v6049_v27 }
 0x521   : > { %10534 = vmatmul.msk.bf16.gmra.mxu3 %vm644_vm0, %v5425_v22 }
 0x522   : > { %v6486_v13 = vpop.f32.mrf.mxu2 }
 0x523   : > { %v13593_v34 = vadd.f32 %v6486_v13, %v6232_v5 }
 0x524   : > { %v5537_v39 = vpop.f32.mrf.mxu3 }
 0x525   : > { %v5909_v32 = vpop.f32.mrf.mxu0  ;;  %v5609_v30 = vadd.f32 %v5537_v39, %v13194_v3  ;;  %v5775_v3 = vsel %vm2577_vm5, %v5765_v56, %v5774_v8  ;;  %v6051_v56 = vrot.slane %v13577_v10, 3 }
 0x526   : > { %v5986_v21 = vadd.f32 %v5909_v32, %v5606_v52  ;;  %v6159_v55 = vpop.f32.mrf.mxu1  ;;  %v5779_v32 = vrot.slane %v5777_v63, 2  ;;  %v5296_v63 = vld [vmem:[%s12382_s17 + $0xa0] sm:$0x3] }
 0x528   : > { %v6233_v48 = vadd.f32 %v6156_v19, %v5986_v21  ;;  %v5427_v19 = vsel %vm1956_vm3, %v5424_v58, %v5426_v11  ;;  %v5782_v58 = vrot.slane %v5780_v44, 3  ;;  %v5786_v44 = vshrl.u32 %v13598_v41, 16 }
 0x529   : > { %10593 = vmatmul.msk.bf16.gmra.mxu1 %vm644_vm0, %v6050_v59  ;;  %v13619_v59 = vld [vmem:[%s12382_s17 + $0x98] sm:$0xff] }
 0x52a   : > { %v6488_v31 = vpop.f32.mrf.mxu2  ;;  %v5783_v10 = vor.u32 %v5782_v58, %v5779_v32 }
 0x52b   : > { %v13601_v18 = vadd.f32 %v6488_v31, %v6233_v48 }
 0x52c   : > { %v5539_v1 = vpop.f32.mrf.mxu3 }
 0x52d   : > { %v5912_v20 = vpop.f32.mrf.mxu0  ;;  %v5610_v52 = vadd.f32 %v5539_v1, %v13208_v43  ;;  %v11316_v1 = vld [vmem:[%s13312_s30 + $0x70] sm:$0xff] }
 0x52e   : > { %v5987_v22 = vadd.f32 %v5912_v20, %v5607_v40  ;;  %v6161_v57 = vpop.f32.mrf.mxu1  ;;  %v5428_v20 = vrot.slane %v13619_v59, 2 }
 0x52f   : > { %10695 = vmatmul.msk.bf16.gmra.mxu2 %vm644_vm0, %v11315_v38 }
 0x530   : > { %10563 = vmatmul.msk.bf16.gmra.mxu0 %vm644_vm0, %v5775_v3  ;;  %v6234_v5 = vadd.f32 %v6159_v55, %v5987_v22  ;;  %v6052_v55 = vsel %vm2958_vm6, %v6049_v27, %v6051_v56 }
 0x531   : > { %10535 = vmatmul.msk.bf16.gmra.mxu3 %vm644_vm0, %v5427_v19 }
 0x532   : > { %v6491_v13 = vpop.f32.mrf.mxu2 }
 0x533   : > { %v13614_v43 = vadd.f32 %v6491_v13, %v6234_v5  ;;  %v5789_v13 = vshll.u32 %v13598_v41, 16 }
 0x534   : > { %v5542_v40 = vpop.f32.mrf.mxu3 }
 0x535   : > { %v5914_v39 = vpop.f32.mrf.mxu0  ;;  %v5611_v26 = vadd.f32 %v5542_v40, %v13225_v17  ;;  %v5784_v17 = vsel %vm2577_vm5, %v5774_v8, %v5783_v10  ;;  %v6053_v8 = vrot.slane %v13598_v41, 3  ;;  %v5791_v58 = vrot.slane %v5789_v13, 3  ;;  %v11398_v13 = vld [vmem:[%s13312_s30] sm:$0xff]  }
 0x536   : > { %v5988_v36 = vadd.f32 %v5914_v39, %v5608_v6  ;;  %v6164_v21 = vpop.f32.mrf.mxu1 }
 0x538   : > { %v6235_v48 = vadd.f32 %v6161_v57, %v5988_v36  ;;  %v5429_v57 = vsel %vm1956_vm3, %v5426_v11, %v5428_v20  ;;  %v5788_v11 = vrot.slane %v5786_v44, 2 }
 0x539   : > { %10594 = vmatmul.msk.bf16.gmra.mxu1 %vm644_vm0, %v6052_v55 }
 0x53a   : > { %v6493_v31 = vpop.f32.mrf.mxu2  ;;  %v5792_v41 = vor.u32 %v5791_v58, %v5788_v11 }
 0x53b   : > { %v13622_v38 = vadd.f32 %v6493_v31, %v6235_v48  ;;  %v6054_v48 = vsel %vm2958_vm6, %v6051_v56, %v6053_v8 }
 0x53c   : > { %v5544_v3 = vpop.f32.mrf.mxu3 }
 0x53d   : > { %v5917_v22 = vpop.f32.mrf.mxu0  ;;  %v5612_v6 = vadd.f32 %v5544_v3, %v13245_v49 }
 0x53e   : > { %v5989_v27 = vadd.f32 %v5917_v22, %v5609_v30  ;;  %v6166_v19 = vpop.f32.mrf.mxu1  ;;  %v5375_v30 = vunpack.c.l.b16 %v5296_v63 }
 0x53f   : > { %10696 = vmatmul.msk.bf16.gmra.mxu2 %vm644_vm0, %v11316_v1 }
 0x540   : > { %10564 = vmatmul.msk.bf16.gmra.mxu0 %vm644_vm0, %v5784_v17  ;;  %v6236_v5 = vadd.f32 %v6164_v21, %v5989_v27  ;;  %v5394_v31 = vpack.c.b16 %v5375_v30, %v5375_v30  ;;  %v11317_v17 = vld [vmem:[%s13312_s30 + $0x78] sm:$0xff]  ;;  %v5798_v30 = vshll.u32 %v13619_v59, 16 }
 0x541   : > { %10536 = vmatmul.msk.bf16.gmra.mxu3 %vm644_vm0, %v5429_v57 }
 0x542   : > { %v6496_v40 = vpop.f32.mrf.mxu2  ;;  %v5430_v27 = vrot.slane %v5394_v31, 2 }
 0x543   : > { %v13636_v49 = vadd.f32 %v6496_v40, %v6236_v5  ;;  %v5795_v40 = vshrl.u32 %v13619_v59, 16 }
 0x544   : > { %v5547_v39 = vpop.f32.mrf.mxu3 }
 0x545   : > { %v5919_v32 = vpop.f32.mrf.mxu0  ;;  %v5613_v36 = vadd.f32 %v5547_v39, %v13267_v35  ;;  %v5793_v35 = vsel %vm2577_vm5, %v5783_v10, %v5792_v41  ;;  %v13659_v10 = vld [vmem:[%s13312_s30 + $0x8] sm:$0xff]  ;;  %v5797_v58 = vrot.slane %v5795_v40, 2 }
 0x546   : > { %v5990_v21 = vadd.f32 %v5919_v32, %v5610_v52  ;;  %v6169_v55 = vpop.f32.mrf.mxu1  ;;  %v6730_v32 = vshll.u32 %v11398_v13, 16 }
 0x548   : > { %v6237_v1 = vadd.f32 %v6166_v19, %v5990_v21  ;;  %v5431_v19 = vsel %vm1956_vm3, %v5428_v20, %v5430_v27  ;;  %v5800_v21 = vrot.slane %v5798_v30, 3  ;;  %v6735_v27 = vshll.u32 %v13659_v10, 16 }
 0x549   : > { %10595 = vmatmul.msk.bf16.gmra.mxu1 %vm644_vm0, %v6054_v48 }
 0x54a   : > { %v6498_v3 = vpop.f32.mrf.mxu2 }
 0x54b   : > { %v13641_v22 = vadd.f32 %v6498_v3, %v6237_v1  ;;  %v6728_v3 = vshrl.u32 %v11398_v13, 16 }
 0x54c   : > { %v5549_v57 = vpop.f32.mrf.mxu3 }
 0x54d   : > { %v5922_v5 = vpop.f32.mrf.mxu0  ;;  %v13646_v52 = vadd.f32 %v5549_v57, %v13282_v61  ;;  %v6055_v61 = vrot.slane %v13619_v59, 3  ;;  %v11365_v59 = vld [vmem:[%s14731_s3 + $0x178] sm:$0xff]  ;;  %v5633_v57 = vld [vmem:[%s12382_s17 + $0xa0] sm:$0x7] }
 0x54e   : > { %v5991_v56 = vadd.f32 %v5922_v5, %v5611_v26  ;;  %v6171_v63 = vpop.f32.mrf.mxu1  ;;  %8194 = vmatpush.bf16.msra.mxu3 %v11365_v59 }
 0x54f   : > { %10697 = vmatmul.msk.bf16.gmra.mxu2 %vm644_vm0, %v11317_v17  ;;  %v6056_v1 = vsel %vm2958_vm6, %v6053_v8, %v6055_v61  ;;  %v6732_v17 = vrot.slane %v6730_v32, 1 }
 0x550   : > { %10565 = vmatmul.msk.bf16.gmra.mxu0 %vm644_vm0, %v5793_v35  ;;  %v6238_v44 = vadd.f32 %v6169_v55, %v5991_v56  ;;  %v5640_v56 = vunpack.c.l.b16 %v5633_v57 }
 0x551   : > { %10537 = vmatmul.msk.bf16.gmra.mxu3 %vm644_vm0, %v5431_v19  ;;  %v11318_v19 = vld [vmem:[%s13312_s30 + $0x80] sm:$0xff]  ;;  %v6733_v8 = vor.u32 %v6732_v17, %v6728_v3  ;;  %v13691_v3 = vld [vmem:[%s13312_s30 + $0x10] sm:$0xff]  ;;  %v7323_v17 = vld [vmem:[%s13312_s30 + $0x8] sm:$0xe] }
 0x552   : > { %v6501_v39 = vpop.f32.mrf.mxu2 }
 0x553   : > { %v13656_v26 = vadd.f32 %v6501_v39, %v6238_v44  ;;  %v6737_v44 = vrot.slane %v6735_v27, 1  ;;  %v13698_v27 = vld [vmem:[%s13312_s30 + $0xc] sm:$0xf] }
 0x554   : > { %v5552_v20 = vpop.f32.mrf.mxu3  ;;  %14747 = vst [vmem:[#allocation3_spill] sm:$0xff] %v13698_v27 }
 0x555   : > { %v5924_v11 = vpop.f32.mrf.mxu0  ;;  %v13662_v55 = vadd.f32 %v5552_v20, %v13301_v16  ;;  %v5801_v16 = vor.u32 %v5800_v21, %v5797_v58  ;;  %v5641_v20 = vpack.c.b16 %v5640_v56, %v5640_v56  ;;  %v11388_v58 = vld [vmem:[%s14731_s3 + $0x1a8] sm:$0xff] }
 0x556   : > { %v5992_v48 = vadd.f32 %v5924_v11, %v5612_v6  ;;  %v6174_v31 = vpop.f32.mrf.mxu1  ;;  %v6738_v11 = vsel %vm483_vm2, %v6733_v8, %v6737_v44  ;;  %9194 = vmatpush.bf16.msra.mxu2 %v11388_v58 }
 0x557   : > { %v5802_v13 = vsel %vm2577_vm5, %v5792_v41, %v5801_v16  ;;  %v5807_v21 = vshll.u32 %v5641_v20, 16 }
 0x558   : > { %v6239_v5 = vadd.f32 %v6171_v63, %v5992_v48 }
 0x559   : > { %10596 = vmatmul.msk.bf16.gmra.mxu1 %vm644_vm0, %v6056_v1  ;;  %v6057_v1 = vrot.slane %v5641_v20, 3  ;;  %v5809_v56 = vrot.slane %v5807_v21, 3 }
 0x55a   : > { %v6503_v35 = vpop.f32.mrf.mxu2 }
 0x55b   : > { %v13671_v6 = vadd.f32 %v6503_v35, %v6239_v5 }
 0x55c   : > { %v5554_v40 = vpop.f32.mrf.mxu3 }
 0x55d   : > { %v5927_v30 = vpop.f32.mrf.mxu0  ;;  %v13676_v39 = vadd.f32 %v5554_v40, %v13315_v29  ;;  %v11384_v29 = vld [vmem:[%s14731_s3 + $0x188] sm:$0xff] }
 0x55e   : > { %v5993_v32 = vadd.f32 %v5927_v30, %v5613_v36  ;;  %v6176_v63 = vpop.f32.mrf.mxu1  ;;  %v5804_v36 = vshrl.u32 %v5641_v20, 16  ;;  %8567 = vmatpush.bf16.msra.mxu0 %v11384_v29  ;;  %v6058_v30 = vsel %vm2958_vm6, %v6055_v61, %v6057_v1  ;;  %v7402_v20 = vunpack.c.l.b16 %v7323_v17 }
 0x55f   : > { %10698 = vmatmul.msk.bf16.gmra.mxu2 %vm644_vm0, %v11318_v19 }
 0x560   : > { %10566 = vmatmul.msk.bf16.gmra.mxu0 %vm644_vm0, %v5802_v13  ;;  %v6240_v41 = vadd.f32 %v6174_v31, %v5993_v32  ;;  %v11386_v31 = vld [vmem:[%s14731_s3 + $0x198] sm:$0xff]  ;;  %v5806_v35 = vrot.slane %v5804_v36, 2  ;;  %v6739_v13 = vshrl.u32 %v13659_v10, 16  ;;  %v6743_v32 = vshll.u32 %v13691_v3, 16  ;;  %v11319_v36 = vld [vmem:[%s13312_s30 + $0x88] sm:$0xff] }
 0x561   : > { %10780 = vmatmul.msk.bf16.vlgmr.msrb.gmra.mxu3 %vm644_vm0, %v6738_v11  ;;  %8947 = vmatpush.bf16.msra.mxu1 %v11386_v31  ;;  %v14737_v11 = vunpack.c.l.b16 %v13698_v27 }
 0x562   : > { %v6506_v48 = vpop.f32.mrf.mxu2  ;;  %v6745_v21 = vrot.slane %v6743_v32, 1  ;;  %v11407_v32 = vld [vmem:[%s13312_s30] sm:$0xf0] }
 0x563   : > { %v13688_v59 = vadd.f32 %v6506_v48, %v6240_v41  ;;  %v5810_v41 = vor.u32 %v5809_v56, %v5806_v35  ;;  %v7439_v61 = vpack.c.b16 %v14737_v11, %v7402_v20  ;;  %v13715_v48 = vld [vmem:[%s13312_s30 + $0x10] sm:$0xff]  ;;  %v11408_v20 = vld [vmem:[%s13312_s30] sm:$0xe] }
 0x564   : > { %v5557_v57 = vpop.f32.mrf.mxu3 }
 0x565   : > { %v5929_v5 = vpop.f32.mrf.mxu0  ;;  %v13701_v19 = vadd.f32 %v5557_v57, %v13329_v23  ;;  %v5811_v17 = vsel %vm2577_vm5, %v5801_v16, %v5810_v41  ;;  %v7706_v35 = vshrl.u32 %v7439_v61, 16  ;;  %v7714_v16 = vshrl.u32 %v13715_v48, 16  ;;  %v13734_v41 = vld [vmem:[%s13312_s30 + $0x18] sm:$0xff] }
 0x566   : > { %v5994_v8 = vadd.f32 %v5929_v5, %v13646_v52  ;;  %v6179_v40 = vpop.f32.mrf.mxu1  ;;  %v6741_v52 = vor.u32 %v6739_v13, %v6737_v44  ;;  %v7458_v13 = vrot.slane %v7439_v61, 1 }
 0x568   : > { %v6241_v58 = vadd.f32 %v6176_v63, %v5994_v8  ;;  %v6746_v44 = vsel %vm483_vm2, %v6741_v52, %v6745_v21  ;;  %v7709_v8 = vshll.u32 %v7439_v61, 16 }
 0x569   : > { %10597 = vmatmul.msk.bf16.gmra.mxu1 %vm644_vm0, %v6058_v30  ;;  %v7717_v30 = vshll.u32 %v13715_v48, 16 }
 0x56a   : > { %v6508_v29 = vpop.f32.mrf.mxu2 }
 0x56b   : > { %v13709_v23 = vadd.f32 %v6508_v29, %v6241_v58  ;;  %v7708_v29 = vrot.slane %v7706_v35, 1  ;;  %v7719_v52 = vrot.slane %v7717_v30, 2  ;;  %v7086_v30 = vrot.slane %v13659_v10, 1 }
 0x56c   : > { %v5559_v1 = vpop.f32.mrf.mxu3 }
 0x56d   : > { %v5932_v31 = vpop.f32.mrf.mxu0  ;;  %v13719_v63 = vadd.f32 %v5559_v1, %v13337_v9 }
 0x56e   : > { %v5995_v57 = vadd.f32 %v5932_v31, %v13662_v55  ;;  %v6181_v5 = vpop.f32.mrf.mxu1  ;;  %v7459_v55 = vrot.slane %v13715_v48, 1 }
 0x56f   : > { %10699 = vmatmul.msk.bf16.gmra.mxu2 %vm644_vm0, %v11319_v36  ;;  %v7711_v36 = vrot.slane %v7709_v8, 2 }
 0x570   : > { %10567 = vmatmul.msk.bf16.gmra.mxu0 %vm644_vm0, %v5811_v17  ;;  %v6242_v56 = vadd.f32 %v6179_v40, %v5995_v57  ;;  %v7716_v40 = vrot.slane %v7714_v16, 1  ;;  %v11409_v17 = vor.u32 %v11408_v20, %v11407_v32  ;;  %v7460_v48 = vsel %vm954_vm1, %v7458_v13, %v7459_v55  ;;  %v13747_v13 = vld [vmem:[%s13312_s30 + $0x18] sm:$0xff] }
 0x571   : > { %10781 = vmatmul.msk.bf16.gmra.mxu3 %vm644_vm0, %v6746_v44  ;;  %v7712_v35 = vor.u32 %v7711_v36, %v7708_v29 }
 0x572   : > { %v6511_v9 = vpop.f32.mrf.mxu2  ;;  %v7720_v8 = vor.u32 %v7719_v52, %v7716_v40  ;;  %v7085_v16 = vrot.slane %v11409_v17, 1  ;;  %v7726_v52 = vshll.u32 %v13747_v13, 16 }
 0x573   : > { %v13731_v58 = vadd.f32 %v6511_v9, %v6242_v56  ;;  %v6747_v56 = vshrl.u32 %v13691_v3, 16  ;;  %v6751_v9 = vshll.u32 %v13734_v41, 16 }
 0x574   : > { %v5562_v1 = vpop.f32.mrf.mxu3 }
 0x575   : > { %v5934_v31 = vpop.f32.mrf.mxu0  ;;  %v5619_v57 = vadd.f32 %v5562_v1, %v13350_v15  ;;  %v6753_v20 = vrot.slane %v6751_v9, 1  ;;  %v7721_v1 = vsel %vm1575_vm4, %v7712_v35, %v7720_v8 }
 0x576   : > { %v5996_v44 = vadd.f32 %v5934_v31, %v13676_v39  ;;  %v6184_v61 = vpop.f32.mrf.mxu1  ;;  %v6749_v39 = vor.u32 %v6747_v56, %v6745_v21  ;;  %v7723_v21 = vshrl.u32 %v13747_v13, 16 }
 0x578   : > { %v6243_v11 = vadd.f32 %v6181_v5, %v5996_v44  ;;  %v7087_v5 = vsel %vm954_vm1, %v7085_v16, %v7086_v30  ;;  %v6754_v10 = vsel %vm483_vm2, %v6749_v39, %v6753_v20  ;;  %v7461_v44 = vrot.slane %v13747_v13, 1 }
 0x579   : > { %10908 = vmatmul.msk.bf16.vlgmr.msrb.gmra.mxu1 %vm644_vm0, %v7460_v48  ;;  %v7728_v48 = vrot.slane %v7726_v52, 2  ;;  %v6755_v39 = vshrl.u32 %v13734_v41, 16 }
 0x57a   : > { %v6513_v32 = vpop.f32.mrf.mxu2 }
 0x57b   : > { %v13743_v15 = vadd.f32 %v6513_v32, %v6243_v11  ;;  %v7462_v32 = vsel %vm954_vm1, %v7459_v55, %v7461_v44 }
 0x57c   : > { %v5564_v31 = vpop.f32.mrf.mxu3 }
 0x57d   : > { %v5937_v27 = vpop.f32.mrf.mxu0  ;;  %v5620_v29 = vadd.f32 %v5564_v31, %v13358_v14 }
 0x57e   : > { %v5997_v36 = vadd.f32 %v5937_v27, %v13701_v19  ;;  %v6186_v40 = vpop.f32.mrf.mxu1  ;;  %v13762_v27 = vld [vmem:[%s13312_s30 + $0x20] sm:$0xff]  ;;  %v7725_v19 = vrot.slane %v7723_v21, 1 }
 0x57f   : > { %10938 = vmatmul.msk.bf16.vlgmr.msrb.gmra.mxu2 %vm644_vm0, %v7721_v1  ;;  %v6759_v1 = vshll.u32 %v13762_v27, 16  ;;  %v13775_v21 = vld [vmem:[%s13312_s30 + $0x20] sm:$0xff] }
 0x580   : > { %10810 = vmatmul.msk.bf16.vlgmr.msrb.gmra.mxu0 %vm644_vm0, %v7087_v5  ;;  %v6244_v11 = vadd.f32 %v6184_v61, %v5997_v36  ;;  %v7729_v31 = vor.u32 %v7728_v48, %v7725_v19  ;;  %v7088_v5 = vrot.slane %v13691_v3, 1 }
 0x581   : > { %10782 = vmatmul.msk.bf16.gmra.mxu3 %vm644_vm0, %v6754_v10 }
 0x582   : > { %v6516_v17 = vpop.f32.mrf.mxu2 }
 0x583   : > { %v13759_v14 = vadd.f32 %v6516_v17, %v6244_v11  ;;  %v6757_v11 = vor.u32 %v6755_v39, %v6753_v20  ;;  %v7089_v17 = vsel %vm954_vm1, %v7086_v30, %v7088_v5  ;;  %v7463_v30 = vrot.slane %v13775_v21, 1 }
 0x584   : > { %v5567_v56 = vpop.f32.mrf.mxu3 }
 0x585   : > { %v5939_v9 = vpop.f32.mrf.mxu0  ;;  %v5621_v61 = vadd.f32 %v5567_v56, %v13371_v12  ;;  %v6761_v12 = vrot.slane %v6759_v1, 1  ;;  %v7735_v56 = vshll.u32 %v13775_v21, 16 }
 0x586   : > { %v5998_v35 = vadd.f32 %v5939_v9, %v13719_v63  ;;  %v6189_v16 = vpop.f32.mrf.mxu1  ;;  %v7730_v63 = vsel %vm1575_vm4, %v7720_v8, %v7729_v31  ;;  %v7732_v8 = vshrl.u32 %v13775_v21, 16 }
 0x587   : > { %v6762_v3 = vsel %vm483_vm2, %v6757_v11, %v6761_v12  ;;  %v7464_v11 = vsel %vm954_vm1, %v7461_v44, %v7463_v30 }
 0x588   : > { %v6245_v13 = vadd.f32 %v6186_v40, %v5998_v35 }
 0x589   : > { %10909 = vmatmul.msk.bf16.gmra.mxu1 %vm644_vm0, %v7462_v32  ;;  %v7737_v32 = vrot.slane %v7735_v56, 2 }
 0x58a   : > { %v6518_v36 = vpop.f32.mrf.mxu2 }
 0x58b   : > { %v13771_v10 = vadd.f32 %v6518_v36, %v6245_v13 }
 0x58c   : > { %v5569_v55 = vpop.f32.mrf.mxu3 }
 0x58d   : > { %v5942_v52 = vpop.f32.mrf.mxu0  ;;  %v5622_v40 = vadd.f32 %v5569_v55, %v13379_v60  ;;  %v13789_v60 = vld [vmem:[%s13312_s30 + $0x28] sm:$0xff] }
 0x58e   : > { %v5999_v19 = vadd.f32 %v5942_v52, %v5619_v57  ;;  %v6191_v48 = vpop.f32.mrf.mxu1  ;;  %v7734_v57 = vrot.slane %v7732_v8, 1  ;;  %v6767_v55 = vshll.u32 %v13789_v60, 16 }
 0x58f   : > { %10939 = vmatmul.msk.bf16.gmra.mxu2 %vm644_vm0, %v7730_v63  ;;  %v6763_v63 = vshrl.u32 %v13762_v27, 16 }
 0x590   : > { %10811 = vmatmul.msk.bf16.gmra.mxu0 %vm644_vm0, %v7089_v17  ;;  %v6246_v20 = vadd.f32 %v6189_v16, %v5999_v19  ;;  %v7738_v52 = vor.u32 %v7737_v32, %v7734_v57  ;;  %v7090_v17 = vrot.slane %v13734_v41, 1  ;;  %v6769_v8 = vrot.slane %v6767_v55, 1 }
 0x591   : > { %10783 = vmatmul.msk.bf16.gmra.mxu3 %vm644_vm0, %v6762_v3 }
 0x592   : > { %v6521_v9 = vpop.f32.mrf.mxu2 }
 0x593   : > { %v13786_v35 = vadd.f32 %v6521_v9, %v6246_v20  ;;  %v6765_v20 = vor.u32 %v6763_v63, %v6761_v12  ;;  %v7091_v9 = vsel %vm954_vm1, %v7088_v5, %v7090_v17 }
 0x594   : > { %v5572_v39 = vpop.f32.mrf.mxu3 }
 0x595   : > { %v5944_v1 = vpop.f32.mrf.mxu0  ;;  %v5623_v16 = vadd.f32 %v5572_v39, %v13392_v47  ;;  %v7739_v47 = vsel %vm1575_vm4, %v7729_v31, %v7738_v52  ;;  %v6770_v41 = vsel %vm483_vm2, %v6765_v20, %v6769_v8 }
 0x596   : > { %v6000_v13 = vadd.f32 %v5944_v1, %v5620_v29  ;;  %v6194_v36 = vpop.f32.mrf.mxu1  ;;  %v13801_v29 = vld [vmem:[%s13312_s30 + $0x28] sm:$0xff] }
 0x597   : > { %v7741_v31 = vshrl.u32 %v13801_v29, 16  ;;  %v7744_v39 = vshll.u32 %v13801_v29, 16  ;;  %v7465_v5 = vrot.slane %v13801_v29, 1 }
 0x598   : > { %v6247_v21 = vadd.f32 %v6191_v48, %v6000_v13 }
 0x599   : > { %10910 = vmatmul.msk.bf16.gmra.mxu1 %vm644_vm0, %v7464_v11  ;;  %v7746_v11 = vrot.slane %v7744_v39, 2  ;;  %v7466_v20 = vsel %vm954_vm1, %v7463_v30, %v7465_v5 }
 0x59a   : > { %v6523_v19 = vpop.f32.mrf.mxu2 }
 0x59b   : > { %v13797_v3 = vadd.f32 %v6523_v19, %v6247_v21 }
 0x59c   : > { %v5574_v44 = vpop.f32.mrf.mxu3 }
 0x59d   : > { %v5947_v56 = vpop.f32.mrf.mxu0  ;;  %v5624_v48 = vadd.f32 %v5574_v44, %v13400_v33  ;;  %v13815_v33 = vld [vmem:[%s13312_s30 + $0x30] sm:$0xff] }
 0x59e   : > { %v6001_v57 = vadd.f32 %v5947_v56, %v5621_v61  ;;  %v6196_v32 = vpop.f32.mrf.mxu1  ;;  %v7743_v61 = vrot.slane %v7741_v31, 1  ;;  %v6775_v44 = vshll.u32 %v13815_v33, 16 }
 0x59f   : > { %10940 = vmatmul.msk.bf16.gmra.mxu2 %vm644_vm0, %v7739_v47  ;;  %v6771_v47 = vshrl.u32 %v13789_v60, 16 }
 0x5a0   : > { %10812 = vmatmul.msk.bf16.gmra.mxu0 %vm644_vm0, %v7091_v9  ;;  %v6248_v12 = vadd.f32 %v6194_v36, %v6001_v57  ;;  %v7747_v56 = vor.u32 %v7746_v11, %v7743_v61  ;;  %v7092_v9 = vrot.slane %v13762_v27, 1  ;;  %v6777_v31 = vrot.slane %v6775_v44, 1 }
 0x5a1   : > { %10784 = vmatmul.msk.bf16.gmra.mxu3 %vm644_vm0, %v6770_v41 }
 0x5a2   : > { %v6526_v1 = vpop.f32.mrf.mxu2 }
 0x5a3   : > { %v13812_v13 = vadd.f32 %v6526_v1, %v6248_v12  ;;  %v6773_v12 = vor.u32 %v6771_v47, %v6769_v8  ;;  %v7093_v1 = vsel %vm954_vm1, %v7090_v17, %v7092_v9 }
 0x5a4   : > { %v5577_v63 = vpop.f32.mrf.mxu3 }
 0x5a5   : > { %v5949_v55 = vpop.f32.mrf.mxu0  ;;  %v5625_v36 = vadd.f32 %v5577_v63, %v13413_v4  ;;  %v7748_v4 = vsel %vm1575_vm4, %v7738_v52, %v7747_v56  ;;  %v6778_v27 = vsel %vm483_vm2, %v6773_v12, %v6777_v31 }
 0x5a6   : > { %v6002_v21 = vadd.f32 %v5949_v55, %v5622_v40  ;;  %v6199_v19 = vpop.f32.mrf.mxu1  ;;  %v13827_v40 = vld [vmem:[%s13312_s30 + $0x30] sm:$0xff] }
 0x5a7   : > { %v7750_v52 = vshrl.u32 %v13827_v40, 16  ;;  %v7753_v63 = vshll.u32 %v13827_v40, 16  ;;  %v7467_v17 = vrot.slane %v13827_v40, 1 }
 0x5a8   : > { %v6249_v29 = vadd.f32 %v6196_v32, %v6002_v21 }
 0x5a9   : > { %10911 = vmatmul.msk.bf16.gmra.mxu1 %vm644_vm0, %v7466_v20  ;;  %v7755_v20 = vrot.slane %v7753_v63, 2  ;;  %v7468_v12 = vsel %vm954_vm1, %v7465_v5, %v7467_v17 }
 0x5aa   : > { %v6528_v57 = vpop.f32.mrf.mxu2 }
 0x5ab   : > { %v13823_v41 = vadd.f32 %v6528_v57, %v6249_v29 }
 0x5ac   : > { %v5579_v30 = vpop.f32.mrf.mxu3 }
 0x5ad   : > { %v5952_v39 = vpop.f32.mrf.mxu0  ;;  %v5626_v32 = vadd.f32 %v5579_v30, %v13421_v46  ;;  %v13841_v46 = vld [vmem:[%s13312_s30 + $0x38] sm:$0xff] }
 0x5ae   : > { %v6003_v61 = vadd.f32 %v5952_v39, %v5623_v16  ;;  %v6201_v11 = vpop.f32.mrf.mxu1  ;;  %v7752_v16 = vrot.slane %v7750_v52, 1  ;;  %v6783_v30 = vshll.u32 %v13841_v46, 16 }
 0x5af   : > { %10941 = vmatmul.msk.bf16.gmra.mxu2 %vm644_vm0, %v7748_v4  ;;  %v6779_v4 = vshrl.u32 %v13815_v33, 16 }
 0x5b0   : > { %10813 = vmatmul.msk.bf16.gmra.mxu0 %vm644_vm0, %v7093_v1  ;;  %v6250_v8 = vadd.f32 %v6199_v19, %v6003_v61  ;;  %v7756_v39 = vor.u32 %v7755_v20, %v7752_v16  ;;  %v7094_v1 = vrot.slane %v13789_v60, 1  ;;  %v6785_v52 = vrot.slane %v6783_v30, 1 }
 0x5b1   : > { %10785 = vmatmul.msk.bf16.gmra.mxu3 %vm644_vm0, %v6778_v27 }
 0x5b2   : > { %v6531_v55 = vpop.f32.mrf.mxu2 }
 0x5b3   : > { %v13838_v21 = vadd.f32 %v6531_v55, %v6250_v8  ;;  %v6781_v8 = vor.u32 %v6779_v4, %v6777_v31  ;;  %v7095_v55 = vsel %vm954_vm1, %v7092_v9, %v7094_v1 }
 0x5b4   : > { %v5582_v47 = vpop.f32.mrf.mxu3 }
 0x5b5   : > { %v5954_v44 = vpop.f32.mrf.mxu0  ;;  %v5627_v19 = vadd.f32 %v5582_v47, %v13434_v28  ;;  %v7757_v28 = vsel %vm1575_vm4, %v7747_v56, %v7756_v39  ;;  %v6786_v60 = vsel %vm483_vm2, %v6781_v8, %v6785_v52 }
 0x5b6   : > { %v6004_v29 = vadd.f32 %v5954_v44, %v5624_v48  ;;  %v6204_v57 = vpop.f32.mrf.mxu1  ;;  %v13853_v48 = vld [vmem:[%s13312_s30 + $0x38] sm:$0xff] }
 0x5b7   : > { %v7759_v56 = vshrl.u32 %v13853_v48, 16  ;;  %v7762_v47 = vshll.u32 %v13853_v48, 16  ;;  %v7469_v9 = vrot.slane %v13853_v48, 1 }
 0x5b8   : > { %v6251_v40 = vadd.f32 %v6201_v11, %v6004_v29 }
 0x5b9   : > { %10912 = vmatmul.msk.bf16.gmra.mxu1 %vm644_vm0, %v7468_v12  ;;  %v7764_v12 = vrot.slane %v7762_v47, 2  ;;  %v7470_v8 = vsel %vm954_vm1, %v7467_v17, %v7469_v9 }
 0x5ba   : > { %v6533_v61 = vpop.f32.mrf.mxu2 }
 0x5bb   : > { %v13849_v27 = vadd.f32 %v6533_v61, %v6251_v40 }
 0x5bc   : > { %v5584_v5 = vpop.f32.mrf.mxu3 }
 0x5bd   : > { %v5957_v63 = vpop.f32.mrf.mxu0  ;;  %v5628_v11 = vadd.f32 %v5584_v5, %v13442_v2  ;;  %v13867_v2 = vld [vmem:[%s13312_s30 + $0x40] sm:$0xff] }
 0x5be   : > { %v6005_v16 = vadd.f32 %v5957_v63, %v5625_v36  ;;  %v6206_v20 = vpop.f32.mrf.mxu1  ;;  %v7761_v36 = vrot.slane %v7759_v56, 1  ;;  %v6791_v5 = vshll.u32 %v13867_v2, 16 }
 0x5bf   : > { %10942 = vmatmul.msk.bf16.gmra.mxu2 %vm644_vm0, %v7757_v28  ;;  %v6787_v28 = vshrl.u32 %v13841_v46, 16 }
 0x5c0   : > { %10814 = vmatmul.msk.bf16.gmra.mxu0 %vm644_vm0, %v7095_v55  ;;  %v6252_v31 = vadd.f32 %v6204_v57, %v6005_v16  ;;  %v7765_v63 = vor.u32 %v7764_v12, %v7761_v36  ;;  %v7096_v55 = vrot.slane %v13815_v33, 1  ;;  %v6793_v56 = vrot.slane %v6791_v5, 1 }
 0x5c1   : > { %10786 = vmatmul.msk.bf16.gmra.mxu3 %vm644_vm0, %v6786_v60 }
 0x5c2   : > { %v6536_v44 = vpop.f32.mrf.mxu2 }
 0x5c3   : > { %v13864_v29 = vadd.f32 %v6536_v44, %v6252_v31  ;;  %v6789_v31 = vor.u32 %v6787_v28, %v6785_v52  ;;  %v7097_v44 = vsel %vm954_vm1, %v7094_v1, %v7096_v55 }
 0x5c4   : > { %v5587_v4 = vpop.f32.mrf.mxu3 }
 0x5c5   : > { %v5959_v30 = vpop.f32.mrf.mxu0  ;;  %v5629_v57 = vadd.f32 %v5587_v4, %v13455_v7  ;;  %v7766_v7 = vsel %vm1575_vm4, %v7756_v39, %v7765_v63  ;;  %v6794_v33 = vsel %vm483_vm2, %v6789_v31, %v6793_v56 }
 0x5c6   : > { %v6006_v40 = vadd.f32 %v5959_v30, %v5626_v32  ;;  %v6209_v61 = vpop.f32.mrf.mxu1  ;;  %v13879_v32 = vld [vmem:[%s13312_s30 + $0x40] sm:$0xff] }
 0x5c7   : > { %v7768_v39 = vshrl.u32 %v13879_v32, 16  ;;  %v7771_v4 = vshll.u32 %v13879_v32, 16  ;;  %v7471_v1 = vrot.slane %v13879_v32, 1 }
 0x5c8   : > { %v6253_v48 = vadd.f32 %v6206_v20, %v6006_v40 }
 0x5c9   : > { %10913 = vmatmul.msk.bf16.gmra.mxu1 %vm644_vm0, %v7470_v8  ;;  %v7773_v8 = vrot.slane %v7771_v4, 2  ;;  %v7472_v31 = vsel %vm954_vm1, %v7469_v9, %v7471_v1 }
 0x5ca   : > { %v6538_v16 = vpop.f32.mrf.mxu2 }
 0x5cb   : > { %v13875_v60 = vadd.f32 %v6538_v16, %v6253_v48 }
 0x5cc   : > { %v5589_v17 = vpop.f32.mrf.mxu3 }
 0x5cd   : > { %v5962_v47 = vpop.f32.mrf.mxu0  ;;  %v5630_v20 = vadd.f32 %v5589_v17, %v13466_v37  ;;  %v13893_v37 = vld [vmem:[%s13312_s30 + $0x48] sm:$0xff] }
 0x5ce   : > { %v6007_v36 = vadd.f32 %v5962_v47, %v5627_v19  ;;  %v6211_v12 = vpop.f32.mrf.mxu1  ;;  %v7770_v19 = vrot.slane %v7768_v39, 1  ;;  %v6799_v17 = vshll.u32 %v13893_v37, 16 }
 0x5cf   : > { %10943 = vmatmul.msk.bf16.gmra.mxu2 %vm644_vm0, %v7766_v7  ;;  %v6795_v7 = vshrl.u32 %v13867_v2, 16 }
 0x5d0   : > { %10815 = vmatmul.msk.bf16.gmra.mxu0 %vm644_vm0, %v7097_v44  ;;  %v6254_v52 = vadd.f32 %v6209_v61, %v6007_v36  ;;  %v7774_v47 = vor.u32 %v7773_v8, %v7770_v19  ;;  %v7098_v44 = vrot.slane %v13841_v46, 1  ;;  %v6801_v39 = vrot.slane %v6799_v17, 1 }
 0x5d1   : > { %10787 = vmatmul.msk.bf16.gmra.mxu3 %vm644_vm0, %v6794_v33 }
 0x5d2   : > { %v6541_v30 = vpop.f32.mrf.mxu2 }
 0x5d3   : > { %v13890_v40 = vadd.f32 %v6541_v30, %v6254_v52  ;;  %v6797_v52 = vor.u32 %v6795_v7, %v6793_v56  ;;  %v7099_v30 = vsel %vm954_vm1, %v7096_v55, %v7098_v44 }
 0x5d4   : > { %v5592_v28 = vpop.f32.mrf.mxu3 }
 0x5d5   : > { %v5964_v5 = vpop.f32.mrf.mxu0  ;;  %v5631_v61 = vadd.f32 %v5592_v28, %v13485_v45  ;;  %v7775_v45 = vsel %vm1575_vm4, %v7765_v63, %v7774_v47  ;;  %v6802_v46 = vsel %vm483_vm2, %v6797_v52, %v6801_v39 }
 0x5d6   : > { %v6008_v48 = vadd.f32 %v5964_v5, %v5628_v11  ;;  %v6214_v16 = vpop.f32.mrf.mxu1  ;;  %v13905_v11 = vld [vmem:[%s13312_s30 + $0x48] sm:$0xff] }
 0x5d7   : > { %v7777_v63 = vshrl.u32 %v13905_v11, 16  ;;  %v7780_v28 = vshll.u32 %v13905_v11, 16  ;;  %v7473_v55 = vrot.slane %v13905_v11, 1  ;;  %v6803_v11 = vshrl.u32 %v13893_v37, 16 }
 0x5d8   : > { %v6255_v32 = vadd.f32 %v6211_v12, %v6008_v48 }
 0x5d9   : > { %10914 = vmatmul.msk.bf16.gmra.mxu1 %vm644_vm0, %v7472_v31  ;;  %v7779_v48 = vrot.slane %v7777_v63, 1  ;;  %v7782_v31 = vrot.slane %v7780_v28, 2  ;;  %v7474_v52 = vsel %vm954_vm1, %v7471_v1, %v7473_v55  ;;  %v13938_v63 = vld [vmem:[%s13312_s30 + $0x50] sm:$0xff] }
 0x5da   : > { %v6543_v36 = vpop.f32.mrf.mxu2 }
 0x5db   : > { %v13901_v33 = vadd.f32 %v6543_v36, %v6255_v32 }
 0x5dc   : > { %v5594_v9 = vpop.f32.mrf.mxu3 }
 0x5dd   : > { %v5967_v4 = vpop.f32.mrf.mxu0  ;;  %v13909_v12 = vadd.f32 %v5594_v9, %v13496_v54 }
 0x5de   : > { %v6009_v19 = vadd.f32 %v5967_v4, %v5629_v57  ;;  %v6216_v8 = vpop.f32.mrf.mxu1  ;;  %v13921_v57 = vld [vmem:[%s13312_s30 + $0x50] sm:$0xff] }
 0x5df   : > { %10944 = vmatmul.msk.bf16.gmra.mxu2 %vm644_vm0, %v7775_v45  ;;  %v11364_v45 = vld [vmem:[%s14731_s3 + $0x170] sm:$0xff]  ;;  %v6807_v9 = vshll.u32 %v13921_v57, 16 }
 0x5e0   : > { %10816 = vmatmul.msk.bf16.gmra.mxu0 %vm644_vm0, %v7099_v30  ;;  %v6256_v56 = vadd.f32 %v6214_v16, %v6009_v19  ;;  %v7783_v30 = vor.u32 %v7782_v31, %v7779_v48  ;;  %8195 = vmatpush.bf16.msra.mxu3 %v11364_v45  ;;  %v13958_v45 = vld [vmem:[%s13312_s30 + $0x58] sm:$0xff] }
 0x5e1   : > { %10788 = vmatmul.msk.bf16.gmra.mxu3 %vm644_vm0, %v6802_v46  ;;  %v6805_v46 = vor.u32 %v6803_v11, %v6801_v39  ;;  %v6809_v1 = vrot.slane %v6807_v9, 1  ;;  %v11387_v39 = vld [vmem:[%s14731_s3 + $0x1a0] sm:$0xff] }
 0x5e2   : > { %v6546_v5 = vpop.f32.mrf.mxu2  ;;  %9195 = vmatpush.bf16.msra.mxu2 %v11387_v39  ;;  %v7102_v39 = vrot.slane %v13893_v37, 1 }
 0x5e3   : > { %v13918_v54 = vadd.f32 %v6546_v5, %v6256_v56  ;;  %v7784_v56 = vsel %vm1575_vm4, %v7774_v47, %v7783_v30 }
 0x5e4   : > { %v6950_v17 = vpop.f32.mrf.mxu3 }
 0x5e5   : > { %v5969_v7 = vpop.f32.mrf.mxu0  ;;  %v13924_v16 = vadd.f32 %v6950_v17, %v13509_v25  ;;  %v7100_v25 = vrot.slane %v13867_v2, 1  ;;  %v6810_v2 = vsel %vm483_vm2, %v6805_v46, %v6809_v1  ;;  %v7786_v17 = vshrl.u32 %v13938_v63, 16 }
 0x5e6   : > { %v6010_v32 = vadd.f32 %v5969_v7, %v5630_v20  ;;  %v6219_v36 = vpop.f32.mrf.mxu1 }
 0x5e7   : > { %v7101_v7 = vsel %vm954_vm1, %v7098_v44, %v7100_v25  ;;  %v7789_v44 = vshll.u32 %v13938_v63, 16  ;;  %v7788_v11 = vrot.slane %v7786_v17, 1 }
 0x5e8   : > { %v6257_v4 = vadd.f32 %v6216_v8, %v6010_v32  ;;  %v7475_v32 = vrot.slane %v13938_v63, 1 }
 0x5e9   : > { %10915 = vmatmul.msk.bf16.gmra.mxu1 %vm644_vm0, %v7474_v52  ;;  %v7791_v9 = vrot.slane %v7789_v44, 2 }
 0x5ea   : > { %v6548_v20 = vpop.f32.mrf.mxu2 }
 0x5eb   : > { %v13934_v19 = vadd.f32 %v6548_v20, %v6257_v4 }
 0x5ec   : > { %v6952_v5 = vpop.f32.mrf.mxu3 }
 0x5ed   : > { %v5972_v28 = vpop.f32.mrf.mxu0  ;;  %v7041_v48 = vadd.f32 %v6952_v5, %v13517_v62  ;;  %v11383_v62 = vld [vmem:[%s14731_s3 + $0x180] sm:$0xff]  ;;  %v6811_v5 = vshrl.u32 %v13921_v57, 16 }
 0x5ee   : > { %v6011_v8 = vadd.f32 %v5972_v28, %v5631_v61  ;;  %v6221_v31 = vpop.f32.mrf.mxu1  ;;  %8568 = vmatpush.bf16.msra.mxu0 %v11383_v62  ;;  %v7476_v28 = vsel %vm954_vm1, %v7473_v55, %v7475_v32  ;;  %v13974_v62 = vld [vmem:[%s13312_s30 + $0x58] sm:$0xff] }
 0x5ef   : > { %10945 = vmatmul.msk.bf16.gmra.mxu2 %vm644_vm0, %v7784_v56  ;;  %v6813_v44 = vor.u32 %v6811_v5, %v6809_v1 }
 0x5f0   : > { %10817 = vmatmul.msk.bf16.gmra.mxu0 %vm644_vm0, %v7101_v7  ;;  %v6258_v47 = vadd.f32 %v6219_v36, %v6011_v8  ;;  %v11385_v36 = vld [vmem:[%s14731_s3 + $0x190] sm:$0xff]  ;;  %v6815_v7 = vshll.u32 %v13958_v45, 16 }
 0x5f1   : > { %10789 = vmatmul.msk.bf16.gmra.mxu3 %vm644_vm0, %v6810_v2  ;;  %8948 = vmatpush.bf16.msra.mxu1 %v11385_v36  ;;  %v7792_v2 = vor.u32 %v7791_v9, %v7788_v11  ;;  %v7103_v36 = vsel %vm954_vm1, %v7100_v25, %v7102_v39  ;;  %v7477_v25 = vrot.slane %v13974_v62, 1 }
 0x5f2   : > { %v6551_v61 = vpop.f32.mrf.mxu2 }
 0x5f3   : > { %v13955_v52 = vadd.f32 %v6551_v61, %v6258_v47 }
 0x5f4   : > { %v6955_v20 = vpop.f32.mrf.mxu3 }
 0x5f5   : > { %v5974_v4 = vpop.f32.mrf.mxu0  ;;  %v7042_v56 = vadd.f32 %v6955_v20, %v13530_v50  ;;  %v7793_v50 = vsel %vm1575_vm4, %v7783_v30, %v7792_v2  ;;  %v7795_v30 = vshrl.u32 %v13974_v62, 16 }
 0x5f6   : > { %v6012_v46 = vadd.f32 %v5974_v4, %v13909_v12  ;;  %v7570_v63 = vpop.f32.mrf.mxu1  ;;  %v6817_v12 = vrot.slane %v6815_v7, 1  ;;  %v7798_v4 = vshll.u32 %v13974_v62, 16 }
 0x5f8   : > { %v6259_v8 = vadd.f32 %v6221_v31, %v6012_v46  ;;  %v6818_v37 = vsel %vm483_vm2, %v6813_v44, %v6817_v12  ;;  %v7797_v46 = vrot.slane %v7795_v30, 1  ;;  %v7478_v44 = vsel %vm954_vm1, %v7475_v32, %v7477_v25 }
 0x5f9   : > { %10916 = vmatmul.msk.bf16.gmra.mxu1 %vm644_vm0, %v7476_v28  ;;  %v7800_v28 = vrot.slane %v7798_v4, 2 }
 0x5fa   : > { %v6553_v47 = vpop.f32.mrf.mxu2 }
 0x5fb   : > { %v13970_v17 = vadd.f32 %v6553_v47, %v6259_v8 }
 0x5fc   : > { %v6957_v55 = vpop.f32.mrf.mxu3 }
 0x5fd   : > { %v7197_v61 = vpop.f32.mrf.mxu0  ;;  %v7043_v31 = vadd.f32 %v6957_v55, %v13538_v24 }
 0x5fe   : > { %v7287_v11 = vadd.f32 %v7197_v61, %v13924_v16  ;;  %v7572_v9 = vpop.f32.mrf.mxu1  ;;  %v13989_v16 = vld [vmem:[%s13312_s30 + $0x60] sm:$0xff]  ;;  %v7801_v61 = vor.u32 %v7800_v28, %v7797_v46 }
 0x5ff   : > { %10946 = vmatmul.msk.bf16.gmra.mxu2 %vm644_vm0, %v7793_v50  ;;  %v6819_v50 = vshrl.u32 %v13958_v45, 16  ;;  %v6823_v55 = vshll.u32 %v13989_v16, 16 }
 0x600   : > { %10818 = vmatmul.msk.bf16.gmra.mxu0 %vm644_vm0, %v7103_v36  ;;  %v7660_v1 = vadd.f32 %v7570_v63, %v7287_v11  ;;  %v7104_v36 = vrot.slane %v13921_v57, 1 }
 0x601   : > { %10790 = vmatmul.msk.bf16.gmra.mxu3 %vm644_vm0, %v6818_v37  ;;  %v6825_v30 = vrot.slane %v6823_v55, 1 }
 0x602   : > { %v7950_v20 = vpop.f32.mrf.mxu2 }
 0x603   : > { %v13986_v24 = vadd.f32 %v7950_v20, %v7660_v1  ;;  %v6821_v1 = vor.u32 %v6819_v50, %v6817_v12  ;;  %v7105_v20 = vsel %vm954_vm1, %v7102_v39, %v7104_v36 }
 0x604   : > { %v6960_v5 = vpop.f32.mrf.mxu3 }
 0x605   : > { %v7199_v7 = vpop.f32.mrf.mxu0  ;;  %v7044_v63 = vadd.f32 %v6960_v5, %v13551_v42  ;;  %v7802_v42 = vsel %vm1575_vm4, %v7792_v2, %v7801_v61  ;;  %v6826_v57 = vsel %vm483_vm2, %v6821_v1, %v6825_v30 }
 0x606   : > { %v7288_v8 = vadd.f32 %v7199_v7, %v7041_v48  ;;  %v7575_v47 = vpop.f32.mrf.mxu1  ;;  %v14001_v48 = vld [vmem:[%s13312_s30 + $0x60] sm:$0xff] }
 0x607   : > { %v7804_v2 = vshrl.u32 %v14001_v48, 16  ;;  %v7807_v5 = vshll.u32 %v14001_v48, 16  ;;  %v7479_v39 = vrot.slane %v14001_v48, 1 }
 0x608   : > { %v7661_v62 = vadd.f32 %v7572_v9, %v7288_v8 }
 0x609   : > { %10917 = vmatmul.msk.bf16.gmra.mxu1 %vm644_vm0, %v7478_v44  ;;  %v7809_v44 = vrot.slane %v7807_v5, 2  ;;  %v7480_v1 = vsel %vm954_vm1, %v7477_v25, %v7479_v39 }
 0x60a   : > { %v7952_v11 = vpop.f32.mrf.mxu2 }
 0x60b   : > { %v13997_v37 = vadd.f32 %v7952_v11, %v7661_v62 }
 0x60c   : > { %v6962_v32 = vpop.f32.mrf.mxu3 }
 0x60d   : > { %v7202_v4 = vpop.f32.mrf.mxu0  ;;  %v7045_v9 = vadd.f32 %v6962_v32, %v13559_v51  ;;  %v14015_v51 = vld [vmem:[%s13312_s30 + $0x68] sm:$0xff] }
 0x60e   : > { %v7289_v46 = vadd.f32 %v7202_v4, %v7042_v56  ;;  %v7577_v28 = vpop.f32.mrf.mxu1  ;;  %v7806_v56 = vrot.slane %v7804_v2, 1  ;;  %v6831_v32 = vshll.u32 %v14015_v51, 16 }
 0x60f   : > { %10947 = vmatmul.msk.bf16.gmra.mxu2 %vm644_vm0, %v7802_v42  ;;  %v6827_v42 = vshrl.u32 %v13989_v16, 16 }
 0x610   : > { %10819 = vmatmul.msk.bf16.gmra.mxu0 %vm644_vm0, %v7105_v20  ;;  %v7662_v12 = vadd.f32 %v7575_v47, %v7289_v46  ;;  %v7810_v4 = vor.u32 %v7809_v44, %v7806_v56  ;;  %v7106_v20 = vrot.slane %v13958_v45, 1  ;;  %v6833_v2 = vrot.slane %v6831_v32, 1 }
 0x611   : > { %10791 = vmatmul.msk.bf16.gmra.mxu3 %vm644_vm0, %v6826_v57 }
 0x612   : > { %v7955_v7 = vpop.f32.mrf.mxu2 }
 0x613   : > { %v14012_v8 = vadd.f32 %v7955_v7, %v7662_v12  ;;  %v6829_v12 = vor.u32 %v6827_v42, %v6825_v30  ;;  %v7107_v7 = vsel %vm954_vm1, %v7104_v36, %v7106_v20 }
 0x614   : > { %v6965_v50 = vpop.f32.mrf.mxu3 }
 0x615   : > { %v7204_v55 = vpop.f32.mrf.mxu0  ;;  %v7046_v47 = vadd.f32 %v6965_v50, %v13572_v0  ;;  %v7811_v0 = vsel %vm1575_vm4, %v7801_v61, %v7810_v4  ;;  %v6834_v45 = vsel %vm483_vm2, %v6829_v12, %v6833_v2 }
 0x616   : > { %v7290_v62 = vadd.f32 %v7204_v55, %v7043_v31  ;;  %v7580_v11 = vpop.f32.mrf.mxu1  ;;  %v14027_v31 = vld [vmem:[%s13312_s30 + $0x68] sm:$0xff] }
 0x617   : > { %v7813_v61 = vshrl.u32 %v14027_v31, 16  ;;  %v7816_v50 = vshll.u32 %v14027_v31, 16  ;;  %v7481_v36 = vrot.slane %v14027_v31, 1 }
 0x618   : > { %v7663_v48 = vadd.f32 %v7577_v28, %v7290_v62 }
 0x619   : > { %10918 = vmatmul.msk.bf16.gmra.mxu1 %vm644_vm0, %v7480_v1  ;;  %v7818_v1 = vrot.slane %v7816_v50, 2  ;;  %v7482_v12 = vsel %vm954_vm1, %v7479_v39, %v7481_v36 }
 0x61a   : > { %v7957_v46 = vpop.f32.mrf.mxu2 }
 0x61b   : > { %v14023_v57 = vadd.f32 %v7957_v46, %v7663_v48 }
 0x61c   : > { %v6967_v25 = vpop.f32.mrf.mxu3 }
 0x61d   : > { %v7207_v5 = vpop.f32.mrf.mxu0  ;;  %v7047_v28 = vadd.f32 %v6967_v25, %v13580_v53  ;;  %v14041_v53 = vld [vmem:[%s13312_s30 + $0x70] sm:$0xff] }
 0x61e   : > { %v7291_v56 = vadd.f32 %v7207_v5, %v7044_v63  ;;  %v7582_v44 = vpop.f32.mrf.mxu1  ;;  %v7815_v63 = vrot.slane %v7813_v61, 1  ;;  %v6839_v25 = vshll.u32 %v14041_v53, 16 }
 0x61f   : > { %10948 = vmatmul.msk.bf16.gmra.mxu2 %vm644_vm0, %v7811_v0  ;;  %v6835_v0 = vshrl.u32 %v14015_v51, 16 }
 0x620   : > { %10820 = vmatmul.msk.bf16.gmra.mxu0 %vm644_vm0, %v7107_v7  ;;  %v7664_v30 = vadd.f32 %v7580_v11, %v7291_v56  ;;  %v7819_v5 = vor.u32 %v7818_v1, %v7815_v63  ;;  %v7108_v7 = vrot.slane %v13989_v16, 1  ;;  %v6841_v61 = vrot.slane %v6839_v25, 1 }
 0x621   : > { %10792 = vmatmul.msk.bf16.gmra.mxu3 %vm644_vm0, %v6834_v45 }
 0x622   : > { %v7960_v55 = vpop.f32.mrf.mxu2 }
 0x623   : > { %v14038_v62 = vadd.f32 %v7960_v55, %v7664_v30  ;;  %v6837_v30 = vor.u32 %v6835_v0, %v6833_v2  ;;  %v7109_v55 = vsel %vm954_vm1, %v7106_v20, %v7108_v7 }
 0x624   : > { %v6970_v42 = vpop.f32.mrf.mxu3 }
 0x625   : > { %v7209_v32 = vpop.f32.mrf.mxu0  ;;  %v7048_v11 = vadd.f32 %v6970_v42, %v13593_v34  ;;  %v7820_v34 = vsel %vm1575_vm4, %v7810_v4, %v7819_v5  ;;  %v6842_v16 = vsel %vm483_vm2, %v6837_v30, %v6841_v61 }
 0x626   : > { %v7292_v48 = vadd.f32 %v7209_v32, %v7045_v9  ;;  %v7585_v46 = vpop.f32.mrf.mxu1  ;;  %v14053_v9 = vld [vmem:[%s13312_s30 + $0x70] sm:$0xff] }
 0x627   : > { %v7822_v4 = vshrl.u32 %v14053_v9, 16  ;;  %v7825_v42 = vshll.u32 %v14053_v9, 16  ;;  %v7483_v20 = vrot.slane %v14053_v9, 1 }
 0x628   : > { %v7665_v31 = vadd.f32 %v7582_v44, %v7292_v48 }
 0x629   : > { %10919 = vmatmul.msk.bf16.gmra.mxu1 %vm644_vm0, %v7482_v12  ;;  %v7827_v12 = vrot.slane %v7825_v42, 2  ;;  %v7484_v30 = vsel %vm954_vm1, %v7481_v36, %v7483_v20 }
 0x62a   : > { %v7962_v56 = vpop.f32.mrf.mxu2 }
 0x62b   : > { %v14049_v45 = vadd.f32 %v7962_v56, %v7665_v31 }
 0x62c   : > { %v6972_v39 = vpop.f32.mrf.mxu3 }
 0x62d   : > { %v7212_v50 = vpop.f32.mrf.mxu0  ;;  %v7049_v44 = vadd.f32 %v6972_v39, %v13601_v18  ;;  %v14067_v18 = vld [vmem:[%s13312_s30 + $0x78] sm:$0xff] }
 0x62e   : > { %v7293_v63 = vadd.f32 %v7212_v50, %v7046_v47  ;;  %v7587_v1 = vpop.f32.mrf.mxu1  ;;  %v7824_v47 = vrot.slane %v7822_v4, 1  ;;  %v6847_v39 = vshll.u32 %v14067_v18, 16 }
 0x62f   : > { %10949 = vmatmul.msk.bf16.gmra.mxu2 %vm644_vm0, %v7820_v34  ;;  %v6843_v34 = vshrl.u32 %v14041_v53, 16 }
 0x630   : > { %10821 = vmatmul.msk.bf16.gmra.mxu0 %vm644_vm0, %v7109_v55  ;;  %v7666_v2 = vadd.f32 %v7585_v46, %v7293_v63  ;;  %v7828_v50 = vor.u32 %v7827_v12, %v7824_v47  ;;  %v7110_v55 = vrot.slane %v14015_v51, 1  ;;  %v6849_v4 = vrot.slane %v6847_v39, 1 }
 0x631   : > { %10793 = vmatmul.msk.bf16.gmra.mxu3 %vm644_vm0, %v6842_v16 }
 0x632   : > { %v7965_v32 = vpop.f32.mrf.mxu2 }
 0x633   : > { %v14064_v48 = vadd.f32 %v7965_v32, %v7666_v2  ;;  %v6845_v2 = vor.u32 %v6843_v34, %v6841_v61  ;;  %v7111_v32 = vsel %vm954_vm1, %v7108_v7, %v7110_v55 }
 0x634   : > { %v6975_v0 = vpop.f32.mrf.mxu3 }
 0x635   : > { %v7214_v25 = vpop.f32.mrf.mxu0  ;;  %v7050_v46 = vadd.f32 %v6975_v0, %v13614_v43  ;;  %v7829_v43 = vsel %vm1575_vm4, %v7819_v5, %v7828_v50  ;;  %v6850_v51 = vsel %vm483_vm2, %v6845_v2, %v6849_v4 }
 0x636   : > { %v7294_v31 = vadd.f32 %v7214_v25, %v7047_v28  ;;  %v7590_v56 = vpop.f32.mrf.mxu1  ;;  %v14079_v28 = vld [vmem:[%s13312_s30 + $0x78] sm:$0xff] }
 0x637   : > { %v7831_v5 = vshrl.u32 %v14079_v28, 16  ;;  %v7834_v0 = vshll.u32 %v14079_v28, 16  ;;  %v7485_v7 = vrot.slane %v14079_v28, 1 }
 0x638   : > { %v7667_v9 = vadd.f32 %v7587_v1, %v7294_v31 }
 0x639   : > { %10920 = vmatmul.msk.bf16.gmra.mxu1 %vm644_vm0, %v7484_v30  ;;  %v7836_v30 = vrot.slane %v7834_v0, 2  ;;  %v7486_v2 = vsel %vm954_vm1, %v7483_v20, %v7485_v7 }
 0x63a   : > { %v7967_v63 = vpop.f32.mrf.mxu2 }
 0x63b   : > { %v14075_v16 = vadd.f32 %v7967_v63, %v7667_v9 }
 0x63c   : > { %v6977_v36 = vpop.f32.mrf.mxu3 }
 0x63d   : > { %v7217_v42 = vpop.f32.mrf.mxu0  ;;  %v7051_v1 = vadd.f32 %v6977_v36, %v13622_v38  ;;  %v14093_v38 = vld [vmem:[%s13312_s30 + $0x80] sm:$0xff] }
 0x63e   : > { %v7295_v47 = vadd.f32 %v7217_v42, %v7048_v11  ;;  %v7592_v12 = vpop.f32.mrf.mxu1  ;;  %v7833_v11 = vrot.slane %v7831_v5, 1  ;;  %v6855_v36 = vshll.u32 %v14093_v38, 16 }
 0x63f   : > { %10950 = vmatmul.msk.bf16.gmra.mxu2 %vm644_vm0, %v7829_v43  ;;  %v6851_v43 = vshrl.u32 %v14067_v18, 16 }
 0x640   : > { %10822 = vmatmul.msk.bf16.gmra.mxu0 %vm644_vm0, %v7111_v32  ;;  %v7668_v61 = vadd.f32 %v7590_v56, %v7295_v47  ;;  %v7837_v42 = vor.u32 %v7836_v30, %v7833_v11  ;;  %v7112_v32 = vrot.slane %v14041_v53, 1  ;;  %v6857_v5 = vrot.slane %v6855_v36, 1 }
 0x641   : > { %10794 = vmatmul.msk.bf16.gmra.mxu3 %vm644_vm0, %v6850_v51 }
 0x642   : > { %v7970_v25 = vpop.f32.mrf.mxu2 }
 0x643   : > { %v14090_v31 = vadd.f32 %v7970_v25, %v7668_v61  ;;  %v6853_v61 = vor.u32 %v6851_v43, %v6849_v4  ;;  %v7113_v25 = vsel %vm954_vm1, %v7110_v55, %v7112_v32 }
 0x644   : > { %v6980_v34 = vpop.f32.mrf.mxu3 }
 0x645   : > { %v7219_v39 = vpop.f32.mrf.mxu0  ;;  %v7052_v56 = vadd.f32 %v6980_v34, %v13636_v49  ;;  %v7838_v49 = vsel %vm1575_vm4, %v7828_v50, %v7837_v42  ;;  %v6858_v53 = vsel %vm483_vm2, %v6853_v61, %v6857_v5 }
 0x646   : > { %v7296_v9 = vadd.f32 %v7219_v39, %v7049_v44  ;;  %v7595_v63 = vpop.f32.mrf.mxu1  ;;  %v14105_v44 = vld [vmem:[%s13312_s30 + $0x80] sm:$0xff] }
 0x647   : > { %v7840_v50 = vshrl.u32 %v14105_v44, 16  ;;  %v7843_v34 = vshll.u32 %v14105_v44, 16  ;;  %v7487_v55 = vrot.slane %v14105_v44, 1 }
 0x648   : > { %v7669_v28 = vadd.f32 %v7592_v12, %v7296_v9 }
 0x649   : > { %10921 = vmatmul.msk.bf16.gmra.mxu1 %vm644_vm0, %v7486_v2  ;;  %v7845_v2 = vrot.slane %v7843_v34, 2  ;;  %v7488_v61 = vsel %vm954_vm1, %v7485_v7, %v7487_v55  ;;  %v6628_v7 = vld [vmem:[%s13312_s30 + $0x90] sm:$0x1] }
 0x64a   : > { %v7972_v47 = vpop.f32.mrf.mxu2 }
 0x64b   : > { %v14101_v51 = vadd.f32 %v7972_v47, %v7669_v28 }
 0x64c   : > { %v6982_v20 = vpop.f32.mrf.mxu3 }
 0x64d   : > { %v7222_v0 = vpop.f32.mrf.mxu0  ;;  %v7053_v12 = vadd.f32 %v6982_v20, %v13641_v22  ;;  %v14119_v22 = vld [vmem:[%s13312_s30 + $0x88] sm:$0xff] }
 0x64e   : > { %v7297_v11 = vadd.f32 %v7222_v0, %v7050_v46  ;;  %v7597_v30 = vpop.f32.mrf.mxu1  ;;  %v7842_v46 = vrot.slane %v7840_v50, 1  ;;  %v6863_v44 = vshll.u32 %v14119_v22, 16  ;;  %v14131_v50 = vld [vmem:[%s13312_s30 + $0x88] sm:$0xff] }
 0x64f   : > { %10951 = vmatmul.msk.bf16.gmra.mxu2 %vm644_vm0, %v7838_v49  ;;  %v6859_v49 = vshrl.u32 %v14093_v38, 16 }
 0x650   : > { %10823 = vmatmul.msk.bf16.gmra.mxu0 %vm644_vm0, %v7113_v25  ;;  %v7670_v4 = vadd.f32 %v7595_v63, %v7297_v11  ;;  %v7846_v0 = vor.u32 %v7845_v2, %v7842_v46  ;;  %v7114_v25 = vrot.slane %v14067_v18, 1 }
 0x651   : > { %10795 = vmatmul.msk.bf16.gmra.mxu3 %vm644_vm0, %v6858_v53 }
 0x652   : > { %v7975_v39 = vpop.f32.mrf.mxu2 }
 0x653   : > { %v14116_v9 = vadd.f32 %v7975_v39, %v7670_v4  ;;  %v6861_v4 = vor.u32 %v6859_v49, %v6857_v5 }
 0x654   : > { %v6985_v43 = vpop.f32.mrf.mxu3 }
 0x655   : > { %v7224_v36 = vpop.f32.mrf.mxu0  ;;  %v7054_v63 = vadd.f32 %v6985_v43, %v13656_v26  ;;  %v6865_v26 = vrot.slane %v6863_v44, 1  ;;  %v7115_v43 = vsel %vm954_vm1, %v7112_v32, %v7114_v25  ;;  %v7489_v32 = vrot.slane %v14131_v50, 1 }
 0x656   : > { %v7298_v28 = vadd.f32 %v7224_v36, %v7051_v1  ;;  %v7600_v47 = vpop.f32.mrf.mxu1  ;;  %v7847_v1 = vsel %vm1575_vm4, %v7837_v42, %v7846_v0  ;;  %v6707_v36 = vunpack.c.l.b16 %v6628_v7  ;;  %v7849_v42 = vshrl.u32 %v14131_v50, 16 }
 0x657   : > { %v6866_v18 = vsel %vm483_vm2, %v6861_v4, %v6865_v26  ;;  %v7490_v7 = vsel %vm954_vm1, %v7487_v55, %v7489_v32 }
 0x658   : > { %v7671_v20 = vadd.f32 %v7597_v30, %v7298_v28  ;;  %v7852_v28 = vshll.u32 %v14131_v50, 16  ;;  %v7851_v49 = vrot.slane %v7849_v42, 1  ;;  %v14157_v42 = vld [vmem:[%s13312_s30 + $0x90] sm:$0xff] }
 0x659   : > { %10922 = vmatmul.msk.bf16.gmra.mxu1 %vm644_vm0, %v7488_v61 }
 0x65a   : > { %v7977_v11 = vpop.f32.mrf.mxu2  ;;  %v7854_v44 = vrot.slane %v7852_v28, 2 }
 0x65b   : > { %v14127_v53 = vadd.f32 %v7977_v11, %v7671_v20 }
 0x65c   : > { %v6987_v34 = vpop.f32.mrf.mxu3 }
 0x65d   : > { %v7227_v39 = vpop.f32.mrf.mxu0  ;;  %v7055_v30 = vadd.f32 %v6987_v34, %v13671_v6  ;;  %v6867_v34 = vshrl.u32 %v14119_v22, 16 }
 0x65e   : > { %v7299_v46 = vadd.f32 %v7227_v39, %v7052_v56  ;;  %v7602_v2 = vpop.f32.mrf.mxu1  ;;  %v14145_v56 = vpack.c.b16 %v6707_v36, %v6707_v36 }
 0x65f   : > { %10952 = vmatmul.msk.bf16.gmra.mxu2 %vm644_vm0, %v7847_v1 }
 0x660   : > { %10824 = vmatmul.msk.bf16.gmra.mxu0 %vm644_vm0, %v7115_v43  ;;  %v7672_v5 = vadd.f32 %v7600_v47, %v7299_v46  ;;  %v6871_v39 = vshll.u32 %v14145_v56, 16  ;;  %v7855_v43 = vor.u32 %v7854_v44, %v7851_v49  ;;  %v7116_v46 = vrot.slane %v14093_v38, 1 }
 0x661   : > { %10796 = vmatmul.msk.bf16.gmra.mxu3 %vm644_vm0, %v6866_v18 }
 0x662   : > { %v7980_v61 = vpop.f32.mrf.mxu2 }
 0x663   : > { %v14143_v6 = vadd.f32 %v7980_v61, %v7672_v5  ;;  %v6869_v5 = vor.u32 %v6867_v34, %v6865_v26  ;;  %v7117_v61 = vsel %vm954_vm1, %v7114_v25, %v7116_v46 }
 0x664   : > { %v6990_v20 = vpop.f32.mrf.mxu3 }
 0x665   : > { %v7229_v11 = vpop.f32.mrf.mxu0  ;;  %v7056_v47 = vadd.f32 %v6990_v20, %v13688_v59  ;;  %v6873_v59 = vrot.slane %v6871_v39, 1  ;;  %v7861_v20 = vshll.u32 %v14157_v42, 16 }
 0x666   : > { %v7300_v4 = vadd.f32 %v7229_v11, %v7053_v12  ;;  %v7605_v1 = vpop.f32.mrf.mxu1  ;;  %v7856_v12 = vsel %vm1575_vm4, %v7846_v0, %v7855_v43  ;;  %v7858_v0 = vshrl.u32 %v14157_v42, 16  ;;  %v8076_v11 = vld [vmem:[%s13312_s30 + $0x8] sm:$0xc] }
 0x667   : > { %v6874_v38 = vsel %vm483_vm2, %v6869_v5, %v6873_v59  ;;  %v7863_v34 = vrot.slane %v7861_v20, 2 }
 0x668   : > { %v7673_v50 = vadd.f32 %v7602_v2, %v7300_v4  ;;  %v8083_v4 = vunpack.c.l.b16 %v8076_v11 }
 0x669   : > { %10923 = vmatmul.msk.bf16.gmra.mxu1 %vm644_vm0, %v7490_v7  ;;  %v7860_v7 = vrot.slane %v7858_v0, 1  ;;  %v7118_v0 = vrot.slane %v14119_v22, 1 }
 0x66a   : > { %v7982_v18 = vpop.f32.mrf.mxu2 }
 0x66b   : > { %v14153_v36 = vadd.f32 %v7982_v18, %v7673_v50  ;;  %v7696_v18 = vld [vmem:[%s13312_s30 + $0x98] sm:$0x3] }
 0x66c   : > { %v6992_v55 = vpop.f32.mrf.mxu3 }
 0x66d   : > { %v7232_v28 = vpop.f32.mrf.mxu0  ;;  %v14161_v2 = vadd.f32 %v6992_v55, %v13709_v23  ;;  %v7491_v23 = vrot.slane %v14157_v42, 1  ;;  %v14748_v55 = vld [vmem:[#allocation3_spill] sm:$0xff]  ;;  %v7359_v42 = vld [vmem:[%s13312_s30 + $0x98] sm:$0x1] }
 0x66e   : > { %v7301_v49 = vadd.f32 %v7232_v28, %v7054_v63  ;;  %v7607_v44 = vpop.f32.mrf.mxu1  ;;  %v14749_v28 = vunpack.c.l.b16 %v14748_v55  ;;  %v8324_v55 = vld [vmem:[%s13312_s30 + $0x14] sm:$0xf] }
 0x66f   : > { %10953 = vmatmul.msk.bf16.gmra.mxu2 %vm644_vm0, %v7856_v12  ;;  %v7492_v12 = vsel %vm954_vm1, %v7489_v32, %v7491_v23 }
 0x670   : > { %10825 = vmatmul.msk.bf16.gmra.mxu0 %vm644_vm0, %v7117_v61  ;;  %v7674_v26 = vadd.f32 %v7605_v1, %v7301_v49  ;;  %v8084_v61 = vpack.c.b16 %v14749_v28, %v8083_v4 }
 0x671   : > { %10797 = vmatmul.msk.bf16.gmra.mxu3 %vm644_vm0, %v6874_v38  ;;  %v7864_v38 = vor.u32 %v7863_v34, %v7860_v7  ;;  %v7119_v34 = vsel %vm954_vm1, %v7116_v46, %v7118_v0 }
 0x672   : > { %v7985_v25 = vpop.f32.mrf.mxu2 }
 0x673   : > { %v14171_v63 = vadd.f32 %v7985_v25, %v7674_v26  ;;  %v7703_v26 = vunpack.c.l.b16 %v7696_v18  ;;  %v11497_v25 = vld [vmem:[%s13312_s30 + $0x10] sm:$0xff] }
 0x674   : > { %v6995_v39 = vpop.f32.mrf.mxu3  ;;  %v8086_v32 = vrot.slane %v11497_v25, 2 }
 0x675   : > { %v7234_v50 = vpop.f32.mrf.mxu0  ;;  %v14175_v1 = vadd.f32 %v6995_v39, %v13731_v58  ;;  %v7438_v58 = vunpack.c.l.b16 %v7359_v42  ;;  %v7865_v39 = vsel %vm1575_vm4, %v7855_v43, %v7864_v38  ;;  %v14187_v4 = vpack.c.b16 %v7703_v26, %v7703_v26 }
 0x676   : > { %v7302_v5 = vadd.f32 %v7234_v50, %v7055_v30  ;;  %v7610_v59 = vpop.f32.mrf.mxu1  ;;  %v8085_v30 = vrot.slane %v8084_v61, 2 }
 0x677   : > { %v7867_v61 = vshrl.u32 %v14187_v4, 16  ;;  %v7870_v42 = vshll.u32 %v14187_v4, 16 }
 0x678   : > { %v7675_v49 = vadd.f32 %v7607_v44, %v7302_v5  ;;  %v7457_v5 = vpack.c.b16 %v7438_v58, %v7438_v58  ;;  %v8087_v28 = vsel %vm1956_vm3, %v8085_v30, %v8086_v32 }
 0x679   : > { %10924 = vmatmul.msk.bf16.gmra.mxu1 %vm644_vm0, %v7492_v12  ;;  %v8323_v12 = vld [vmem:[%s13312_s30 + $0x10] sm:$0xc]  ;;  %v7872_v58 = vrot.slane %v7870_v42, 2 }
 0x67a   : > { %v7987_v20 = vpop.f32.mrf.mxu2  ;;  %v8402_v46 = vunpack.c.l.b16 %v8323_v12 }
 0x67b   : > { %v14183_v11 = vadd.f32 %v7987_v20, %v7675_v49  ;;  %v7869_v20 = vrot.slane %v7867_v61, 1 }
 0x67c   : > { %v6997_v44 = vpop.f32.mrf.mxu3 }
 0x67d   : > { %14750 = vst [vmem:[#allocation2_spill] sm:$0xff] %v14183_v11  ;;  %v7237_v7 = vpop.f32.mrf.mxu0  ;;  %v14191_v50 = vadd.f32 %v6997_v44, %v13743_v15  ;;  %v8403_v15 = vunpack.c.l.b16 %v8324_v55  ;;  %v7873_v12 = vor.u32 %v7872_v58, %v7869_v20  ;;  %v7120_v55 = vrot.slane %v14145_v56, 1 }
 0x67e   : > { %v7303_v22 = vadd.f32 %v7237_v7, %v7056_v47  ;;  %v7612_v18 = vpop.f32.mrf.mxu1  ;;  %v7493_v47 = vrot.slane %v7457_v5, 1 }
 0x67f   : > { %10954 = vmatmul.msk.bf16.gmra.mxu2 %vm644_vm0, %v7865_v39  ;;  %v14203_v39 = vpack.c.b16 %v8403_v15, %v8402_v46  ;;  %v7121_v20 = vsel %vm954_vm1, %v7118_v0, %v7120_v55 }
 0x680   : > { %10826 = vmatmul.msk.bf16.gmra.mxu0 %vm644_vm0, %v7119_v34  ;;  %v7676_v43 = vadd.f32 %v7610_v59, %v7303_v22  ;;  %v7494_v34 = vsel %vm954_vm1, %v7491_v23, %v7493_v47  ;;  %v14211_v22 = vld [vmem:[%s13312_s30 + $0x18] sm:$0xff] }
 0x681   : > { %10968 = vmatmul.msk.bf16.vlgmr.msra.gmra.mxu3 %vm644_vm0, %v8087_v28  ;;  %v8706_v28 = vshrl.u32 %v14203_v39, 16  ;;  %v8714_v61 = vshrl.u32 %v14211_v22, 16  ;;  %v11498_v23 = vld [vmem:[%s13312_s30 + $0x18] sm:$0xff] }
 0x682   : > { %v7990_v49 = vpop.f32.mrf.mxu2  ;;  %v8088_v46 = vrot.slane %v11498_v23, 2 }
 0x683   : > { %v14201_v26 = vadd.f32 %v7990_v49, %v7676_v43  ;;  %v8709_v43 = vshll.u32 %v14203_v39, 16  ;;  %v8708_v56 = vrot.slane %v8706_v28, 2 }
 0x684   : > { %v7000_v25 = vpop.f32.mrf.mxu3 }
 0x685   : > { %14751 = vst [vmem:[#allocation3_spill] sm:$0xff] %v14201_v26  ;;  %v7239_v30 = vpop.f32.mrf.mxu0  ;;  %v14206_v59 = vadd.f32 %v7000_v25, %v13759_v14  ;;  %v8711_v58 = vrot.slane %v8709_v43, 3  ;;  %v9076_v25 = vld [vmem:[%s13312_s30 + $0x10] sm:$0x8]  ;;  %v8716_v26 = vrot.slane %v8714_v61, 2 }
 0x686   : > { %v7304_v44 = vadd.f32 %v7239_v30, %v14161_v2  ;;  %v7615_v7 = vpop.f32.mrf.mxu1  ;;  %v8717_v2 = vshll.u32 %v14211_v22, 16 }
 0x687   : > { %v8712_v55 = vor.u32 %v8711_v58, %v8708_v56  ;;  %v11499_v56 = vld [vmem:[%s13312_s30 + $0x20] sm:$0xff] }
 0x688   : > { %v7677_v5 = vadd.f32 %v7612_v18, %v7304_v44  ;;  %v7874_v18 = vsel %vm1575_vm4, %v7864_v38, %v7873_v12  ;;  %v8719_v11 = vrot.slane %v8717_v2, 3  ;;  %v9083_v12 = vunpack.c.l.b16 %v9076_v25 }
 0x689   : > { %10925 = vmatmul.msk.bf16.gmra.mxu1 %vm644_vm0, %v7494_v34  ;;  %v8090_v58 = vrot.slane %v11499_v56, 2 }
 0x68a   : > { %v7992_v14 = vpop.f32.mrf.mxu2  ;;  %v8720_v28 = vor.u32 %v8719_v11, %v8716_v26  ;;  %v8458_v11 = vrot.slane %v14203_v39, 2 }
 0x68b   : > { %v14219_v42 = vadd.f32 %v7992_v14, %v7677_v5  ;;  %v8089_v5 = vsel %vm1956_vm3, %v8086_v32, %v8088_v46 }
 0x68c   : > { %v7002_v49 = vpop.f32.mrf.mxu3  ;;  %v8721_v23 = vsel %vm2577_vm5, %v8712_v55, %v8720_v28  ;;  %v8091_v55 = vsel %vm1956_vm3, %v8088_v46, %v8090_v58 }
 0x68d   : > { %v7242_v47 = vpop.f32.mrf.mxu0  ;;  %v7061_v30 = vadd.f32 %v7002_v49, %v13771_v10 }
 0x68e   : > { %v7305_v44 = vadd.f32 %v7242_v47, %v14175_v1  ;;  %v7617_v34 = vpop.f32.mrf.mxu1  ;;  %v9084_v1 = vpack.c.b16 %v8403_v15, %v9083_v12  ;;  %v9086_v47 = vrot.slane %v14211_v22, 3  ;;  %v8459_v15 = vrot.slane %v14211_v22, 2 }
 0x68f   : > { %10955 = vmatmul.msk.bf16.gmra.mxu2 %vm644_vm0, %v7874_v18 }
 0x690   : > { %10827 = vmatmul.msk.bf16.gmra.mxu0 %vm644_vm0, %v7121_v20  ;;  %v7678_v38 = vadd.f32 %v7615_v7, %v7305_v44  ;;  %v14237_v7 = vld [vmem:[%s13312_s30 + $0x20] sm:$0xff]  ;;  %v9085_v49 = vrot.slane %v9084_v1, 3 }
 0x691   : > { %10969 = vmatmul.msk.bf16.gmra.mxu3 %vm644_vm0, %v8089_v5  ;;  %v8460_v5 = vsel %vm1956_vm3, %v8458_v11, %v8459_v15 }
 0x692   : > { %v7995_v0 = vpop.f32.mrf.mxu2  ;;  %v9087_v25 = vsel %vm2958_vm6, %v9085_v49, %v9086_v47 }
 0x693   : > { %v14231_v10 = vadd.f32 %v7995_v0, %v7678_v38 }
 0x694   : > { %v7005_v43 = vpop.f32.mrf.mxu3 }
 0x695   : > { %v7244_v14 = vpop.f32.mrf.mxu0  ;;  %v7062_v61 = vadd.f32 %v7005_v43, %v13786_v35  ;;  %v8723_v35 = vshrl.u32 %v14237_v7, 16 }
 0x696   : > { %v7306_v32 = vadd.f32 %v7244_v14, %v14191_v50  ;;  %v7620_v2 = vpop.f32.mrf.mxu1  ;;  %v8726_v50 = vshll.u32 %v14237_v7, 16 }
 0x697   : > { %v8725_v12 = vrot.slane %v8723_v35, 2  ;;  %v8461_v35 = vrot.slane %v14237_v7, 2 }
 0x698   : > { %v7679_v18 = vadd.f32 %v7617_v34, %v7306_v32  ;;  %v8728_v0 = vrot.slane %v8726_v50, 3 }
 0x699   : > { %11096 = vmatmul.msk.bf16.vlgmr.msra.gmra.mxu1 %vm644_vm0, %v8721_v23 }
 0x69a   : > { %v7997_v26 = vpop.f32.mrf.mxu2  ;;  %v8729_v14 = vor.u32 %v8728_v0, %v8725_v12 }
 0x69b   : > { %v14245_v20 = vadd.f32 %v7997_v26, %v7679_v18  ;;  %v14261_v26 = vld [vmem:[%s13312_s30 + $0x28] sm:$0xff] }
 0x69c   : > { %v7007_v44 = vpop.f32.mrf.mxu3  ;;  %v8730_v11 = vsel %vm2577_vm5, %v8720_v28, %v8729_v14  ;;  %v8732_v56 = vshrl.u32 %v14261_v26, 16 }
 0x69d   : > { %v7247_v34 = vpop.f32.mrf.mxu0  ;;  %v7063_v38 = vadd.f32 %v7007_v44, %v13797_v3 }
 0x69e   : > { %v7307_v39 = vadd.f32 %v7247_v34, %v14206_v59  ;;  %v7622_v22 = vpop.f32.mrf.mxu1 }
 0x69f   : > { %11126 = vmatmul.msk.bf16.vlgmr.msra.gmra.mxu2 %vm644_vm0, %v9087_v25  ;;  %v8735_v25 = vshll.u32 %v14261_v26, 16 }
 0x6a0   : > { %11066 = vmatmul.msk.bf16.vlgmr.msra.gmra.mxu0 %vm644_vm0, %v8460_v5  ;;  %v7680_v1 = vadd.f32 %v7620_v2, %v7307_v39  ;;  %v9088_v2 = vrot.slane %v14237_v7, 3  ;;  %v8462_v39 = vsel %vm1956_vm3, %v8459_v15, %v8461_v35  ;;  %v8734_v7 = vrot.slane %v8732_v56, 2 }
 0x6a1   : > { %10970 = vmatmul.msk.bf16.gmra.mxu3 %vm644_vm0, %v8091_v55  ;;  %v8737_v55 = vrot.slane %v8735_v25, 3  ;;  %v8463_v56 = vrot.slane %v14261_v26, 2 }
 0x6a2   : > { %v8000_v43 = vpop.f32.mrf.mxu2  ;;  %v9089_v28 = vsel %vm2958_vm6, %v9086_v47, %v9088_v2 }
 0x6a3   : > { %v14256_v32 = vadd.f32 %v8000_v43, %v7680_v1  ;;  %v8738_v47 = vor.u32 %v8737_v55, %v8734_v7 }
 0x6a4   : > { %v7010_v3 = vpop.f32.mrf.mxu3 }
 0x6a5   : > { %v7249_v59 = vpop.f32.mrf.mxu0  ;;  %v7064_v23 = vadd.f32 %v7010_v3, %v13812_v13  ;;  %v11500_v13 = vld [vmem:[%s13312_s30 + $0x28] sm:$0xff] }
 0x6a6   : > { %v7308_v18 = vadd.f32 %v7249_v59, %v7061_v30  ;;  %v7625_v49 = vpop.f32.mrf.mxu1  ;;  %v8092_v30 = vrot.slane %v11500_v13, 2 }
 0x6a8   : > { %v7681_v46 = vadd.f32 %v7622_v22, %v7308_v18  ;;  %v8093_v1 = vsel %vm1956_vm3, %v8090_v58, %v8092_v30 }
 0x6a9   : > { %11097 = vmatmul.msk.bf16.gmra.mxu1 %vm644_vm0, %v8730_v11 }
 0x6aa   : > { %v8002_v50 = vpop.f32.mrf.mxu2 }
 0x6ab   : > { %v14268_v44 = vadd.f32 %v8002_v50, %v7681_v46  ;;  %v8739_v46 = vsel %vm2577_vm5, %v8729_v14, %v8738_v47  ;;  %v14283_v50 = vld [vmem:[%s13312_s30 + $0x30] sm:$0xff] }
 0x6ac   : > { %v7012_v34 = vpop.f32.mrf.mxu3  ;;  %v8741_v13 = vshrl.u32 %v14283_v50, 16 }
 0x6ad   : > { %v7252_v5 = vpop.f32.mrf.mxu0  ;;  %v7065_v22 = vadd.f32 %v7012_v34, %v13823_v41 }
 0x6ae   : > { %v7309_v12 = vadd.f32 %v7252_v5, %v7062_v61  ;;  %v7627_v0 = vpop.f32.mrf.mxu1 }
 0x6af   : > { %11127 = vmatmul.msk.bf16.gmra.mxu2 %vm644_vm0, %v9089_v28  ;;  %v8744_v28 = vshll.u32 %v14283_v50, 16 }
 0x6b0   : > { %11067 = vmatmul.msk.bf16.gmra.mxu0 %vm644_vm0, %v8462_v39  ;;  %v7682_v43 = vadd.f32 %v7625_v49, %v7309_v12  ;;  %v9090_v49 = vrot.slane %v14261_v26, 3  ;;  %v8464_v12 = vsel %vm1956_vm3, %v8461_v35, %v8463_v56  ;;  %v8743_v26 = vrot.slane %v8741_v13, 2 }
 0x6b1   : > { %10971 = vmatmul.msk.bf16.gmra.mxu3 %vm644_vm0, %v8093_v1  ;;  %v8746_v1 = vrot.slane %v8744_v28, 3  ;;  %v8465_v13 = vrot.slane %v14283_v50, 2 }
 0x6b2   : > { %v8005_v3 = vpop.f32.mrf.mxu2  ;;  %v9091_v14 = vsel %vm2958_vm6, %v9088_v2, %v9090_v49 }
 0x6b3   : > { %v14278_v59 = vadd.f32 %v8005_v3, %v7682_v43  ;;  %v8747_v2 = vor.u32 %v8746_v1, %v8743_v26 }
 0x6b4   : > { %v7015_v41 = vpop.f32.mrf.mxu3 }
 0x6b5   : > { %v7254_v61 = vpop.f32.mrf.mxu0  ;;  %v7066_v15 = vadd.f32 %v7015_v41, %v13838_v21  ;;  %v11501_v21 = vld [vmem:[%s13312_s30 + $0x30] sm:$0xff] }
 0x6b6   : > { %v7310_v18 = vadd.f32 %v7254_v61, %v7063_v38  ;;  %v7630_v11 = vpop.f32.mrf.mxu1  ;;  %v8094_v38 = vrot.slane %v11501_v21, 2 }
 0x6b8   : > { %v7683_v58 = vadd.f32 %v7627_v0, %v7310_v18  ;;  %v8095_v43 = vsel %vm1956_vm3, %v8092_v30, %v8094_v38 }
 0x6b9   : > { %11098 = vmatmul.msk.bf16.gmra.mxu1 %vm644_vm0, %v8739_v46 }
 0x6ba   : > { %v8007_v25 = vpop.f32.mrf.mxu2 }
 0x6bb   : > { %v14290_v34 = vadd.f32 %v8007_v25, %v7683_v58  ;;  %v8748_v58 = vsel %vm2577_vm5, %v8738_v47, %v8747_v2  ;;  %v14305_v25 = vld [vmem:[%s13312_s30 + $0x38] sm:$0xff] }
 0x6bc   : > { %v7017_v5 = vpop.f32.mrf.mxu3  ;;  %v8750_v21 = vshrl.u32 %v14305_v25, 16 }
 0x6bd   : > { %v7257_v39 = vpop.f32.mrf.mxu0  ;;  %v7067_v0 = vadd.f32 %v7017_v5, %v13849_v27 }
 0x6be   : > { %v7311_v7 = vadd.f32 %v7257_v39, %v7064_v23  ;;  %v7632_v55 = vpop.f32.mrf.mxu1 }
 0x6bf   : > { %11128 = vmatmul.msk.bf16.gmra.mxu2 %vm644_vm0, %v9091_v14  ;;  %v8753_v14 = vshll.u32 %v14305_v25, 16 }
 0x6c0   : > { %11068 = vmatmul.msk.bf16.gmra.mxu0 %vm644_vm0, %v8464_v12  ;;  %v7684_v3 = vadd.f32 %v7630_v11, %v7311_v7  ;;  %v9092_v11 = vrot.slane %v14283_v50, 3  ;;  %v8466_v7 = vsel %vm1956_vm3, %v8463_v56, %v8465_v13  ;;  %v8752_v50 = vrot.slane %v8750_v21, 2 }
 0x6c1   : > { %10972 = vmatmul.msk.bf16.gmra.mxu3 %vm644_vm0, %v8095_v43  ;;  %v8755_v43 = vrot.slane %v8753_v14, 3  ;;  %v8467_v21 = vrot.slane %v14305_v25, 2 }
 0x6c2   : > { %v8010_v41 = vpop.f32.mrf.mxu2  ;;  %v9093_v47 = vsel %vm2958_vm6, %v9090_v49, %v9092_v11 }
 0x6c3   : > { %v14300_v61 = vadd.f32 %v8010_v41, %v7684_v3  ;;  %v8756_v49 = vor.u32 %v8755_v43, %v8752_v50 }
 0x6c4   : > { %v7020_v27 = vpop.f32.mrf.mxu3 }
 0x6c5   : > { %v7259_v23 = vpop.f32.mrf.mxu0  ;;  %v7068_v35 = vadd.f32 %v7020_v27, %v13864_v29  ;;  %v11502_v29 = vld [vmem:[%s13312_s30 + $0x38] sm:$0xff] }
 0x6c6   : > { %v7312_v18 = vadd.f32 %v7259_v23, %v7065_v22  ;;  %v7635_v46 = vpop.f32.mrf.mxu1  ;;  %v8096_v22 = vrot.slane %v11502_v29, 2 }
 0x6c8   : > { %v7685_v30 = vadd.f32 %v7632_v55, %v7312_v18  ;;  %v8097_v3 = vsel %vm1956_vm3, %v8094_v38, %v8096_v22 }
 0x6c9   : > { %11099 = vmatmul.msk.bf16.gmra.mxu1 %vm644_vm0, %v8748_v58 }
 0x6ca   : > { %v8012_v28 = vpop.f32.mrf.mxu2 }
 0x6cb   : > { %v14312_v5 = vadd.f32 %v8012_v28, %v7685_v30  ;;  %v8757_v30 = vsel %vm2577_vm5, %v8747_v2, %v8756_v49  ;;  %v14327_v28 = vld [vmem:[%s13312_s30 + $0x40] sm:$0xff] }
 0x6cc   : > { %v7022_v39 = vpop.f32.mrf.mxu3  ;;  %v8759_v29 = vshrl.u32 %v14327_v28, 16 }
 0x6cd   : > { %v7262_v12 = vpop.f32.mrf.mxu0  ;;  %v7069_v55 = vadd.f32 %v7022_v39, %v13875_v60 }
 0x6ce   : > { %v7313_v26 = vadd.f32 %v7262_v12, %v7066_v15  ;;  %v7637_v1 = vpop.f32.mrf.mxu1 }
 0x6cf   : > { %11129 = vmatmul.msk.bf16.gmra.mxu2 %vm644_vm0, %v9093_v47  ;;  %v8762_v47 = vshll.u32 %v14327_v28, 16 }
 0x6d0   : > { %11069 = vmatmul.msk.bf16.gmra.mxu0 %vm644_vm0, %v8466_v7  ;;  %v7686_v41 = vadd.f32 %v7635_v46, %v7313_v26  ;;  %v9094_v46 = vrot.slane %v14305_v25, 3  ;;  %v8468_v26 = vsel %vm1956_vm3, %v8465_v13, %v8467_v21  ;;  %v8761_v25 = vrot.slane %v8759_v29, 2 }
 0x6d1   : > { %10973 = vmatmul.msk.bf16.gmra.mxu3 %vm644_vm0, %v8097_v3  ;;  %v8764_v3 = vrot.slane %v8762_v47, 3  ;;  %v8469_v29 = vrot.slane %v14327_v28, 2 }
 0x6d2   : > { %v8015_v27 = vpop.f32.mrf.mxu2  ;;  %v9095_v2 = vsel %vm2958_vm6, %v9092_v11, %v9094_v46 }
 0x6d3   : > { %v14322_v23 = vadd.f32 %v8015_v27, %v7686_v41  ;;  %v8765_v11 = vor.u32 %v8764_v3, %v8761_v25 }
 0x6d4   : > { %v7025_v60 = vpop.f32.mrf.mxu3 }
 0x6d5   : > { %v7264_v15 = vpop.f32.mrf.mxu0  ;;  %v7070_v56 = vadd.f32 %v7025_v60, %v13890_v40  ;;  %v11503_v40 = vld [vmem:[%s13312_s30 + $0x40] sm:$0xff] }
 0x6d6   : > { %v7314_v18 = vadd.f32 %v7264_v15, %v7067_v0  ;;  %v7640_v58 = vpop.f32.mrf.mxu1  ;;  %v8098_v0 = vrot.slane %v11503_v40, 2 }
 0x6d8   : > { %v7687_v38 = vadd.f32 %v7637_v1, %v7314_v18  ;;  %v8099_v41 = vsel %vm1956_vm3, %v8096_v22, %v8098_v0 }
 0x6d9   : > { %11100 = vmatmul.msk.bf16.gmra.mxu1 %vm644_vm0, %v8757_v30 }
 0x6da   : > { %v8017_v14 = vpop.f32.mrf.mxu2 }
 0x6db   : > { %v14334_v39 = vadd.f32 %v8017_v14, %v7687_v38  ;;  %v8766_v38 = vsel %vm2577_vm5, %v8756_v49, %v8765_v11  ;;  %v14349_v14 = vld [vmem:[%s13312_s30 + $0x48] sm:$0xff] }
 0x6dc   : > { %v7027_v12 = vpop.f32.mrf.mxu3  ;;  %v8768_v40 = vshrl.u32 %v14349_v14, 16 }
 0x6dd   : > { %v7267_v7 = vpop.f32.mrf.mxu0  ;;  %v7071_v1 = vadd.f32 %v7027_v12, %v13901_v33 }
 0x6de   : > { %v7315_v50 = vadd.f32 %v7267_v7, %v7068_v35  ;;  %v7642_v43 = vpop.f32.mrf.mxu1 }
 0x6df   : > { %11130 = vmatmul.msk.bf16.gmra.mxu2 %vm644_vm0, %v9095_v2  ;;  %v8771_v2 = vshll.u32 %v14349_v14, 16 }
 0x6e0   : > { %11070 = vmatmul.msk.bf16.gmra.mxu0 %vm644_vm0, %v8468_v26  ;;  %v7688_v27 = vadd.f32 %v7640_v58, %v7315_v50  ;;  %v9096_v58 = vrot.slane %v14327_v28, 3  ;;  %v8470_v50 = vsel %vm1956_vm3, %v8467_v21, %v8469_v29  ;;  %v8770_v28 = vrot.slane %v8768_v40, 2 }
 0x6e1   : > { %10974 = vmatmul.msk.bf16.gmra.mxu3 %vm644_vm0, %v8099_v41  ;;  %v8773_v41 = vrot.slane %v8771_v2, 3  ;;  %v8471_v40 = vrot.slane %v14349_v14, 2 }
 0x6e2   : > { %v8020_v60 = vpop.f32.mrf.mxu2  ;;  %v9097_v49 = vsel %vm2958_vm6, %v9094_v46, %v9096_v58 }
 0x6e3   : > { %v14344_v15 = vadd.f32 %v8020_v60, %v7688_v27  ;;  %v8774_v46 = vor.u32 %v8773_v41, %v8770_v28 }
 0x6e4   : > { %v7030_v33 = vpop.f32.mrf.mxu3 }
 0x6e5   : > { %v7269_v35 = vpop.f32.mrf.mxu0  ;;  %v7072_v13 = vadd.f32 %v7030_v33, %v13918_v54  ;;  %v11504_v54 = vld [vmem:[%s13312_s30 + $0x48] sm:$0xff] }
 0x6e6   : > { %v7316_v18 = vadd.f32 %v7269_v35, %v7069_v55  ;;  %v7645_v30 = vpop.f32.mrf.mxu1  ;;  %v8100_v55 = vrot.slane %v11504_v54, 2 }
 0x6e8   : > { %v7689_v22 = vadd.f32 %v7642_v43, %v7316_v18  ;;  %v8101_v27 = vsel %vm1956_vm3, %v8098_v0, %v8100_v55 }
 0x6e9   : > { %11101 = vmatmul.msk.bf16.gmra.mxu1 %vm644_vm0, %v8766_v38 }
 0x6ea   : > { %v8022_v47 = vpop.f32.mrf.mxu2 }
 0x6eb   : > { %v14356_v12 = vadd.f32 %v8022_v47, %v7689_v22  ;;  %v8775_v22 = vsel %vm2577_vm5, %v8765_v11, %v8774_v46  ;;  %v14371_v47 = vld [vmem:[%s13312_s30 + $0x50] sm:$0xff] }
 0x6ec   : > { %v7032_v7 = vpop.f32.mrf.mxu3  ;;  %v8777_v54 = vshrl.u32 %v14371_v47, 16 }
 0x6ed   : > { %v7272_v26 = vpop.f32.mrf.mxu0  ;;  %v7073_v43 = vadd.f32 %v7032_v7, %v13934_v19 }
 0x6ee   : > { %v7317_v25 = vadd.f32 %v7272_v26, %v7070_v56  ;;  %v7647_v3 = vpop.f32.mrf.mxu1 }
 0x6ef   : > { %11131 = vmatmul.msk.bf16.gmra.mxu2 %vm644_vm0, %v9097_v49  ;;  %v8780_v49 = vshll.u32 %v14371_v47, 16 }
 0x6f0   : > { %11071 = vmatmul.msk.bf16.gmra.mxu0 %vm644_vm0, %v8470_v50  ;;  %v7690_v60 = vadd.f32 %v7645_v30, %v7317_v25  ;;  %v9098_v30 = vrot.slane %v14349_v14, 3  ;;  %v8472_v25 = vsel %vm1956_vm3, %v8469_v29, %v8471_v40  ;;  %v8779_v14 = vrot.slane %v8777_v54, 2 }
 0x6f1   : > { %10975 = vmatmul.msk.bf16.gmra.mxu3 %vm644_vm0, %v8101_v27  ;;  %v8782_v27 = vrot.slane %v8780_v49, 3 }
 0x6f2   : > { %v8025_v33 = vpop.f32.mrf.mxu2  ;;  %v9099_v11 = vsel %vm2958_vm6, %v9096_v58, %v9098_v30 }
 0x6f3   : > { %v14366_v35 = vadd.f32 %v8025_v33, %v7690_v60  ;;  %v8783_v58 = vor.u32 %v8782_v27, %v8779_v14 }
 0x6f4   : > { %v7035_v19 = vpop.f32.mrf.mxu3 }
 0x6f5   : > { %v7274_v56 = vpop.f32.mrf.mxu0  ;;  %v7074_v21 = vadd.f32 %v7035_v19, %v13955_v52  ;;  %v11505_v52 = vld [vmem:[%s13312_s30 + $0x50] sm:$0xff] }
 0x6f6   : > { %v7318_v18 = vadd.f32 %v7274_v56, %v7071_v1  ;;  %v7650_v38 = vpop.f32.mrf.mxu1  ;;  %v8102_v1 = vrot.slane %v11505_v52, 2 }
 0x6f8   : > { %v7691_v0 = vadd.f32 %v7647_v3, %v7318_v18  ;;  %v8103_v60 = vsel %vm1956_vm3, %v8100_v55, %v8102_v1  ;;  %v9100_v55 = vrot.slane %v14371_v47, 3 }
 0x6f9   : > { %11102 = vmatmul.msk.bf16.gmra.mxu1 %vm644_vm0, %v8775_v22  ;;  %v8784_v22 = vsel %vm2577_vm5, %v8774_v46, %v8783_v58 }
 0x6fa   : > { %v8027_v2 = vpop.f32.mrf.mxu2  ;;  %v9101_v46 = vsel %vm2958_vm6, %v9098_v30, %v9100_v55 }
 0x6fb   : > { %v14378_v7 = vadd.f32 %v8027_v2, %v7691_v0  ;;  %v14392_v0 = vld [vmem:[%s13312_s30 + $0x58] sm:$0xff] }
 0x6fc   : > { %v7037_v26 = vpop.f32.mrf.mxu3  ;;  %v8786_v49 = vshrl.u32 %v14392_v0, 16  ;;  %v8789_v52 = vshll.u32 %v14392_v0, 16 }
 0x6fd   : > { %v7277_v50 = vpop.f32.mrf.mxu0  ;;  %v7075_v3 = vadd.f32 %v7037_v26, %v13970_v17 }
 0x6fe   : > { %v7319_v28 = vadd.f32 %v7277_v50, %v7072_v13  ;;  %v7652_v41 = vpop.f32.mrf.mxu1  ;;  %v8788_v27 = vrot.slane %v8786_v49, 2  ;;  %v8475_v49 = vrot.slane %v14392_v0, 2 }
 0x6ff   : > { %11132 = vmatmul.msk.bf16.gmra.mxu2 %vm644_vm0, %v9099_v11 }
 0x700   : > { %11072 = vmatmul.msk.bf16.gmra.mxu0 %vm644_vm0, %v8472_v25  ;;  %v7692_v33 = vadd.f32 %v7650_v38, %v7319_v28  ;;  %v8473_v38 = vrot.slane %v14371_v47, 2  ;;  %v8791_v47 = vrot.slane %v8789_v52, 3 }
 0x701   : > { %10976 = vmatmul.msk.bf16.gmra.mxu3 %vm644_vm0, %v8103_v60 }
 0x702   : > { %v8030_v19 = vpop.f32.mrf.mxu2  ;;  %v8474_v28 = vsel %vm1956_vm3, %v8471_v40, %v8473_v38  ;;  %v8792_v30 = vor.u32 %v8791_v47, %v8788_v27  ;;  %v8476_v47 = vsel %vm1956_vm3, %v8473_v38, %v8475_v49 }
 0x703   : > { %v14388_v29 = vadd.f32 %v8030_v19, %v7692_v33 }
 0x704   : > { %v8197_v13 = vpop.f32.mrf.mxu3 }
 0x705   : > { %v7279_v17 = vpop.f32.mrf.mxu0 }
 0x706   : > { %v7320_v56 = vadd.f32 %v7279_v17, %v7073_v43  ;;  %v7655_v18 = vpop.f32.mrf.mxu1  ;;  %v11506_v43 = vld [vmem:[%s13312_s30 + $0x58] sm:$0xff] }
 0x707   : > { %v8104_v26 = vrot.slane %v11506_v43, 2 }
 0x708   : > { %v7693_v2 = vadd.f32 %v7652_v41, %v7320_v56 }
 0x709   : > { %11103 = vmatmul.msk.bf16.gmra.mxu1 %vm644_vm0, %v8784_v22  ;;  %v8105_v60 = vsel %vm1956_vm3, %v8102_v1, %v8104_v26  ;;  %v14413_v1 = vld [vmem:[%s13312_s30 + $0x60] sm:$0xff] }
 0x70a   : > { %v8032_v54 = vpop.f32.mrf.mxu2  ;;  %v8795_v43 = vshrl.u32 %v14413_v1, 16 }
 0x70b   : > { %v14399_v11 = vadd.f32 %v8032_v54, %v7693_v2  ;;  %v8793_v2 = vsel %vm2577_vm5, %v8783_v58, %v8792_v30 }
 0x70c   : > { %v8199_v25 = vpop.f32.mrf.mxu3 }
 0x70d   : > { %v7282_v50 = vpop.f32.mrf.mxu0 }
 0x70e   : > { %v7321_v41 = vadd.f32 %v7282_v50, %v7074_v21  ;;  %v7657_v14 = vpop.f32.mrf.mxu1 }
 0x70f   : > { %11133 = vmatmul.msk.bf16.gmra.mxu2 %vm644_vm0, %v9101_v46  ;;  %v8798_v46 = vshll.u32 %v14413_v1, 16 }
 0x710   : > { %11073 = vmatmul.msk.bf16.gmra.mxu0 %vm644_vm0, %v8474_v28  ;;  %v7694_v33 = vadd.f32 %v7655_v18, %v7321_v41  ;;  %v9102_v18 = vrot.slane %v14392_v0, 3  ;;  %v8287_v28 = vadd.f32 %v8197_v13, %v13986_v24  ;;  %v14434_v24 = vld [vmem:[%s14732_s4] ss:$0 sm:$0xff] }
 0x711   : > { %10977 = vmatmul.msk.bf16.gmra.mxu3 %vm644_vm0, %v8105_v60 }
 0x712   : > { %v8035_v19 = vpop.f32.mrf.mxu2  ;;  %v9103_v41 = vsel %vm2958_vm6, %v9100_v55, %v9102_v18 }
 0x713   : > { %v14408_v17 = vadd.f32 %v8035_v19, %v7694_v33  ;;  %v8797_v33 = vrot.slane %v8795_v43, 2  ;;  %v8800_v19 = vrot.slane %v8798_v46, 3 }
 0x714   : > { %v8202_v40 = vpop.f32.mrf.mxu3 }
 0x715   : > { %v7284_v21 = vpop.f32.mrf.mxu0  ;;  %v8801_v55 = vor.u32 %v8800_v19, %v8797_v33  ;;  %v11508_v19 = vld [vmem:[%s13312_s30 + $0x68] sm:$0xff] }
 0x716   : > { %v7322_v56 = vadd.f32 %v7284_v21, %v7075_v3  ;;  %v8950_v22 = vpop.f32.mrf.mxu1  ;;  %v11507_v3 = vld [vmem:[%s13312_s30 + $0x60] sm:$0xff] }
 0x717   : > { %v8106_v58 = vrot.slane %v11507_v3, 2  ;;  %v8802_v46 = vsel %vm2577_vm5, %v8792_v30, %v8801_v55  ;;  %v14446_v3 = vld [vmem:[%s13312_s30 + $0x68] sm:$0xff]  ;;  %v8108_v30 = vrot.slane %v11508_v19, 2 }
 0x718   : > { %v7695_v54 = vadd.f32 %v7657_v14, %v7322_v56 }
 0x719   : > { %11104 = vmatmul.msk.bf16.gmra.mxu1 %vm644_vm0, %v8793_v2  ;;  %v8107_v21 = vsel %vm1956_vm3, %v8104_v26, %v8106_v58  ;;  %v8288_v2 = vadd.f32 %v8199_v25, %v13997_v37  ;;  %v9104_v25 = vrot.slane %v14413_v1, 3 }
 0x71a   : > { %v8037_v52 = vpop.f32.mrf.mxu2 }
 0x71b   : > { %v14421_v50 = vadd.f32 %v8037_v52, %v7695_v54 }
 0x71c   : > { %v8204_v14 = vpop.f32.mrf.mxu3 }
 0x71d   : > { %v8570_v27 = vpop.f32.mrf.mxu0 }
 0x71e   : > { %v8660_v0 = vadd.f32 %v8570_v27, %v8287_v28  ;;  %v8952_v60 = vpop.f32.mrf.mxu1 }
 0x71f   : > { %11134 = vmatmul.msk.bf16.gmra.mxu2 %vm644_vm0, %v9103_v41  ;;  %v8477_v41 = vrot.slane %v14413_v1, 2 }
 0x720   : > { %11074 = vmatmul.msk.bf16.gmra.mxu0 %vm644_vm0, %v8476_v47  ;;  %v9040_v56 = vadd.f32 %v8950_v22, %v8660_v0  ;;  %v8804_v47 = vshrl.u32 %v14446_v3, 16  ;;  %v8807_v0 = vshll.u32 %v14446_v3, 16 }
 0x721   : > { %10978 = vmatmul.msk.bf16.gmra.mxu3 %vm644_vm0, %v8107_v21  ;;  %v8289_v21 = vadd.f32 %v8202_v40, %v14012_v8 }
 0x722   : > { %v9197_v13 = vpop.f32.mrf.mxu2 }
 0x723   : > { %v9287_v38 = vadd.f32 %v9197_v13, %v9040_v56 }
 0x724   : > { %v8207_v54 = vpop.f32.mrf.mxu3 }
 0x725   : > { %v9327_v26 = vadd.f32 %v14434_v24, %v9287_v38  ;;  %v8572_v52 = vpop.f32.mrf.mxu0 }
 0x726   : > { %v8661_v22 = vadd.f32 %v8572_v52, %v8288_v2  ;;  %v8955_v43 = vpop.f32.mrf.mxu1  ;;  %v8478_v2 = vsel %vm1956_vm3, %v8475_v49, %v8477_v41  ;;  %v8806_v52 = vrot.slane %v8804_v47, 2 }
 0x727   : > { %v9363_v28 = vmax.f32 %v9327_v26, 0.0 }
 0x728   : > { %v9041_v37 = vadd.f32 %v8952_v60, %v8661_v22  ;;  %v9105_v60 = vsel %vm2958_vm6, %v9102_v18, %v9104_v25  ;;  %v8809_v22 = vrot.slane %v8807_v0, 3 }
 0x729   : > { %9400 = vst.msk [vmem:[%s14442_s27] sm:$0xff] %vm9399_vm7, %v9363_v28  ;;  %11105 = vmatmul.msk.bf16.gmra.mxu1 %vm644_vm0, %v8802_v46  ;;  %v8109_v28 = vsel %vm1956_vm3, %v8106_v58, %v8108_v30 }
 0x72a   : > { %v9199_v27 = vpop.f32.mrf.mxu2  ;;  %v8810_v18 = vor.u32 %v8809_v22, %v8806_v52  ;;  %v11509_v52 = vld [vmem:[%s13312_s30 + $0x70] sm:$0xff]  ;;  %v8291_v22 = vadd.f32 %v8207_v54, %v14038_v62 }
 0x72b   : > { %v9288_v33 = vadd.f32 %v9199_v27, %v9041_v37  ;;  %v8290_v37 = vadd.f32 %v8204_v14, %v14023_v57  ;;  %v8479_v57 = vrot.slane %v14446_v3, 2 }
 0x72c   : > { %v8209_v13 = vpop.f32.mrf.mxu3  ;;  %v8811_v19 = vsel %vm2577_vm5, %v8801_v55, %v8810_v18  ;;  %v8110_v55 = vrot.slane %v11509_v52, 2 }
 0x72d   : > { %v9328_v56 = vadd.f32 %v14434_v24, %v9288_v33  ;;  %v8575_v38 = vpop.f32.mrf.mxu0 }
 0x72e   : > { %v8662_v1 = vadd.f32 %v8575_v38, %v8289_v21  ;;  %v8957_v26 = vpop.f32.mrf.mxu1 }
 0x72f   : > { %v9364_v46 = vmax.f32 %v9328_v56, 0.0  ;;  %11135 = vmatmul.msk.bf16.gmra.mxu2 %vm644_vm0, %v9105_v60  ;;  %v9106_v56 = vrot.slane %v14446_v3, 3 }
 0x730   : > { %11075 = vmatmul.msk.bf16.gmra.mxu0 %vm644_vm0, %v8478_v2  ;;  %v9042_v8 = vadd.f32 %v8955_v43, %v8662_v1  ;;  %v14470_v43 = vld [vmem:[%s13312_s30 + $0x70] sm:$0xff] }
 0x731   : > { %9401 = vst.msk [vmem:[%s14442_s27 + $0x8] sm:$0xff] %vm9399_vm7, %v9364_v46  ;;  %10979 = vmatmul.msk.bf16.gmra.mxu3 %vm644_vm0, %v8109_v28  ;;  %v8813_v38 = vshrl.u32 %v14470_v43, 16  ;;  %v8816_v2 = vshll.u32 %v14470_v43, 16 }
 0x732   : > { %v9202_v40 = vpop.f32.mrf.mxu2 }
 0x733   : > { %v9289_v49 = vadd.f32 %v9202_v40, %v9042_v8  ;;  %v8480_v40 = vsel %vm1956_vm3, %v8477_v41, %v8479_v57 }
 0x734   : > { %v8212_v47 = vpop.f32.mrf.mxu3 }
 0x735   : > { %v9329_v27 = vadd.f32 %v14434_v24, %v9289_v49  ;;  %v8577_v0 = vpop.f32.mrf.mxu0 }
 0x736   : > { %v8663_v33 = vadd.f32 %v8577_v0, %v8290_v37  ;;  %v8960_v58 = vpop.f32.mrf.mxu1  ;;  %v8815_v37 = vrot.slane %v8813_v38, 2 }
 0x737   : > { %v9365_v21 = vmax.f32 %v9329_v27, 0.0  ;;  %v8818_v27 = vrot.slane %v8816_v2, 3 }
 0x738   : > { %v9043_v60 = vadd.f32 %v8957_v26, %v8663_v33  ;;  %v9107_v26 = vsel %vm2958_vm6, %v9104_v25, %v9106_v56  ;;  %v8111_v33 = vsel %vm1956_vm3, %v8108_v30, %v8110_v55 }
 0x739   : > { %9402 = vst.msk [vmem:[%s14442_s27 + $0x10] sm:$0xff] %vm9399_vm7, %v9365_v21  ;;  %11106 = vmatmul.msk.bf16.gmra.mxu1 %vm644_vm0, %v8811_v19  ;;  %v8819_v25 = vor.u32 %v8818_v27, %v8815_v37  ;;  %v8292_v19 = vadd.f32 %v8209_v13, %v14049_v45  ;;  %v8481_v45 = vrot.slane %v14470_v43, 2 }
 0x73a   : > { %v9204_v14 = vpop.f32.mrf.mxu2 }
 0x73b   : > { %v9290_v1 = vadd.f32 %v9204_v14, %v9043_v60  ;;  %v8820_v2 = vsel %vm2577_vm5, %v8810_v18, %v8819_v25 }
 0x73c   : > { %v8214_v28 = vpop.f32.mrf.mxu3 }
 0x73d   : > { %v9330_v46 = vadd.f32 %v14434_v24, %v9290_v1  ;;  %v8580_v8 = vpop.f32.mrf.mxu0 }
 0x73e   : > { %v8664_v3 = vadd.f32 %v8580_v8, %v8291_v22  ;;  %v8962_v49 = vpop.f32.mrf.mxu1  ;;  %v9108_v22 = vrot.slane %v14470_v43, 3 }
 0x73f   : > { %v9366_v0 = vmax.f32 %v9330_v46, 0.0  ;;  %11136 = vmatmul.msk.bf16.gmra.mxu2 %vm644_vm0, %v9107_v26 }
 0x740   : > { %11076 = vmatmul.msk.bf16.gmra.mxu0 %vm644_vm0, %v8480_v40  ;;  %v9044_v62 = vadd.f32 %v8960_v58, %v8664_v3  ;;  %v14494_v58 = vld [vmem:[%s13312_s30 + $0x78] sm:$0xff]  ;;  %v8293_v3 = vadd.f32 %v8212_v47, %v14064_v48 }
 0x741   : > { %9403 = vst.msk [vmem:[%s14442_s27 + $0x18] sm:$0xff] %vm9399_vm7, %v9366_v0  ;;  %10980 = vmatmul.msk.bf16.gmra.mxu3 %vm644_vm0, %v8111_v33  ;;  %v8822_v26 = vshrl.u32 %v14494_v58, 16  ;;  %v8825_v46 = vshll.u32 %v14494_v58, 16  ;;  %v11510_v40 = vld [vmem:[%s13312_s30 + $0x78] sm:$0xff]  ;;  %v8482_v33 = vsel %vm1956_vm3, %v8479_v57, %v8481_v45 }
 0x742   : > { %v9207_v54 = vpop.f32.mrf.mxu2  ;;  %v8112_v18 = vrot.slane %v11510_v40, 2 }
 0x743   : > { %v9291_v41 = vadd.f32 %v9207_v54, %v9044_v62  ;;  %v8824_v54 = vrot.slane %v8822_v26, 2 }
 0x744   : > { %v8217_v60 = vpop.f32.mrf.mxu3 }
 0x745   : > { %v9331_v21 = vadd.f32 %v14434_v24, %v9291_v41  ;;  %v8582_v14 = vpop.f32.mrf.mxu0  ;;  %v8827_v41 = vrot.slane %v8825_v46, 3 }
 0x746   : > { %v8665_v38 = vadd.f32 %v8582_v14, %v8292_v19  ;;  %v8965_v30 = vpop.f32.mrf.mxu1  ;;  %v8294_v14 = vadd.f32 %v8214_v28, %v14075_v16  ;;  %v8483_v16 = vrot.slane %v14494_v58, 2 }
 0x747   : > { %v9367_v1 = vmax.f32 %v9331_v21, 0.0  ;;  %v8113_v21 = vsel %vm1956_vm3, %v8110_v55, %v8112_v18 }
 0x748   : > { %v9045_v52 = vadd.f32 %v8962_v49, %v8665_v38  ;;  %v9109_v49 = vsel %vm2958_vm6, %v9106_v56, %v9108_v22  ;;  %v8828_v56 = vor.u32 %v8827_v41, %v8824_v54  ;;  %v8484_v41 = vsel %vm1956_vm3, %v8481_v45, %v8483_v16 }
 0x749   : > { %9404 = vst.msk [vmem:[%s14442_s27 + $0x20] sm:$0xff] %vm9399_vm7, %v9367_v1  ;;  %11107 = vmatmul.msk.bf16.gmra.mxu1 %vm644_vm0, %v8820_v2 }
 0x74a   : > { %v9209_v13 = vpop.f32.mrf.mxu2 }
 0x74b   : > { %v9292_v8 = vadd.f32 %v9209_v13, %v9045_v52  ;;  %v8829_v13 = vsel %vm2577_vm5, %v8819_v25, %v8828_v56 }
 0x74c   : > { %v8219_v27 = vpop.f32.mrf.mxu3 }
 0x74d   : > { %v9332_v37 = vadd.f32 %v14434_v24, %v9292_v8  ;;  %v8585_v0 = vpop.f32.mrf.mxu0  ;;  %v9110_v8 = vrot.slane %v14494_v58, 3 }
 0x74e   : > { %v8666_v43 = vadd.f32 %v8585_v0, %v8293_v3  ;;  %v8967_v62 = vpop.f32.mrf.mxu1  ;;  %v8295_v0 = vadd.f32 %v8217_v60, %v14090_v31 }
 0x74f   : > { %v9368_v19 = vmax.f32 %v9332_v37, 0.0  ;;  %11137 = vmatmul.msk.bf16.gmra.mxu2 %vm644_vm0, %v9109_v49  ;;  %v11511_v37 = vld [vmem:[%s13312_s30 + $0x80] sm:$0xff] }
 0x750   : > { %11077 = vmatmul.msk.bf16.gmra.mxu0 %vm644_vm0, %v8482_v33  ;;  %v9046_v48 = vadd.f32 %v8965_v30, %v8666_v43  ;;  %v14518_v30 = vld [vmem:[%s13312_s30 + $0x80] sm:$0xff]  ;;  %v8114_v25 = vrot.slane %v11511_v37, 2  ;;  %v9111_v33 = vsel %vm2958_vm6, %v9108_v22, %v9110_v8 }
 0x751   : > { %9405 = vst.msk [vmem:[%s14442_s27 + $0x28] sm:$0xff] %vm9399_vm7, %v9368_v19  ;;  %10981 = vmatmul.msk.bf16.gmra.mxu3 %vm644_vm0, %v8113_v21  ;;  %v8831_v40 = vshrl.u32 %v14518_v30, 16  ;;  %v8834_v3 = vshll.u32 %v14518_v30, 16 }
 0x752   : > { %v9212_v47 = vpop.f32.mrf.mxu2 }
 0x753   : > { %v9293_v57 = vadd.f32 %v9212_v47, %v9046_v48  ;;  %v8833_v21 = vrot.slane %v8831_v40, 2  ;;  %v8836_v48 = vrot.slane %v8834_v3, 3  ;;  %v9112_v40 = vrot.slane %v14518_v30, 3 }
 0x754   : > { %v8222_v2 = vpop.f32.mrf.mxu3 }
 0x755   : > { %v9333_v38 = vadd.f32 %v14434_v24, %v9293_v57  ;;  %v8587_v1 = vpop.f32.mrf.mxu0  ;;  %v8115_v57 = vsel %vm1956_vm3, %v8112_v18, %v8114_v25  ;;  %v8837_v22 = vor.u32 %v8836_v48, %v8833_v21 }
 0x756   : > { %v8667_v52 = vadd.f32 %v8587_v1, %v8294_v14  ;;  %v8970_v55 = vpop.f32.mrf.mxu1  ;;  %v8296_v14 = vadd.f32 %v8219_v27, %v14101_v51  ;;  %v8485_v51 = vrot.slane %v14518_v30, 2 }
 0x757   : > { %v9369_v26 = vmax.f32 %v9333_v38, 0.0 }
 0x758   : > { %v9047_v46 = vadd.f32 %v8967_v62, %v8667_v52 }
 0x759   : > { %9406 = vst.msk [vmem:[%s14442_s27 + $0x30] sm:$0xff] %vm9399_vm7, %v9369_v26  ;;  %11108 = vmatmul.msk.bf16.gmra.mxu1 %vm644_vm0, %v8829_v13  ;;  %v8838_v26 = vsel %vm2577_vm5, %v8828_v56, %v8837_v22 }
 0x75a   : > { %v9214_v28 = vpop.f32.mrf.mxu2 }
 0x75b   : > { %v9294_v49 = vadd.f32 %v9214_v28, %v9047_v46 }
 0x75c   : > { %v8224_v62 = vpop.f32.mrf.mxu3 }
 0x75d   : > { %v9334_v43 = vadd.f32 %v14434_v24, %v9294_v49  ;;  %v8590_v54 = vpop.f32.mrf.mxu0 }
 0x75e   : > { %v8668_v58 = vadd.f32 %v8590_v54, %v8295_v0  ;;  %v8972_v19 = vpop.f32.mrf.mxu1  ;;  %v11512_v0 = vld [vmem:[%s13312_s30 + $0x88] sm:$0xff] }
 0x75f   : > { %v9370_v47 = vmax.f32 %v9334_v43, 0.0  ;;  %11138 = vmatmul.msk.bf16.gmra.mxu2 %vm644_vm0, %v9111_v33  ;;  %v8116_v56 = vrot.slane %v11512_v0, 2  ;;  %v8297_v33 = vadd.f32 %v8222_v2, %v14116_v9  ;;  %v9113_v43 = vsel %vm2958_vm6, %v9110_v8, %v9112_v40 }
 0x760   : > { %11078 = vmatmul.msk.bf16.gmra.mxu0 %vm644_vm0, %v8484_v41  ;;  %v9048_v31 = vadd.f32 %v8970_v55, %v8668_v58  ;;  %v14542_v55 = vld [vmem:[%s13312_s30 + $0x88] sm:$0xff] }
 0x761   : > { %9407 = vst.msk [vmem:[%s14442_s27 + $0x38] sm:$0xff] %vm9399_vm7, %v9370_v47  ;;  %10982 = vmatmul.msk.bf16.gmra.mxu3 %vm644_vm0, %v8115_v57  ;;  %v8840_v3 = vshrl.u32 %v14542_v55, 16  ;;  %v8843_v49 = vshll.u32 %v14542_v55, 16 }
 0x762   : > { %v9217_v60 = vpop.f32.mrf.mxu2 }
 0x763   : > { %v9295_v45 = vadd.f32 %v9217_v60, %v9048_v31  ;;  %v8842_v48 = vrot.slane %v8840_v3, 2  ;;  %v8845_v47 = vrot.slane %v8843_v49, 3  ;;  %v8117_v31 = vsel %vm1956_vm3, %v8114_v25, %v8116_v56 }
 0x764   : > { %v8227_v1 = vpop.f32.mrf.mxu3  ;;  %v8298_v60 = vadd.f32 %v8224_v62, %v14127_v53  ;;  %v8487_v53 = vrot.slane %v14542_v55, 2 }
 0x765   : > { %v9335_v38 = vadd.f32 %v14434_v24, %v9295_v45  ;;  %v8592_v52 = vpop.f32.mrf.mxu0  ;;  %v8846_v8 = vor.u32 %v8845_v47, %v8842_v48  ;;  %v8299_v0 = vadd.f32 %v8227_v1, %v14143_v6 }
 0x766   : > { %v8669_v13 = vadd.f32 %v8592_v52, %v8296_v14  ;;  %v8975_v18 = vpop.f32.mrf.mxu1 }
 0x767   : > { %v9371_v46 = vmax.f32 %v9335_v38, 0.0 }
 0x768   : > { %v9049_v28 = vadd.f32 %v8972_v19, %v8669_v13  ;;  %v8486_v19 = vsel %vm1956_vm3, %v8483_v16, %v8485_v51  ;;  %v8847_v13 = vsel %vm2577_vm5, %v8837_v22, %v8846_v8 }
 0x769   : > { %9408 = vst.msk [vmem:[%s14442_s27 + $0x40] sm:$0xff] %vm9399_vm7, %v9371_v46  ;;  %11109 = vmatmul.msk.bf16.gmra.mxu1 %vm644_vm0, %v8838_v26 }
 0x76a   : > { %v9219_v27 = vpop.f32.mrf.mxu2 }
 0x76b   : > { %v9296_v37 = vadd.f32 %v9219_v27, %v9049_v28  ;;  %v9114_v28 = vrot.slane %v14542_v55, 3 }
 0x76c   : > { %v8229_v41 = vpop.f32.mrf.mxu3 }
 0x76d   : > { %v9336_v54 = vadd.f32 %v14434_v24, %v9296_v37  ;;  %v8595_v58 = vpop.f32.mrf.mxu0  ;;  %v11513_v37 = vld [vmem:[%s13312_s30 + $0x90] sm:$0xff] }
 0x76e   : > { %v8670_v30 = vadd.f32 %v8595_v58, %v8297_v33  ;;  %v8977_v21 = vpop.f32.mrf.mxu1  ;;  %v8118_v22 = vrot.slane %v11513_v37, 2  ;;  %v9115_v33 = vsel %vm2958_vm6, %v9112_v40, %v9114_v28 }
 0x76f   : > { %v9372_v57 = vmax.f32 %v9336_v54, 0.0  ;;  %11139 = vmatmul.msk.bf16.gmra.mxu2 %vm644_vm0, %v9113_v43 }
 0x770   : > { %11079 = vmatmul.msk.bf16.gmra.mxu0 %vm644_vm0, %v8486_v19  ;;  %v9050_v9 = vadd.f32 %v8975_v18, %v8670_v30  ;;  %v14566_v18 = vld [vmem:[%s13312_s30 + $0x90] sm:$0xff]  ;;  %v8488_v19 = vsel %vm1956_vm3, %v8485_v51, %v8487_v53 }
 0x771   : > { %9409 = vst.msk [vmem:[%s14442_s27 + $0x48] sm:$0xff] %vm9399_vm7, %v9372_v57  ;;  %10983 = vmatmul.msk.bf16.gmra.mxu3 %vm644_vm0, %v8117_v31  ;;  %v8849_v27 = vshrl.u32 %v14566_v18, 16  ;;  %v8852_v3 = vshll.u32 %v14566_v18, 16  ;;  %v8119_v57 = vsel %vm1956_vm3, %v8116_v56, %v8118_v22  ;;  %v8300_v31 = vadd.f32 %v8229_v41, %v14153_v36 }
 0x772   : > { %v9222_v2 = vpop.f32.mrf.mxu2  ;;  %v8489_v36 = vrot.slane %v14566_v18, 2 }
 0x773   : > { %v9297_v16 = vadd.f32 %v9222_v2, %v9050_v9  ;;  %v8854_v48 = vrot.slane %v8852_v3, 3 }
 0x774   : > { %v8232_v14 = vpop.f32.mrf.mxu3 }
 0x775   : > { %v9337_v45 = vadd.f32 %v14434_v24, %v9297_v16  ;;  %v8597_v38 = vpop.f32.mrf.mxu0 }
 0x776   : > { %v8671_v52 = vadd.f32 %v8597_v38, %v8298_v60  ;;  %v8980_v25 = vpop.f32.mrf.mxu1  ;;  %v14590_v38 = vld [vmem:[%s13312_s30 + $0x98] sm:$0xff] }
 0x777   : > { %v9373_v26 = vmax.f32 %v9337_v45, 0.0 }
 0x778   : > { %v9051_v46 = vadd.f32 %v8977_v21, %v8671_v52  ;;  %v8851_v21 = vrot.slane %v8849_v27, 2  ;;  %v8301_v27 = vadd.f32 %v8232_v14, %v14171_v63 }
 0x779   : > { %9410 = vst.msk [vmem:[%s14442_s27 + $0x50] sm:$0xff] %vm9399_vm7, %v9373_v26  ;;  %11110 = vmatmul.msk.bf16.gmra.mxu1 %vm644_vm0, %v8847_v13  ;;  %v9116_v13 = vrot.slane %v14566_v18, 3  ;;  %v8858_v26 = vshrl.u32 %v14590_v38, 16  ;;  %v8490_v18 = vsel %vm1956_vm3, %v8487_v53, %v8489_v36 }
 0x77a   : > { %v9224_v62 = vpop.f32.mrf.mxu2  ;;  %v8855_v40 = vor.u32 %v8854_v48, %v8851_v21  ;;  %v14752_v48 = vld [vmem:[#allocation2_spill] sm:$0xff] }
 0x77b   : > { %v9298_v49 = vadd.f32 %v9224_v62, %v9051_v46  ;;  %v8861_v46 = vshll.u32 %v14590_v38, 16  ;;  %v9117_v3 = vsel %vm2958_vm6, %v9114_v28, %v9116_v13 }
 0x77c   : > { %v8234_v54 = vpop.f32.mrf.mxu3  ;;  %v8856_v56 = vsel %vm2577_vm5, %v8846_v8, %v8855_v40  ;;  %v8120_v8 = vrot.slane %v14187_v4, 2 }
 0x77d   : > { %v9338_v43 = vadd.f32 %v14434_v24, %v9298_v49  ;;  %v8600_v58 = vpop.f32.mrf.mxu0 }
 0x77e   : > { %v8672_v55 = vadd.f32 %v8600_v58, %v8299_v0  ;;  %v8982_v30 = vpop.f32.mrf.mxu1  ;;  %v8860_v58 = vrot.slane %v8858_v26, 2  ;;  %v8121_v4 = vsel %vm1956_vm3, %v8118_v22, %v8120_v8  ;;  %v14753_v26 = vld [vmem:[#allocation3_spill] sm:$0xff] }
 0x77f   : > { %v9374_v47 = vmax.f32 %v9338_v43, 0.0  ;;  %11140 = vmatmul.msk.bf16.gmra.mxu2 %vm644_vm0, %v9115_v33 }
 0x780   : > { %11080 = vmatmul.msk.bf16.gmra.mxu0 %vm644_vm0, %v8488_v19  ;;  %v9052_v6 = vadd.f32 %v8980_v25, %v8672_v55  ;;  %v8863_v19 = vrot.slane %v8861_v46, 3 }
 0x781   : > { %9411 = vst.msk [vmem:[%s14442_s27 + $0x58] sm:$0xff] %vm9399_vm7, %v9374_v47  ;;  %10984 = vmatmul.msk.bf16.gmra.mxu3 %vm644_vm0, %v8119_v57  ;;  %v8302_v47 = vadd.f32 %v8234_v54, %v14752_v48  ;;  %v8491_v54 = vrot.slane %v14590_v38, 2 }
 0x782   : > { %v9227_v1 = vpop.f32.mrf.mxu2  ;;  %v8864_v28 = vor.u32 %v8863_v19, %v8860_v58 }
 0x783   : > { %v9299_v51 = vadd.f32 %v9227_v1, %v9052_v6 }
 0x784   : > { %v8237_v2 = vpop.f32.mrf.mxu3 }
 0x785   : > { %v9339_v9 = vadd.f32 %v14434_v24, %v9299_v51  ;;  %v8602_v16 = vpop.f32.mrf.mxu0  ;;  %v8303_v46 = vadd.f32 %v8237_v2, %v14753_v26 }
 0x786   : > { %v8673_v60 = vadd.f32 %v8602_v16, %v8300_v31  ;;  %v8985_v45 = vpop.f32.mrf.mxu1  ;;  %v8865_v31 = vsel %vm2577_vm5, %v8855_v40, %v8864_v28 }
 0x787   : > { %v9375_v52 = vmax.f32 %v9339_v9, 0.0 }
 0x788   : > { %v9053_v25 = vadd.f32 %v8982_v30, %v8673_v60  ;;  %v8696_v30 = vld [vmem:[%s13312_s30 + $0xa0] sm:$0x7] }
 0x789   : > { %9412 = vst.msk [vmem:[%s14442_s27 + $0x60] sm:$0xff] %vm9399_vm7, %v9375_v52  ;;  %11111 = vmatmul.msk.bf16.gmra.mxu1 %vm644_vm0, %v8856_v56  ;;  %v8703_v53 = vunpack.c.l.b16 %v8696_v30 }
 0x78a   : > { %v9229_v41 = vpop.f32.mrf.mxu2 }
 0x78b   : > { %v9300_v62 = vadd.f32 %v9229_v41, %v9053_v25  ;;  %v8704_v9 = vpack.c.b16 %v8703_v53, %v8703_v53 }
 0x78c   : > { %v8239_v37 = vpop.f32.mrf.mxu3 }
 0x78d   : > { %v9340_v49 = vadd.f32 %v14434_v24, %v9300_v62  ;;  %v8605_v0 = vpop.f32.mrf.mxu0  ;;  %v8867_v52 = vshrl.u32 %v8704_v9, 16  ;;  %v8870_v25 = vshll.u32 %v8704_v9, 16 }
 0x78e   : > { %v8674_v33 = vadd.f32 %v8605_v0, %v8301_v27  ;;  %v8987_v43 = vpop.f32.mrf.mxu1 }
 0x78f   : > { %v9376_v55 = vmax.f32 %v9340_v49, 0.0  ;;  %11141 = vmatmul.msk.bf16.gmra.mxu2 %vm644_vm0, %v9117_v3  ;;  %v8492_v3 = vsel %vm1956_vm3, %v8489_v36, %v8491_v54  ;;  %v8304_v36 = vadd.f32 %v8239_v37, %v14219_v42 }
 0x790   : > { %11081 = vmatmul.msk.bf16.gmra.mxu0 %vm644_vm0, %v8490_v18  ;;  %v9054_v63 = vadd.f32 %v8985_v45, %v8674_v33  ;;  %v9118_v45 = vrot.slane %v14590_v38, 3  ;;  %v8869_v18 = vrot.slane %v8867_v52, 2  ;;  %v8872_v33 = vrot.slane %v8870_v25, 3  ;;  %v8359_v38 = vld [vmem:[%s13312_s30 + $0xa0] sm:$0x3] }
 0x791   : > { %9413 = vst.msk [vmem:[%s14442_s27 + $0x68] sm:$0xff] %vm9399_vm7, %v9376_v55  ;;  %10985 = vmatmul.msk.bf16.gmra.mxu3 %vm644_vm0, %v8121_v4  ;;  %v8438_v2 = vunpack.c.l.b16 %v8359_v38 }
 0x792   : > { %v9232_v14 = vpop.f32.mrf.mxu2  ;;  %v9119_v40 = vsel %vm2958_vm6, %v9116_v13, %v9118_v45  ;;  %v8873_v19 = vor.u32 %v8872_v33, %v8869_v18 }
 0x793   : > { %v9301_v21 = vadd.f32 %v9232_v14, %v9054_v63  ;;  %v8457_v14 = vpack.c.b16 %v8438_v2, %v8438_v2 }
 0x794   : > { %v8242_v6 = vpop.f32.mrf.mxu3  ;;  %v8874_v48 = vsel %vm2577_vm5, %v8864_v28, %v8873_v19 }
 0x795   : > { %v9341_v57 = vadd.f32 %v14434_v24, %v9301_v21  ;;  %v8607_v1 = vpop.f32.mrf.mxu0  ;;  %v8305_v37 = vadd.f32 %v8242_v6, %v14231_v10 }
 0x796   : > { %v8675_v22 = vadd.f32 %v8607_v1, %v8302_v47  ;;  %v8990_v51 = vpop.f32.mrf.mxu1  ;;  %v9120_v1 = vrot.slane %v8704_v9, 3 }
 0x797   : > { %v9377_v16 = vmax.f32 %v9341_v57, 0.0 }
 0x798   : > { %v9055_v60 = vadd.f32 %v8987_v43, %v8675_v22  ;;  %v8493_v22 = vrot.slane %v8457_v14, 2 }
 0x799   : > { %9414 = vst.msk [vmem:[%s14442_s27 + $0x70] sm:$0xff] %vm9399_vm7, %v9377_v16  ;;  %11112 = vmatmul.msk.bf16.gmra.mxu1 %vm644_vm0, %v8865_v31  ;;  %v9121_v31 = vsel %vm2958_vm6, %v9118_v45, %v9120_v1 }
 0x79a   : > { %v9234_v56 = vpop.f32.mrf.mxu2  ;;  %v8494_v28 = vsel %vm1956_vm3, %v8491_v54, %v8493_v22 }
 0x79b   : > { %v9302_v41 = vadd.f32 %v9234_v56, %v9055_v60 }
 0x79c   : > { %v8244_v8 = vpop.f32.mrf.mxu3 }
 0x79d   : > { %v9342_v62 = vadd.f32 %v14434_v24, %v9302_v41  ;;  %v8610_v27 = vpop.f32.mrf.mxu0  ;;  %v8306_v45 = vadd.f32 %v8244_v8, %v14245_v20 }
 0x79e   : > { %v8676_v49 = vadd.f32 %v8610_v27, %v8303_v46  ;;  %v8992_v0 = vpop.f32.mrf.mxu1 }
 0x79f   : > { %v9378_v43 = vmax.f32 %v9342_v62, 0.0  ;;  %11142 = vmatmul.msk.bf16.gmra.mxu2 %vm644_vm0, %v9119_v40 }
 0x7a0   : > { %11082 = vmatmul.msk.bf16.gmra.mxu0 %vm644_vm0, %v8492_v3  ;;  %v9056_v58 = vadd.f32 %v8990_v51, %v8676_v49 }
 0x7a1   : > { %9415 = vst.msk [vmem:[%s14442_s27 + $0x78] sm:$0xff] %vm9399_vm7, %v9378_v43 }
 0x7a2   : > { %v9237_v13 = vpop.f32.mrf.mxu2 }
 0x7a3   : > { %v9303_v55 = vadd.f32 %v9237_v13, %v9056_v58 }
 0x7a4   : > { %v8247_v30 = vpop.f32.mrf.mxu3 }
 0x7a5   : > { %v9343_v4 = vadd.f32 %v14434_v24, %v9303_v55  ;;  %v8612_v63 = vpop.f32.mrf.mxu0  ;;  %v8307_v18 = vadd.f32 %v8247_v30, %v14256_v32 }
 0x7a6   : > { %v8677_v53 = vadd.f32 %v8612_v63, %v8304_v36  ;;  %v8995_v21 = vpop.f32.mrf.mxu1 }
 0x7a7   : > { %v9379_v47 = vmax.f32 %v9343_v4, 0.0 }
 0x7a8   : > { %v9057_v57 = vadd.f32 %v8992_v0, %v8677_v53 }
 0x7a9   : > { %9416 = vst.msk [vmem:[%s14442_s27 + $0x80] sm:$0xff] %vm9399_vm7, %v9379_v47  ;;  %11113 = vmatmul.msk.bf16.gmra.mxu1 %vm644_vm0, %v8874_v48 }
 0x7aa   : > { %v9239_v51 = vpop.f32.mrf.mxu2 }
 0x7ab   : > { %v9304_v42 = vadd.f32 %v9239_v51, %v9057_v57 }
 0x7ac   : > { %v8249_v60 = vpop.f32.mrf.mxu3 }
 0x7ad   : > { %v9344_v16 = vadd.f32 %v14434_v24, %v9304_v42  ;;  %v8615_v56 = vpop.f32.mrf.mxu0  ;;  %v8308_v55 = vadd.f32 %v8249_v60, %v14268_v44 }
 0x7ae   : > { %v8678_v52 = vadd.f32 %v8615_v56, %v8305_v37  ;;  %v8997_v9 = vpop.f32.mrf.mxu1 }
 0x7af   : > { %v9380_v25 = vmax.f32 %v9344_v16, 0.0  ;;  %11143 = vmatmul.msk.bf16.gmra.mxu2 %vm644_vm0, %v9121_v31 }
 0x7b0   : > { %11083 = vmatmul.msk.bf16.gmra.mxu0 %vm644_vm0, %v8494_v28  ;;  %v9058_v41 = vadd.f32 %v8995_v21, %v8678_v52 }
 0x7b1   : > { %9417 = vst.msk [vmem:[%s14442_s27 + $0x88] sm:$0xff] %vm9399_vm7, %v9380_v25 }
 0x7b2   : > { %v9242_v10 = vpop.f32.mrf.mxu2 }
 0x7b3   : > { %v9305_v6 = vadd.f32 %v9242_v10, %v9058_v41 }
 0x7b4   : > { %v8252_v46 = vpop.f32.mrf.mxu3 }
 0x7b5   : > { %v9345_v26 = vadd.f32 %v14434_v24, %v9305_v6  ;;  %v8617_v40 = vpop.f32.mrf.mxu0  ;;  %v8309_v47 = vadd.f32 %v8252_v46, %v14278_v59 }
 0x7b6   : > { %v8679_v54 = vadd.f32 %v8617_v40, %v8306_v45  ;;  %v9000_v62 = vpop.f32.mrf.mxu1 }
 0x7b7   : > { %v9381_v27 = vmax.f32 %v9345_v26, 0.0 }
 0x7b8   : > { %v9059_v3 = vadd.f32 %v8997_v9, %v8679_v54 }
 0x7b9   : > { %9418 = vst.msk [vmem:[%s14442_s27 + $0x90] sm:$0xff] %vm9399_vm7, %v9381_v27 }
 0x7ba   : > { %v9244_v49 = vpop.f32.mrf.mxu2 }
 0x7bb   : > { %v9306_v0 = vadd.f32 %v9244_v49, %v9059_v3 }
 0x7bc   : > { %v8254_v38 = vpop.f32.mrf.mxu3 }
 0x7bd   : > { %v9346_v33 = vadd.f32 %v14434_v24, %v9306_v0  ;;  %v8620_v43 = vpop.f32.mrf.mxu0  ;;  %v8310_v60 = vadd.f32 %v8254_v38, %v14290_v34 }
 0x7be   : > { %v8680_v20 = vadd.f32 %v8620_v43, %v8307_v18  ;;  %v9002_v8 = vpop.f32.mrf.mxu1 }
 0x7bf   : > { %v9382_v58 = vmax.f32 %v9346_v33, 0.0 }
 0x7c0   : > { %v9060_v2 = vadd.f32 %v9000_v62, %v8680_v20 }
 0x7c1   : > { %9419 = vst.msk [vmem:[%s14442_s27 + $0x98] sm:$0xff] %vm9399_vm7, %v9382_v58 }
 0x7c2   : > { %v9247_v13 = vpop.f32.mrf.mxu2 }
 0x7c3   : > { %v9307_v19 = vadd.f32 %v9247_v13, %v9060_v2 }
 0x7c4   : > { %v8257_v4 = vpop.f32.mrf.mxu3 }
 0x7c5   : > { %v9347_v36 = vadd.f32 %v14434_v24, %v9307_v19  ;;  %v8622_v63 = vpop.f32.mrf.mxu0  ;;  %v8311_v45 = vadd.f32 %v8257_v4, %v14300_v61 }
 0x7c6   : > { %v8681_v32 = vadd.f32 %v8622_v63, %v8308_v55  ;;  %v9005_v30 = vpop.f32.mrf.mxu1 }
 0x7c7   : > { %v9383_v14 = vmax.f32 %v9347_v36, 0.0 }
 0x7c8   : > { %v9061_v53 = vadd.f32 %v9002_v8, %v8681_v32 }
 0x7c9   : > { %9420 = vst.msk [vmem:[%s14442_s27 + $0xa0] sm:$0xff] %vm9399_vm7, %v9383_v14 }
 0x7ca   : > { %v9249_v21 = vpop.f32.mrf.mxu2 }
 0x7cb   : > { %v9308_v48 = vadd.f32 %v9249_v21, %v9061_v53 }
 0x7cc   : > { %v8259_v1 = vpop.f32.mrf.mxu3 }
 0x7cd   : > { %v9348_v57 = vadd.f32 %v14434_v24, %v9308_v48  ;;  %v8625_v22 = vpop.f32.mrf.mxu0  ;;  %v8312_v0 = vadd.f32 %v8259_v1, %v14312_v5 }
 0x7ce   : > { %v8682_v44 = vadd.f32 %v8625_v22, %v8309_v47  ;;  %v9007_v51 = vpop.f32.mrf.mxu1 }
 0x7cf   : > { %v9384_v42 = vmax.f32 %v9348_v57, 0.0 }
 0x7d0   : > { %v9062_v37 = vadd.f32 %v9005_v30, %v8682_v44 }
 0x7d1   : > { %9421 = vst.msk [vmem:[%s14442_s27 + $0xa8] sm:$0xff] %vm9399_vm7, %v9384_v42 }
 0x7d2   : > { %v9252_v31 = vpop.f32.mrf.mxu2 }
 0x7d3   : > { %v9309_v16 = vadd.f32 %v9252_v31, %v9062_v37 }
 0x7d4   : > { %v8262_v25 = vpop.f32.mrf.mxu3 }
 0x7d5   : > { %v9349_v56 = vadd.f32 %v14434_v24, %v9309_v16  ;;  %v8627_v28 = vpop.f32.mrf.mxu0  ;;  %v8313_v13 = vadd.f32 %v8262_v25, %v14322_v23 }
 0x7d6   : > { %v8683_v59 = vadd.f32 %v8627_v28, %v8310_v60  ;;  %v9010_v52 = vpop.f32.mrf.mxu1 }
 0x7d7   : > { %v9385_v9 = vmax.f32 %v9349_v56, 0.0 }
 0x7d8   : > { %v9063_v41 = vadd.f32 %v9007_v51, %v8683_v59 }
 0x7d9   : > { %9422 = vst.msk [vmem:[%s14442_s27 + $0xb0] sm:$0xff] %vm9399_vm7, %v9385_v9 }
 0x7da   : > { %v9254_v10 = vpop.f32.mrf.mxu2 }
 0x7db   : > { %v9310_v6 = vadd.f32 %v9254_v10, %v9063_v41 }
 0x7dc   : > { %v8264_v27 = vpop.f32.mrf.mxu3 }
 0x7dd   : > { %v9350_v26 = vadd.f32 %v14434_v24, %v9310_v6  ;;  %v8630_v46 = vpop.f32.mrf.mxu0  ;;  %v8314_v14 = vadd.f32 %v8264_v27, %v14334_v39 }
 0x7de   : > { %v8684_v34 = vadd.f32 %v8630_v46, %v8311_v45  ;;  %v9012_v40 = vpop.f32.mrf.mxu1 }
 0x7df   : > { %v9386_v54 = vmax.f32 %v9350_v26, 0.0 }
 0x7e0   : > { %v9064_v62 = vadd.f32 %v9010_v52, %v8684_v34 }
 0x7e1   : > { %9423 = vst.msk [vmem:[%s14442_s27 + $0xb8] sm:$0xff] %vm9399_vm7, %v9386_v54 }
 0x7e2   : > { %v9257_v3 = vpop.f32.mrf.mxu2 }
 0x7e3   : > { %v9311_v49 = vadd.f32 %v9257_v3, %v9064_v62 }
 0x7e4   : > { %v8267_v58 = vpop.f32.mrf.mxu3 }
 0x7e5   : > { %v9351_v18 = vadd.f32 %v14434_v24, %v9311_v49  ;;  %v8632_v33 = vpop.f32.mrf.mxu0  ;;  %v8315_v51 = vadd.f32 %v8267_v58, %v14344_v15 }
 0x7e6   : > { %v8685_v61 = vadd.f32 %v8632_v33, %v8312_v0  ;;  %v9015_v38 = vpop.f32.mrf.mxu1 }
 0x7e7   : > { %v9387_v43 = vmax.f32 %v9351_v18, 0.0 }
 0x7e8   : > { %v9065_v20 = vadd.f32 %v9012_v40, %v8685_v61 }
 0x7e9   : > { %9424 = vst.msk [vmem:[%s14442_s27 + $0xc0] sm:$0xff] %vm9399_vm7, %v9387_v43 }
 0x7ea   : > { %v9259_v8 = vpop.f32.mrf.mxu2 }
 0x7eb   : > { %v9312_v2 = vadd.f32 %v9259_v8, %v9065_v20 }
 0x7ec   : > { %v8269_v53 = vpop.f32.mrf.mxu3 }
 0x7ed   : > { %v9352_v19 = vadd.f32 %v14434_v24, %v9312_v2  ;;  %v8635_v55 = vpop.f32.mrf.mxu0  ;;  %v8316_v52 = vadd.f32 %v8269_v53, %v14356_v12 }
 0x7ee   : > { %v8686_v5 = vadd.f32 %v8635_v55, %v8313_v13  ;;  %v9017_v36 = vpop.f32.mrf.mxu1 }
 0x7ef   : > { %v9388_v4 = vmax.f32 %v9352_v19, 0.0 }
 0x7f0   : > { %v9066_v63 = vadd.f32 %v9015_v38, %v8686_v5 }
 0x7f1   : > { %9425 = vst.msk [vmem:[%s14442_s27 + $0xc8] sm:$0xff] %vm9399_vm7, %v9388_v4 }
 0x7f2   : > { %v9262_v32 = vpop.f32.mrf.mxu2 }
 0x7f3   : > { %v9313_v30 = vadd.f32 %v9262_v32, %v9066_v63 }
 0x7f4   : > { %v8272_v16 = vpop.f32.mrf.mxu3 }
 0x7f5   : > { %v9353_v21 = vadd.f32 %v14434_v24, %v9313_v30  ;;  %v8637_v48 = vpop.f32.mrf.mxu0  ;;  %v8317_v34 = vadd.f32 %v8272_v16, %v14366_v35 }
 0x7f6   : > { %v8687_v23 = vadd.f32 %v8637_v48, %v8314_v14  ;;  %v9020_v47 = vpop.f32.mrf.mxu1 }
 0x7f7   : > { %v9389_v57 = vmax.f32 %v9353_v21, 0.0 }
 0x7f8   : > { %v9067_v1 = vadd.f32 %v9017_v36, %v8687_v23 }
 0x7f9   : > { %9426 = vst.msk [vmem:[%s14442_s27 + $0xd0] sm:$0xff] %vm9399_vm7, %v9389_v57 }
 0x7fa   : > { %v9264_v22 = vpop.f32.mrf.mxu2 }
 0x7fb   : > { %v9314_v44 = vadd.f32 %v9264_v22, %v9067_v1 }
 0x7fc   : > { %v8274_v45 = vpop.f32.mrf.mxu3 }
 0x7fd   : > { %v9354_v42 = vadd.f32 %v14434_v24, %v9314_v44  ;;  %v8640_v37 = vpop.f32.mrf.mxu0  ;;  %v8318_v33 = vadd.f32 %v8274_v45, %v14378_v7 }
 0x7fe   : > { %v8688_v31 = vadd.f32 %v8640_v37, %v8315_v51  ;;  %v9022_v39 = vpop.f32.mrf.mxu1  ;;  %v11514_v51 = vld [vmem:[%s14732_s4] ss:$0 sm:$0xff] }
 0x7ff   : > { %v9390_v60 = vmax.f32 %v9354_v42, 0.0 }
 0x800   : > { %v9068_v56 = vadd.f32 %v9020_v47, %v8688_v31 }
 0x801   : > { %9427 = vst.msk [vmem:[%s14442_s27 + $0xd8] sm:$0xff] %vm9399_vm7, %v9390_v60 }
 0x802   : > { %v9267_v28 = vpop.f32.mrf.mxu2 }
 0x803   : > { %v9315_v59 = vadd.f32 %v9267_v28, %v9068_v56 }
 0x804   : > { %v8277_v0 = vpop.f32.mrf.mxu3 }
 0x805   : > { %v9355_v9 = vadd.f32 %v14434_v24, %v9315_v59  ;;  %v8642_v25 = vpop.f32.mrf.mxu0  ;;  %v8319_v13 = vadd.f32 %v8277_v0, %v14388_v29 }
 0x806   : > { %v8689_v15 = vadd.f32 %v8642_v25, %v8316_v52  ;;  %v9025_v41 = vpop.f32.mrf.mxu1 }
 0x807   : > { %v9391_v10 = vmax.f32 %v9355_v9, 0.0 }
 0x808   : > { %v9069_v6 = vadd.f32 %v9022_v39, %v8689_v15 }
 0x809   : > { %9428 = vst.msk [vmem:[%s14442_s27 + $0xe0] sm:$0xff] %vm9399_vm7, %v9391_v10 }
 0x80a   : > { %v9269_v26 = vpop.f32.mrf.mxu2 }
 0x80b   : > { %v9316_v46 = vadd.f32 %v9269_v26, %v9069_v6 }
 0x80c   : > { %v8279_v19 = vpop.f32.mrf.mxu3 }
 0x80d   : > { %v9356_v40 = vadd.f32 %v14434_v24, %v9316_v46  ;;  %v8645_v54 = vpop.f32.mrf.mxu0  ;;  %v8320_v14 = vadd.f32 %v8279_v19, %v14399_v11 }
 0x80e   : > { %v8690_v12 = vadd.f32 %v8645_v54, %v8317_v34  ;;  %v9027_v27 = vpop.f32.mrf.mxu1 }
 0x80f   : > { %v9392_v62 = vmax.f32 %v9356_v40, 0.0 }
 0x810   : > { %v9070_v3 = vadd.f32 %v9025_v41, %v8690_v12 }
 0x811   : > { %9429 = vst.msk [vmem:[%s14442_s27 + $0xe8] sm:$0xff] %vm9399_vm7, %v9392_v62 }
 0x812   : > { %v9272_v49 = vpop.f32.mrf.mxu2 }
 0x813   : > { %v9317_v18 = vadd.f32 %v9272_v49, %v9070_v3 }
 0x814   : > { %v8282_v29 = vpop.f32.mrf.mxu3 }
 0x815   : > { %v9357_v61 = vadd.f32 %v14434_v24, %v9317_v18  ;;  %v8647_v38 = vpop.f32.mrf.mxu0  ;;  %v8321_v22 = vadd.f32 %v8282_v29, %v14408_v17 }
 0x816   : > { %v8691_v35 = vadd.f32 %v8647_v38, %v8318_v33  ;;  %v9030_v8 = vpop.f32.mrf.mxu1 }
 0x817   : > { %v9393_v43 = vmax.f32 %v9357_v61, 0.0 }
 0x818   : > { %v9071_v20 = vadd.f32 %v9027_v27, %v8691_v35 }
 0x819   : > { %9430 = vst.msk [vmem:[%s14442_s27 + $0xf0] sm:$0xff] %vm9399_vm7, %v9393_v43 }
 0x81a   : > { %v9274_v58 = vpop.f32.mrf.mxu2 }
 0x81b   : > { %v9318_v2 = vadd.f32 %v9274_v58, %v9071_v20 }
 0x81c   : > { %v8284_v39 = vpop.f32.mrf.mxu3 }
 0x81d   : > { %v9358_v55 = vadd.f32 %v14434_v24, %v9318_v2  ;;  %v8650_v5 = vpop.f32.mrf.mxu0  ;;  %v8322_v56 = vadd.f32 %v8284_v39, %v14421_v50 }
 0x81e   : > { %v8692_v7 = vadd.f32 %v8650_v5, %v8319_v13  ;;  %v9032_v32 = vpop.f32.mrf.mxu1 }
 0x81f   : > { %v9394_v36 = vmax.f32 %v9358_v55, 0.0 }
 0x820   : > { %v9072_v4 = vadd.f32 %v9030_v8, %v8692_v7 }
 0x821   : > { %9431 = vst.msk [vmem:[%s14442_s27 + $0xf8] sm:$0xff] %vm9399_vm7, %v9394_v36 }
 0x822   : > { %v9277_v63 = vpop.f32.mrf.mxu2 }
 0x823   : > { %v9319_v30 = vadd.f32 %v9277_v63, %v9072_v4 }
 0x825   : > { %v9359_v53 = vadd.f32 %v14434_v24, %v9319_v30  ;;  %v8652_v21 = vpop.f32.mrf.mxu0 }
 0x826   : > { %v8693_v48 = vadd.f32 %v8652_v21, %v8320_v14  ;;  %v9035_v44 = vpop.f32.mrf.mxu1 }
 0x827   : > { %v9395_v23 = vmax.f32 %v9359_v53, 0.0 }
 0x828   : > { %v9073_v47 = vadd.f32 %v9032_v32, %v8693_v48 }
 0x829   : > { %9432 = vst.msk [vmem:[%s14442_s27 + $0x100] sm:$0xff] %vm9399_vm7, %v9395_v23 }
 0x82a   : > { %v9279_v57 = vpop.f32.mrf.mxu2 }
 0x82b   : > { %v9320_v1 = vadd.f32 %v9279_v57, %v9073_v47 }
 0x82d   : > { %v9360_v11 = vadd.f32 %v11514_v51, %v9320_v1  ;;  %v8655_v24 = vpop.f32.mrf.mxu0 }
 0x82e   : > { %v8694_v42 = vadd.f32 %v8655_v24, %v8321_v22  ;;  %v9037_v52 = vpop.f32.mrf.mxu1 }
 0x82f   : > { %v9396_v37 = vmax.f32 %v9360_v11, 0.0 }
 0x830   : > { %v9074_v31 = vadd.f32 %v9035_v44, %v8694_v42 }
 0x831   : > { %9433 = vst.msk [vmem:[%s14442_s27 + $0x108] sm:$0xff] %vm9399_vm7, %v9396_v37 }
 0x832   : > { %v9282_v16 = vpop.f32.mrf.mxu2 }
 0x833   : > { %v9321_v60 = vadd.f32 %v9282_v16, %v9074_v31 }
 0x835   : > { %v9361_v17 = vadd.f32 %v11514_v51, %v9321_v60  ;;  %v8657_v28 = vpop.f32.mrf.mxu0 }
 0x836   : > { %v8695_v59 = vadd.f32 %v8657_v28, %v8322_v56 }
 0x837   : > { %v9397_v9 = vmax.f32 %v9361_v17, 0.0 }
 0x838   : > { %v9075_v25 = vadd.f32 %v9037_v52, %v8695_v59 }
 0x839   : > { %9434 = vst.msk [vmem:[%s14442_s27 + $0x110] sm:$0xff] %vm9399_vm7, %v9397_v9 }
 0x83a   : > { %v9284_v15 = vpop.f32.mrf.mxu2 }
 0x83b   : > { %v9322_v41 = vadd.f32 %v9284_v15, %v9075_v25 }
 0x83d   : > { %v9362_v10 = vadd.f32 %v11514_v51, %v9322_v41 }
 0x83f   : > { %v9398_v6 = vmax.f32 %v9362_v10, 0.0 }
 0x841   : > { %9435 = vst.msk [vmem:[%s14442_s27 + $0x118] sm:$0xff] %vm9399_vm7, %v9398_v6 }
 0x842 PF: > { %s15_s22 = sadd.s32 1, %s11553_s22   ;;  %s14754_s18 = smov %s11545_s20 }
 0x843   : > { %p12_p10 = scmp.ge.s32.totalorder %s15_s22, 34   ;;  %s14755_s19 = smov %s11549_s21 }
 0x844   : > { %s14756_s20 = smov %s14759_s23  ;;  %s14757_s21 = smov %s14763_s24 }
 0x845   :  { %14 = sbr.rel (!%p12_p10) target bundleno = 3 (0x3), region = 102 }

</bundles_post_ra>
